<compile_context>
chip_gen: v6e
topology: v6e:2x2x1
jax: 0.10.0
libtpu: 0.0.40
codegen_flags: <defaults>
</compile_context>

<pallas_src>
import numpy as np
import jax
import jax.numpy as jnp
from jax.experimental import pallas as pl
from jax.experimental.pallas import tpu as pltpu

_B = 128     # images per grid step: every lane slice below is a multiple of 128
_NCH = 8     # conv channels padded 6 -> 8 (padded rows/cols are all-zero weights)


def _fused_kernel(x_ref, L_ref, bc_ref, wl_ref, bl_ref, o_ref, r_ref):
    """x_ref  (2, 32, 16*B)  column-parity-split zero-padded images; lane = q*B + i
       L_ref  (448, 192)     block-Toeplitz conv weight; row = (parity*8+c)*14+ph, col = b*32+r
       bc_ref (112, 1)       conv bias per (c, ph) row
       wl_ref (14, 10, 112)  linear weight per pooled column pw
       bl_ref (10, 1)        linear bias
       o_ref  (10, B)        output block (classes x images)
       r_ref  (192, 14*B)    VMEM scratch: conv window matrix, built in-kernel"""
    B = o_ref.shape[1]

    # Build the 192-row window matrix from six 128-aligned lane slices (no HBM im2col).
    for b in range(6):
        cb, sb = b % 2, b // 2
        r_ref[b * 32:(b + 1) * 32, :] = x_ref[cb, :, sb * B:(sb + 14) * B]

    # Conv for all 4 pool parities x 8 channels x 14 pooled rows x B images: ONE matmul.
    conv = jnp.dot(L_ref[...], r_ref[...], preferred_element_type=jnp.float32)  # (448, 14B)

    # 2x2/2 max-pool = max over the 4 parity row-groups (112-row aligned slices).
    m = jnp.maximum(jnp.maximum(conv[0:112], conv[112:224]),
                    jnp.maximum(conv[224:336], conv[336:448]))                   # (112, 14B)
    act = jnp.maximum(m + bc_ref[...], 0.0)                                      # (112, 14B)

    # Fused Linear(1176->10) + ReLU: accumulate over the 14 pooled columns.
    acc = jnp.zeros((10, B), jnp.float32)
    for pw in range(14):
        acc = acc + jnp.dot(wl_ref[pw], act[:, pw * B:(pw + 1) * B],
                            preferred_element_type=jnp.float32)
    o_ref[...] = jnp.maximum(acc + bl_ref[...], 0.0)


def torch_conv_forward(x, w_conv, b_conv, w_lin, b_lin):
    N = x.shape[0]
    assert x.shape[1:] == (1, 28, 28)

    # ---- input glue: zero-pad to 32x32, split column parity, group per batch block ----
    Np = ((N + _B - 1) // _B) * _B
    nblk = Np // _B                      # keep >= 2 at real batch sizes for v7x megacore
    xp = jnp.pad(x[:, 0], ((0, Np - N), (2, 2), (2, 2)))                  # (Np, 32, 32)
    # [n, i, r, q, cb] -> [n, cb, r, q, i]  (lane index inside a block = q*B + i)
    xcp = xp.reshape(nblk, _B, 32, 16, 2).transpose(0, 4, 2, 3, 1)
    xcp = xcp.reshape(nblk, 2, 32, 16 * _B)

    # ---- weight glue (tiny, lane-dense tiles) ----
    # Block-Toeplitz conv weight: L[(dy,dx,c,ph), (b,r)] = w[c, r-2ph-dy, b-dx] (0 outside 5x5)
    w6 = w_conv[:, 0]                                                     # (6,5,5)
    ph = jnp.arange(14); r = jnp.arange(32)
    b6 = jnp.arange(6); dy = jnp.arange(2); dx = jnp.arange(2)
    kh = r[None, None, :] - 2 * ph[None, :, None] - dy[:, None, None]     # (2,14,32)
    kw = b6[None, :] - dx[:, None]                                        # (2,6)
    okh = (kh >= 0) & (kh <= 4)
    okw = (kw >= 0) & (kw <= 4)
    Wg = w6[:, jnp.clip(kh, 0, 4), :][..., jnp.clip(kw, 0, 4)]            # (6,2,14,32,2,6)
    L = Wg * okh[None, :, :, :, None, None] * okw[None, None, None, None, :, :]
    L = L.transpose(1, 4, 0, 2, 5, 3)                                     # (dy,dx,c,ph,b,r)
    L = jnp.pad(L, ((0, 0), (0, 0), (0, 2), (0, 0), (0, 0), (0, 0)))      # pad c 6->8
    L = L.reshape(4 * _NCH * 14, 6 * 32).astype(jnp.float32)              # (448, 192)

    bc = jnp.repeat(jnp.pad(b_conv, (0, 2)), 14).reshape(_NCH * 14, 1)    # (112, 1)
    wl = jnp.pad(w_lin.reshape(10, 6, 14, 14), ((0, 0), (0, 2), (0, 0), (0, 0)))
    wl = wl.transpose(3, 0, 1, 2).reshape(14, 10, _NCH * 14)              # (14, 10, 112)
    bl = b_lin.reshape(10, 1)

    out = pl.pallas_call(
        _fused_kernel,
        out_shape=jax.ShapeDtypeStruct((10, Np), jnp.float32),
        grid=(nblk,),
        in_specs=[
            pl.BlockSpec((None, 2, 32, 16 * _B), lambda n: (n, 0, 0, 0)),
            pl.BlockSpec((4 * _NCH * 14, 6 * 32), lambda n: (0, 0)),
            pl.BlockSpec((_NCH * 14, 1), lambda n: (0, 0)),
            pl.BlockSpec((14, 10, _NCH * 14), lambda n: (0, 0, 0)),
            pl.BlockSpec((10, 1), lambda n: (0, 0)),
        ],
        out_specs=pl.BlockSpec((10, _B), lambda n: (0, n)),
        scratch_shapes=[pltpu.VMEM((6 * 32, 14 * _B), jnp.float32)],
        compiler_params=pltpu.CompilerParams(
            dimension_semantics=("parallel",),
            vmem_limit_bytes=32 * 1024 * 1024),
    )(xcp, L, bc, wl, bl)
    return out[:, :N].T


if __name__ == "__main__":
    key = jax.random.PRNGKey(0)
    kx, kw1, kb1, kw2, kb2 = jax.random.split(key, 5)

    N = 2  # 28x28 spatial is fixed by Linear(in_features=1176) == 6*14*14
    x = jax.random.normal(kx, (N, 1, 28, 28), jnp.float32)
    w_conv = jax.random.normal(kw1, (6, 1, 5, 5), jnp.float32) * 0.2   # Conv2d weight
    b_conv = jax.random.normal(kb1, (6,), jnp.float32) * 0.1           # Conv2d bias
    w_lin = jax.random.normal(kw2, (10, 1176), jnp.float32) * 0.03     # Linear weight (out, in)
    b_lin = jax.random.normal(kb2, (10,), jnp.float32) * 0.1           # Linear bias

    out = jax.jit(torch_conv_forward)(x, w_conv, b_conv, w_lin, b_lin)
    out = jax.block_until_ready(out)

    # pure-JAX reference of the PyTorch forward pass
    ref = jax.lax.conv_general_dilated(
        x, w_conv, (1, 1), ((2, 2), (2, 2)),
        dimension_numbers=("NCHW", "OIHW", "NCHW")) + b_conv[None, :, None, None]
    ref = jax.nn.relu(ref)
    ref = jax.lax.reduce_window(ref, -jnp.inf, jax.lax.max,
                                (1, 1, 2, 2), (1, 1, 2, 2), "VALID")
    ref = ref.reshape(N, -1)
    ref = jax.nn.relu(ref @ w_lin.T + b_lin)

    np.testing.assert_allclose(np.asarray(out), np.asarray(ref), atol=1e-3, rtol=1e-3)
    print("KERNEL_OK")
</pallas_src>

<mosaic_0001>
module attributes {stable_mosaic.version = 11 : i64} {
  func.func @_fused_kernel(%arg0: i32, %arg1: memref<1x2x32x2048xf32, #tpu.memory_space<vmem>>, %arg2: memref<448x192xf32, #tpu.memory_space<vmem>>, %arg3: memref<112x1xf32, #tpu.memory_space<vmem>>, %arg4: memref<14x10x112xf32, #tpu.memory_space<vmem>>, %arg5: memref<10x1xf32, #tpu.memory_space<vmem>>, %arg6: memref<10x128xf32, #tpu.memory_space<vmem>>, %arg7: memref<192x1792xf32, #tpu.memory_space<vmem>>) attributes {dimension_semantics = [#tpu.dimension_semantics<parallel>], iteration_bounds = array<i64: 1>, scalar_prefetch = 0 : i64, scratch_operands = 1 : i64, tpu.core_type = #tpu.core_type<tc>, window_params = [{transform_indices = @transform_0, window_bounds = array<i64: 1, 2, 32, 2048>}, {pipeline_mode = #tpu.pipeline_mode<synchronous>, transform_indices = @transform_1, window_bounds = array<i64: 448, 192>}, {pipeline_mode = #tpu.pipeline_mode<synchronous>, transform_indices = @transform_2, window_bounds = array<i64: 112, 1>}, {pipeline_mode = #tpu.pipeline_mode<synchronous>, transform_indices = @transform_3, window_bounds = array<i64: 14, 10, 112>}, {pipeline_mode = #tpu.pipeline_mode<synchronous>, transform_indices = @transform_4, window_bounds = array<i64: 10, 1>}, {transform_indices = @transform_5, window_bounds = array<i64: 10, 128>}]} {
    %c0 = arith.constant 0 : index
    %c0_0 = arith.constant 0 : index
    %c0_1 = arith.constant 0 : index
    %c0_2 = arith.constant 0 : index
    %0 = vector.load %arg1[%c0, %c0_0, %c0_1, %c0_2] : memref<1x2x32x2048xf32, #tpu.memory_space<vmem>>, vector<1x1x32x1792xf32>
    %1 = vector.shape_cast %0 : vector<1x1x32x1792xf32> to vector<32x1792xf32>
    %c0_3 = arith.constant 0 : index
    %c0_4 = arith.constant 0 : index
    %2 = vector.load %arg7[%c0_3, %c0_4] : memref<192x1792xf32, #tpu.memory_space<vmem>>, vector<32x1792xf32>
    tpu.vector_store %arg7[%c0_3, %c0_4], %1 {strides = array<i32>} : memref<192x1792xf32, #tpu.memory_space<vmem>>, vector<32x1792xf32>,
    %c0_5 = arith.constant 0 : index
    %c1 = arith.constant 1 : index
    %c0_6 = arith.constant 0 : index
    %c0_7 = arith.constant 0 : index
    %3 = vector.load %arg1[%c0_5, %c1, %c0_6, %c0_7] : memref<1x2x32x2048xf32, #tpu.memory_space<vmem>>, vector<1x1x32x1792xf32>
    %4 = vector.shape_cast %3 : vector<1x1x32x1792xf32> to vector<32x1792xf32>
    %c32 = arith.constant 32 : index
    %c0_8 = arith.constant 0 : index
    %5 = vector.load %arg7[%c32, %c0_8] : memref<192x1792xf32, #tpu.memory_space<vmem>>, vector<32x1792xf32>
    tpu.vector_store %arg7[%c32, %c0_8], %4 {strides = array<i32>} : memref<192x1792xf32, #tpu.memory_space<vmem>>, vector<32x1792xf32>,
    %c0_9 = arith.constant 0 : index
    %c0_10 = arith.constant 0 : index
    %c0_11 = arith.constant 0 : index
    %c128 = arith.constant 128 : index
    %6 = vector.load %arg1[%c0_9, %c0_10, %c0_11, %c128] : memref<1x2x32x2048xf32, #tpu.memory_space<vmem>>, vector<1x1x32x1792xf32>
    %7 = vector.shape_cast %6 : vector<1x1x32x1792xf32> to vector<32x1792xf32>
    %c64 = arith.constant 64 : index
    %c0_12 = arith.constant 0 : index
    %8 = vector.load %arg7[%c64, %c0_12] : memref<192x1792xf32, #tpu.memory_space<vmem>>, vector<32x1792xf32>
    tpu.vector_store %arg7[%c64, %c0_12], %7 {strides = array<i32>} : memref<192x1792xf32, #tpu.memory_space<vmem>>, vector<32x1792xf32>,
    %c0_13 = arith.constant 0 : index
    %c1_14 = arith.constant 1 : index
    %c0_15 = arith.constant 0 : index
    %c128_16 = arith.constant 128 : index
    %9 = vector.load %arg1[%c0_13, %c1_14, %c0_15, %c128_16] : memref<1x2x32x2048xf32, #tpu.memory_space<vmem>>, vector<1x1x32x1792xf32>
    %10 = vector.shape_cast %9 : vector<1x1x32x1792xf32> to vector<32x1792xf32>
    %c96 = arith.constant 96 : index
    %c0_17 = arith.constant 0 : index
    %11 = vector.load %arg7[%c96, %c0_17] : memref<192x1792xf32, #tpu.memory_space<vmem>>, vector<32x1792xf32>
    tpu.vector_store %arg7[%c96, %c0_17], %10 {strides = array<i32>} : memref<192x1792xf32, #tpu.memory_space<vmem>>, vector<32x1792xf32>,
    %c0_18 = arith.constant 0 : index
    %c0_19 = arith.constant 0 : index
    %c0_20 = arith.constant 0 : index
    %c256 = arith.constant 256 : index
    %12 = vector.load %arg1[%c0_18, %c0_19, %c0_20, %c256] : memref<1x2x32x2048xf32, #tpu.memory_space<vmem>>, vector<1x1x32x1792xf32>
    %13 = vector.shape_cast %12 : vector<1x1x32x1792xf32> to vector<32x1792xf32>
    %c128_21 = arith.constant 128 : index
    %c0_22 = arith.constant 0 : index
    %14 = vector.load %arg7[%c128_21, %c0_22] : memref<192x1792xf32, #tpu.memory_space<vmem>>, vector<32x1792xf32>
    tpu.vector_store %arg7[%c128_21, %c0_22], %13 {strides = array<i32>} : memref<192x1792xf32, #tpu.memory_space<vmem>>, vector<32x1792xf32>,
    %c0_23 = arith.constant 0 : index
    %c1_24 = arith.constant 1 : index
    %c0_25 = arith.constant 0 : index
    %c256_26 = arith.constant 256 : index
    %15 = vector.load %arg1[%c0_23, %c1_24, %c0_25, %c256_26] : memref<1x2x32x2048xf32, #tpu.memory_space<vmem>>, vector<1x1x32x1792xf32>
    %16 = vector.shape_cast %15 : vector<1x1x32x1792xf32> to vector<32x1792xf32>
    %c160 = arith.constant 160 : index
    %c0_27 = arith.constant 0 : index
    %17 = vector.load %arg7[%c160, %c0_27] : memref<192x1792xf32, #tpu.memory_space<vmem>>, vector<32x1792xf32>
    tpu.vector_store %arg7[%c160, %c0_27], %16 {strides = array<i32>} : memref<192x1792xf32, #tpu.memory_space<vmem>>, vector<32x1792xf32>,
    %c0_28 = arith.constant 0 : index
    %c0_29 = arith.constant 0 : index
    %18 = vector.load %arg2[%c0_28, %c0_29] : memref<448x192xf32, #tpu.memory_space<vmem>>, vector<448x192xf32>
    %c0_30 = arith.constant 0 : index
    %c0_31 = arith.constant 0 : index
    %19 = vector.load %arg7[%c0_30, %c0_31] : memref<192x1792xf32, #tpu.memory_space<vmem>>, vector<192x1792xf32>
    %cst = arith.constant dense<0.000000e+00> : vector<448x1792xf32>
    %20 = tpu.matmul %18, %19, %cst {dimension_numbers = #tpu.dot_dimension_numbers<[1], [0], [0], [1], [0, 0, 1, 1], [], []>} : vector<448x192xf32>, vector<192x1792xf32>, vector<448x1792xf32> -> vector<448x1792xf32>
    %21 = vector.extract_strided_slice %20 {offsets = [0, 0], sizes = [112, 1792], strides = [1, 1]} : vector<448x1792xf32> to vector<112x1792xf32>
    %22 = vector.extract_strided_slice %20 {offsets = [112, 0], sizes = [112, 1792], strides = [1, 1]} : vector<448x1792xf32> to vector<112x1792xf32>
    %23 = arith.maximumf %21, %22 : vector<112x1792xf32>
    %24 = vector.extract_strided_slice %20 {offsets = [224, 0], sizes = [112, 1792], strides = [1, 1]} : vector<448x1792xf32> to vector<112x1792xf32>
    %25 = vector.extract_strided_slice %20 {offsets = [336, 0], sizes = [112, 1792], strides = [1, 1]} : vector<448x1792xf32> to vector<112x1792xf32>
    %26 = arith.maximumf %24, %25 : vector<112x1792xf32>
    %27 = arith.maximumf %23, %26 : vector<112x1792xf32>
    %c0_32 = arith.constant 0 : index
    %c0_33 = arith.constant 0 : index
    %28 = vector.load %arg3[%c0_32, %c0_33] : memref<112x1xf32, #tpu.memory_space<vmem>>, vector<112x1xf32>
    %29 = vector.broadcast %28 : vector<112x1xf32> to vector<112x1792xf32>
    %30 = arith.addf %27, %29 : vector<112x1792xf32>
    %cst_34 = arith.constant 0.000000e+00 : f32
    %31 = vector.broadcast %cst_34 : f32 to vector<112x1792xf32>
    %32 = arith.maximumf %30, %31 : vector<112x1792xf32>
    %cst_35 = arith.constant 0.000000e+00 : f32
    %33 = vector.broadcast %cst_35 : f32 to vector<10x128xf32>
    %c0_36 = arith.constant 0 : index
    %c0_37 = arith.constant 0 : index
    %c0_38 = arith.constant 0 : index
    %34 = vector.load %arg4[%c0_36, %c0_37, %c0_38] : memref<14x10x112xf32, #tpu.memory_space<vmem>>, vector<1x10x112xf32>
    %35 = vector.shape_cast %34 : vector<1x10x112xf32> to vector<10x112xf32>
    %36 = vector.extract_strided_slice %32 {offsets = [0, 0], sizes = [112, 128], strides = [1, 1]} : vector<112x1792xf32> to vector<112x128xf32>
    %cst_39 = arith.constant dense<0.000000e+00> : vector<10x128xf32>
    %37 = tpu.matmul %35, %36, %cst_39 {dimension_numbers = #tpu.dot_dimension_numbers<[1], [0], [0], [1], [0, 0, 1, 1], [], []>} : vector<10x112xf32>, vector<112x128xf32>, vector<10x128xf32> -> vector<10x128xf32>
    %38 = arith.addf %33, %37 : vector<10x128xf32>
    %c1_40 = arith.constant 1 : index
    %c0_41 = arith.constant 0 : index
    %c0_42 = arith.constant 0 : index
    %39 = vector.load %arg4[%c1_40, %c0_41, %c0_42] : memref<14x10x112xf32, #tpu.memory_space<vmem>>, vector<1x10x112xf32>
    %40 = vector.shape_cast %39 : vector<1x10x112xf32> to vector<10x112xf32>
    %41 = vector.extract_strided_slice %32 {offsets = [0, 128], sizes = [112, 128], strides = [1, 1]} : vector<112x1792xf32> to vector<112x128xf32>
    %cst_43 = arith.constant dense<0.000000e+00> : vector<10x128xf32>
    %42 = tpu.matmul %40, %41, %cst_43 {dimension_numbers = #tpu.dot_dimension_numbers<[1], [0], [0], [1], [0, 0, 1, 1], [], []>} : vector<10x112xf32>, vector<112x128xf32>, vector<10x128xf32> -> vector<10x128xf32>
    %43 = arith.addf %38, %42 : vector<10x128xf32>
    %c2 = arith.constant 2 : index
    %c0_44 = arith.constant 0 : index
    %c0_45 = arith.constant 0 : index
    %44 = vector.load %arg4[%c2, %c0_44, %c0_45] : memref<14x10x112xf32, #tpu.memory_space<vmem>>, vector<1x10x112xf32>
    %45 = vector.shape_cast %44 : vector<1x10x112xf32> to vector<10x112xf32>
    %46 = vector.extract_strided_slice %32 {offsets = [0, 256], sizes = [112, 128], strides = [1, 1]} : vector<112x1792xf32> to vector<112x128xf32>
    %cst_46 = arith.constant dense<0.000000e+00> : vector<10x128xf32>
    %47 = tpu.matmul %45, %46, %cst_46 {dimension_numbers = #tpu.dot_dimension_numbers<[1], [0], [0], [1], [0, 0, 1, 1], [], []>} : vector<10x112xf32>, vector<112x128xf32>, vector<10x128xf32> -> vector<10x128xf32>
    %48 = arith.addf %43, %47 : vector<10x128xf32>
    %c3 = arith.constant 3 : index
    %c0_47 = arith.constant 0 : index
    %c0_48 = arith.constant 0 : index
    %49 = vector.load %arg4[%c3, %c0_47, %c0_48] : memref<14x10x112xf32, #tpu.memory_space<vmem>>, vector<1x10x112xf32>
    %50 = vector.shape_cast %49 : vector<1x10x112xf32> to vector<10x112xf32>
    %51 = vector.extract_strided_slice %32 {offsets = [0, 384], sizes = [112, 128], strides = [1, 1]} : vector<112x1792xf32> to vector<112x128xf32>
    %cst_49 = arith.constant dense<0.000000e+00> : vector<10x128xf32>
    %52 = tpu.matmul %50, %51, %cst_49 {dimension_numbers = #tpu.dot_dimension_numbers<[1], [0], [0], [1], [0, 0, 1, 1], [], []>} : vector<10x112xf32>, vector<112x128xf32>, vector<10x128xf32> -> vector<10x128xf32>
    %53 = arith.addf %48, %52 : vector<10x128xf32>
    %c4 = arith.constant 4 : index
    %c0_50 = arith.constant 0 : index
    %c0_51 = arith.constant 0 : index
    %54 = vector.load %arg4[%c4, %c0_50, %c0_51] : memref<14x10x112xf32, #tpu.memory_space<vmem>>, vector<1x10x112xf32>
    %55 = vector.shape_cast %54 : vector<1x10x112xf32> to vector<10x112xf32>
    %56 = vector.extract_strided_slice %32 {offsets = [0, 512], sizes = [112, 128], strides = [1, 1]} : vector<112x1792xf32> to vector<112x128xf32>
    %cst_52 = arith.constant dense<0.000000e+00> : vector<10x128xf32>
    %57 = tpu.matmul %55, %56, %cst_52 {dimension_numbers = #tpu.dot_dimension_numbers<[1], [0], [0], [1], [0, 0, 1, 1], [], []>} : vector<10x112xf32>, vector<112x128xf32>, vector<10x128xf32> -> vector<10x128xf32>
    %58 = arith.addf %53, %57 : vector<10x128xf32>
    %c5 = arith.constant 5 : index
    %c0_53 = arith.constant 0 : index
    %c0_54 = arith.constant 0 : index
    %59 = vector.load %arg4[%c5, %c0_53, %c0_54] : memref<14x10x112xf32, #tpu.memory_space<vmem>>, vector<1x10x112xf32>
    %60 = vector.shape_cast %59 : vector<1x10x112xf32> to vector<10x112xf32>
    %61 = vector.extract_strided_slice %32 {offsets = [0, 640], sizes = [112, 128], strides = [1, 1]} : vector<112x1792xf32> to vector<112x128xf32>
    %cst_55 = arith.constant dense<0.000000e+00> : vector<10x128xf32>
    %62 = tpu.matmul %60, %61, %cst_55 {dimension_numbers = #tpu.dot_dimension_numbers<[1], [0], [0], [1], [0, 0, 1, 1], [], []>} : vector<10x112xf32>, vector<112x128xf32>, vector<10x128xf32> -> vector<10x128xf32>
    %63 = arith.addf %58, %62 : vector<10x128xf32>
    %c6 = arith.constant 6 : index
    %c0_56 = arith.constant 0 : index
    %c0_57 = arith.constant 0 : index
    %64 = vector.load %arg4[%c6, %c0_56, %c0_57] : memref<14x10x112xf32, #tpu.memory_space<vmem>>, vector<1x10x112xf32>
    %65 = vector.shape_cast %64 : vector<1x10x112xf32> to vector<10x112xf32>
    %66 = vector.extract_strided_slice %32 {offsets = [0, 768], sizes = [112, 128], strides = [1, 1]} : vector<112x1792xf32> to vector<112x128xf32>
    %cst_58 = arith.constant dense<0.000000e+00> : vector<10x128xf32>
    %67 = tpu.matmul %65, %66, %cst_58 {dimension_numbers = #tpu.dot_dimension_numbers<[1], [0], [0], [1], [0, 0, 1, 1], [], []>} : vector<10x112xf32>, vector<112x128xf32>, vector<10x128xf32> -> vector<10x128xf32>
    %68 = arith.addf %63, %67 : vector<10x128xf32>
    %c7 = arith.constant 7 : index
    %c0_59 = arith.constant 0 : index
    %c0_60 = arith.constant 0 : index
    %69 = vector.load %arg4[%c7, %c0_59, %c0_60] : memref<14x10x112xf32, #tpu.memory_space<vmem>>, vector<1x10x112xf32>
    %70 = vector.shape_cast %69 : vector<1x10x112xf32> to vector<10x112xf32>
    %71 = vector.extract_strided_slice %32 {offsets = [0, 896], sizes = [112, 128], strides = [1, 1]} : vector<112x1792xf32> to vector<112x128xf32>
    %cst_61 = arith.constant dense<0.000000e+00> : vector<10x128xf32>
    %72 = tpu.matmul %70, %71, %cst_61 {dimension_numbers = #tpu.dot_dimension_numbers<[1], [0], [0], [1], [0, 0, 1, 1], [], []>} : vector<10x112xf32>, vector<112x128xf32>, vector<10x128xf32> -> vector<10x128xf32>
    %73 = arith.addf %68, %72 : vector<10x128xf32>
    %c8 = arith.constant 8 : index
    %c0_62 = arith.constant 0 : index
    %c0_63 = arith.constant 0 : index
    %74 = vector.load %arg4[%c8, %c0_62, %c0_63] : memref<14x10x112xf32, #tpu.memory_space<vmem>>, vector<1x10x112xf32>
    %75 = vector.shape_cast %74 : vector<1x10x112xf32> to vector<10x112xf32>
    %76 = vector.extract_strided_slice %32 {offsets = [0, 1024], sizes = [112, 128], strides = [1, 1]} : vector<112x1792xf32> to vector<112x128xf32>
    %cst_64 = arith.constant dense<0.000000e+00> : vector<10x128xf32>
    %77 = tpu.matmul %75, %76, %cst_64 {dimension_numbers = #tpu.dot_dimension_numbers<[1], [0], [0], [1], [0, 0, 1, 1], [], []>} : vector<10x112xf32>, vector<112x128xf32>, vector<10x128xf32> -> vector<10x128xf32>
    %78 = arith.addf %73, %77 : vector<10x128xf32>
    %c9 = arith.constant 9 : index
    %c0_65 = arith.constant 0 : index
    %c0_66 = arith.constant 0 : index
    %79 = vector.load %arg4[%c9, %c0_65, %c0_66] : memref<14x10x112xf32, #tpu.memory_space<vmem>>, vector<1x10x112xf32>
    %80 = vector.shape_cast %79 : vector<1x10x112xf32> to vector<10x112xf32>
    %81 = vector.extract_strided_slice %32 {offsets = [0, 1152], sizes = [112, 128], strides = [1, 1]} : vector<112x1792xf32> to vector<112x128xf32>
    %cst_67 = arith.constant dense<0.000000e+00> : vector<10x128xf32>
    %82 = tpu.matmul %80, %81, %cst_67 {dimension_numbers = #tpu.dot_dimension_numbers<[1], [0], [0], [1], [0, 0, 1, 1], [], []>} : vector<10x112xf32>, vector<112x128xf32>, vector<10x128xf32> -> vector<10x128xf32>
    %83 = arith.addf %78, %82 : vector<10x128xf32>
    %c10 = arith.constant 10 : index
    %c0_68 = arith.constant 0 : index
    %c0_69 = arith.constant 0 : index
    %84 = vector.load %arg4[%c10, %c0_68, %c0_69] : memref<14x10x112xf32, #tpu.memory_space<vmem>>, vector<1x10x112xf32>
    %85 = vector.shape_cast %84 : vector<1x10x112xf32> to vector<10x112xf32>
    %86 = vector.extract_strided_slice %32 {offsets = [0, 1280], sizes = [112, 128], strides = [1, 1]} : vector<112x1792xf32> to vector<112x128xf32>
    %cst_70 = arith.constant dense<0.000000e+00> : vector<10x128xf32>
    %87 = tpu.matmul %85, %86, %cst_70 {dimension_numbers = #tpu.dot_dimension_numbers<[1], [0], [0], [1], [0, 0, 1, 1], [], []>} : vector<10x112xf32>, vector<112x128xf32>, vector<10x128xf32> -> vector<10x128xf32>
    %88 = arith.addf %83, %87 : vector<10x128xf32>
    %c11 = arith.constant 11 : index
    %c0_71 = arith.constant 0 : index
    %c0_72 = arith.constant 0 : index
    %89 = vector.load %arg4[%c11, %c0_71, %c0_72] : memref<14x10x112xf32, #tpu.memory_space<vmem>>, vector<1x10x112xf32>
    %90 = vector.shape_cast %89 : vector<1x10x112xf32> to vector<10x112xf32>
    %91 = vector.extract_strided_slice %32 {offsets = [0, 1408], sizes = [112, 128], strides = [1, 1]} : vector<112x1792xf32> to vector<112x128xf32>
    %cst_73 = arith.constant dense<0.000000e+00> : vector<10x128xf32>
    %92 = tpu.matmul %90, %91, %cst_73 {dimension_numbers = #tpu.dot_dimension_numbers<[1], [0], [0], [1], [0, 0, 1, 1], [], []>} : vector<10x112xf32>, vector<112x128xf32>, vector<10x128xf32> -> vector<10x128xf32>
    %93 = arith.addf %88, %92 : vector<10x128xf32>
    %c12 = arith.constant 12 : index
    %c0_74 = arith.constant 0 : index
    %c0_75 = arith.constant 0 : index
    %94 = vector.load %arg4[%c12, %c0_74, %c0_75] : memref<14x10x112xf32, #tpu.memory_space<vmem>>, vector<1x10x112xf32>
    %95 = vector.shape_cast %94 : vector<1x10x112xf32> to vector<10x112xf32>
    %96 = vector.extract_strided_slice %32 {offsets = [0, 1536], sizes = [112, 128], strides = [1, 1]} : vector<112x1792xf32> to vector<112x128xf32>
    %cst_76 = arith.constant dense<0.000000e+00> : vector<10x128xf32>
    %97 = tpu.matmul %95, %96, %cst_76 {dimension_numbers = #tpu.dot_dimension_numbers<[1], [0], [0], [1], [0, 0, 1, 1], [], []>} : vector<10x112xf32>, vector<112x128xf32>, vector<10x128xf32> -> vector<10x128xf32>
    %98 = arith.addf %93, %97 : vector<10x128xf32>
    %c13 = arith.constant 13 : index
    %c0_77 = arith.constant 0 : index
    %c0_78 = arith.constant 0 : index
    %99 = vector.load %arg4[%c13, %c0_77, %c0_78] : memref<14x10x112xf32, #tpu.memory_space<vmem>>, vector<1x10x112xf32>
    %100 = vector.shape_cast %99 : vector<1x10x112xf32> to vector<10x112xf32>
    %101 = vector.extract_strided_slice %32 {offsets = [0, 1664], sizes = [112, 128], strides = [1, 1]} : vector<112x1792xf32> to vector<112x128xf32>
    %cst_79 = arith.constant dense<0.000000e+00> : vector<10x128xf32>
    %102 = tpu.matmul %100, %101, %cst_79 {dimension_numbers = #tpu.dot_dimension_numbers<[1], [0], [0], [1], [0, 0, 1, 1], [], []>} : vector<10x112xf32>, vector<112x128xf32>, vector<10x128xf32> -> vector<10x128xf32>
    %103 = arith.addf %98, %102 : vector<10x128xf32>
    %c0_80 = arith.constant 0 : index
    %c0_81 = arith.constant 0 : index
    %104 = vector.load %arg5[%c0_80, %c0_81] : memref<10x1xf32, #tpu.memory_space<vmem>>, vector<10x1xf32>
    %105 = vector.broadcast %104 : vector<10x1xf32> to vector<10x128xf32>
    %106 = arith.addf %103, %105 : vector<10x128xf32>
    %cst_82 = arith.constant 0.000000e+00 : f32
    %107 = vector.broadcast %cst_82 : f32 to vector<10x128xf32>
    %108 = arith.maximumf %106, %107 : vector<10x128xf32>
    %c0_83 = arith.constant 0 : index
    %c0_84 = arith.constant 0 : index
    %109 = vector.load %arg6[%c0_83, %c0_84] : memref<10x128xf32, #tpu.memory_space<vmem>>, vector<10x128xf32>
    tpu.vector_store %arg6[%c0_83, %c0_84], %108 {strides = array<i32>} : memref<10x128xf32, #tpu.memory_space<vmem>>, vector<10x128xf32>,
    return
  }
  func.func @transform_0(%arg0: i32) -> (i32, i32, i32, i32) {
    %c0_i32 = arith.constant 0 : i32
    %c0_i32_0 = arith.constant 0 : i32
    %c0_i32_1 = arith.constant 0 : i32
    %c0_i32_2 = arith.constant 0 : i32
    return %arg0, %c0_i32, %c0_i32_0, %c0_i32_1 : i32, i32, i32, i32
  }
  func.func @transform_1(%arg0: i32) -> (i32, i32) {
    %c0_i32 = arith.constant 0 : i32
    %c0_i32_0 = arith.constant 0 : i32
    %c0_i32_1 = arith.constant 0 : i32
    return %c0_i32, %c0_i32_0 : i32, i32
  }
  func.func @transform_2(%arg0: i32) -> (i32, i32) {
    %c0_i32 = arith.constant 0 : i32
    %c0_i32_0 = arith.constant 0 : i32
    %c0_i32_1 = arith.constant 0 : i32
    return %c0_i32, %c0_i32_0 : i32, i32
  }
  func.func @transform_3(%arg0: i32) -> (i32, i32, i32) {
    %c0_i32 = arith.constant 0 : i32
    %c0_i32_0 = arith.constant 0 : i32
    %c0_i32_1 = arith.constant 0 : i32
    %c0_i32_2 = arith.constant 0 : i32
    return %c0_i32, %c0_i32_0, %c0_i32_1 : i32, i32, i32
  }
  func.func @transform_4(%arg0: i32) -> (i32, i32) {
    %c0_i32 = arith.constant 0 : i32
    %c0_i32_0 = arith.constant 0 : i32
    %c0_i32_1 = arith.constant 0 : i32
    return %c0_i32, %c0_i32_0 : i32, i32
  }
  func.func @transform_5(%arg0: i32) -> (i32, i32) {
    %c0_i32 = arith.constant 0 : i32
    %c0_i32_0 = arith.constant 0 : i32
    return %c0_i32, %arg0 : i32, i32
  }
}

</mosaic_0001>

<bundles_post_ra>
// kernel: torch_conv_forward.1
= control target key start
LH: loop header
LB: loop body
LE: loop exit
PB: predicated region body
PF: predicated region fallthrough
CT: control target
= control target key end

     0   :  { %vm1141_vm0 = vcmask 523264   ;;  %vm5186_vm1 = vcmask 916480   ;;  %s13954_s0 = inlined_call_operand.vmem [shape: f32[1,2,32,2048], index: 0, kind: input, shape index: {}]   ;;  %s13955_s1 = inlined_call_operand.vmem [shape: f32[448,192], index: 1, kind: input, shape index: {}]   ;;  %s13956_s2 = inlined_call_operand.vmem [shape: f32[112,1], index: 2, kind: input, shape index: {}]   ;;  %s13957_s4 = inlined_call_operand.vmem [shape: f32[10,1], index: 4, kind: input, shape index: {}]   ;;  %s13958_s3 = inlined_call_operand.vmem [shape: f32[14,10,112], index: 3, kind: input, shape index: {}]   ;;  %s13959_s5 = inlined_call_operand.vmem [shape: f32[10,128], index: 5, kind: output, shape index: {}]  }
   0x1   :  { %v8056_v0 = vld [vmem:[%s13954_s0 + $0x390] sm:$0xff]  ;;  %v8061_v1 = vld [vmem:[%s13954_s0 + $0x3a0] sm:$0xff]  ;;  %v6501_v2 = vld [vmem:[%s13954_s0 + $0x388] sm:$0xff] }
   0x2   :  { %1310 = vmatprep.subr.mxu0 %v8056_v0  ;;  %1711 = vmatprep.subr.mxu1 %v8061_v1  ;;  %v8071_v3 = vld [vmem:[%s13954_s0 + $0x398] sm:$0xff]  ;;  %v8076_v4 = vld [vmem:[%s13954_s0 + $0x310] sm:$0xff]  ;;  %v8081_v5 = vld [vmem:[%s13954_s0 + $0x320] sm:$0xff] }
   0x3   :  { %1311 = vmatpush1.msra.mxu0 %v6501_v2  ;;  %1712 = vmatpush1.msra.mxu1 %v8071_v3  ;;  %v6487_v6 = vld [vmem:[%s13954_s0 + $0x308] sm:$0xff]  ;;  %v8090_v7 = vld [vmem:[%s13954_s0 + $0x318] sm:$0xff]  ;;  %v8095_v8 = vld [vmem:[%s13954_s0 + $0x290] sm:$0xff] }
   0x4   :  { %1312 = vmatprep.subr.mxu0 %v8076_v4  ;;  %1713 = vmatprep.subr.mxu1 %v8081_v5  ;;  %v8102_v9 = vld [vmem:[%s13954_s0 + $0x2a0] sm:$0xff]  ;;  %v6473_v10 = vld [vmem:[%s13954_s0 + $0x288] sm:$0xff]  ;;  %v8110_v11 = vld [vmem:[%s13954_s0 + $0x298] sm:$0xff] }
   0x5   :  { %1313 = vmatpush1.msra.mxu0 %v6487_v6  ;;  %1714 = vmatpush1.msra.mxu1 %v8090_v7  ;;  %v8116_v12 = vld [vmem:[%s13954_s0 + $0x210] sm:$0xff]  ;;  %v8121_v13 = vld [vmem:[%s13954_s0 + $0x220] sm:$0xff]  ;;  %v6459_v14 = vld [vmem:[%s13954_s0 + $0x208] sm:$0xff] }
   0x6   :  { %1314 = vmatprep.subr.mxu0 %v8095_v8  ;;  %1715 = vmatprep.subr.mxu1 %v8102_v9  ;;  %v8131_v15 = vld [vmem:[%s13954_s0 + $0x218] sm:$0xff]  ;;  %v8137_v16 = vld [vmem:[%s13954_s0 + $0x190] sm:$0xff]  ;;  %v8142_v17 = vld [vmem:[%s13954_s0 + $0x1a0] sm:$0xff] }
   0x7   :  { %1315 = vmatpush1.msra.mxu0 %v6473_v10  ;;  %1716 = vmatpush1.msra.mxu1 %v8110_v11  ;;  %v287_v18 = vld [vmem:[%s13954_s0 + $0x188] sm:$0xff]  ;;  %v8152_v19 = vld [vmem:[%s13954_s0 + $0x198] sm:$0xff]  ;;  %v8158_v20 = vld [vmem:[%s13954_s0 + $0x110] sm:$0xff] }
   0x8   :  { %1316 = vmatprep.subr.mxu0 %v8116_v12  ;;  %1717 = vmatprep.subr.mxu1 %v8121_v13  ;;  %v8163_v21 = vld [vmem:[%s13954_s0 + $0x120] sm:$0xff]  ;;  %v273_v22 = vld [vmem:[%s13954_s0 + $0x108] sm:$0xff]  ;;  %v8173_v23 = vld [vmem:[%s13954_s0 + $0x118] sm:$0xff] }
   0x9   :  { %1317 = vmatpush1.msra.mxu0 %v6459_v14  ;;  %1718 = vmatpush1.msra.mxu1 %v8131_v15  ;;  %v8179_v24 = vld [vmem:[%s13954_s0 + $0x90] sm:$0xff]  ;;  %v8184_v25 = vld [vmem:[%s13954_s0 + $0xa0] sm:$0xff]  ;;  %v259_v26 = vld [vmem:[%s13954_s0 + $0x88] sm:$0xff] }
   0xa   :  { %1318 = vmatprep.subr.mxu0 %v8137_v16  ;;  %1719 = vmatprep.subr.mxu1 %v8142_v17  ;;  %v8194_v27 = vld [vmem:[%s13954_s0 + $0x98] sm:$0xff]  ;;  %v8200_v28 = vld [vmem:[%s13954_s0 + $0x10] sm:$0xff]  ;;  %v8205_v29 = vld [vmem:[%s13954_s0 + $0x20] sm:$0xff] }
   0xb   :  { %1319 = vmatpush1.msra.mxu0 %v287_v18  ;;  %1720 = vmatpush1.msra.mxu1 %v8152_v19  ;;  %v245_v30 = vld [vmem:[%s13954_s0 + $0x8] sm:$0xff]  ;;  %v8215_v31 = vld [vmem:[%s13954_s0 + $0x18] sm:$0xff]  ;;  %v6445_v32 = vld [vmem:[%s13954_s0 + $0x380] sm:$0xff] }
   0xc   :  { %1320 = vmatprep.subr.mxu0 %v8158_v20  ;;  %1721 = vmatprep.subr.mxu1 %v8163_v21  ;;  %v6431_v33 = vld [vmem:[%s13954_s0 + $0x300] sm:$0xff]  ;;  %v8262_v40 = vld [vmem:[%s13954_s0 + $0x3a8] sm:$0xff]  ;;  %v696_v50 = vld [vmem:[%s13955_s1 + $0x18] sm:$0xff] }
   0xd   :  { %1321 = vmatpush1.msra.mxu0 %v273_v22  ;;  %1722 = vmatpush1.msra.mxu1 %v8173_v23  ;;  %v6417_v34 = vld [vmem:[%s13954_s0 + $0x280] sm:$0xff]  ;;  %v8269_v41 = vld [vmem:[%s13954_s0 + $0x328] sm:$0xff]  ;;  %v8347_v51 = vld [vmem:[%s13954_s0 + $0x3b0] sm:$0xff] }
   0xe   :  { %1322 = vmatprep.subr.mxu0 %v8179_v24  ;;  %1723 = vmatprep.subr.mxu1 %v8184_v25  ;;  %v6403_v35 = vld [vmem:[%s13954_s0 + $0x200] sm:$0xff]  ;;  %v8278_v42 = vld [vmem:[%s13954_s0 + $0x2a8] sm:$0xff]  ;;  %v695_v52 = vld [vmem:[%s13955_s1 + $0x10] sm:$0xff] }
   0xf   :  { %1323 = vmatpush1.msra.mxu0 %v259_v26  ;;  %1724 = vmatpush1.msra.mxu1 %v8194_v27  ;;  %v62_v36 = vld [vmem:[%s13954_s0 + $0x180] sm:$0xff]  ;;  %v8287_v43 = vld [vmem:[%s13954_s0 + $0x228] sm:$0xff]  ;;  %v8362_v54 = vld [vmem:[%s13954_s0 + $0x330] sm:$0xff] }
  0x10   :  { %1324 = vmatprep.subr.mxu0 %v8200_v28  ;;  %1725 = vmatprep.subr.mxu1 %v8205_v29  ;;  %v48_v37 = vld [vmem:[%s13954_s0 + $0x100] sm:$0xff]  ;;  %v8296_v44 = vld [vmem:[%s13954_s0 + $0x1a8] sm:$0xff]  ;;  %v700_v56 = vld [vmem:[%s13955_s1 + $0x38] sm:$0xff] }
  0x11   :  { %1325 = vmatpush1.msra.mxu0 %v245_v30  ;;  %1726 = vmatpush1.msra.mxu1 %v8215_v31  ;;  %v34_v38 = vld [vmem:[%s13954_s0 + $0x80] sm:$0xff]  ;;  %v8305_v45 = vld [vmem:[%s13954_s0 + $0x128] sm:$0xff]  ;;  %v8377_v57 = vld [vmem:[%s13954_s0 + $0x2b0] sm:$0xff] }
  0x12   :  { %1326 = vmatprep.subr.mxu0 %v6501_v2  ;;  %1727 = vmatprep.subr.mxu1 %v8071_v3  ;;  %v20_v39 = vld [vmem:[%s13954_s0] sm:$0xff]  ;;  %v8314_v46 = vld [vmem:[%s13954_s0 + $0xa8] sm:$0xff]  ;;  %v699_v58 = vld [vmem:[%s13955_s1 + $0x30] sm:$0xff] }
  0x13   :  { %1327 = vmatpush1.msra.mxu0 %v6445_v32  ;;  %1728 = vmatpush1.msra.mxu1 %v8056_v0  ;;  %v8323_v47 = vld [vmem:[%s13954_s0 + $0x28] sm:$0xff]  ;;  %v693_v49 = vld [vmem:[%s13955_s1] sm:$0xff]  ;;  %v8392_v60 = vld [vmem:[%s13954_s0 + $0x230] sm:$0xff] }
  0x14   :  { %1328 = vmatprep.subr.mxu0 %v6487_v6  ;;  %1729 = vmatprep.subr.mxu1 %v8090_v7  ;;  %v694_v48 = vld [vmem:[%s13955_s1 + $0x8] sm:$0xff]  ;;  %v697_v55 = vld [vmem:[%s13955_s1 + $0x20] sm:$0xff]  ;;  %v704_v62 = vld [vmem:[%s13955_s1 + $0x58] sm:$0xff] }
  0x15   :  { %1329 = vmatpush1.msra.mxu0 %v6431_v33  ;;  %1730 = vmatpush1.msra.mxu1 %v8076_v4  ;;  %v698_v53 = vld [vmem:[%s13955_s1 + $0x28] sm:$0xff]  ;;  %v701_v61 = vld [vmem:[%s13955_s1 + $0x40] sm:$0xff]  ;;  %v8407_v63 = vld [vmem:[%s13954_s0 + $0x1b0] sm:$0xff] }
  0x16   :  { %1330 = vmatprep.subr.mxu0 %v6473_v10  ;;  %1731 = vmatprep.subr.mxu1 %v8110_v11  ;;  %v702_v59 = vld [vmem:[%s13955_s1 + $0x48] sm:$0xff]  ;;  %v708_v6 = vld [vmem:[%s13955_s1 + $0x78] sm:$0xff]  ;;  %v8573_v33 = vld [vmem:[%s13954_s0 + $0x240] sm:$0xff] }
  0x17   :  { %1331 = vmatpush1.msra.mxu0 %v6417_v34  ;;  %1732 = vmatpush1.msra.mxu1 %v8095_v8  ;;  %v706_v2 = vld [vmem:[%s13955_s1 + $0x68] sm:$0xff]  ;;  %v8578_v34 = vld [vmem:[%s13954_s0 + $0x238] sm:$0xff] }
  0x18   :  { %1332 = vmatprep.subr.mxu0 %v6459_v14  ;;  %1733 = vmatprep.subr.mxu1 %v8131_v15  ;;  %v710_v10 = vld [vmem:[%s13955_s1 + $0x88] sm:$0xff]  ;;  %v712_v14 = vld [vmem:[%s13955_s1 + $0x98] sm:$0xff] }
  0x19   :  { %1333 = vmatpush1.msra.mxu0 %v6403_v35  ;;  %1734 = vmatpush1.msra.mxu1 %v8116_v12  ;;  %v726_v32 = vld [vmem:[%s13955_s1 + $0x108] sm:$0xff]  ;;  %v728_v35 = vld [vmem:[%s13955_s1 + $0x118] sm:$0xff] }
  0x1a   :  { %1334 = vmatprep.subr.mxu0 %v287_v18  ;;  %1735 = vmatprep.subr.mxu1 %v8152_v19  ;;  %v713_v18 = vld [vmem:[%s13955_s1 + $0xa0] sm:$0xff] }
  0x1b   :  { %1335 = vmatpush1.msra.mxu0 %v62_v36  ;;  %1736 = vmatpush1.msra.mxu1 %v8137_v16  ;;  %v8595_v36 = vld [vmem:[%s13954_s0 + $0x1c0] sm:$0xff] }
  0x1c   :  { %1336 = vmatprep.subr.mxu0 %v273_v22  ;;  %1737 = vmatprep.subr.mxu1 %v8173_v23  ;;  %v720_v22 = vld [vmem:[%s13955_s1 + $0xd8] sm:$0xff] }
  0x1d   :  { %1337 = vmatpush1.msra.mxu0 %v48_v37  ;;  %1738 = vmatpush1.msra.mxu1 %v8158_v20  ;;  %v8600_v37 = vld [vmem:[%s13954_s0 + $0x1b8] sm:$0xff] }
  0x1e   :  { %1338 = vmatprep.subr.mxu0 %v259_v26  ;;  %1739 = vmatprep.subr.mxu1 %v8194_v27  ;;  %v8529_v26 = vld [vmem:[%s13954_s0 + $0x340] sm:$0xff] }
  0x1f   :  { %1339 = vmatpush1.msra.mxu0 %v34_v38  ;;  %1740 = vmatpush1.msra.mxu1 %v8179_v24  ;;  %v730_v38 = vld [vmem:[%s13955_s1 + $0x128] sm:$0xff] }
  0x20   :  { %1340 = vmatprep.subr.mxu0 %v245_v30  ;;  %1741 = vmatprep.subr.mxu1 %v8215_v31  ;;  %v8551_v30 = vld [vmem:[%s13954_s0 + $0x2c0] sm:$0xff] }
  0x21   :  { %1341 = vmatpush1.msra.mxu0 %v20_v39  ;;  %1742 = vmatpush1.msra.mxu1 %v8200_v28  ;;  %v8617_v39 = vld [vmem:[%s13954_s0 + $0x140] sm:$0xff] }
  0x22   :  { %1358 = vmatprep.subr.mxu0 %v8071_v3  ;;  %1759 = vmatprep.subr.mxu1 %v8262_v40  ;;  %v8422_v3 = vld [vmem:[%s13954_s0 + $0x130] sm:$0xff] }
  0x23   :  { %1359 = vmatpush2.msra.mxu0 %v8056_v0  ;;  %1760 = vmatpush2.msra.mxu1 %v8061_v1  ;;  %v703_v0 = vld [vmem:[%s13955_s1 + $0x50] sm:$0xff] }
  0x24   :  { %1360 = vmatprep.subr.mxu0 %v8090_v7  ;;  %1761 = vmatprep.subr.mxu1 %v8269_v41  ;;  %v8437_v7 = vld [vmem:[%s13954_s0 + $0xb0] sm:$0xff] }
  0x25   :  { %1361 = vmatpush2.msra.mxu0 %v8076_v4  ;;  %1762 = vmatpush2.msra.mxu1 %v8081_v5  ;;  %v705_v4 = vld [vmem:[%s13955_s1 + $0x60] sm:$0xff] }
  0x26   :  { %1362 = vmatprep.subr.mxu0 %v8110_v11  ;;  %1763 = vmatprep.subr.mxu1 %v8278_v42  ;;  %v8452_v11 = vld [vmem:[%s13954_s0 + $0x30] sm:$0xff] }
  0x27   :  { %1363 = vmatpush2.msra.mxu0 %v8095_v8  ;;  %1764 = vmatpush2.msra.mxu1 %v8102_v9  ;;  %v707_v8 = vld [vmem:[%s13955_s1 + $0x70] sm:$0xff] }
  0x28   :  { %1364 = vmatprep.subr.mxu0 %v8131_v15  ;;  %1765 = vmatprep.subr.mxu1 %v8287_v43  ;;  %v711_v15 = vld [vmem:[%s13955_s1 + $0x90] sm:$0xff] }
  0x29   :  { %1365 = vmatpush2.msra.mxu0 %v8116_v12  ;;  %1766 = vmatpush2.msra.mxu1 %v8121_v13  ;;  %v709_v12 = vld [vmem:[%s13955_s1 + $0x80] sm:$0xff] }
  0x2a   :  { %1366 = vmatprep.subr.mxu0 %v8152_v19  ;;  %1767 = vmatprep.subr.mxu1 %v8296_v44  ;;  %v716_v19 = vld [vmem:[%s13955_s1 + $0xb8] sm:$0xff] }
  0x2b   :  { %1367 = vmatpush2.msra.mxu0 %v8137_v16  ;;  %1768 = vmatpush2.msra.mxu1 %v8142_v17  ;;  %v714_v16 = vld [vmem:[%s13955_s1 + $0xa8] sm:$0xff] }
  0x2c   :  { %1368 = vmatprep.subr.mxu0 %v8173_v23  ;;  %1769 = vmatprep.subr.mxu1 %v8305_v45  ;;  %v8512_v23 = vld [vmem:[%s13954_s0 + $0x3b8] sm:$0xff] }
  0x2d   :  { %1369 = vmatpush2.msra.mxu0 %v8158_v20  ;;  %1770 = vmatpush2.msra.mxu1 %v8163_v21  ;;  %v718_v20 = vld [vmem:[%s13955_s1 + $0xc8] sm:$0xff] }
  0x2e   :  { %1370 = vmatprep.subr.mxu0 %v8194_v27  ;;  %1771 = vmatprep.subr.mxu1 %v8314_v46  ;;  %v8534_v27 = vld [vmem:[%s13954_s0 + $0x338] sm:$0xff] }
  0x2f   :  { %1371 = vmatpush2.msra.mxu0 %v8179_v24  ;;  %1772 = vmatpush2.msra.mxu1 %v8184_v25  ;;  %v722_v24 = vld [vmem:[%s13955_s1 + $0xe8] sm:$0xff] }
  0x30   :  { %1372 = vmatprep.subr.mxu0 %v8215_v31  ;;  %1773 = vmatprep.subr.mxu1 %v8323_v47  ;;  %v8556_v31 = vld [vmem:[%s13954_s0 + $0x2b8] sm:$0xff] }
  0x31   :  { %1373 = vmatpush2.msra.mxu0 %v8200_v28  ;;  %6571 = vmatprep.mubr.msk.f32.mxu0 %vm1141_vm0, %v694_v48  ;;  %v724_v28 = vld [vmem:[%s13955_s1 + $0xf8] sm:$0xff] }
  0x32   :  { %1774 = vmatpush2.msra.mxu1 %v8205_v29  ;;  %6627 = vmatprep.mubr.msk.f32.mxu1 %vm1141_vm0, %v694_v48  ;;  %v8666_v48 = vld [vmem:[%s13954_s0 + $0x38] sm:$0xff] }
  0x33   :  { %1375 = vmatmul.mubr.f32.vlgmr.msra.gmra.mxu0 %v693_v49  ;;  %1776 = vmatmul.mubr.f32.vlgmr.msra.gmra.mxu1 %v693_v49  ;;  %v733_v49 = vld [vmem:[%s13955_s1 + $0x140] sm:$0xff] }
  0x34   :  { %6572 = vmatprep.mubr.msk.f32.mxu0 %vm1141_vm0, %v696_v50  ;;  %6628 = vmatprep.mubr.msk.f32.mxu1 %vm1141_vm0, %v696_v50  ;;  %v736_v50 = vld [vmem:[%s13955_s1 + $0x158] sm:$0xff] }
  0x35   :  { %2112 = vmatprep.subr.mxu0 %v8347_v51 }
  0x36   :  { %2113 = vmatpush1.msra.mxu0 %v8262_v40 }
  0x37   :  { %1381 = vmatmul.mubr.f32.gmra.mxu0 %v695_v52  ;;  %1782 = vmatmul.mubr.f32.gmra.mxu1 %v695_v52  ;;  %v735_v52 = vld [vmem:[%s13955_s1 + $0x150] sm:$0xff] }
  0x38   :  { %6573 = vmatprep.mubr.msk.f32.mxu0 %vm1141_vm0, %v698_v53  ;;  %6629 = vmatprep.mubr.msk.f32.mxu1 %vm1141_vm0, %v698_v53  ;;  %v738_v53 = vld [vmem:[%s13955_s1 + $0x168] sm:$0xff] }
  0x39   :  { %2114 = vmatprep.subr.mxu0 %v8362_v54 }
  0x3a   :  { %2115 = vmatpush1.msra.mxu0 %v8269_v41 }
  0x3b   :  { %1387 = vmatmul.mubr.f32.gmra.mxu0 %v697_v55  ;;  %1788 = vmatmul.mubr.f32.gmra.mxu1 %v697_v55  ;;  %v737_v55 = vld [vmem:[%s13955_s1 + $0x160] sm:$0xff] }
  0x3c   :  { %6574 = vmatprep.mubr.msk.f32.mxu0 %vm1141_vm0, %v700_v56  ;;  %6630 = vmatprep.mubr.msk.f32.mxu1 %vm1141_vm0, %v700_v56  ;;  %v740_v56 = vld [vmem:[%s13955_s1 + $0x178] sm:$0xff] }
  0x3d   :  { %2116 = vmatprep.subr.mxu0 %v8377_v57 }
  0x3e   :  { %2117 = vmatpush1.msra.mxu0 %v8278_v42 }
  0x3f   :  { %1393 = vmatmul.mubr.f32.gmra.mxu0 %v699_v58  ;;  %1794 = vmatmul.mubr.f32.gmra.mxu1 %v699_v58  ;;  %v4716_v58 = vld [vmem:[%s13956_s2 + $0x58] sm:$0xff] }
  0x40   :  { %6575 = vmatprep.mubr.msk.f32.mxu0 %vm1141_vm0, %v702_v59  ;;  %6631 = vmatprep.mubr.msk.f32.mxu1 %vm1141_vm0, %v702_v59  ;;  %v739_v59 = vld [vmem:[%s13955_s1 + $0x170] sm:$0xff] }
  0x41   :  { %2118 = vmatprep.subr.mxu0 %v8392_v60 }
  0x42   :  { %2119 = vmatpush1.msra.mxu0 %v8287_v43 }
  0x43   :  { %1399 = vmatmul.mubr.f32.gmra.mxu0 %v701_v61  ;;  %1800 = vmatmul.mubr.f32.gmra.mxu1 %v701_v61  ;;  %v741_v61 = vld [vmem:[%s13955_s1 + $0x180] sm:$0xff] }
  0x44   :  { %6576 = vmatprep.mubr.msk.f32.mxu0 %vm1141_vm0, %v704_v62  ;;  %6632 = vmatprep.mubr.msk.f32.mxu1 %vm1141_vm0, %v704_v62  ;;  %v744_v62 = vld [vmem:[%s13955_s1 + $0x198] sm:$0xff] }
  0x45   :  { %2120 = vmatprep.subr.mxu0 %v8407_v63 }
  0x46   :  { %2121 = vmatpush1.msra.mxu0 %v8296_v44 }
  0x47   :  { %1405 = vmatmul.mubr.f32.gmra.mxu0 %v703_v0  ;;  %1806 = vmatmul.mubr.f32.gmra.mxu1 %v703_v0  ;;  %v4715_v0 = vld [vmem:[%s13956_s2 + $0x50] sm:$0xff] }
  0x48   :  { %6577 = vmatprep.mubr.msk.f32.mxu0 %vm1141_vm0, %v706_v2  ;;  %6633 = vmatprep.mubr.msk.f32.mxu1 %vm1141_vm0, %v706_v2  ;;  %v746_v2 = vld [vmem:[%s13955_s1 + $0x1a8] sm:$0xff] }
  0x49   :  { %2122 = vmatprep.subr.mxu0 %v8422_v3 }
  0x4a   :  { %2123 = vmatpush1.msra.mxu0 %v8305_v45 }
  0x4b   :  { %1411 = vmatmul.mubr.f32.gmra.mxu0 %v705_v4  ;;  %1812 = vmatmul.mubr.f32.gmra.mxu1 %v705_v4  ;;  %v745_v4 = vld [vmem:[%s13955_s1 + $0x1a0] sm:$0xff] }
  0x4c   :  { %6578 = vmatprep.mubr.msk.f32.mxu0 %vm1141_vm0, %v708_v6  ;;  %6634 = vmatprep.mubr.msk.f32.mxu1 %vm1141_vm0, %v708_v6  ;;  %v748_v6 = vld [vmem:[%s13955_s1 + $0x1b8] sm:$0xff] }
  0x4d   :  { %2124 = vmatprep.subr.mxu0 %v8437_v7 }
  0x4e   :  { %2125 = vmatpush1.msra.mxu0 %v8314_v46 }
  0x4f   :  { %1417 = vmatmul.mubr.f32.gmra.mxu0 %v707_v8  ;;  %1818 = vmatmul.mubr.f32.gmra.mxu1 %v707_v8  ;;  %v747_v8 = vld [vmem:[%s13955_s1 + $0x1b0] sm:$0xff] }
  0x50   :  { %6579 = vmatprep.mubr.msk.f32.mxu0 %vm1141_vm0, %v710_v10  ;;  %6635 = vmatprep.mubr.msk.f32.mxu1 %vm1141_vm0, %v710_v10  ;;  %v4713_v10 = vld [vmem:[%s13956_s2 + $0x40] sm:$0xff] }
  0x51   :  { %2126 = vmatprep.subr.mxu0 %v8452_v11 }
  0x52   :  { %2127 = vmatpush1.msra.mxu0 %v8323_v47 }
  0x53   :  { %1423 = vmatmul.mubr.f32.gmra.mxu0 %v709_v12  ;;  %1824 = vmatmul.mubr.f32.gmra.mxu1 %v709_v12  ;;  %v4714_v12 = vld [vmem:[%s13956_s2 + $0x48] sm:$0xff] }
  0x54   :  { %6580 = vmatprep.mubr.msk.f32.mxu0 %vm1141_vm0, %v712_v14  ;;  %6636 = vmatprep.mubr.msk.f32.mxu1 %vm1141_vm0, %v712_v14  ;;  %v749_v14 = vld [vmem:[%s13955_s1 + $0x1c0] sm:$0xff] }
  0x55   :  { %2128 = vmatprep.subr.mxu0 %v8262_v40  ;;  %v8622_v40 = vld [vmem:[%s13954_s0 + $0x138] sm:$0xff] }
  0x56   :  { %2129 = vmatpush1.msra.mxu0 %v8061_v1  ;;  %v715_v1 = vld [vmem:[%s13955_s1 + $0xb0] sm:$0xff] }
  0x57   :  { %1429 = vmatmul.mubr.f32.gmra.mxu0 %v711_v15  ;;  %1830 = vmatmul.mubr.f32.gmra.mxu1 %v711_v15  ;;  %v8789_v15 = vld [vmem:[%s13954_s0 + $0x3c8] sm:$0xff] }
  0x58   :  { %6581 = vmatprep.mubr.msk.f32.mxu0 %vm1141_vm0, %v714_v16  ;;  %6637 = vmatprep.mubr.msk.f32.mxu1 %vm1141_vm0, %v714_v16  ;;  %v4711_v16 = vld [vmem:[%s13956_s2 + $0x30] sm:$0xff] }
  0x59   :  { %2130 = vmatprep.subr.mxu0 %v8269_v41  ;;  %v729_v41 = vld [vmem:[%s13955_s1 + $0x120] sm:$0xff] }
  0x5a   :  { %2131 = vmatpush1.msra.mxu0 %v8081_v5  ;;  %v717_v5 = vld [vmem:[%s13955_s1 + $0xc0] sm:$0xff] }
  0x5b   :  { %1435 = vmatmul.mubr.f32.gmra.mxu0 %v713_v18  ;;  %1836 = vmatmul.mubr.f32.gmra.mxu1 %v713_v18  ;;  %v4712_v18 = vld [vmem:[%s13956_s2 + $0x38] sm:$0xff] }
  0x5c   :  { %6582 = vmatprep.mubr.msk.f32.mxu0 %vm1141_vm0, %v716_v19  ;;  %6638 = vmatprep.mubr.msk.f32.mxu1 %vm1141_vm0, %v716_v19  ;;  %v754_v19 = vld [vmem:[%s13955_s1 + $0x1e8] sm:$0xff] }
  0x5d   :  { %2132 = vmatprep.subr.mxu0 %v8278_v42  ;;  %v732_v42 = vld [vmem:[%s13955_s1 + $0x138] sm:$0xff] }
  0x5e   :  { %2133 = vmatpush1.msra.mxu0 %v8102_v9  ;;  %v8507_v9 = vld [vmem:[%s13954_s0 + $0x3c0] sm:$0xff] }
  0x5f   :  { %1441 = vmatmul.mubr.f32.gmra.mxu0 %v715_v1  ;;  %1842 = vmatmul.mubr.f32.gmra.mxu1 %v715_v1  ;;  %v8810_v1 = vld [vmem:[%s13954_s0 + $0x348] sm:$0xff] }
  0x60   :  { %6583 = vmatprep.mubr.msk.f32.mxu0 %vm1141_vm0, %v718_v20  ;;  %6639 = vmatprep.mubr.msk.f32.mxu1 %vm1141_vm0, %v718_v20  ;;  %v4709_v20 = vld [vmem:[%s13956_s2 + $0x20] sm:$0xff] }
  0x61   :  { %2134 = vmatprep.subr.mxu0 %v8287_v43  ;;  %2513 = vmatprep.subr.mxu1 %v8507_v9  ;;  %v8639_v43 = vld [vmem:[%s13954_s0 + $0xc0] sm:$0xff] }
  0x62   :  { %2135 = vmatpush1.msra.mxu0 %v8121_v13  ;;  %v719_v13 = vld [vmem:[%s13955_s1 + $0xd0] sm:$0xff]  ;;  %2514 = vmatpush1.msra.mxu1 %v8512_v23 }
  0x63   :  { %1447 = vmatmul.mubr.f32.gmra.mxu0 %v717_v5  ;;  %1848 = vmatmul.mubr.f32.gmra.mxu1 %v717_v5  ;;  %v4710_v5 = vld [vmem:[%s13956_s2 + $0x28] sm:$0xff] }
  0x64   :  { %6584 = vmatprep.mubr.msk.f32.mxu0 %vm1141_vm0, %v720_v22  ;;  %6640 = vmatprep.mubr.msk.f32.mxu1 %vm1141_vm0, %v720_v22  ;;  %v753_v22 = vld [vmem:[%s13955_s1 + $0x1e0] sm:$0xff] }
  0x65   :  { %2136 = vmatprep.subr.mxu0 %v8296_v44  ;;  %2515 = vmatprep.subr.mxu1 %v8529_v26  ;;  %v8644_v44 = vld [vmem:[%s13954_s0 + $0xb8] sm:$0xff] }
  0x66   :  { %2137 = vmatpush1.msra.mxu0 %v8142_v17  ;;  %v721_v17 = vld [vmem:[%s13955_s1 + $0xe0] sm:$0xff]  ;;  %2516 = vmatpush1.msra.mxu1 %v8534_v27 }
  0x67   :  { %1453 = vmatmul.mubr.f32.gmra.mxu0 %v719_v13  ;;  %1854 = vmatmul.mubr.f32.gmra.mxu1 %v719_v13  ;;  %v4707_v13 = vld [vmem:[%s13956_s2 + $0x10] sm:$0xff] }
  0x68   :  { %6585 = vmatprep.mubr.msk.f32.mxu0 %vm1141_vm0, %v722_v24  ;;  %6641 = vmatprep.mubr.msk.f32.mxu1 %vm1141_vm0, %v722_v24  ;;  %v4708_v24 = vld [vmem:[%s13956_s2 + $0x18] sm:$0xff] }
  0x69   :  { %2138 = vmatprep.subr.mxu0 %v8305_v45  ;;  %2517 = vmatprep.subr.mxu1 %v8551_v30  ;;  %v731_v45 = vld [vmem:[%s13955_s1 + $0x130] sm:$0xff] }
  0x6a   :  { %2139 = vmatpush1.msra.mxu0 %v8163_v21  ;;  %v723_v21 = vld [vmem:[%s13955_s1 + $0xf0] sm:$0xff]  ;;  %2518 = vmatpush1.msra.mxu1 %v8556_v31 }
  0x6b   :  { %1459 = vmatmul.mubr.f32.gmra.mxu0 %v721_v17  ;;  %1860 = vmatmul.mubr.f32.gmra.mxu1 %v721_v17  ;;  %v8852_v17 = vld [vmem:[%s13954_s0 + $0x248] sm:$0xff] }
  0x6c   :  { %6586 = vmatprep.mubr.msk.f32.mxu0 %vm1141_vm0, %v724_v28  ;;  %6642 = vmatprep.mubr.msk.f32.mxu1 %vm1141_vm0, %v724_v28  ;;  %v4705_v28 = vld [vmem:[%s13956_s2] sm:$0xff] }
  0x6d   :  { %2140 = vmatprep.subr.mxu0 %v8314_v46  ;;  %2519 = vmatprep.subr.mxu1 %v8573_v33  ;;  %v734_v46 = vld [vmem:[%s13955_s1 + $0x148] sm:$0xff] }
  0x6e   :  { %2141 = vmatpush1.msra.mxu0 %v8184_v25  ;;  %v725_v25 = vld [vmem:[%s13955_s1 + $0x100] sm:$0xff]  ;;  %2520 = vmatpush1.msra.mxu1 %v8578_v34 }
  0x6f   :  { %1465 = vmatmul.mubr.f32.gmra.mxu0 %v723_v21  ;;  %1866 = vmatmul.mubr.f32.gmra.mxu1 %v723_v21  ;;  %v760_v21 = vld [vmem:[%s13955_s1 + $0x218] sm:$0xff] }
  0x70   :  { %6587 = vmatprep.mubr.msk.f32.mxu0 %vm1141_vm0, %v726_v32  ;;  %6643 = vmatprep.mubr.msk.f32.mxu1 %vm1141_vm0, %v726_v32  ;;  %v8873_v32 = vld [vmem:[%s13954_s0 + $0x1c8] sm:$0xff] }
  0x71   :  { %2142 = vmatprep.subr.mxu0 %v8323_v47  ;;  %2521 = vmatprep.subr.mxu1 %v8595_v36  ;;  %v8660_v47 = vld [vmem:[%s13954_s0 + $0x40] sm:$0xff] }
  0x72   :  { %2143 = vmatpush1.msra.mxu0 %v8205_v29  ;;  %v727_v29 = vld [vmem:[%s13955_s1 + $0x110] sm:$0xff]  ;;  %2522 = vmatpush1.msra.mxu1 %v8600_v37 }
  0x73   :  { %1471 = vmatmul.mubr.f32.gmra.mxu0 %v725_v25  ;;  %1872 = vmatmul.mubr.f32.gmra.mxu1 %v725_v25  ;;  %v762_v25 = vld [vmem:[%s13955_s1 + $0x228] sm:$0xff] }
  0x74   :  { %6588 = vmatprep.mubr.msk.f32.mxu0 %vm1141_vm0, %v728_v35  ;;  %6644 = vmatprep.mubr.msk.f32.mxu1 %vm1141_vm0, %v728_v35  ;;  %v8891_v35 = vld [vmem:[%s13954_s0 + $0x148] sm:$0xff] }
  0x75   :  { %2160 = vmatprep.subr.mxu0 %v8512_v23  ;;  %2523 = vmatprep.subr.mxu1 %v8617_v39 }
  0x76   :  { %2161 = vmatpush2.msra.mxu0 %v8347_v51  ;;  %2524 = vmatpush1.msra.mxu1 %v8622_v40 }
  0x77   :  { %1477 = vmatmul.mubr.f32.gmra.mxu0 %v727_v29  ;;  %1878 = vmatmul.mubr.f32.gmra.mxu1 %v727_v29  ;;  %v764_v29 = vld [vmem:[%s13955_s1 + $0x238] sm:$0xff] }
  0x78   :  { %6589 = vmatprep.mubr.msk.f32.mxu0 %vm1141_vm0, %v730_v38  ;;  %6645 = vmatprep.mubr.msk.f32.mxu1 %vm1141_vm0, %v730_v38  ;;  %v763_v38 = vld [vmem:[%s13955_s1 + $0x230] sm:$0xff] }
  0x79   :  { %2162 = vmatprep.subr.mxu0 %v8534_v27  ;;  %2525 = vmatprep.subr.mxu1 %v8639_v43 }
  0x7a   :  { %2163 = vmatpush2.msra.mxu0 %v8362_v54  ;;  %2526 = vmatpush1.msra.mxu1 %v8644_v44 }
  0x7b   :  { %1483 = vmatmul.mubr.f32.gmra.mxu0 %v729_v41  ;;  %1884 = vmatmul.mubr.f32.gmra.mxu1 %v729_v41  ;;  %v765_v41 = vld [vmem:[%s13955_s1 + $0x240] sm:$0xff] }
  0x7c   :  { %6590 = vmatprep.mubr.msk.f32.mxu0 %vm1141_vm0, %v732_v42  ;;  %6646 = vmatprep.mubr.msk.f32.mxu1 %vm1141_vm0, %v732_v42  ;;  %v768_v42 = vld [vmem:[%s13955_s1 + $0x258] sm:$0xff] }
  0x7d   :  { %2164 = vmatprep.subr.mxu0 %v8556_v31  ;;  %2527 = vmatprep.subr.mxu1 %v8660_v47 }
  0x7e   :  { %2165 = vmatpush2.msra.mxu0 %v8377_v57  ;;  %2528 = vmatpush1.msra.mxu1 %v8666_v48 }
  0x7f   :  { %1489 = vmatmul.mubr.f32.gmra.mxu0 %v731_v45  ;;  %1890 = vmatmul.mubr.f32.gmra.mxu1 %v731_v45  ;;  %v769_v45 = vld [vmem:[%s13955_s1 + $0x260] sm:$0xff] }
  0x80   :  { %6591 = vmatprep.mubr.msk.f32.mxu0 %vm1141_vm0, %v734_v46  ;;  %6647 = vmatprep.mubr.msk.f32.mxu1 %vm1141_vm0, %v734_v46  ;;  %v772_v46 = vld [vmem:[%s13955_s1 + $0x278] sm:$0xff] }
  0x81   :  { %2166 = vmatprep.subr.mxu0 %v8578_v34  ;;  %2529 = vmatprep.subr.mxu1 %v8512_v23  ;;  %v8831_v23 = vld [vmem:[%s13954_s0 + $0x2c8] sm:$0xff] }
  0x82   :  { %2167 = vmatpush2.msra.mxu0 %v8392_v60  ;;  %2530 = vmatpush1.msra.mxu1 %v8347_v51  ;;  %v8022_v51 = vmov 0  }
  0x83   :  { %1495 = vmatmul.mubr.f32.gmra.mxu0 %v733_v49  ;;  %1896 = vmatmul.mubr.f32.gmra.mxu1 %v733_v49  ;;  %v773_v49 = vld [vmem:[%s13955_s1 + $0x280] sm:$0xff] }
  0x84   :  { %6592 = vmatprep.mubr.msk.f32.mxu0 %vm1141_vm0, %v736_v50  ;;  %6648 = vmatprep.mubr.msk.f32.mxu1 %vm1141_vm0, %v736_v50  ;;  %v776_v50 = vld [vmem:[%s13955_s1 + $0x298] sm:$0xff] }
  0x85   :  { %2168 = vmatprep.subr.mxu0 %v8600_v37  ;;  %2531 = vmatprep.subr.mxu1 %v8534_v27  ;;  %v758_v27 = vld [vmem:[%s13955_s1 + $0x208] sm:$0xff] }
  0x86   :  { %2169 = vmatpush2.msra.mxu0 %v8407_v63  ;;  %2532 = vmatpush1.msra.mxu1 %v8362_v54  ;;  %v742_v54 = vld [vmem:[%s13955_s1 + $0x188] sm:$0xff] }
  0x87   :  { %1501 = vmatmul.mubr.f32.gmra.mxu0 %v735_v52  ;;  %1902 = vmatmul.mubr.f32.gmra.mxu1 %v735_v52  ;;  %v775_v52 = vld [vmem:[%s13955_s1 + $0x290] sm:$0xff] }
  0x88   :  { %6593 = vmatprep.mubr.msk.f32.mxu0 %vm1141_vm0, %v738_v53  ;;  %6649 = vmatprep.mubr.msk.f32.mxu1 %vm1141_vm0, %v738_v53  ;;  %v778_v53 = vld [vmem:[%s13955_s1 + $0x2a8] sm:$0xff] }
  0x89   :  { %2170 = vmatprep.subr.mxu0 %v8622_v40  ;;  %7677 = vset.pattern.permute.xlu1 %v8022_v51 }
  0x8a   :  { %2533 = vmatprep.subr.mxu1 %v8556_v31  ;;  %4776 = vperm.xlu1 %7677, %v4716_v58   ;;  %v4706_v31 = vld [vmem:[%s13956_s2 + $0x8] sm:$0xff] }
  0x8b   :  { %1507 = vmatmul.mubr.f32.gmra.mxu0 %v737_v55  ;;  %1908 = vmatmul.mubr.f32.gmra.mxu1 %v737_v55  ;;  %v777_v55 = vld [vmem:[%s13955_s1 + $0x2a0] sm:$0xff]  ;;  %v782_v58 = vld [vmem:[%s13955_s1 + $0x2c8] sm:$0xff] }
  0x8c   :  { %6594 = vmatprep.mubr.msk.f32.mxu0 %vm1141_vm0, %v740_v56  ;;  %6650 = vmatprep.mubr.msk.f32.mxu1 %vm1141_vm0, %v740_v56  ;;  %v780_v56 = vld [vmem:[%s13955_s1 + $0x2b8] sm:$0xff] }
  0x8d   :  { %2534 = vmatpush1.msra.mxu1 %v8377_v57  ;;  %2171 = vmatpush2.msra.mxu0 %v8422_v3  ;;  %v4718_v57 = vld [vmem:[%s13956_s2 + $0x68] sm:$0xff] }
  0x8e   :  { %2535 = vmatprep.subr.mxu1 %v8578_v34  ;;  %7676 = vset.pattern.permute.xlu0 %v8022_v51  ;;  %v6510_v34 = vld [vmem:[%s13954_s0 + $0x3d0] sm:$0xff] }
  0x8f   :  { %1513 = vmatmul.mubr.f32.gmra.mxu0 %v739_v59  ;;  %1914 = vmatmul.mubr.f32.gmra.mxu1 %v739_v59  ;;  %v779_v51 = vld [vmem:[%s13955_s1 + $0x2b0] sm:$0xff]  ;;  %v781_v59 = vld [vmem:[%s13955_s1 + $0x2c0] sm:$0xff] }
  0x90   :  { %6595 = vmatprep.mubr.msk.f32.mxu0 %vm1141_vm0, %v742_v54  ;;  %6651 = vmatprep.mubr.msk.f32.mxu1 %vm1141_vm0, %v742_v54  ;;  %v784_v54 = vld [vmem:[%s13955_s1 + $0x2d8] sm:$0xff] }
  0x91   :  { %2536 = vmatpush1.msra.mxu1 %v8392_v60  ;;  %2172 = vmatprep.subr.mxu0 %v8644_v44  ;;  %v743_v60 = vld [vmem:[%s13955_s1 + $0x190] sm:$0xff] }
  0x92   :  { %2537 = vmatprep.subr.mxu1 %v8600_v37  ;;  %4786 = vperm.xlu0 %7676, %v4718_v57   ;;  %v761_v37 = vld [vmem:[%s13955_s1 + $0x220] sm:$0xff] }
  0x93   :  { %1519 = vmatmul.mubr.f32.gmra.mxu0 %v741_v61  ;;  %1920 = vmatmul.mubr.f32.gmra.mxu1 %v741_v61  ;;  %v783_v61 = vld [vmem:[%s13955_s1 + $0x2d0] sm:$0xff]  ;;  %v785_v57 = vld [vmem:[%s13955_s1 + $0x2e0] sm:$0xff] }
  0x94   :  { %6596 = vmatprep.mubr.msk.f32.mxu0 %vm1141_vm0, %v744_v62  ;;  %6652 = vmatprep.mubr.msk.f32.mxu1 %vm1141_vm0, %v744_v62  ;;  %v786_v62 = vld [vmem:[%s13955_s1 + $0x2e8] sm:$0xff] }
  0x95   :  { %2538 = vmatpush1.msra.mxu1 %v8407_v63  ;;  %4771 = vperm.xlu1 %7677, %v4715_v0   ;;  %v4717_v63 = vld [vmem:[%s13956_s2 + $0x60] sm:$0xff]  ;;  %v788_v0 = vld [vmem:[%s13955_s1 + $0x2f8] sm:$0xff] }
  0x96   :  { %2539 = vmatprep.subr.mxu1 %v8622_v40  ;;  %2173 = vmatpush2.msra.mxu0 %v8437_v7  ;;  %v766_v40 = vld [vmem:[%s13955_s1 + $0x248] sm:$0xff] }
  0x97   :  { %1525 = vmatmul.mubr.f32.gmra.mxu0 %v743_v60  ;;  %1926 = vmatmul.mubr.f32.gmra.mxu1 %v743_v60  ;;  %v787_v60 = vld [vmem:[%s13955_s1 + $0x2f0] sm:$0xff] }
  0x98   :  { %6597 = vmatprep.mubr.msk.f32.mxu0 %vm1141_vm0, %v746_v2  ;;  %6653 = vmatprep.mubr.msk.f32.mxu1 %vm1141_vm0, %v746_v2  ;;  %v790_v2 = vld [vmem:[%s13955_s1 + $0x308] sm:$0xff] }
  0x99   :  { %2540 = vmatpush1.msra.mxu1 %v8422_v3  ;;  %2174 = vmatprep.subr.mxu0 %v8666_v48  ;;  %v750_v3 = vld [vmem:[%s13955_s1 + $0x1c8] sm:$0xff] }
  0x9a   :  { %2541 = vmatprep.subr.mxu1 %v8644_v44  ;;  %2175 = vmatpush2.msra.mxu0 %v8452_v11  ;;  %v770_v44 = vld [vmem:[%s13955_s1 + $0x268] sm:$0xff] }
  0x9b   :  { %1531 = vmatmul.mubr.f32.gmra.mxu0 %v745_v4  ;;  %1932 = vmatmul.mubr.f32.gmra.mxu1 %v745_v4  ;;  %v789_v4 = vld [vmem:[%s13955_s1 + $0x300] sm:$0xff] }
  0x9c   :  { %6598 = vmatprep.mubr.msk.f32.mxu0 %vm1141_vm0, %v748_v6  ;;  %6654 = vmatprep.mubr.msk.f32.mxu1 %vm1141_vm0, %v748_v6  ;;  %v792_v6 = vld [vmem:[%s13955_s1 + $0x318] sm:$0xff] }
  0x9d   :  { %2542 = vmatpush1.msra.mxu1 %v8437_v7  ;;  %4781 = vperm.xlu0 %7676, %v4717_v63   ;;  %v752_v7 = vld [vmem:[%s13955_s1 + $0x1d8] sm:$0xff] }
  0x9e   :  { %2543 = vmatprep.subr.mxu1 %v8666_v48  ;;  %4761 = vperm.xlu1 %7677, %v4713_v10   ;;  %v774_v48 = vld [vmem:[%s13955_s1 + $0x288] sm:$0xff] }
  0x9f   :  { %1537 = vmatmul.mubr.f32.gmra.mxu0 %v747_v8  ;;  %1938 = vmatmul.mubr.f32.gmra.mxu1 %v747_v8 }
  0xa0   :  { %6599 = vmatprep.mubr.msk.f32.mxu0 %vm1141_vm0, %v750_v3  ;;  %6655 = vmatprep.mubr.msk.f32.mxu1 %vm1141_vm0, %v750_v3  ;;  %v791_v3 = vld [vmem:[%s13955_s1 + $0x310] sm:$0xff] }
  0xa1   :  { %2544 = vmatpush1.msra.mxu1 %v8452_v11  ;;  %4766 = vperm.xlu0 %7676, %v4714_v12   ;;  %v751_v11 = vld [vmem:[%s13955_s1 + $0x1d0] sm:$0xff] }
  0xa2   :  { %2561 = vmatprep.subr.mxu1 %v8789_v15  ;;  %4751 = vperm.xlu1 %7677, %v4711_v16  }
  0xa3   :  { %1543 = vmatmul.mubr.f32.gmra.mxu0 %v749_v14  ;;  %1944 = vmatmul.mubr.f32.gmra.mxu1 %v749_v14  ;;  %v794_v14 = vld [vmem:[%s13955_s1 + $0x328] sm:$0xff] }
  0xa4   :  { %6600 = vmatprep.mubr.msk.f32.mxu0 %vm1141_vm0, %v752_v7  ;;  %6656 = vmatprep.mubr.msk.f32.mxu1 %vm1141_vm0, %v752_v7 }
  0xa5   :  { %2562 = vmatpush2.msra.mxu1 %v8507_v9  ;;  %4756 = vperm.xlu0 %7676, %v4712_v18   ;;  %v756_v9 = vld [vmem:[%s13955_s1 + $0x1f8] sm:$0xff]  ;;  %v793_v18 = vld [vmem:[%s13955_s1 + $0x320] sm:$0xff] }
  0xa6   :  { %2563 = vmatprep.subr.mxu1 %v8810_v1  ;;  %4741 = vperm.xlu1 %7677, %v4709_v20   ;;  %v796_v20 = vld [vmem:[%s13955_s1 + $0x338] sm:$0xff] }
  0xa7   :  { %1549 = vmatmul.mubr.f32.gmra.mxu0 %v751_v11  ;;  %1950 = vmatmul.mubr.f32.gmra.mxu1 %v751_v11 }
  0xa8   :  { %6601 = vmatprep.mubr.msk.f32.mxu0 %vm1141_vm0, %v754_v19  ;;  %6657 = vmatprep.mubr.msk.f32.mxu1 %vm1141_vm0, %v754_v19 }
  0xa9   :  { %2564 = vmatpush2.msra.mxu1 %v8529_v26  ;;  %4746 = vperm.xlu0 %7676, %v4710_v5   ;;  %v755_v26 = vld [vmem:[%s13955_s1 + $0x1f0] sm:$0xff] }
  0xaa   :  { %2565 = vmatprep.subr.mxu1 %v8831_v23  ;;  %4731 = vperm.xlu1 %7677, %v4707_v13  }
  0xab   :  { %1555 = vmatmul.mubr.f32.gmra.mxu0 %v753_v22  ;;  %1956 = vmatmul.mubr.f32.gmra.mxu1 %v753_v22 }
  0xac   :  { %6602 = vmatprep.mubr.msk.f32.mxu0 %vm1141_vm0, %v756_v9  ;;  %6658 = vmatprep.mubr.msk.f32.mxu1 %vm1141_vm0, %v756_v9  ;;  %v795_v9 = vld [vmem:[%s13955_s1 + $0x330] sm:$0xff] }
  0xad   :  { %2566 = vmatpush2.msra.mxu1 %v8551_v30  ;;  %4736 = vperm.xlu0 %7676, %v4708_v24   ;;  %v757_v30 = vld [vmem:[%s13955_s1 + $0x200] sm:$0xff] }
  0xae   :  { %2567 = vmatprep.subr.mxu1 %v8852_v17  ;;  %4721 = vperm.xlu1 %7677, %v4705_v28  }
  0xaf   :  { %1561 = vmatmul.mubr.f32.gmra.mxu0 %v755_v26  ;;  %1962 = vmatmul.mubr.f32.gmra.mxu1 %v755_v26  ;;  %v798_v26 = vld [vmem:[%s13955_s1 + $0x348] sm:$0xff] }
  0xb0   :  { %6603 = vmatprep.mubr.msk.f32.mxu0 %vm1141_vm0, %v758_v27  ;;  %6659 = vmatprep.mubr.msk.f32.mxu1 %vm1141_vm0, %v758_v27 }
  0xb1   :  { %2568 = vmatpush2.msra.mxu1 %v8573_v33  ;;  %4726 = vperm.xlu0 %7676, %v4706_v31   ;;  %v759_v33 = vld [vmem:[%s13955_s1 + $0x210] sm:$0xff]  ;;  %v797_v31 = vld [vmem:[%s13955_s1 + $0x340] sm:$0xff] }
  0xb2   :  { %2569 = vmatprep.subr.mxu1 %v8873_v32  ;;  %2914 = vmatprep.subr.mxu0 %v6510_v34  ;;  %v800_v34 = vld [vmem:[%s13955_s1 + $0x358] sm:$0xff] }
  0xb3   :  { %1567 = vmatmul.mubr.f32.gmra.mxu0 %v757_v30  ;;  %1968 = vmatmul.mubr.f32.gmra.mxu1 %v757_v30 }
  0xb4   :  { %6604 = vmatprep.mubr.msk.f32.mxu0 %vm1141_vm0, %v760_v21  ;;  %6660 = vmatprep.mubr.msk.f32.mxu1 %vm1141_vm0, %v760_v21 }
  0xb5   :  { %2570 = vmatpush2.msra.mxu1 %v8595_v36  ;;  %v8906_v36 = vld [vmem:[%s13954_s0 + $0xc8] sm:$0xff] }
  0xb6   :  { %2571 = vmatprep.subr.mxu1 %v8891_v35 }
  0xb7   :  { %1573 = vmatmul.mubr.f32.gmra.mxu0 %v759_v33  ;;  %1974 = vmatmul.mubr.f32.gmra.mxu1 %v759_v33 }
  0xb8   :  { %6605 = vmatprep.mubr.msk.f32.mxu0 %vm1141_vm0, %v762_v25  ;;  %6661 = vmatprep.mubr.msk.f32.mxu1 %vm1141_vm0, %v762_v25 }
  0xb9   :  { %2572 = vmatpush2.msra.mxu1 %v8617_v39  ;;  %v8921_v39 = vld [vmem:[%s13954_s0 + $0x48] sm:$0xff] }
  0xba   :  { %2573 = vmatprep.subr.mxu1 %v8906_v36 }
  0xbb   :  { %1579 = vmatmul.mubr.f32.gmra.mxu0 %v761_v37  ;;  %1980 = vmatmul.mubr.f32.gmra.mxu1 %v761_v37  ;;  %v799_v37 = vld [vmem:[%s13955_s1 + $0x350] sm:$0xff] }
  0xbc   :  { %6606 = vmatprep.mubr.msk.f32.mxu0 %vm1141_vm0, %v764_v29  ;;  %6662 = vmatprep.mubr.msk.f32.mxu1 %vm1141_vm0, %v764_v29 }
  0xbd   :  { %2574 = vmatpush2.msra.mxu1 %v8639_v43  ;;  %v767_v43 = vld [vmem:[%s13955_s1 + $0x250] sm:$0xff] }
  0xbe   :  { %2575 = vmatprep.subr.mxu1 %v8921_v39 }
  0xbf   :  { %1585 = vmatmul.mubr.f32.gmra.mxu0 %v763_v38  ;;  %1986 = vmatmul.mubr.f32.gmra.mxu1 %v763_v38 }
  0xc0   :  { %6607 = vmatprep.mubr.msk.f32.mxu0 %vm1141_vm0, %v766_v40  ;;  %6663 = vmatprep.mubr.msk.f32.mxu1 %vm1141_vm0, %v766_v40  ;;  %v802_v40 = vld [vmem:[%s13955_s1 + $0x368] sm:$0xff] }
  0xc1   :  { %2576 = vmatpush2.msra.mxu1 %v8660_v47  ;;  %v771_v47 = vld [vmem:[%s13955_s1 + $0x270] sm:$0xff] }
  0xc3   :  { %1591 = vmatmul.mubr.f32.gmra.mxu0 %v765_v41  ;;  %1992 = vmatmul.mubr.f32.gmra.mxu1 %v765_v41 }
  0xc4   :  { %6608 = vmatprep.mubr.msk.f32.mxu0 %vm1141_vm0, %v768_v42  ;;  %6664 = vmatprep.mubr.msk.f32.mxu1 %vm1141_vm0, %v768_v42 }
  0xc7   :  { %1597 = vmatmul.mubr.f32.gmra.mxu0 %v767_v43  ;;  %1998 = vmatmul.mubr.f32.gmra.mxu1 %v767_v43  ;;  %v801_v43 = vld [vmem:[%s13955_s1 + $0x360] sm:$0xff] }
  0xc8   :  { %6609 = vmatprep.mubr.msk.f32.mxu0 %vm1141_vm0, %v770_v44  ;;  %6665 = vmatprep.mubr.msk.f32.mxu1 %vm1141_vm0, %v770_v44 }
  0xcb   :  { %1603 = vmatmul.mubr.f32.gmra.mxu0 %v769_v45  ;;  %2004 = vmatmul.mubr.f32.gmra.mxu1 %v769_v45 }
  0xcc   :  { %6610 = vmatprep.mubr.msk.f32.mxu0 %vm1141_vm0, %v772_v46  ;;  %6666 = vmatprep.mubr.msk.f32.mxu1 %vm1141_vm0, %v772_v46  ;;  %v804_v46 = vld [vmem:[%s13955_s1 + $0x378] sm:$0xff] }
  0xcf   :  { %1609 = vmatmul.mubr.f32.gmra.mxu0 %v771_v47  ;;  %2010 = vmatmul.mubr.f32.gmra.mxu1 %v771_v47 }
  0xd0   :  { %6611 = vmatprep.mubr.msk.f32.mxu0 %vm1141_vm0, %v774_v48  ;;  %6667 = vmatprep.mubr.msk.f32.mxu1 %vm1141_vm0, %v774_v48 }
  0xd3   :  { %1615 = vmatmul.mubr.f32.gmra.mxu0 %v773_v49  ;;  %2016 = vmatmul.mubr.f32.gmra.mxu1 %v773_v49  ;;  %v803_v49 = vld [vmem:[%s13955_s1 + $0x370] sm:$0xff] }
  0xd4   :  { %6612 = vmatprep.mubr.msk.f32.mxu0 %vm1141_vm0, %v776_v50  ;;  %6668 = vmatprep.mubr.msk.f32.mxu1 %vm1141_vm0, %v776_v50 }
  0xd7   :  { %1621 = vmatmul.mubr.f32.gmra.mxu0 %v775_v52  ;;  %2022 = vmatmul.mubr.f32.gmra.mxu1 %v775_v52 }
  0xd8   :  { %6613 = vmatprep.mubr.msk.f32.mxu0 %vm1141_vm0, %v778_v53  ;;  %6669 = vmatprep.mubr.msk.f32.mxu1 %vm1141_vm0, %v778_v53 }
  0xdb   :  { %1627 = vmatmul.mubr.f32.gmra.mxu0 %v777_v55  ;;  %2028 = vmatmul.mubr.f32.gmra.mxu1 %v777_v55 }
  0xdc   :  { %6614 = vmatprep.mubr.msk.f32.mxu0 %vm1141_vm0, %v780_v56  ;;  %6670 = vmatprep.mubr.msk.f32.mxu1 %vm1141_vm0, %v780_v56  ;;  %v7678_v56 = vld [vmem:[%s13955_s1 + $0x8] sm:$0xff] }
  0xdf   :  { %1633 = vmatmul.mubr.f32.gmra.mxu0 %v779_v51  ;;  %2034 = vmatmul.mubr.f32.gmra.mxu1 %v779_v51 }
  0xe0   :  { %6615 = vmatprep.mubr.msk.f32.mxu0 %vm1141_vm0, %v782_v58  ;;  %6671 = vmatprep.mubr.msk.f32.mxu1 %vm1141_vm0, %v782_v58 }
  0xe3   :  { %1639 = vmatmul.mubr.f32.gmra.mxu0 %v781_v59  ;;  %2040 = vmatmul.mubr.f32.gmra.mxu1 %v781_v59 }
  0xe4   :  { %6616 = vmatprep.mubr.msk.f32.mxu0 %vm1141_vm0, %v784_v54  ;;  %6672 = vmatprep.mubr.msk.f32.mxu1 %vm1141_vm0, %v784_v54 }
  0xe7   :  { %1645 = vmatmul.mubr.f32.gmra.mxu0 %v783_v61  ;;  %2046 = vmatmul.mubr.f32.gmra.mxu1 %v783_v61  ;;  %v7679_v61 = vld [vmem:[%s13955_s1] sm:$0xff] }
  0xe8   :  { %6617 = vmatprep.mubr.msk.f32.mxu0 %vm1141_vm0, %v786_v62  ;;  %6673 = vmatprep.mubr.msk.f32.mxu1 %vm1141_vm0, %v786_v62  ;;  %v7680_v62 = vld [vmem:[%s13955_s1 + $0x18] sm:$0xff] }
  0xeb   :  { %1651 = vmatmul.mubr.f32.gmra.mxu0 %v785_v57  ;;  %2052 = vmatmul.mubr.f32.gmra.mxu1 %v785_v57 }
  0xec   :  { %6618 = vmatprep.mubr.msk.f32.mxu0 %vm1141_vm0, %v788_v0  ;;  %6674 = vmatprep.mubr.msk.f32.mxu1 %vm1141_vm0, %v788_v0 }
  0xef   :  { %1657 = vmatmul.mubr.f32.gmra.mxu0 %v787_v60  ;;  %2058 = vmatmul.mubr.f32.gmra.mxu1 %v787_v60  ;;  %v9171_v60 = vld [vmem:[%s13954_s0 + $0x350] sm:$0xff] }
  0xf0   :  { %6619 = vmatprep.mubr.msk.f32.mxu0 %vm1141_vm0, %v790_v2  ;;  %6675 = vmatprep.mubr.msk.f32.mxu1 %vm1141_vm0, %v790_v2 }
  0xf3   :  { %v9029_v63 = vpop.f32.mrf.mxu0  ;;  %1663 = vmatmul.mubr.f32.gmra.mxu0 %v789_v4  ;;  %v9031_v8 = vpop.f32.mrf.mxu1  ;;  %2064 = vmatmul.mubr.f32.gmra.mxu1 %v789_v4 }
  0xf4   :  { %14297 = vst [vmem:[#allocation3_spill] sm:$0xff] %v9031_v8  ;;  %6620 = vmatprep.mubr.msk.f32.mxu0 %vm1141_vm0, %v792_v6  ;;  %6676 = vmatprep.mubr.msk.f32.mxu1 %vm1141_vm0, %v792_v6  ;;  %v7681_v6 = vld [vmem:[%s13955_s1 + $0x10] sm:$0xff] }
  0xf5   :  { %v9038_v10 = vpop.f32.mrf.mxu0  ;;  %v9040_v12 = vpop.f32.mrf.mxu1 }
  0xf6   :  { %14298 = vst [vmem:[#allocation4_spill] sm:$0xff] %v9038_v10  ;;  %14299 = vst [vmem:[#allocation5_spill] sm:$0xff] %v9040_v12  ;;  %v7695_v12 = vld [vmem:[%s13955_s1 + $0x80] sm:$0xff] }
  0xf7   :  { %v9045_v7 = vpop.f32.mrf.mxu0  ;;  %1669 = vmatmul.mubr.f32.gmra.mxu0 %v791_v3  ;;  %v9047_v16 = vpop.f32.mrf.mxu1  ;;  %2070 = vmatmul.mubr.f32.gmra.mxu1 %v791_v3  ;;  %v7682_v3 = vld [vmem:[%s13955_s1 + $0x28] sm:$0xff] }
  0xf8   :  { %14300 = vst [vmem:[#allocation6_spill] sm:$0xff] %v9047_v16  ;;  %6621 = vmatprep.mubr.msk.f32.mxu0 %vm1141_vm0, %v794_v14  ;;  %6677 = vmatprep.mubr.msk.f32.mxu1 %vm1141_vm0, %v794_v14 }
  0xf9   :  { %v9054_v11 = vpop.f32.mrf.mxu0  ;;  %v9056_v19 = vpop.f32.mrf.mxu1 }
  0xfa   :  { %14301 = vst [vmem:[#allocation7_spill] sm:$0xff] %v9056_v19  ;;  %v7696_v19 = vld [vmem:[%s13955_s1 + $0x98] sm:$0xff] }
  0xfb   :  { %v9061_v5 = vpop.f32.mrf.mxu0  ;;  %1675 = vmatmul.mubr.f32.gmra.mxu0 %v793_v18  ;;  %v9063_v22 = vpop.f32.mrf.mxu1  ;;  %2076 = vmatmul.mubr.f32.gmra.mxu1 %v793_v18 }
  0xfc   :  { %14302 = vst [vmem:[#allocation8_spill] sm:$0xff] %v9063_v22  ;;  %6622 = vmatprep.mubr.msk.f32.mxu0 %vm1141_vm0, %v796_v20  ;;  %6678 = vmatprep.mubr.msk.f32.mxu1 %vm1141_vm0, %v796_v20  ;;  %v9194_v20 = vld [vmem:[%s13954_s0 + $0x2d0] sm:$0xff] }
  0xfd   :  { %v9070_v13 = vpop.f32.mrf.mxu0  ;;  %v9072_v24 = vpop.f32.mrf.mxu1 }
  0xfe   :  { %14303 = vst [vmem:[#allocation9_spill] sm:$0xff] %v9072_v24  ;;  %v7698_v24 = vld [vmem:[%s13955_s1 + $0xa8] sm:$0xff] }
  0xff   :  { %v9077_v27 = vpop.f32.mrf.mxu0  ;;  %1681 = vmatmul.mubr.f32.gmra.mxu0 %v795_v9  ;;  %v9079_v28 = vpop.f32.mrf.mxu1  ;;  %2082 = vmatmul.mubr.f32.gmra.mxu1 %v795_v9 }
 0x100   :  { %14304 = vst [vmem:[#allocation10_spill] sm:$0xff] %v9079_v28  ;;  %6623 = vmatprep.mubr.msk.f32.mxu0 %vm1141_vm0, %v798_v26  ;;  %6679 = vmatprep.mubr.msk.f32.mxu1 %vm1141_vm0, %v798_v26 }
 0x101   :  { %v9086_v30 = vpop.f32.mrf.mxu0  ;;  %v9088_v21 = vpop.f32.mrf.mxu1 }
 0x102   :  { %14305 = vst [vmem:[#allocation11_spill] sm:$0xff] %v9088_v21  ;;  %v7700_v21 = vld [vmem:[%s13955_s1 + $0xb8] sm:$0xff] }
 0x103   :  { %v9093_v33 = vpop.f32.mrf.mxu0  ;;  %1687 = vmatmul.mubr.f32.gmra.mxu0 %v797_v31  ;;  %v9095_v25 = vpop.f32.mrf.mxu1  ;;  %2088 = vmatmul.mubr.f32.gmra.mxu1 %v797_v31  ;;  %v7683_v31 = vld [vmem:[%s13955_s1 + $0x20] sm:$0xff] }
 0x104   :  { %14306 = vst [vmem:[#allocation12_spill] sm:$0xff] %v9095_v25  ;;  %6624 = vmatprep.mubr.msk.f32.mxu0 %vm1141_vm0, %v800_v34  ;;  %6680 = vmatprep.mubr.msk.f32.mxu1 %vm1141_vm0, %v800_v34  ;;  %v7684_v34 = vld [vmem:[%s13955_s1 + $0x38] sm:$0xff] }
 0x105   :  { %v9102_v29 = vpop.f32.mrf.mxu0  ;;  %v9104_v38 = vpop.f32.mrf.mxu1 }
 0x106   :  { %14307 = vst [vmem:[#allocation13_spill] sm:$0xff] %v9104_v38  ;;  %v7702_v38 = vld [vmem:[%s13955_s1 + $0xc8] sm:$0xff] }
 0x107   :  { %v9109_v41 = vpop.f32.mrf.mxu0  ;;  %1693 = vmatmul.mubr.f32.gmra.mxu0 %v799_v37  ;;  %v9111_v42 = vpop.f32.mrf.mxu1  ;;  %2094 = vmatmul.mubr.f32.gmra.mxu1 %v799_v37 }
 0x108   :  { %14308 = vst [vmem:[#allocation14_spill] sm:$0xff] %v9111_v42  ;;  %6625 = vmatprep.mubr.msk.f32.mxu0 %vm1141_vm0, %v802_v40  ;;  %6681 = vmatprep.mubr.msk.f32.mxu1 %vm1141_vm0, %v802_v40 }
 0x109   :  { %v9118_v44 = vpop.f32.mrf.mxu0  ;;  %v9120_v45 = vpop.f32.mrf.mxu1 }
 0x10a   :  { %14309 = vst [vmem:[#allocation15_spill] sm:$0xff] %v9120_v45  ;;  %v7704_v45 = vld [vmem:[%s13955_s1 + $0xd8] sm:$0xff] }
 0x10b   :  { %v9125_v47 = vpop.f32.mrf.mxu0  ;;  %1699 = vmatmul.mubr.f32.gmra.mxu0 %v801_v43  ;;  %v9127_v48 = vpop.f32.mrf.mxu1  ;;  %2100 = vmatmul.mubr.f32.gmra.mxu1 %v801_v43  ;;  %v9217_v43 = vld [vmem:[%s13954_s0 + $0x250] sm:$0xff] }
 0x10c   :  { %14310 = vst [vmem:[#allocation16_spill] sm:$0xff] %v9127_v48  ;;  %6626 = vmatprep.mubr.msk.f32.mxu0 %vm1141_vm0, %v804_v46  ;;  %6682 = vmatprep.mubr.msk.f32.mxu1 %vm1141_vm0, %v804_v46  ;;  %14327 = vst [vmem:[#allocation33_spill] sm:$0xff] %v9217_v43 }
 0x10d   :  { %v9134_v50 = vpop.f32.mrf.mxu0  ;;  %v9136_v52 = vpop.f32.mrf.mxu1 }
 0x10e   :  { %14311 = vst [vmem:[#allocation17_spill] sm:$0xff] %v9136_v52  ;;  %v7706_v52 = vld [vmem:[%s13955_s1 + $0xe8] sm:$0xff] }
 0x10f   :  { %v9138_v53 = vpop.f32.mrf.mxu0  ;;  %1705 = vmatmul.mubr.f32.gmra.mxu0 %v803_v49  ;;  %v9140_v55 = vpop.f32.mrf.mxu1  ;;  %2106 = vmatmul.mubr.f32.gmra.mxu1 %v803_v49 }
 0x110   :  { %14312 = vst [vmem:[#allocation18_spill] sm:$0xff] %v9140_v55  ;;  %6683 = vmatprep.mubr.msk.f32.mxu0 %vm1141_vm0, %v7678_v56  ;;  %6739 = vmatprep.mubr.msk.f32.mxu1 %vm1141_vm0, %v7678_v56  ;;  %v7685_v56 = vld [vmem:[%s13955_s1 + $0x30] sm:$0xff] }
 0x111   :  { %v9147_v51 = vpop.f32.mrf.mxu0  ;;  %v9149_v58 = vpop.f32.mrf.mxu1 }
 0x112   :  { %14313 = vst [vmem:[#allocation19_spill] sm:$0xff] %v9147_v51  ;;  %14314 = vst [vmem:[#allocation20_spill] sm:$0xff] %v9149_v58  ;;  %v7708_v58 = vld [vmem:[%s13955_s1 + $0xf8] sm:$0xff] }
 0x113   :  { %v9151_v59 = vpop.f32.mrf.mxu0  ;;  %v9153_v54 = vpop.f32.mrf.mxu1  ;;  %2177 = vmatmul.mubr.f32.vlgmr.msra.gmra.mxu0 %v7679_v61  ;;  %2578 = vmatmul.mubr.f32.vlgmr.msra.gmra.mxu1 %v7679_v61  ;;  %v7686_v61 = vld [vmem:[%s13955_s1 + $0x48] sm:$0xff] }
 0x114   :  { %14315 = vst [vmem:[#allocation21_spill] sm:$0xff] %v9151_v59  ;;  %14316 = vst [vmem:[#allocation22_spill] sm:$0xff] %v9153_v54  ;;  %6684 = vmatprep.mubr.msk.f32.mxu0 %vm1141_vm0, %v7680_v62  ;;  %6740 = vmatprep.mubr.msk.f32.mxu1 %vm1141_vm0, %v7680_v62  ;;  %v7736_v59 = vld [vmem:[%s13955_s1 + $0x1d8] sm:$0xff] }
 0x115   :  { %v9163_v57 = vpop.f32.mrf.mxu0  ;;  %v9165_v0 = vpop.f32.mrf.mxu1  ;;  %2915 = vmatpush1.msra.mxu0 %v8789_v15 }
 0x116   :  { %14317 = vst [vmem:[#allocation23_spill] sm:$0xff] %v9163_v57  ;;  %14318 = vst [vmem:[#allocation24_spill] sm:$0xff] %v9165_v0  ;;  %2916 = vmatprep.subr.mxu0 %v9171_v60 }
 0x117   :  { %v9174_v2 = vpop.f32.mrf.mxu0  ;;  %v9176_v4 = vpop.f32.mrf.mxu1  ;;  %2183 = vmatmul.mubr.f32.gmra.mxu0 %v7681_v6  ;;  %2584 = vmatmul.mubr.f32.gmra.mxu1 %v7681_v6 }
 0x118   :  { %14319 = vst [vmem:[#allocation25_spill] sm:$0xff] %v9174_v2  ;;  %14320 = vst [vmem:[#allocation26_spill] sm:$0xff] %v9176_v4  ;;  %6685 = vmatprep.mubr.msk.f32.mxu0 %vm1141_vm0, %v7682_v3  ;;  %6741 = vmatprep.mubr.msk.f32.mxu1 %vm1141_vm0, %v7682_v3  ;;  %v9240_v3 = vld [vmem:[%s13954_s0 + $0x1d0] sm:$0xff]  ;;  %v7732_v4 = vld [vmem:[%s13955_s1 + $0x1b8] sm:$0xff] }
 0x119   :  { %v9186_v14 = vpop.f32.mrf.mxu0  ;;  %v9188_v18 = vpop.f32.mrf.mxu1  ;;  %2917 = vmatpush1.msra.mxu0 %v8810_v1  ;;  %14332 = vst [vmem:[#allocation38_spill] sm:$0xff] %v9240_v3  ;;  %v7733_v2 = vld [vmem:[%s13955_s1 + $0x1b0] sm:$0xff] }
 0x11a   :  { %14321 = vst [vmem:[#allocation27_spill] sm:$0xff] %v9186_v14  ;;  %14322 = vst [vmem:[#allocation28_spill] sm:$0xff] %v9188_v18  ;;  %2918 = vmatprep.subr.mxu0 %v9194_v20  ;;  %v7727_v18 = vld [vmem:[%s13955_s1 + $0x180] sm:$0xff]  ;;  %v7729_v14 = vld [vmem:[%s13955_s1 + $0x190] sm:$0xff] }
 0x11b   :  { %v9197_v9 = vpop.f32.mrf.mxu0  ;;  %v9199_v26 = vpop.f32.mrf.mxu1  ;;  %2189 = vmatmul.mubr.f32.gmra.mxu0 %v7683_v31  ;;  %2590 = vmatmul.mubr.f32.gmra.mxu1 %v7683_v31 }
 0x11c   :  { %14323 = vst [vmem:[#allocation29_spill] sm:$0xff] %v9197_v9  ;;  %14324 = vst [vmem:[#allocation30_spill] sm:$0xff] %v9199_v26  ;;  %6686 = vmatprep.mubr.msk.f32.mxu0 %vm1141_vm0, %v7684_v34  ;;  %6742 = vmatprep.mubr.msk.f32.mxu1 %vm1141_vm0, %v7684_v34 }
 0x11d   :  { %v9209_v37 = vpop.f32.mrf.mxu0  ;;  %v9211_v40 = vpop.f32.mrf.mxu1  ;;  %2919 = vmatpush1.msra.mxu0 %v8831_v23 }
 0x11e   :  { %14325 = vst [vmem:[#allocation31_spill] sm:$0xff] %v9209_v37  ;;  %14326 = vst [vmem:[#allocation32_spill] sm:$0xff] %v9211_v40  ;;  %2920 = vmatprep.subr.mxu0 %v9217_v43  ;;  %v7692_v43 = vld [vmem:[%s13955_s1 + $0x78] sm:$0xff] }
 0x11f   :  { %v9220_v46 = vpop.f32.mrf.mxu0  ;;  %v9222_v49 = vpop.f32.mrf.mxu1  ;;  %2195 = vmatmul.mubr.f32.gmra.mxu0 %v7685_v56  ;;  %2596 = vmatmul.mubr.f32.gmra.mxu1 %v7685_v56  ;;  %v7687_v56 = vld [vmem:[%s13955_s1 + $0x40] sm:$0xff] }
 0x120   :  { %14328 = vst [vmem:[#allocation34_spill] sm:$0xff] %v9220_v46  ;;  %14329 = vst [vmem:[#allocation35_spill] sm:$0xff] %v9222_v49  ;;  %6687 = vmatprep.mubr.msk.f32.mxu0 %vm1141_vm0, %v7686_v61  ;;  %6743 = vmatprep.mubr.msk.f32.mxu1 %vm1141_vm0, %v7686_v61  ;;  %v7688_v61 = vld [vmem:[%s13955_s1 + $0x58] sm:$0xff] }
 0x121   :  { %v9232_v62 = vpop.f32.mrf.mxu0  ;;  %v9234_v6 = vpop.f32.mrf.mxu1  ;;  %2921 = vmatpush1.msra.mxu0 %v8852_v17 }
 0x122   :  { %14330 = vst [vmem:[#allocation36_spill] sm:$0xff] %v9232_v62  ;;  %14331 = vst [vmem:[#allocation37_spill] sm:$0xff] %v9234_v6  ;;  %2922 = vmatprep.subr.mxu0 %v9240_v3  ;;  %v7693_v62 = vld [vmem:[%s13955_s1 + $0x70] sm:$0xff] }
 0x123   :  { %v9243_v31 = vpop.f32.mrf.mxu0  ;;  %v9245_v34 = vpop.f32.mrf.mxu1  ;;  %2201 = vmatmul.mubr.f32.gmra.mxu0 %v7687_v56  ;;  %2602 = vmatmul.mubr.f32.gmra.mxu1 %v7687_v56 }
 0x124   :  { %14333 = vst [vmem:[#allocation39_spill] sm:$0xff] %v9243_v31  ;;  %14334 = vst [vmem:[#allocation40_spill] sm:$0xff] %v9245_v34  ;;  %6688 = vmatprep.mubr.msk.f32.mxu0 %vm1141_vm0, %v7688_v61  ;;  %6744 = vmatprep.mubr.msk.f32.mxu1 %vm1141_vm0, %v7688_v61  ;;  %v9263_v34 = vld [vmem:[%s13954_s0 + $0x150] sm:$0xff] }
 0x125   :  { %v9255_v6 = vpop.f32.mrf.mxu0  ;;  %v9257_v3 = vpop.f32.mrf.mxu1  ;;  %2923 = vmatpush1.msra.mxu0 %v8873_v32  ;;  %14337 = vst [vmem:[#allocation43_spill] sm:$0xff] %v9263_v34  ;;  %v7689_v61 = vld [vmem:[%s13955_s1 + $0x50] sm:$0xff] }
 0x126   :  { %14335 = vst [vmem:[#allocation41_spill] sm:$0xff] %v9255_v6  ;;  %14336 = vst [vmem:[#allocation42_spill] sm:$0xff] %v9257_v3  ;;  %2924 = vmatprep.subr.mxu0 %v9263_v34  ;;  %v7690_v3 = vld [vmem:[%s13955_s1 + $0x68] sm:$0xff] }
 0x127   :  { %v9266_v56 = vpop.f32.mrf.mxu0  ;;  %v9268_v31 = vpop.f32.mrf.mxu1  ;;  %2207 = vmatmul.mubr.f32.gmra.mxu0 %v7689_v61  ;;  %2608 = vmatmul.mubr.f32.gmra.mxu1 %v7689_v61  ;;  %v9291_v61 = vld [vmem:[%s13954_s0 + $0x3e0] sm:$0xff] }
 0x128   :  { %14338 = vst [vmem:[#allocation44_spill] sm:$0xff] %v9266_v56  ;;  %14339 = vst [vmem:[#allocation45_spill] sm:$0xff] %v9268_v31  ;;  %6689 = vmatprep.mubr.msk.f32.mxu0 %vm1141_vm0, %v7690_v3  ;;  %6745 = vmatprep.mubr.msk.f32.mxu1 %vm1141_vm0, %v7690_v3  ;;  %v9286_v31 = vld [vmem:[%s13954_s0 + $0xd0] sm:$0xff]  ;;  %v9298_v3 = vld [vmem:[%s13954_s0 + $0x3d8] sm:$0xff] }
 0x129   :  { %v9278_v6 = vpop.f32.mrf.mxu0  ;;  %v9280_v34 = vpop.f32.mrf.mxu1  ;;  %2925 = vmatpush1.msra.mxu0 %v8891_v35  ;;  %14342 = vst [vmem:[#allocation48_spill] sm:$0xff] %v9286_v31  ;;  %14343 = vst [vmem:[#allocation49_spill] sm:$0xff] %v9291_v61  ;;  %3315 = vmatprep.subr.mxu1 %v9291_v61  ;;  %v7691_v56 = vld [vmem:[%s13955_s1 + $0x60] sm:$0xff]  ;;  %v9329_v61 = vld [vmem:[%s13954_s0 + $0x50] sm:$0xff] }
 0x12a   :  { %14340 = vst [vmem:[#allocation46_spill] sm:$0xff] %v9278_v6  ;;  %14341 = vst [vmem:[#allocation47_spill] sm:$0xff] %v9280_v34  ;;  %2926 = vmatprep.subr.mxu0 %v9286_v31  ;;  %v9310_v31 = vld [vmem:[%s13954_s0 + $0x360] sm:$0xff]  ;;  %3316 = vmatpush1.msra.mxu1 %v9298_v3 }
 0x12b   :  { %v9300_v34 = vpop.f32.mrf.mxu0  ;;  %v9302_v6 = vpop.f32.mrf.mxu1  ;;  %2213 = vmatmul.mubr.f32.gmra.mxu0 %v7691_v56  ;;  %2614 = vmatmul.mubr.f32.gmra.mxu1 %v7691_v56 }
 0x12c   :  { %14344 = vst [vmem:[#allocation50_spill] sm:$0xff] %v9302_v6  ;;  %6690 = vmatprep.mubr.msk.f32.mxu0 %vm1141_vm0, %v7692_v43  ;;  %6746 = vmatprep.mubr.msk.f32.mxu1 %vm1141_vm0, %v7692_v43  ;;  %v9353_v6 = vld [vmem:[%s13954_s0 + $0x2e0] sm:$0xff] }
 0x12d   :  { %v9321_v56 = vpop.f32.mrf.mxu0  ;;  %v9323_v49 = vpop.f32.mrf.mxu1  ;;  %2927 = vmatpush1.msra.mxu0 %v8906_v36  ;;  %3317 = vmatprep.subr.mxu1 %v9310_v31  ;;  %v9341_v36 = vld [vmem:[%s13954_s0 + $0x358] sm:$0xff] }
 0x12e   :  { %14345 = vst [vmem:[#allocation51_spill] sm:$0xff] %v9321_v56  ;;  %14346 = vst [vmem:[#allocation52_spill] sm:$0xff] %v9323_v49  ;;  %2928 = vmatprep.subr.mxu0 %v9329_v61  ;;  %v7694_v56 = vld [vmem:[%s13955_s1 + $0x88] sm:$0xff]  ;;  %3318 = vmatpush1.msra.mxu1 %v9341_v36  ;;  %v7707_v49 = vld [vmem:[%s13955_s1 + $0xe0] sm:$0xff] }
 0x12f   :  { %v9343_v43 = vpop.f32.mrf.mxu0  ;;  %v9345_v8 = vpop.f32.mrf.mxu1  ;;  %2219 = vmatmul.mubr.f32.gmra.mxu0 %v7693_v62  ;;  %2620 = vmatmul.mubr.f32.gmra.mxu1 %v7693_v62 }
 0x130   :  { %14347 = vst [vmem:[#allocation53_spill] sm:$0xff] %v9345_v8  ;;  %6691 = vmatprep.mubr.msk.f32.mxu0 %vm1141_vm0, %v7694_v56  ;;  %6747 = vmatprep.mubr.msk.f32.mxu1 %vm1141_vm0, %v7694_v56  ;;  %v6453_v56 = vld [vmem:[%s13954_s0 + $0x3c0] sm:$0xff]  ;;  %v14409_v46 = vld [vmem:[#allocation49_spill] sm:$0xff] }
 0x131   :  { %v9364_v62 = vpop.f32.mrf.mxu0  ;;  %v9366_v10 = vpop.f32.mrf.mxu1  ;;  %2929 = vmatpush1.msra.mxu0 %v8921_v39  ;;  %3319 = vmatprep.subr.mxu1 %v9353_v6  ;;  %v9382_v39 = vld [vmem:[%s13954_s0 + $0x2d8] sm:$0xff] }
 0x132   :  { %14348 = vst [vmem:[#allocation54_spill] sm:$0xff] %v9364_v62  ;;  %14349 = vst [vmem:[#allocation55_spill] sm:$0xff] %v9366_v10  ;;  %2930 = vmatprep.subr.mxu0 %v8789_v15  ;;  %v9394_v15 = vld [vmem:[%s13954_s0 + $0x260] sm:$0xff]  ;;  %3320 = vmatpush1.msra.mxu1 %v9382_v39  ;;  %v7697_v10 = vld [vmem:[%s13955_s1 + $0x90] sm:$0xff] }
 0x133   :  { %v9384_v8 = vpop.f32.mrf.mxu0  ;;  %v9386_v16 = vpop.f32.mrf.mxu1  ;;  %2225 = vmatmul.mubr.f32.gmra.mxu0 %v7695_v12  ;;  %2626 = vmatmul.mubr.f32.gmra.mxu1 %v7695_v12 }
 0x134   :  { %14350 = vst [vmem:[#allocation56_spill] sm:$0xff] %v9386_v16  ;;  %6692 = vmatprep.mubr.msk.f32.mxu0 %vm1141_vm0, %v7696_v19  ;;  %6748 = vmatprep.mubr.msk.f32.mxu1 %vm1141_vm0, %v7696_v19  ;;  %v6439_v16 = vld [vmem:[%s13954_s0 + $0x340] sm:$0xff]  ;;  %v9422_v19 = vld [vmem:[%s13954_s0 + $0x258] sm:$0xff] }
 0x135   :  { %v9405_v12 = vpop.f32.mrf.mxu0  ;;  %v9407_v62 = vpop.f32.mrf.mxu1  ;;  %2931 = vmatpush1.msra.mxu0 %v6453_v56  ;;  %3321 = vmatprep.subr.mxu1 %v9394_v15 }
 0x136   :  { %14351 = vst [vmem:[#allocation57_spill] sm:$0xff] %v9405_v12  ;;  %14352 = vst [vmem:[#allocation58_spill] sm:$0xff] %v9407_v62  ;;  %2932 = vmatprep.subr.mxu0 %v8810_v1  ;;  %v9434_v1 = vld [vmem:[%s13954_s0 + $0x1e0] sm:$0xff]  ;;  %3322 = vmatpush1.msra.mxu1 %v9422_v19 }
 0x137   :  { %v9424_v56 = vpop.f32.mrf.mxu0  ;;  %v9426_v22 = vpop.f32.mrf.mxu1  ;;  %2231 = vmatmul.mubr.f32.gmra.mxu0 %v7697_v10  ;;  %2632 = vmatmul.mubr.f32.gmra.mxu1 %v7697_v10  ;;  %v7699_v62 = vld [vmem:[%s13955_s1 + $0xa0] sm:$0xff] }
 0x138   :  { %14353 = vst [vmem:[#allocation59_spill] sm:$0xff] %v9426_v22  ;;  %6693 = vmatprep.mubr.msk.f32.mxu0 %vm1141_vm0, %v7698_v24  ;;  %6749 = vmatprep.mubr.msk.f32.mxu1 %vm1141_vm0, %v7698_v24  ;;  %v6425_v22 = vld [vmem:[%s13954_s0 + $0x2c0] sm:$0xff] }
 0x139   :  { %v9445_v10 = vpop.f32.mrf.mxu0  ;;  %v9447_v12 = vpop.f32.mrf.mxu1  ;;  %2933 = vmatpush1.msra.mxu0 %v6439_v16  ;;  %3323 = vmatprep.subr.mxu1 %v9434_v1  ;;  %v9462_v16 = vld [vmem:[%s13954_s0 + $0x1d8] sm:$0xff] }
 0x13a   :  { %14354 = vst [vmem:[#allocation60_spill] sm:$0xff] %v9445_v10  ;;  %14355 = vst [vmem:[#allocation61_spill] sm:$0xff] %v9447_v12  ;;  %2934 = vmatprep.subr.mxu0 %v8831_v23  ;;  %v9474_v23 = vld [vmem:[%s13954_s0 + $0x160] sm:$0xff]  ;;  %3324 = vmatpush1.msra.mxu1 %v9462_v16  ;;  %v7701_v12 = vld [vmem:[%s13955_s1 + $0xb0] sm:$0xff] }
 0x13b   :  { %v9464_v24 = vpop.f32.mrf.mxu0  ;;  %v9466_v28 = vpop.f32.mrf.mxu1  ;;  %2237 = vmatmul.mubr.f32.gmra.mxu0 %v7699_v62  ;;  %2638 = vmatmul.mubr.f32.gmra.mxu1 %v7699_v62 }
 0x13c   :  { %14356 = vst [vmem:[#allocation62_spill] sm:$0xff] %v9466_v28  ;;  %6694 = vmatprep.mubr.msk.f32.mxu0 %vm1141_vm0, %v7700_v21  ;;  %6750 = vmatprep.mubr.msk.f32.mxu1 %vm1141_vm0, %v7700_v21  ;;  %v6411_v28 = vld [vmem:[%s13954_s0 + $0x240] sm:$0xff] }
 0x13d   :  { %v9485_v62 = vpop.f32.mrf.mxu0  ;;  %v9487_v10 = vpop.f32.mrf.mxu1  ;;  %2935 = vmatpush1.msra.mxu0 %v6425_v22  ;;  %3325 = vmatprep.subr.mxu1 %v9474_v23  ;;  %v9502_v22 = vld [vmem:[%s13954_s0 + $0x158] sm:$0xff] }
 0x13e   :  { %14357 = vst [vmem:[#allocation63_spill] sm:$0xff] %v9485_v62  ;;  %14358 = vst [vmem:[#allocation64_spill] sm:$0xff] %v9487_v10  ;;  %2936 = vmatprep.subr.mxu0 %v8852_v17  ;;  %v9514_v17 = vld [vmem:[%s13954_s0 + $0xe0] sm:$0xff]  ;;  %3326 = vmatpush1.msra.mxu1 %v9502_v22 }
 0x13f   :  { %v9504_v21 = vpop.f32.mrf.mxu0  ;;  %v9506_v25 = vpop.f32.mrf.mxu1  ;;  %2243 = vmatmul.mubr.f32.gmra.mxu0 %v7701_v12  ;;  %2644 = vmatmul.mubr.f32.gmra.mxu1 %v7701_v12  ;;  %v7703_v10 = vld [vmem:[%s13955_s1 + $0xc0] sm:$0xff] }
 0x140   :  { %14359 = vst [vmem:[#allocation65_spill] sm:$0xff] %v9506_v25  ;;  %6695 = vmatprep.mubr.msk.f32.mxu0 %vm1141_vm0, %v7702_v38  ;;  %6751 = vmatprep.mubr.msk.f32.mxu1 %vm1141_vm0, %v7702_v38  ;;  %v70_v25 = vld [vmem:[%s13954_s0 + $0x1c0] sm:$0xff] }
 0x141   :  { %v9525_v12 = vpop.f32.mrf.mxu0  ;;  %v9527_v62 = vpop.f32.mrf.mxu1  ;;  %2937 = vmatpush1.msra.mxu0 %v6411_v28  ;;  %3327 = vmatprep.subr.mxu1 %v9514_v17  ;;  %v9542_v28 = vld [vmem:[%s13954_s0 + $0xd8] sm:$0xff] }
 0x142   :  { %14360 = vst [vmem:[#allocation66_spill] sm:$0xff] %v9525_v12  ;;  %14361 = vst [vmem:[#allocation67_spill] sm:$0xff] %v9527_v62  ;;  %2938 = vmatprep.subr.mxu0 %v8873_v32  ;;  %v9554_v32 = vld [vmem:[%s13954_s0 + $0x60] sm:$0xff]  ;;  %3328 = vmatpush1.msra.mxu1 %v9542_v28  ;;  %v7705_v62 = vld [vmem:[%s13955_s1 + $0xd0] sm:$0xff] }
 0x143   :  { %v9544_v38 = vpop.f32.mrf.mxu0  ;;  %v9546_v42 = vpop.f32.mrf.mxu1  ;;  %2249 = vmatmul.mubr.f32.gmra.mxu0 %v7703_v10  ;;  %2650 = vmatmul.mubr.f32.gmra.mxu1 %v7703_v10 }
 0x144   :  { %14362 = vst [vmem:[#allocation68_spill] sm:$0xff] %v9546_v42  ;;  %6696 = vmatprep.mubr.msk.f32.mxu0 %vm1141_vm0, %v7704_v45  ;;  %6752 = vmatprep.mubr.msk.f32.mxu1 %vm1141_vm0, %v7704_v45  ;;  %v56_v42 = vld [vmem:[%s13954_s0 + $0x140] sm:$0xff] }
 0x145   :  { %v9565_v10 = vpop.f32.mrf.mxu0  ;;  %v9567_v12 = vpop.f32.mrf.mxu1  ;;  %2939 = vmatpush1.msra.mxu0 %v70_v25  ;;  %3329 = vmatprep.subr.mxu1 %v9554_v32  ;;  %v9582_v25 = vld [vmem:[%s13954_s0 + $0x58] sm:$0xff] }
 0x146   :  { %14363 = vst [vmem:[#allocation69_spill] sm:$0xff] %v9565_v10  ;;  %14364 = vst [vmem:[#allocation70_spill] sm:$0xff] %v9567_v12  ;;  %2940 = vmatprep.subr.mxu0 %v8891_v35  ;;  %v43_v35 = vld [vmem:[%s13954_s0 + $0xc8] sm:$0xff]  ;;  %3330 = vmatpush1.msra.mxu1 %v9582_v25 }
 0x147   :  { %v9584_v45 = vpop.f32.mrf.mxu0  ;;  %v9586_v48 = vpop.f32.mrf.mxu1  ;;  %2255 = vmatmul.mubr.f32.gmra.mxu0 %v7705_v62  ;;  %2656 = vmatmul.mubr.f32.gmra.mxu1 %v7705_v62  ;;  %v7710_v12 = vld [vmem:[%s13955_s1 + $0x108] sm:$0xff] }
 0x148   :  { %14365 = vst [vmem:[#allocation71_spill] sm:$0xff] %v9584_v45  ;;  %14366 = vst [vmem:[#allocation72_spill] sm:$0xff] %v9586_v48  ;;  %6697 = vmatprep.mubr.msk.f32.mxu0 %vm1141_vm0, %v7706_v52  ;;  %6753 = vmatprep.mubr.msk.f32.mxu1 %vm1141_vm0, %v7706_v52  ;;  %v42_v48 = vld [vmem:[%s13954_s0 + $0xc0] sm:$0xff]  ;;  %v6455_v52 = vld [vmem:[%s13954_s0 + $0x3d0] sm:$0xff] }
 0x149   :  { %v9603_v10 = vpop.f32.mrf.mxu0  ;;  %v9605_v62 = vpop.f32.mrf.mxu1  ;;  %2941 = vmatpush1.msra.mxu0 %v56_v42  ;;  %3331 = vmatprep.subr.mxu1 %v9298_v3 }
 0x14a   :  { %14367 = vst [vmem:[#allocation73_spill] sm:$0xff] %v9603_v10  ;;  %14368 = vst [vmem:[#allocation74_spill] sm:$0xff] %v9605_v62  ;;  %2942 = vmatprep.subr.mxu0 %v43_v35  ;;  %v29_v35 = vld [vmem:[%s13954_s0 + $0x48] sm:$0xff]  ;;  %3332 = vmatpush1.msra.mxu1 %v6455_v52 }
 0x14b   :  { %v9619_v42 = vpop.f32.mrf.mxu0  ;;  %v9621_v55 = vpop.f32.mrf.mxu1  ;;  %2261 = vmatmul.mubr.f32.gmra.mxu0 %v7707_v49  ;;  %2662 = vmatmul.mubr.f32.gmra.mxu1 %v7707_v49 }
 0x14c   :  { %14369 = vst [vmem:[#allocation75_spill] sm:$0xff] %v9619_v42  ;;  %14370 = vst [vmem:[#allocation76_spill] sm:$0xff] %v9621_v55  ;;  %6698 = vmatprep.mubr.msk.f32.mxu0 %vm1141_vm0, %v7708_v58  ;;  %6754 = vmatprep.mubr.msk.f32.mxu1 %vm1141_vm0, %v7708_v58  ;;  %v28_v55 = vld [vmem:[%s13954_s0 + $0x40] sm:$0xff] }
 0x14d   :  { %v9638_v10 = vpop.f32.mrf.mxu0  ;;  %v9640_v49 = vpop.f32.mrf.mxu1  ;;  %2943 = vmatpush1.msra.mxu0 %v42_v48  ;;  %3333 = vmatprep.subr.mxu1 %v9341_v36  ;;  %v7709_v48 = vld [vmem:[%s13955_s1 + $0xf0] sm:$0xff]  ;;  %v7735_v42 = vld [vmem:[%s13955_s1 + $0x1c0] sm:$0xff] }
 0x14e   :  { %14371 = vst [vmem:[#allocation77_spill] sm:$0xff] %v9638_v10  ;;  %14372 = vst [vmem:[#allocation78_spill] sm:$0xff] %v9640_v49  ;;  %2944 = vmatprep.subr.mxu0 %v29_v35  ;;  %3334 = vmatpush1.msra.mxu1 %v9171_v60  ;;  %v7734_v10 = vld [vmem:[%s13955_s1 + $0x1c8] sm:$0xff] }
 0x14f   :  { %v9650_v58 = vpop.f32.mrf.mxu0  ;;  %v9652_v54 = vpop.f32.mrf.mxu1  ;;  %2267 = vmatmul.mubr.f32.gmra.mxu0 %v7709_v48  ;;  %2668 = vmatmul.mubr.f32.gmra.mxu1 %v7709_v48 }
 0x150   :  { %14373 = vst [vmem:[#allocation79_spill] sm:$0xff] %v9650_v58  ;;  %14374 = vst [vmem:[#allocation80_spill] sm:$0xff] %v9652_v54  ;;  %6699 = vmatprep.mubr.msk.f32.mxu0 %vm1141_vm0, %v7710_v12  ;;  %6755 = vmatprep.mubr.msk.f32.mxu1 %vm1141_vm0, %v7710_v12  ;;  %v7731_v54 = vld [vmem:[%s13955_s1 + $0x1a0] sm:$0xff] }
 0x151   :  { %v9666_v49 = vpop.f32.mrf.mxu0  ;;  %v9668_v0 = vpop.f32.mrf.mxu1  ;;  %2945 = vmatpush1.msra.mxu0 %v28_v55  ;;  %3335 = vmatprep.subr.mxu1 %v9382_v39  ;;  %v7711_v55 = vld [vmem:[%s13955_s1 + $0x100] sm:$0xff] }
 0x152   :  { %14375 = vst [vmem:[#allocation81_spill] sm:$0xff] %v9666_v49  ;;  %14376 = vst [vmem:[#allocation82_spill] sm:$0xff] %v9668_v0  ;;  %2962 = vmatprep.subr.mxu0 %v9298_v3  ;;  %v7712_v3 = vld [vmem:[%s13955_s1 + $0x118] sm:$0xff]  ;;  %3336 = vmatpush1.msra.mxu1 %v9194_v20  ;;  %v7713_v20 = vld [vmem:[%s13955_s1 + $0x110] sm:$0xff] }
 0x153   :  { %v9677_v62 = vpop.f32.mrf.mxu0  ;;  %v9679_v12 = vpop.f32.mrf.mxu1  ;;  %2273 = vmatmul.mubr.f32.gmra.mxu0 %v7711_v55  ;;  %2674 = vmatmul.mubr.f32.gmra.mxu1 %v7711_v55  ;;  %v7714_v55 = vld [vmem:[%s13955_s1 + $0x128] sm:$0xff] }
 0x154   :  { %14377 = vst [vmem:[#allocation83_spill] sm:$0xff] %v9677_v62  ;;  %14378 = vst [vmem:[#allocation84_spill] sm:$0xff] %v9679_v12  ;;  %6700 = vmatprep.mubr.msk.f32.mxu0 %vm1141_vm0, %v7712_v3  ;;  %6756 = vmatprep.mubr.msk.f32.mxu1 %vm1141_vm0, %v7712_v3  ;;  %v6551_v3 = vld [vmem:[%s13954_s0 + $0x350] sm:$0xff] }
 0x155   :  { %v9693_v48 = vpop.f32.mrf.mxu0  ;;  %v9695_v0 = vpop.f32.mrf.mxu1  ;;  %2963 = vmatpush2.msra.mxu0 %v6455_v52  ;;  %3337 = vmatprep.subr.mxu1 %v9422_v19 }
 0x156   :  { %14379 = vst [vmem:[#allocation85_spill] sm:$0xff] %v9693_v48  ;;  %14380 = vst [vmem:[#allocation86_spill] sm:$0xff] %v9695_v0  ;;  %2964 = vmatprep.subr.mxu0 %v9341_v36  ;;  %v14386_v48 = vld [vmem:[#allocation33_spill] sm:$0xff] }
 0x157   :  { %v9707_v60 = vpop.f32.mrf.mxu0  ;;  %v9709_v12 = vpop.f32.mrf.mxu1  ;;  %2279 = vmatmul.mubr.f32.gmra.mxu0 %v7713_v20  ;;  %2680 = vmatmul.mubr.f32.gmra.mxu1 %v7713_v20  ;;  %v14395_v20 = vld [vmem:[#allocation38_spill] sm:$0xff] }
 0x158   :  { %14381 = vst [vmem:[#allocation87_spill] sm:$0xff] %v9707_v60  ;;  %14382 = vst [vmem:[#allocation88_spill] sm:$0xff] %v9709_v12  ;;  %6701 = vmatprep.mubr.msk.f32.mxu0 %vm1141_vm0, %v7714_v55  ;;  %6757 = vmatprep.mubr.msk.f32.mxu1 %vm1141_vm0, %v7714_v55  ;;  %v6537_v55 = vld [vmem:[%s13954_s0 + $0x2d0] sm:$0xff] }
 0x159   :  { %v9723_v0 = vpop.f32.mrf.mxu0  ;;  %v9725_v40 = vpop.f32.mrf.mxu1  ;;  %3338 = vmatpush1.msra.mxu1 %v14386_v48  ;;  %2965 = vmatpush2.msra.mxu0 %v6551_v3  ;;  %v7715_v48 = vld [vmem:[%s13955_s1 + $0x120] sm:$0xff]  ;;  %v7724_v3 = vld [vmem:[%s13955_s1 + $0x178] sm:$0xff] }
 0x15a   :  { %14384 = vst [vmem:[#allocation89_spill] sm:$0xff] %v9723_v0  ;;  %14385 = vst [vmem:[#allocation90_spill] sm:$0xff] %v9725_v40  ;;  %3339 = vmatprep.subr.mxu1 %v9462_v16  ;;  %2966 = vmatprep.subr.mxu0 %v9382_v39  ;;  %v7716_v40 = vld [vmem:[%s13955_s1 + $0x138] sm:$0xff] }
 0x15b   :  { %v9737_v35 = vpop.f32.mrf.mxu0  ;;  %v9739_v60 = vpop.f32.mrf.mxu1  ;;  %2285 = vmatmul.mubr.f32.gmra.mxu0 %v7715_v48  ;;  %2686 = vmatmul.mubr.f32.gmra.mxu1 %v7715_v48 }
 0x15c   :  { %14389 = vst [vmem:[#allocation33_spill] sm:$0xff] %v9737_v35  ;;  %14390 = vst [vmem:[#allocation91_spill] sm:$0xff] %v9739_v60  ;;  %6702 = vmatprep.mubr.msk.f32.mxu0 %vm1141_vm0, %v7716_v40  ;;  %6758 = vmatprep.mubr.msk.f32.mxu1 %vm1141_vm0, %v7716_v40  ;;  %v7717_v35 = vld [vmem:[%s13955_s1 + $0x130] sm:$0xff] }
 0x15d   :  { %v9753_v36 = vpop.f32.mrf.mxu0  ;;  %v9755_v0 = vpop.f32.mrf.mxu1  ;;  %3340 = vmatpush1.msra.mxu1 %v14395_v20  ;;  %2967 = vmatpush2.msra.mxu0 %v6537_v55  ;;  %v7720_v55 = vld [vmem:[%s13955_s1 + $0x158] sm:$0xff] }
 0x15e   :  { %14393 = vst [vmem:[#allocation92_spill] sm:$0xff] %v9753_v36  ;;  %14394 = vst [vmem:[#allocation93_spill] sm:$0xff] %v9755_v0  ;;  %3341 = vmatprep.subr.mxu1 %v9502_v22  ;;  %2968 = vmatprep.subr.mxu0 %v9422_v19  ;;  %v7718_v19 = vld [vmem:[%s13955_s1 + $0x148] sm:$0xff]  ;;  %v14404_v36 = vld [vmem:[#allocation43_spill] sm:$0xff] }
 0x15f   :  { %v9764_v52 = vpop.f32.mrf.mxu0  ;;  %v9766_v40 = vpop.f32.mrf.mxu1  ;;  %2291 = vmatmul.mubr.f32.gmra.mxu0 %v7717_v35  ;;  %2692 = vmatmul.mubr.f32.gmra.mxu1 %v7717_v35  ;;  %v6523_v35 = vld [vmem:[%s13954_s0 + $0x250] sm:$0xff] }
 0x160   :  { %14398 = vst [vmem:[#allocation38_spill] sm:$0xff] %v9764_v52  ;;  %14399 = vst [vmem:[#allocation94_spill] sm:$0xff] %v9766_v40  ;;  %6703 = vmatprep.mubr.msk.f32.mxu0 %vm1141_vm0, %v7718_v19  ;;  %6759 = vmatprep.mubr.msk.f32.mxu1 %vm1141_vm0, %v7718_v19 }
 0x161   :  { %v9780_v0 = vpop.f32.mrf.mxu0  ;;  %v9782_v39 = vpop.f32.mrf.mxu1  ;;  %3342 = vmatpush1.msra.mxu1 %v14404_v36  ;;  %2969 = vmatpush2.msra.mxu0 %v6523_v35  ;;  %v7719_v36 = vld [vmem:[%s13955_s1 + $0x140] sm:$0xff] }
 0x162   :  { %14402 = vst [vmem:[#allocation95_spill] sm:$0xff] %v9780_v0  ;;  %14403 = vst [vmem:[#allocation96_spill] sm:$0xff] %v9782_v39  ;;  %3343 = vmatprep.subr.mxu1 %v9542_v28  ;;  %v14407_v39 = vld [vmem:[#allocation48_spill] sm:$0xff]  ;;  %2970 = vmatprep.subr.mxu0 %v9462_v16  ;;  %v7721_v0 = vld [vmem:[%s13955_s1 + $0x150] sm:$0xff] }
 0x163   :  { %v9793_v19 = vpop.f32.mrf.mxu0  ;;  %v9795_v52 = vpop.f32.mrf.mxu1  ;;  %2297 = vmatmul.mubr.f32.gmra.mxu0 %v7719_v36  ;;  %2698 = vmatmul.mubr.f32.gmra.mxu1 %v7719_v36  ;;  %v7722_v16 = vld [vmem:[%s13955_s1 + $0x168] sm:$0xff] }
 0x164   :  { %6704 = vmatprep.mubr.msk.f32.mxu0 %vm1141_vm0, %v7720_v55  ;;  %6760 = vmatprep.mubr.msk.f32.mxu1 %vm1141_vm0, %v7720_v55  ;;  %v9822_v55 = vld [vmem:[%s13954_s0 + $0x3e8] sm:$0xff] }
 0x165   :  { %v9805_v12 = vpop.f32.mrf.mxu0  ;;  %v9807_v35 = vpop.f32.mrf.mxu1  ;;  %3344 = vmatpush1.msra.mxu1 %v14407_v39  ;;  %14408 = vst [vmem:[#allocation43_spill] sm:$0xff] %v9822_v55 }
 0x166   :  { %3345 = vmatprep.subr.mxu1 %v9582_v25 }
 0x167   :  { %v9812_v40 = vpop.f32.mrf.mxu0  ;;  %v9814_v36 = vpop.f32.mrf.mxu1  ;;  %2303 = vmatmul.mubr.f32.gmra.mxu0 %v7721_v0  ;;  %2704 = vmatmul.mubr.f32.gmra.mxu1 %v7721_v0  ;;  %v519_v0 = vld [vmem:[%s13954_s0 + $0x1d0] sm:$0xff] }
 0x168   :  { %6705 = vmatprep.mubr.msk.f32.mxu0 %vm1141_vm0, %v7722_v16  ;;  %6761 = vmatprep.mubr.msk.f32.mxu1 %vm1141_vm0, %v7722_v16  ;;  %v7723_v16 = vld [vmem:[%s13955_s1 + $0x160] sm:$0xff] }
 0x169   :  { %v9829_v39 = vpop.f32.mrf.mxu0  ;;  %v9831_v60 = vpop.f32.mrf.mxu1  ;;  %3346 = vmatpush1.msra.mxu1 %v9329_v61  ;;  %2971 = vmatpush2.msra.mxu0 %v519_v0  ;;  %v6554_v61 = vld [vmem:[%s13954_s0 + $0x368] sm:$0xff] }
 0x16a   :  { %3363 = vmatprep.subr.mxu1 %v9822_v55  ;;  %2972 = vmatprep.subr.mxu0 %v9502_v22  ;;  %v491_v22 = vld [vmem:[%s13954_s0 + $0xd0] sm:$0xff] }
 0x16b   :  { %v9838_v20 = vpop.f32.mrf.mxu0  ;;  %v9840_v48 = vpop.f32.mrf.mxu1  ;;  %2309 = vmatmul.mubr.f32.gmra.mxu0 %v7723_v16  ;;  %2710 = vmatmul.mubr.f32.gmra.mxu1 %v7723_v16  ;;  %v505_v16 = vld [vmem:[%s13954_s0 + $0x150] sm:$0xff] }
 0x16c   :  { %6706 = vmatprep.mubr.msk.f32.mxu0 %vm1141_vm0, %v7724_v3  ;;  %6762 = vmatprep.mubr.msk.f32.mxu1 %vm1141_vm0, %v7724_v3  ;;  %v7725_v3 = vld [vmem:[%s13955_s1 + $0x170] sm:$0xff] }
 0x16d   :  { %v9853_v0 = vpop.f32.mrf.mxu0  ;;  %v9855_v55 = vpop.f32.mrf.mxu1  ;;  %3364 = vmatpush2.msra.mxu1 %v14409_v46  ;;  %2973 = vmatpush2.msra.mxu0 %v505_v16  ;;  %v6540_v46 = vld [vmem:[%s13954_s0 + $0x2e8] sm:$0xff] }
 0x16e   :  { %3365 = vmatprep.subr.mxu1 %v6554_v61  ;;  %v7726_v61 = vld [vmem:[%s13955_s1 + $0x188] sm:$0xff]  ;;  %2974 = vmatprep.subr.mxu0 %v9542_v28  ;;  %v7728_v28 = vld [vmem:[%s13955_s1 + $0x198] sm:$0xff] }
 0x16f   :  { %v9862_v37 = vpop.f32.mrf.mxu0  ;;  %v9864_v26 = vpop.f32.mrf.mxu1  ;;  %2315 = vmatmul.mubr.f32.gmra.mxu0 %v7725_v3  ;;  %2716 = vmatmul.mubr.f32.gmra.mxu1 %v7725_v3 }
 0x170   :  { %6707 = vmatprep.mubr.msk.f32.mxu0 %vm1141_vm0, %v7726_v61  ;;  %6763 = vmatprep.mubr.msk.f32.mxu1 %vm1141_vm0, %v7726_v61  ;;  %v6526_v61 = vld [vmem:[%s13954_s0 + $0x268] sm:$0xff] }
 0x171   :  { %v9880_v16 = vpop.f32.mrf.mxu0  ;;  %v9882_v62 = vpop.f32.mrf.mxu1  ;;  %3366 = vmatpush2.msra.mxu1 %v9310_v31  ;;  %2975 = vmatpush2.msra.mxu0 %v491_v22  ;;  %v477_v31 = vld [vmem:[%s13954_s0 + $0x50] sm:$0xff] }
 0x172   :  { %3367 = vmatprep.subr.mxu1 %v6540_v46  ;;  %2976 = vmatprep.subr.mxu0 %v9582_v25 }
 0x173   :  { %v9886_v3 = vpop.f32.mrf.mxu0  ;;  %v9888_v9 = vpop.f32.mrf.mxu1  ;;  %2321 = vmatmul.mubr.f32.gmra.mxu0 %v7727_v18  ;;  %2722 = vmatmul.mubr.f32.gmra.mxu1 %v7727_v18 }
 0x174   :  { %6708 = vmatprep.mubr.msk.f32.mxu0 %vm1141_vm0, %v7728_v28  ;;  %6764 = vmatprep.mubr.msk.f32.mxu1 %vm1141_vm0, %v7728_v28  ;;  %v522_v28 = vld [vmem:[%s13954_s0 + $0x1e8] sm:$0xff] }
 0x175   :  { %v9904_v46 = vpop.f32.mrf.mxu0  ;;  %v9906_v22 = vpop.f32.mrf.mxu1  ;;  %3368 = vmatpush2.msra.mxu1 %v9353_v6  ;;  %2977 = vmatpush2.msra.mxu0 %v477_v31  ;;  %v7730_v6 = vld [vmem:[%s13955_s1 + $0x1a8] sm:$0xff] }
 0x176   :  { %3369 = vmatprep.subr.mxu1 %v6526_v61 }
 0x177   :  { %v9910_v18 = vpop.f32.mrf.mxu0  ;;  %v9912_v49 = vpop.f32.mrf.mxu1  ;;  %2327 = vmatmul.mubr.f32.gmra.mxu0 %v7729_v14  ;;  %2728 = vmatmul.mubr.f32.gmra.mxu1 %v7729_v14 }
 0x178   :  { %6709 = vmatprep.mubr.msk.f32.mxu0 %vm1141_vm0, %v7730_v6  ;;  %6765 = vmatprep.mubr.msk.f32.mxu1 %vm1141_vm0, %v7730_v6  ;;  %v508_v6 = vld [vmem:[%s13954_s0 + $0x168] sm:$0xff] }
 0x179   :  { %v9925_v25 = vpop.f32.mrf.mxu0  ;;  %v9927_v61 = vpop.f32.mrf.mxu1  ;;  %3370 = vmatpush2.msra.mxu1 %v9394_v15 }
 0x17a   :  { %3371 = vmatprep.subr.mxu1 %v522_v28 }
 0x17b   :  { %v9930_v14 = vpop.f32.mrf.mxu0  ;;  %v9932_v31 = vpop.f32.mrf.mxu1  ;;  %2333 = vmatmul.mubr.f32.gmra.mxu0 %v7731_v54  ;;  %2734 = vmatmul.mubr.f32.gmra.mxu1 %v7731_v54 }
 0x17c   :  { %6710 = vmatprep.mubr.msk.f32.mxu0 %vm1141_vm0, %v7732_v4  ;;  %6766 = vmatprep.mubr.msk.f32.mxu1 %vm1141_vm0, %v7732_v4  ;;  %v494_v4 = vld [vmem:[%s13954_s0 + $0xe8] sm:$0xff] }
 0x17d   :  { %v9945_v15 = vpop.f32.mrf.mxu0  ;;  %v9947_v28 = vpop.f32.mrf.mxu1  ;;  %3372 = vmatpush2.msra.mxu1 %v9434_v1 }
 0x17e   :  { %3373 = vmatprep.subr.mxu1 %v508_v6 }
 0x17f   :  { %v9950_v54 = vpop.f32.mrf.mxu0  ;;  %v9952_v58 = vpop.f32.mrf.mxu1  ;;  %2339 = vmatmul.mubr.f32.gmra.mxu0 %v7733_v2  ;;  %2740 = vmatmul.mubr.f32.gmra.mxu1 %v7733_v2 }
 0x180   :  { %6711 = vmatprep.mubr.msk.f32.mxu0 %vm1141_vm0, %v7734_v10  ;;  %6767 = vmatprep.mubr.msk.f32.mxu1 %vm1141_vm0, %v7734_v10  ;;  %v480_v10 = vld [vmem:[%s13954_s0 + $0x68] sm:$0xff] }
 0x181   :  { %v9965_v1 = vpop.f32.mrf.mxu0  ;;  %v9967_v6 = vpop.f32.mrf.mxu1  ;;  %3374 = vmatpush2.msra.mxu1 %v9474_v23 }
 0x182   :  { %14410 = vst [vmem:[#allocation48_spill] sm:$0xff] %v9965_v1  ;;  %14411 = vst [vmem:[#allocation49_spill] sm:$0xff] %v9967_v6  ;;  %3375 = vmatprep.subr.mxu1 %v494_v4  ;;  %v14439_v6 = vld [vmem:[#allocation50_spill] sm:$0xff] }
 0x183   :  { %v9970_v2 = vpop.f32.mrf.mxu0  ;;  %v9972_v57 = vpop.f32.mrf.mxu1  ;;  %2345 = vmatmul.mubr.f32.gmra.mxu0 %v7735_v42  ;;  %2746 = vmatmul.mubr.f32.gmra.mxu1 %v7735_v42 }
 0x184   :  { %14412 = vst [vmem:[#allocation97_spill] sm:$0xff] %v9970_v2  ;;  %14413 = vst [vmem:[#allocation98_spill] sm:$0xff] %v9972_v57  ;;  %6712 = vmatprep.mubr.msk.f32.mxu0 %vm1141_vm0, %v7736_v59  ;;  %6768 = vmatprep.mubr.msk.f32.mxu1 %vm1141_vm0, %v7736_v59  ;;  %v7737_v2 = vld [vmem:[%s13955_s1 + $0x1d0] sm:$0xff]  ;;  %v7738_v59 = vld [vmem:[%s13955_s1 + $0x1e8] sm:$0xff] }
 0x185   :  { %v9985_v23 = vpop.f32.mrf.mxu0  ;;  %v9987_v4 = vpop.f32.mrf.mxu1  ;;  %3376 = vmatpush2.msra.mxu1 %v9514_v17 }
 0x186   :  { %14414 = vst [vmem:[#allocation99_spill] sm:$0xff] %v9985_v23  ;;  %14415 = vst [vmem:[#allocation100_spill] sm:$0xff] %v9987_v4  ;;  %3377 = vmatprep.subr.mxu1 %v480_v10  ;;  %v7744_v4 = vld [vmem:[%s13955_s1 + $0x218] sm:$0xff]  ;;  %v14436_v23 = vmax.f32 %v9029_v63, %v9300_v34  ;;  %v14442_v63 = vld [vmem:[#allocation4_spill] sm:$0xff] }
 0x187   :  { %v9990_v42 = vpop.f32.mrf.mxu0  ;;  %v9992_v57 = vpop.f32.mrf.mxu1  ;;  %2351 = vmatmul.mubr.f32.gmra.mxu0 %v7737_v2  ;;  %2752 = vmatmul.mubr.f32.gmra.mxu1 %v7737_v2  ;;  %v7739_v2 = vld [vmem:[%s13955_s1 + $0x1e0] sm:$0xff] }
 0x188   :  { %14416 = vst [vmem:[#allocation101_spill] sm:$0xff] %v9990_v42  ;;  %14417 = vst [vmem:[#allocation102_spill] sm:$0xff] %v9992_v57  ;;  %6713 = vmatprep.mubr.msk.f32.mxu0 %vm1141_vm0, %v7738_v59  ;;  %6769 = vmatprep.mubr.msk.f32.mxu1 %vm1141_vm0, %v7738_v59  ;;  %v7740_v59 = vld [vmem:[%s13955_s1 + $0x1f8] sm:$0xff]  ;;  %v14443_v34 = vld [vmem:[#allocation51_spill] sm:$0xff] }
 0x189   :  { %v10002_v17 = vpop.f32.mrf.mxu0  ;;  %v10004_v10 = vpop.f32.mrf.mxu1  ;;  %3378 = vmatpush2.msra.mxu1 %v9554_v32 }
 0x18a   :  { %14418 = vst [vmem:[#allocation103_spill] sm:$0xff] %v10002_v17  ;;  %14419 = vst [vmem:[#allocation104_spill] sm:$0xff] %v10004_v10  ;;  %v6514_v17 = vld [vmem:[%s13954_s0 + $0x3f0] sm:$0xff] }
 0x18b   :  { %v10007_v57 = vpop.f32.mrf.mxu0  ;;  %v10009_v42 = vpop.f32.mrf.mxu1  ;;  %2357 = vmatmul.mubr.f32.gmra.mxu0 %v7739_v2  ;;  %2758 = vmatmul.mubr.f32.gmra.mxu1 %v7739_v2  ;;  %v7741_v2 = vld [vmem:[%s13955_s1 + $0x1f0] sm:$0xff] }
 0x18c   :  { %14420 = vst [vmem:[#allocation105_spill] sm:$0xff] %v10007_v57  ;;  %14421 = vst [vmem:[#allocation106_spill] sm:$0xff] %v10009_v42  ;;  %6714 = vmatprep.mubr.msk.f32.mxu0 %vm1141_vm0, %v7740_v59  ;;  %6770 = vmatprep.mubr.msk.f32.mxu1 %vm1141_vm0, %v7740_v59  ;;  %v7742_v59 = vld [vmem:[%s13955_s1 + $0x208] sm:$0xff] }
 0x18d   :  { %v10019_v10 = vpop.f32.mrf.mxu0  ;;  %v10021_v32 = vpop.f32.mrf.mxu1  ;;  %3716 = vmatprep.subr.mxu0 %v6514_v17 }
 0x18e   :  { %14422 = vst [vmem:[#allocation107_spill] sm:$0xff] %v10019_v10  ;;  %14423 = vst [vmem:[#allocation108_spill] sm:$0xff] %v10021_v32  ;;  %v7743_v10 = vld [vmem:[%s13955_s1 + $0x200] sm:$0xff] }
 0x18f   :  { %v10023_v57 = vpop.f32.mrf.mxu0  ;;  %v10025_v42 = vpop.f32.mrf.mxu1  ;;  %2363 = vmatmul.mubr.f32.gmra.mxu0 %v7741_v2  ;;  %2764 = vmatmul.mubr.f32.gmra.mxu1 %v7741_v2 }
 0x190   :  { %14424 = vst [vmem:[#allocation109_spill] sm:$0xff] %v10023_v57  ;;  %14425 = vst [vmem:[#allocation110_spill] sm:$0xff] %v10025_v42  ;;  %6715 = vmatprep.mubr.msk.f32.mxu0 %vm1141_vm0, %v7742_v59  ;;  %6771 = vmatprep.mubr.msk.f32.mxu1 %vm1141_vm0, %v7742_v59 }
 0x191   :  { %v10038_v57 = vpop.f32.mrf.mxu0  ;;  %v10040_v42 = vpop.f32.mrf.mxu1 }
 0x192   :  { %14426 = vst [vmem:[#allocation111_spill] sm:$0xff] %v10038_v57  ;;  %14427 = vst [vmem:[#allocation112_spill] sm:$0xff] %v10040_v42  ;;  %v7746_v42 = vld [vmem:[%s13955_s1 + $0x228] sm:$0xff] }
 0x193   :  { %v10042_v32 = vpop.f32.mrf.mxu0  ;;  %v10044_v2 = vpop.f32.mrf.mxu1  ;;  %2369 = vmatmul.mubr.f32.gmra.mxu0 %v7743_v10  ;;  %2770 = vmatmul.mubr.f32.gmra.mxu1 %v7743_v10  ;;  %v7745_v10 = vld [vmem:[%s13955_s1 + $0x210] sm:$0xff] }
 0x194   :  { %14428 = vst [vmem:[#allocation113_spill] sm:$0xff] %v10042_v32  ;;  %14429 = vst [vmem:[#allocation114_spill] sm:$0xff] %v10044_v2  ;;  %6716 = vmatprep.mubr.msk.f32.mxu0 %vm1141_vm0, %v7744_v4  ;;  %6772 = vmatprep.mubr.msk.f32.mxu1 %vm1141_vm0, %v7744_v4 }
 0x195   :  { %v10054_v59 = vpop.f32.mrf.mxu0  ;;  %v10056_v17 = vpop.f32.mrf.mxu1 }
 0x196   :  { %14430 = vst [vmem:[#allocation115_spill] sm:$0xff] %v10054_v59  ;;  %14431 = vst [vmem:[#allocation116_spill] sm:$0xff] %v10056_v17  ;;  %v7747_v59 = vld [vmem:[%s13955_s1 + $0x220] sm:$0xff] }
 0x197   :  { %v10058_v32 = vpop.f32.mrf.mxu0  ;;  %v10060_v2 = vpop.f32.mrf.mxu1  ;;  %2375 = vmatmul.mubr.f32.gmra.mxu0 %v7745_v10  ;;  %2776 = vmatmul.mubr.f32.gmra.mxu1 %v7745_v10 }
 0x198   :  { %14432 = vst [vmem:[#allocation117_spill] sm:$0xff] %v10058_v32  ;;  %14433 = vst [vmem:[#allocation118_spill] sm:$0xff] %v10060_v2  ;;  %6717 = vmatprep.mubr.msk.f32.mxu0 %vm1141_vm0, %v7746_v42  ;;  %6773 = vmatprep.mubr.msk.f32.mxu1 %vm1141_vm0, %v7746_v42  ;;  %v7748_v42 = vld [vmem:[%s13955_s1 + $0x238] sm:$0xff] }
 0x199   :  { %v10070_v4 = vpop.f32.mrf.mxu0  ;;  %v10072_v17 = vpop.f32.mrf.mxu1 }
 0x19a   :  { %14434 = vst [vmem:[#allocation119_spill] sm:$0xff] %v10070_v4  ;;  %14435 = vst [vmem:[#allocation120_spill] sm:$0xff] %v10072_v17 }
 0x19b   :  { %v1628_v32 = vpop.f32.mrf.mxu0  ;;  %v2029_v2 = vpop.f32.mrf.mxu1  ;;  %2381 = vmatmul.mubr.f32.gmra.mxu0 %v7747_v59  ;;  %2782 = vmatmul.mubr.f32.gmra.mxu1 %v7747_v59  ;;  %v14438_v59 = vld [vmem:[#allocation3_spill] sm:$0xff] }
 0x19c   :  { %v4313_v10 = vmax.f32 %v9793_v19, %v1628_v32  ;;  %v4315_v57 = vmax.f32 %v9795_v52, %v2029_v2  ;;  %6718 = vmatprep.mubr.msk.f32.mxu0 %vm1141_vm0, %v7748_v42  ;;  %6774 = vmatprep.mubr.msk.f32.mxu1 %vm1141_vm0, %v7748_v42  ;;  %v14440_v19 = vmax.f32 %v14438_v59, %v14439_v6  ;;  %v7749_v42 = vld [vmem:[%s13955_s1 + $0x230] sm:$0xff] }
 0x19d   :  { %v1630_v17 = vpop.f32.mrf.mxu0  ;;  %v2031_v4 = vpop.f32.mrf.mxu1  ;;  %v14445_v6 = vld [vmem:[#allocation5_spill] sm:$0xff] }
 0x19e   :  { %v10087_v51 = vmax.f32 %v14436_v23, %v4313_v10  ;;  %v10092_v32 = vmax.f32 %v14440_v19, %v4315_v57  ;;  %v4314_v52 = vmax.f32 %v9805_v12, %v1630_v17  ;;  %v4316_v2 = vmax.f32 %v9807_v35, %v2031_v4  ;;  %v14446_v57 = vld [vmem:[#allocation52_spill] sm:$0xff] }
 0x19f   :  { %v1634_v1 = vpop.f32.mrf.mxu0  ;;  %v2035_v45 = vpop.f32.mrf.mxu1  ;;  %2387 = vmatmul.mubr.f32.gmra.mxu0 %v7749_v42  ;;  %2788 = vmatmul.mubr.f32.gmra.mxu1 %v7749_v42  ;;  %v14444_v23 = vmax.f32 %v14442_v63, %v14443_v34  ;;  %v14447_v59 = vmax.f32 %v14445_v6, %v14446_v57  ;;  %v7750_v17 = vld [vmem:[%s13955_s1 + $0x248] sm:$0xff]  ;;  %v14452_v34 = vld [vmem:[#allocation53_spill] sm:$0xff]  ;;  %v7751_v57 = vld [vmem:[%s13955_s1 + $0x240] sm:$0xff] }
 0x1a0   :  { %14437 = vst [vmem:[#allocation121_spill] sm:$0xff] %v10087_v51  ;;  %14441 = vst [vmem:[#allocation3_spill] sm:$0xff] %v10092_v32  ;;  %v4327_v12 = vmax.f32 %v9812_v40, %v1634_v1  ;;  %v4329_v35 = vmax.f32 %v9814_v36, %v2035_v45  ;;  %6719 = vmatprep.mubr.msk.f32.mxu0 %vm1141_vm0, %v7750_v17  ;;  %6775 = vmatprep.mubr.msk.f32.mxu1 %vm1141_vm0, %v7750_v17 }
 0x1a1   :  { %v10102_v10 = vmax.f32 %v14444_v23, %v4314_v52  ;;  %v10107_v19 = vmax.f32 %v14447_v59, %v4316_v2  ;;  %v1636_v4 = vpop.f32.mrf.mxu0  ;;  %v2037_v42 = vpop.f32.mrf.mxu1  ;;  %v14449_v52 = vmax.f32 %v9045_v7, %v9343_v43  ;;  %v14451_v2 = vld [vmem:[#allocation6_spill] sm:$0xff] }
 0x1a2   :  { %v14453_v40 = vmax.f32 %v14451_v2, %v14452_v34  ;;  %v4328_v45 = vmax.f32 %v9829_v39, %v1636_v4  ;;  %v4330_v36 = vmax.f32 %v9831_v60, %v2037_v42  ;;  %v14455_v7 = vld [vmem:[#allocation54_spill] sm:$0xff] }
 0x1a3   :  { %14448 = vst [vmem:[#allocation50_spill] sm:$0xff] %v10107_v19  ;;  %v10119_v63 = vmax.f32 %v14449_v52, %v4327_v12  ;;  %v1640_v23 = vpop.f32.mrf.mxu0  ;;  %v2041_v6 = vpop.f32.mrf.mxu1  ;;  %2393 = vmatmul.mubr.f32.gmra.mxu0 %v7751_v57  ;;  %2794 = vmatmul.mubr.f32.gmra.mxu1 %v7751_v57  ;;  %v14456_v43 = vmax.f32 %v9054_v11, %v14455_v7  ;;  %v14457_v12 = vld [vmem:[#allocation7_spill] sm:$0xff]  ;;  %v7752_v4 = vld [vmem:[%s13955_s1 + $0x258] sm:$0xff]  ;;  %v7753_v7 = vld [vmem:[%s13955_s1 + $0x250] sm:$0xff] }
 0x1a4   :  { %v10124_v1 = vmax.f32 %v14453_v40, %v4329_v35  ;;  %v14458_v35 = vld [vmem:[#allocation55_spill] sm:$0xff]  ;;  %v4341_v60 = vmax.f32 %v9838_v20, %v1640_v23  ;;  %v4343_v39 = vmax.f32 %v9840_v48, %v2041_v6  ;;  %6720 = vmatprep.mubr.msk.f32.mxu0 %vm1141_vm0, %v7752_v4  ;;  %6776 = vmatprep.mubr.msk.f32.mxu1 %vm1141_vm0, %v7752_v4  ;;  %v14463_v40 = vld [vmem:[#allocation8_spill] sm:$0xff] }
 0x1a5   :  { %14450 = vst [vmem:[#allocation4_spill] sm:$0xff] %v10119_v63  ;;  %v10134_v59 = vmax.f32 %v14456_v43, %v4328_v45  ;;  %v14459_v17 = vmax.f32 %v14457_v12, %v14458_v35  ;;  %v1642_v42 = vpop.f32.mrf.mxu0  ;;  %v2043_v2 = vpop.f32.mrf.mxu1  ;;  %v14461_v11 = vmax.f32 %v9061_v5, %v9384_v8  ;;  %v14464_v45 = vld [vmem:[#allocation56_spill] sm:$0xff]  ;;  %v14467_v8 = vld [vmem:[#allocation57_spill] sm:$0xff]  ;;  %v14470_v35 = vld [vmem:[#allocation58_spill] sm:$0xff] }
 0x1a6   :  { %14454 = vst [vmem:[#allocation51_spill] sm:$0xff] %v10124_v1  ;;  %v14465_v20 = vmax.f32 %v14463_v40, %v14464_v45  ;;  %v4342_v48 = vmax.f32 %v9853_v0, %v1642_v42  ;;  %v4344_v23 = vmax.f32 %v9855_v55, %v2043_v2  ;;  %v14468_v5 = vmax.f32 %v9070_v13, %v14467_v8  ;;  %v14469_v12 = vld [vmem:[#allocation9_spill] sm:$0xff]  ;;  %v14476_v40 = vld [vmem:[#allocation59_spill] sm:$0xff] }
 0x1a7   :  { %v10139_v52 = vmax.f32 %v14459_v17, %v4330_v36  ;;  %v10151_v34 = vmax.f32 %v14461_v11, %v4341_v60  ;;  %v1646_v6 = vpop.f32.mrf.mxu0  ;;  %v2047_v57 = vpop.f32.mrf.mxu1  ;;  %2399 = vmatmul.mubr.f32.gmra.mxu0 %v7753_v7  ;;  %2800 = vmatmul.mubr.f32.gmra.mxu1 %v7753_v7  ;;  %v14471_v17 = vmax.f32 %v14469_v12, %v14470_v35  ;;  %v14475_v11 = vld [vmem:[#allocation10_spill] sm:$0xff]  ;;  %v14481_v7 = vld [vmem:[#allocation11_spill] sm:$0xff]  ;;  %v14482_v8 = vld [vmem:[#allocation61_spill] sm:$0xff] }
 0x1a8   :  { %v10156_v36 = vmax.f32 %v14465_v20, %v4343_v39  ;;  %v10166_v43 = vmax.f32 %v14468_v5, %v4342_v48  ;;  %v4355_v55 = vmax.f32 %v9862_v37, %v1646_v6  ;;  %v4357_v0 = vmax.f32 %v9864_v26, %v2047_v57  ;;  %v7754_v39 = vld [vmem:[%s13955_s1 + $0x268] sm:$0xff]  ;;  %v7755_v6 = vld [vmem:[%s13955_s1 + $0x260] sm:$0xff]  ;;  %v7756_v35 = vld [vmem:[%s13955_s1 + $0x278] sm:$0xff] }
 0x1a9   :  { %14460 = vst [vmem:[#allocation5_spill] sm:$0xff] %v10139_v52  ;;  %14462 = vst [vmem:[#allocation52_spill] sm:$0xff] %v10151_v34  ;;  %v10171_v60 = vmax.f32 %v14471_v17, %v4344_v23  ;;  %6721 = vmatprep.mubr.msk.f32.mxu0 %vm1141_vm0, %v7754_v39  ;;  %v1648_v4 = vpop.f32.mrf.mxu0  ;;  %v2049_v42 = vpop.f32.mrf.mxu1  ;;  %6777 = vmatprep.mubr.msk.f32.mxu1 %vm1141_vm0, %v7754_v39  ;;  %v14473_v13 = vmax.f32 %v9077_v27, %v9424_v56  ;;  %v14479_v27 = vld [vmem:[#allocation60_spill] sm:$0xff] }
 0x1aa   :  { %14466 = vst [vmem:[#allocation6_spill] sm:$0xff] %v10156_v36  ;;  %v14477_v37 = vmax.f32 %v14475_v11, %v14476_v40  ;;  %v4356_v26 = vmax.f32 %v9880_v16, %v1648_v4  ;;  %v4358_v20 = vmax.f32 %v9882_v62, %v2049_v42  ;;  %v14480_v56 = vmax.f32 %v9086_v30, %v14479_v27  ;;  %v14487_v39 = vld [vmem:[#allocation12_spill] sm:$0xff]  ;;  %v14488_v4 = vld [vmem:[#allocation62_spill] sm:$0xff] }
 0x1ab   :  { %14472 = vst [vmem:[#allocation53_spill] sm:$0xff] %v10171_v60  ;;  %v10183_v2 = vmax.f32 %v14473_v13, %v4355_v55  ;;  %v1652_v48 = vpop.f32.mrf.mxu0  ;;  %v2053_v23 = vpop.f32.mrf.mxu1  ;;  %2405 = vmatmul.mubr.f32.gmra.mxu0 %v7755_v6  ;;  %2806 = vmatmul.mubr.f32.gmra.mxu1 %v7755_v6  ;;  %v14483_v5 = vmax.f32 %v14481_v7, %v14482_v8  ;;  %v7758_v27 = vld [vmem:[%s13955_s1 + $0x288] sm:$0xff] }
 0x1ac   :  { %v10188_v45 = vmax.f32 %v14477_v37, %v4357_v0  ;;  %v10198_v57 = vmax.f32 %v14480_v56, %v4356_v26  ;;  %v4369_v62 = vmax.f32 %v9886_v3, %v1652_v48  ;;  %v4371_v16 = vmax.f32 %v9888_v9, %v2053_v23  ;;  %6722 = vmatprep.mubr.msk.f32.mxu0 %vm1141_vm0, %v7756_v35  ;;  %v7757_v37 = vld [vmem:[%s13955_s1 + $0x270] sm:$0xff]  ;;  %v14494_v48 = vld [vmem:[#allocation64_spill] sm:$0xff] }
 0x1ad   :  { %14474 = vst [vmem:[#allocation54_spill] sm:$0xff] %v10183_v2  ;;  %v10203_v12 = vmax.f32 %v14483_v5, %v4358_v20  ;;  %v1654_v17 = vpop.f32.mrf.mxu0  ;;  %v2055_v55 = vpop.f32.mrf.mxu1  ;;  %6778 = vmatprep.mubr.msk.f32.mxu1 %vm1141_vm0, %v7756_v35  ;;  %v14485_v30 = vmax.f32 %v9093_v33, %v9464_v24  ;;  %v14489_v3 = vmax.f32 %v14487_v39, %v14488_v4  ;;  %v14491_v33 = vld [vmem:[#allocation63_spill] sm:$0xff]  ;;  %v14493_v20 = vld [vmem:[#allocation13_spill] sm:$0xff]  ;;  %v14499_v5 = vld [vmem:[#allocation14_spill] sm:$0xff] }
 0x1ae   :  { %14478 = vst [vmem:[#allocation7_spill] sm:$0xff] %v10188_v45  ;;  %v4370_v9 = vmax.f32 %v9904_v46, %v1654_v17  ;;  %v4372_v13 = vmax.f32 %v9906_v22, %v2055_v55  ;;  %v14492_v24 = vmax.f32 %v9102_v29, %v14491_v33  ;;  %v14495_v23 = vmax.f32 %v14493_v20, %v14494_v48  ;;  %v14505_v4 = vld [vmem:[#allocation15_spill] sm:$0xff]  ;;  %v14512_v20 = vld [vmem:[#allocation68_spill] sm:$0xff] }
 0x1af   :  { %14484 = vst [vmem:[#allocation55_spill] sm:$0xff] %v10203_v12  ;;  %v10215_v0 = vmax.f32 %v14485_v30, %v4369_v62  ;;  %v10220_v42 = vmax.f32 %v14489_v3, %v4371_v16  ;;  %v1658_v11 = vpop.f32.mrf.mxu0  ;;  %v2059_v40 = vpop.f32.mrf.mxu1  ;;  %2411 = vmatmul.mubr.f32.gmra.mxu0 %v7757_v37  ;;  %2812 = vmatmul.mubr.f32.gmra.mxu1 %v7757_v37  ;;  %v14500_v62 = vld [vmem:[#allocation65_spill] sm:$0xff]  ;;  %v7759_v30 = vld [vmem:[%s13955_s1 + $0x280] sm:$0xff]  ;;  %v7774_v12 = vld [vmem:[%s13955_s1 + $0x308] sm:$0xff] }
 0x1b0   :  { %v10230_v26 = vmax.f32 %v14492_v24, %v4370_v9  ;;  %v10235_v6 = vmax.f32 %v14495_v23, %v4372_v13  ;;  %v4383_v46 = vmax.f32 %v9910_v18, %v1658_v11  ;;  %v4385_v22 = vmax.f32 %v9912_v49, %v2059_v40  ;;  %6723 = vmatprep.mubr.msk.f32.mxu0 %vm1141_vm0, %v7758_v27  ;;  %v14506_v3 = vld [vmem:[#allocation67_spill] sm:$0xff]  ;;  %v7760_v11 = vld [vmem:[%s13955_s1 + $0x298] sm:$0xff]  ;;  %v14511_v24 = vld [vmem:[#allocation16_spill] sm:$0xff] }
 0x1b1   :  { %14486 = vst [vmem:[#allocation8_spill] sm:$0xff] %v10215_v0  ;;  %14490 = vst [vmem:[#allocation56_spill] sm:$0xff] %v10220_v42  ;;  %v1660_v56 = vpop.f32.mrf.mxu0  ;;  %v2061_v7 = vpop.f32.mrf.mxu1  ;;  %6779 = vmatprep.mubr.msk.f32.mxu1 %vm1141_vm0, %v7758_v27  ;;  %v14497_v29 = vmax.f32 %v9109_v41, %v9504_v21  ;;  %v14501_v18 = vmax.f32 %v14499_v5, %v14500_v62  ;;  %v14503_v41 = vld [vmem:[#allocation66_spill] sm:$0xff]  ;;  %v14507_v9 = vmax.f32 %v14505_v4, %v14506_v3  ;;  %v7761_v27 = vld [vmem:[%s13955_s1 + $0x290] sm:$0xff] }
 0x1b2   :  { %14496 = vst [vmem:[#allocation57_spill] sm:$0xff] %v10235_v6  ;;  %v4384_v49 = vmax.f32 %v9925_v25, %v1660_v56  ;;  %v4386_v35 = vmax.f32 %v9927_v61, %v2061_v7  ;;  %v14504_v21 = vmax.f32 %v9118_v44, %v14503_v41  ;;  %v14509_v44 = vmax.f32 %v9125_v47, %v9544_v38  ;;  %v14515_v47 = vld [vmem:[#allocation69_spill] sm:$0xff]  ;;  %v14525_v41 = vld [vmem:[#allocation72_spill] sm:$0xff] }
 0x1b3   :  { %v10247_v8 = vmax.f32 %v14497_v29, %v4383_v46  ;;  %v10252_v16 = vmax.f32 %v14501_v18, %v4385_v22  ;;  %v1664_v17 = vpop.f32.mrf.mxu0  ;;  %v2065_v55 = vpop.f32.mrf.mxu1  ;;  %2417 = vmatmul.mubr.f32.gmra.mxu0 %v7759_v30  ;;  %2818 = vmatmul.mubr.f32.gmra.mxu1 %v7759_v30  ;;  %v14516_v38 = vmax.f32 %v9134_v50, %v14515_v47  ;;  %v14517_v7 = vld [vmem:[#allocation17_spill] sm:$0xff]  ;;  %v14518_v29 = vld [vmem:[#allocation70_spill] sm:$0xff]  ;;  %v7762_v18 = vld [vmem:[%s13955_s1 + $0x2a8] sm:$0xff] }
 0x1b4   :  { %v10262_v39 = vmax.f32 %v14504_v21, %v4384_v49  ;;  %v10267_v13 = vmax.f32 %v14507_v9, %v4386_v35  ;;  %v4397_v25 = vmax.f32 %v9930_v14, %v1664_v17  ;;  %v4399_v61 = vmax.f32 %v9932_v31, %v2065_v55  ;;  %6724 = vmatprep.mubr.msk.f32.mxu0 %vm1141_vm0, %v7760_v11  ;;  %v14521_v50 = vld [vmem:[#allocation71_spill] sm:$0xff]  ;;  %v14524_v30 = vld [vmem:[#allocation18_spill] sm:$0xff]  ;;  %v14529_v3 = vld [vmem:[#allocation49_spill] sm:$0xff] }
 0x1b5   :  { %14498 = vst [vmem:[#allocation9_spill] sm:$0xff] %v10247_v8  ;;  %14502 = vst [vmem:[#allocation58_spill] sm:$0xff] %v10252_v16  ;;  %v1666_v40 = vpop.f32.mrf.mxu0  ;;  %v2067_v37 = vpop.f32.mrf.mxu1  ;;  %6780 = vmatprep.mubr.msk.f32.mxu1 %vm1141_vm0, %v7760_v11  ;;  %v14513_v14 = vmax.f32 %v14511_v24, %v14512_v20  ;;  %v14519_v5 = vmax.f32 %v14517_v7, %v14518_v29  ;;  %v14522_v17 = vmax.f32 %v9138_v53, %v14521_v50  ;;  %v7763_v11 = vld [vmem:[%s13955_s1 + $0x2a0] sm:$0xff]  ;;  %v14533_v20 = vld [vmem:[#allocation20_spill] sm:$0xff] }
 0x1b6   :  { %14508 = vst [vmem:[#allocation10_spill] sm:$0xff] %v10267_v13  ;;  %v10279_v33 = vmax.f32 %v14509_v44, %v4397_v25  ;;  %v4398_v31 = vmax.f32 %v9945_v15, %v1666_v40  ;;  %v4400_v23 = vmax.f32 %v9947_v28, %v2067_v37  ;;  %v6381_v53 = vld [vmem:[%s13957_s4] sm:$0xff]  ;;  %v14531_v37 = vld [vmem:[#allocation73_spill] sm:$0xff] }
 0x1b7   :  { %v10284_v48 = vmax.f32 %v14513_v14, %v4399_v61  ;;  %v1670_v46 = vpop.f32.mrf.mxu0  ;;  %v2071_v22 = vpop.f32.mrf.mxu1  ;;  %2423 = vmatmul.mubr.f32.gmra.mxu0 %v7761_v27  ;;  %2824 = vmatmul.mubr.f32.gmra.mxu1 %v7761_v27  ;;  %v14530_v40 = vld [vmem:[#allocation19_spill] sm:$0xff]  ;;  %v14534_v14 = vld [vmem:[#allocation74_spill] sm:$0xff] }
 0x1b8   :  { %14510 = vst [vmem:[#allocation59_spill] sm:$0xff] %v10279_v33  ;;  %v10294_v56 = vmax.f32 %v14516_v38, %v4398_v31  ;;  %v10299_v62 = vmax.f32 %v14519_v5, %v4400_v23  ;;  %v4411_v15 = vmax.f32 %v9950_v54, %v1670_v46  ;;  %v4413_v28 = vmax.f32 %v9952_v58, %v2071_v22  ;;  %v14528_v58 = vld [vmem:[#allocation48_spill] sm:$0xff]  ;;  %v14537_v46 = vld [vmem:[#allocation97_spill] sm:$0xff]  ;;  %v14538_v27 = vld [vmem:[#allocation98_spill] sm:$0xff] }
 0x1b9   :  { %14514 = vst [vmem:[#allocation60_spill] sm:$0xff] %v10284_v48  ;;  %6725 = vmatprep.mubr.msk.f32.mxu0 %vm1141_vm0, %v7762_v18  ;;  %v1672_v49 = vpop.f32.mrf.mxu0  ;;  %v2073_v35 = vpop.f32.mrf.mxu1  ;;  %6781 = vmatprep.mubr.msk.f32.mxu1 %vm1141_vm0, %v7762_v18  ;;  %v14526_v54 = vmax.f32 %v14524_v30, %v14525_v41  ;;  %v14532_v44 = vmax.f32 %v14530_v40, %v14531_v37  ;;  %v7764_v38 = vld [vmem:[%s13955_s1 + $0x2b8] sm:$0xff]  ;;  %v14539_v5 = vld [vmem:[#allocation21_spill] sm:$0xff]  ;;  %v14547_v30 = vld [vmem:[#allocation99_spill] sm:$0xff] }
 0x1ba   :  { %14520 = vst [vmem:[#allocation11_spill] sm:$0xff] %v10299_v62  ;;  %v10311_v55 = vmax.f32 %v14522_v17, %v4411_v15  ;;  %v4412_v4 = vmax.f32 %v14528_v58, %v1672_v49  ;;  %v4414_v9 = vmax.f32 %v14529_v3, %v2073_v35  ;;  %v14535_v31 = vmax.f32 %v14533_v20, %v14534_v14  ;;  %v14540_v15 = vld [vmem:[#allocation75_spill] sm:$0xff]  ;;  %v14543_v49 = vld [vmem:[#allocation22_spill] sm:$0xff]  ;;  %v14544_v35 = vld [vmem:[#allocation76_spill] sm:$0xff] }
 0x1bb   :  { %v10316_v21 = vmax.f32 %v14526_v54, %v4413_v28  ;;  %v1676_v25 = vpop.f32.mrf.mxu0  ;;  %v2077_v61 = vpop.f32.mrf.mxu1  ;;  %2429 = vmatmul.mubr.f32.gmra.mxu0 %v7763_v11  ;;  %2830 = vmatmul.mubr.f32.gmra.mxu1 %v7763_v11  ;;  %v14541_v28 = vmax.f32 %v14539_v5, %v14540_v15  ;;  %v14545_v50 = vmax.f32 %v14543_v49, %v14544_v35  ;;  %v14548_v54 = vld [vmem:[#allocation100_spill] sm:$0xff]  ;;  %v14553_v37 = vld [vmem:[#allocation78_spill] sm:$0xff]  ;;  %v14556_v14 = vld [vmem:[#allocation101_spill] sm:$0xff] }
 0x1bc   :  { %14523 = vst [vmem:[#allocation61_spill] sm:$0xff] %v10311_v55  ;;  %v10329_v24 = vmax.f32 %v14532_v44, %v4412_v4  ;;  %v10334_v23 = vmax.f32 %v14535_v31, %v4414_v9  ;;  %v4425_v22 = vmax.f32 %v14537_v46, %v1676_v25  ;;  %v4427_v47 = vmax.f32 %v14538_v27, %v2077_v61  ;;  %v7765_v9 = vld [vmem:[%s13955_s1 + $0x2b0] sm:$0xff]  ;;  %v14549_v25 = vld [vmem:[#allocation23_spill] sm:$0xff]  ;;  %v14552_v40 = vld [vmem:[#allocation24_spill] sm:$0xff] }
 0x1bd   :  { %14527 = vst [vmem:[#allocation12_spill] sm:$0xff] %v10316_v21  ;;  %6726 = vmatprep.mubr.msk.f32.mxu0 %vm1141_vm0, %v7764_v38  ;;  %v1678_v7 = vpop.f32.mrf.mxu0  ;;  %v2079_v29 = vpop.f32.mrf.mxu1  ;;  %6782 = vmatprep.mubr.msk.f32.mxu1 %vm1141_vm0, %v7764_v38  ;;  %v14550_v61 = vld [vmem:[#allocation77_spill] sm:$0xff]  ;;  %v14554_v44 = vmax.f32 %v14552_v40, %v14553_v37  ;;  %v14557_v46 = vld [vmem:[#allocation102_spill] sm:$0xff]  ;;  %v7766_v27 = vld [vmem:[%s13955_s1 + $0x2c8] sm:$0xff] }
 0x1be   :  { %14536 = vst [vmem:[#allocation62_spill] sm:$0xff] %v10334_v23  ;;  %6385 = vperm.xlu0 %7676, %v6381_v53   ;;  %v10346_v18 = vmax.f32 %v14541_v28, %v4425_v22  ;;  %v10351_v17 = vmax.f32 %v14545_v50, %v4427_v47  ;;  %v4426_v41 = vmax.f32 %v14547_v30, %v1678_v7  ;;  %v14558_v7 = vld [vmem:[#allocation25_spill] sm:$0xff]  ;;  %v14562_v28 = vld [vmem:[#allocation26_spill] sm:$0xff]  ;;  %v14563_v49 = vld [vmem:[#allocation80_spill] sm:$0xff] }
 0x1bf   :  { %v4428_v58 = vmax.f32 %v14548_v54, %v2079_v29  ;;  %v1682_v4 = vpop.f32.mrf.mxu0  ;;  %v2083_v3 = vpop.f32.mrf.mxu1  ;;  %2435 = vmatmul.mubr.f32.gmra.mxu0 %v7765_v9  ;;  %2836 = vmatmul.mubr.f32.gmra.mxu1 %v7765_v9  ;;  %v14551_v11 = vmax.f32 %v14549_v25, %v14550_v61  ;;  %v14559_v29 = vld [vmem:[#allocation79_spill] sm:$0xff]  ;;  %v14564_v35 = vmax.f32 %v14562_v28, %v14563_v49  ;;  %v14567_v54 = vld [vmem:[#allocation104_spill] sm:$0xff]  ;;  %v14569_v61 = vld [vmem:[#allocation81_spill] sm:$0xff] }
 0x1c0   :  { %14542 = vst [vmem:[#allocation63_spill] sm:$0xff] %v10346_v18  ;;  %14546 = vst [vmem:[#allocation13_spill] sm:$0xff] %v10351_v17  ;;  %v4439_v31 = vmax.f32 %v14556_v14, %v1682_v4  ;;  %v4441_v22 = vmax.f32 %v14557_v46, %v2083_v3  ;;  %6727 = vmatprep.mubr.msk.f32.mxu0 %vm1141_vm0, %v7766_v27  ;;  %6783 = vmatprep.mubr.msk.f32.mxu1 %vm1141_vm0, %v7766_v27  ;;  %v14566_v30 = vld [vmem:[#allocation103_spill] sm:$0xff]  ;;  %v14571_v37 = vld [vmem:[#allocation28_spill] sm:$0xff] }
 0x1c1   :  { %v10361_v53 = vmax.f32 %v14551_v11, %v4426_v41  ;;  %v10366_v20 = vmax.f32 %v14554_v44, %v4428_v58  ;;  %v1684_v47 = vpop.f32.mrf.mxu0  ;;  %v2085_v38 = vpop.f32.mrf.mxu1  ;;  %v14560_v5 = vmax.f32 %v14558_v7, %v14559_v29  ;;  %v7767_v9 = vld [vmem:[%s13955_s1 + $0x2c0] sm:$0xff]  ;;  %v14572_v44 = vld [vmem:[#allocation82_spill] sm:$0xff]  ;;  %v14575_v46 = vld [vmem:[#allocation105_spill] sm:$0xff] }
 0x1c2   :  { %v10383_v50 = vmax.f32 %v14564_v35, %v4441_v22  ;;  %v4440_v41 = vmax.f32 %v14566_v30, %v1684_v47  ;;  %v4442_v58 = vmax.f32 %v14567_v54, %v2085_v38  ;;  %v14568_v25 = vld [vmem:[#allocation27_spill] sm:$0xff]  ;;  %v14573_v14 = vmax.f32 %v14571_v37, %v14572_v44  ;;  %v14576_v27 = vld [vmem:[#allocation106_spill] sm:$0xff]  ;;  %v7769_v37 = vld [vmem:[%s13955_s1 + $0x2d0] sm:$0xff] }
 0x1c3   :  { %14555 = vst [vmem:[#allocation64_spill] sm:$0xff] %v10366_v20  ;;  %v10378_v15 = vmax.f32 %v14560_v5, %v4439_v31  ;;  %v1688_v4 = vpop.f32.mrf.mxu0  ;;  %v2089_v3 = vpop.f32.mrf.mxu1  ;;  %2441 = vmatmul.mubr.f32.gmra.mxu0 %v7767_v9  ;;  %2842 = vmatmul.mubr.f32.gmra.mxu1 %v7767_v9  ;;  %v14570_v11 = vmax.f32 %v14568_v25, %v14569_v61  ;;  %v7768_v38 = vld [vmem:[%s13955_s1 + $0x2d8] sm:$0xff]  ;;  %v14577_v5 = vld [vmem:[#allocation29_spill] sm:$0xff]  ;;  %v14578_v28 = vld [vmem:[#allocation83_spill] sm:$0xff] }
 0x1c4   :  { %14565 = vst [vmem:[#allocation65_spill] sm:$0xff] %v10383_v50  ;;  %v10398_v31 = vmax.f32 %v14573_v14, %v4442_v58  ;;  %v4453_v22 = vmax.f32 %v14575_v46, %v1688_v4  ;;  %v4455_v47 = vmax.f32 %v14576_v27, %v2089_v3  ;;  %6728 = vmatprep.mubr.msk.f32.mxu0 %vm1141_vm0, %v7768_v38  ;;  %v14581_v30 = vld [vmem:[#allocation30_spill] sm:$0xff]  ;;  %v14585_v4 = vld [vmem:[#allocation107_spill] sm:$0xff]  ;;  %v14586_v9 = vld [vmem:[#allocation108_spill] sm:$0xff] }
 0x1c5   :  { %14561 = vst [vmem:[#allocation14_spill] sm:$0xff] %v10378_v15  ;;  %v10393_v40 = vmax.f32 %v14570_v11, %v4440_v41  ;;  %v1690_v7 = vpop.f32.mrf.mxu0  ;;  %v2091_v29 = vpop.f32.mrf.mxu1  ;;  %6784 = vmatprep.mubr.msk.f32.mxu1 %vm1141_vm0, %v7768_v38  ;;  %v14579_v49 = vmax.f32 %v14577_v5, %v14578_v28  ;;  %v14582_v41 = vld [vmem:[#allocation84_spill] sm:$0xff]  ;;  %v14587_v44 = vld [vmem:[#allocation31_spill] sm:$0xff]  ;;  %v14588_v14 = vld [vmem:[#allocation85_spill] sm:$0xff] }
 0x1c6   :  { %14574 = vst [vmem:[#allocation66_spill] sm:$0xff] %v10398_v31  ;;  %v14583_v54 = vmax.f32 %v14581_v30, %v14582_v41  ;;  %v4454_v3 = vmax.f32 %v14585_v4, %v1690_v7  ;;  %v4456_v25 = vmax.f32 %v14586_v9, %v2091_v29  ;;  %v14589_v46 = vmax.f32 %v14587_v44, %v14588_v14  ;;  %v14590_v27 = vld [vmem:[#allocation32_spill] sm:$0xff]  ;;  %v14594_v7 = vld [vmem:[#allocation109_spill] sm:$0xff]  ;;  %v14595_v28 = vld [vmem:[#allocation110_spill] sm:$0xff] }
 0x1c7   :  { %v10410_v35 = vmax.f32 %v14579_v49, %v4453_v22  ;;  %v1694_v61 = vpop.f32.mrf.mxu0  ;;  %v2095_v11 = vpop.f32.mrf.mxu1  ;;  %2447 = vmatmul.mubr.f32.gmra.mxu0 %v7769_v37  ;;  %2848 = vmatmul.mubr.f32.gmra.mxu1 %v7769_v37  ;;  %v7770_v30 = vld [vmem:[%s13955_s1 + $0x2e8] sm:$0xff]  ;;  %v14596_v4 = vld [vmem:[#allocation34_spill] sm:$0xff]  ;;  %v7781_v20 = vld [vmem:[%s13955_s1 + $0x330] sm:$0xff] }
 0x1c8   :  { %v10415_v58 = vmax.f32 %v14583_v54, %v4455_v47  ;;  %v10425_v22 = vmax.f32 %v14589_v46, %v4454_v3  ;;  %v14591_v47 = vld [vmem:[#allocation86_spill] sm:$0xff]  ;;  %v4467_v29 = vmax.f32 %v14594_v7, %v1694_v61  ;;  %v4469_v49 = vmax.f32 %v14595_v28, %v2095_v11  ;;  %6729 = vmatprep.mubr.msk.f32.mxu0 %vm1141_vm0, %v7770_v30  ;;  %v14597_v3 = vld [vmem:[#allocation87_spill] sm:$0xff]  ;;  %v14601_v44 = vld [vmem:[#allocation88_spill] sm:$0xff] }
 0x1c9   :  { %14580 = vst [vmem:[#allocation15_spill] sm:$0xff] %v10410_v35  ;;  %v14592_v38 = vmax.f32 %v14590_v27, %v14591_v47  ;;  %v1696_v41 = vpop.f32.mrf.mxu0  ;;  %v2097_v54 = vpop.f32.mrf.mxu1  ;;  %6785 = vmatprep.mubr.msk.f32.mxu1 %vm1141_vm0, %v7770_v30  ;;  %v14598_v9 = vmax.f32 %v14596_v4, %v14597_v3  ;;  %v14604_v11 = vld [vmem:[#allocation111_spill] sm:$0xff]  ;;  %v14605_v27 = vld [vmem:[#allocation112_spill] sm:$0xff] }
 0x1ca   :  { %14584 = vst [vmem:[#allocation67_spill] sm:$0xff] %v10415_v58  ;;  %v4468_v46 = vmax.f32 %v14604_v11, %v1696_v41  ;;  %v4470_v47 = vmax.f32 %v14605_v27, %v2097_v54  ;;  %v7771_v28 = vld [vmem:[%s13955_s1 + $0x2e0] sm:$0xff]  ;;  %v14606_v30 = vld [vmem:[#allocation36_spill] sm:$0xff]  ;;  %v14613_v41 = vld [vmem:[#allocation113_spill] sm:$0xff] }
 0x1cb   :  { %v10430_v5 = vmax.f32 %v14592_v38, %v4456_v25  ;;  %v10442_v37 = vmax.f32 %v14598_v9, %v4467_v29  ;;  %v14600_v25 = vld [vmem:[#allocation35_spill] sm:$0xff]  ;;  %v1700_v38 = vpop.f32.mrf.mxu0  ;;  %v2101_v7 = vpop.f32.mrf.mxu1  ;;  %2453 = vmatmul.mubr.f32.gmra.mxu0 %v7771_v28  ;;  %2854 = vmatmul.mubr.f32.gmra.mxu1 %v7771_v28  ;;  %v14607_v29 = vld [vmem:[#allocation89_spill] sm:$0xff]  ;;  %v7772_v27 = vld [vmem:[%s13955_s1 + $0x2f8] sm:$0xff] }
 0x1cc   :  { %v14602_v61 = vmax.f32 %v14600_v25, %v14601_v44  ;;  %v14608_v4 = vmax.f32 %v14606_v30, %v14607_v29  ;;  %v14609_v9 = vld [vmem:[#allocation37_spill] sm:$0xff]  ;;  %v4481_v54 = vmax.f32 %v14613_v41, %v1700_v38  ;;  %6730 = vmatprep.mubr.msk.f32.mxu0 %vm1141_vm0, %v7772_v27  ;;  %6786 = vmatprep.mubr.msk.f32.mxu1 %vm1141_vm0, %v7772_v27  ;;  %v14624_v41 = vld [vmem:[#allocation116_spill] sm:$0xff]  ;;  %v7791_v55 = vld [vmem:[%s13955_s1] sm:$0xff] }
 0x1cd   :  { %14593 = vst [vmem:[#allocation16_spill] sm:$0xff] %v10430_v5  ;;  %14599 = vst [vmem:[#allocation68_spill] sm:$0xff] %v10442_v37  ;;  %v1702_v28 = vpop.f32.mrf.mxu0  ;;  %v2103_v19 = vpop.f32.mrf.mxu1  ;;  %v14616_v30 = vld [vmem:[#allocation33_spill] sm:$0xff]  ;;  %v7782_v31 = vld [vmem:[%s13955_s1 + $0x348] sm:$0xff] }
 0x1ce   :  { %v10447_v14 = vmax.f32 %v14602_v61, %v4469_v49  ;;  %v10457_v3 = vmax.f32 %v14608_v4, %v4468_v46  ;;  %v14610_v49 = vld [vmem:[#allocation90_spill] sm:$0xff]  ;;  %v14615_v46 = vld [vmem:[#allocation39_spill] sm:$0xff]  ;;  %v7773_v27 = vld [vmem:[%s13955_s1 + $0x2f0] sm:$0xff] }
 0x1cf   :  { %v14611_v25 = vmax.f32 %v14609_v9, %v14610_v49  ;;  %v14614_v61 = vld [vmem:[#allocation114_spill] sm:$0xff]  ;;  %v14617_v29 = vmax.f32 %v14615_v46, %v14616_v30  ;;  %v14620_v9 = vld [vmem:[#allocation91_spill] sm:$0xff]  ;;  %v1706_v52 = vpop.f32.mrf.mxu0  ;;  %v2107_v60 = vpop.f32.mrf.mxu1  ;;  %2459 = vmatmul.mubr.f32.gmra.mxu0 %v7773_v27  ;;  %2860 = vmatmul.mubr.f32.gmra.mxu1 %v7773_v27  ;;  %v14625_v46 = vld [vmem:[#allocation41_spill] sm:$0xff] }
 0x1d0   :  { %14603 = vst [vmem:[#allocation69_spill] sm:$0xff] %v10447_v14  ;;  %v4483_v11 = vmax.f32 %v14614_v61, %v2101_v7  ;;  %v14623_v7 = vld [vmem:[#allocation115_spill] sm:$0xff]  ;;  %v4484_v61 = vmax.f32 %v14624_v41, %v2103_v19  ;;  %6731 = vmatprep.mubr.msk.f32.mxu0 %vm1141_vm0, %v7774_v12  ;;  %6787 = vmatprep.mubr.msk.f32.mxu1 %vm1141_vm0, %v7774_v12 }
 0x1d1   :  { %v10462_v44 = vmax.f32 %v14611_v25, %v4470_v47  ;;  %v10474_v4 = vmax.f32 %v14617_v29, %v4481_v54  ;;  %v14619_v47 = vld [vmem:[#allocation40_spill] sm:$0xff]  ;;  %v4482_v25 = vmax.f32 %v14623_v7, %v1702_v28  ;;  %v14632_v28 = vld [vmem:[#allocation117_spill] sm:$0xff]  ;;  %v14633_v7 = vld [vmem:[#allocation118_spill] sm:$0xff]  ;;  %v1708_v27 = vpop.f32.mrf.mxu0  ;;  %v2109_v6 = vpop.f32.mrf.mxu1 }
 0x1d2   :  { %v14621_v38 = vmax.f32 %v14619_v47, %v14620_v9  ;;  %v14626_v54 = vld [vmem:[#allocation92_spill] sm:$0xff]  ;;  %v14628_v47 = vld [vmem:[#allocation42_spill] sm:$0xff]  ;;  %v4495_v19 = vmax.f32 %v14632_v28, %v1706_v52  ;;  %v4497_v41 = vmax.f32 %v14633_v7, %v2107_v60  ;;  %v14641_v60 = vld [vmem:[#allocation119_spill] sm:$0xff] }
 0x1d3   :  { %14612 = vst [vmem:[#allocation17_spill] sm:$0xff] %v10462_v44  ;;  %14618 = vst [vmem:[#allocation70_spill] sm:$0xff] %v10474_v4  ;;  %v14627_v30 = vmax.f32 %v14625_v46, %v14626_v54  ;;  %v14635_v46 = vld [vmem:[#allocation38_spill] sm:$0xff]  ;;  %v14642_v28 = vld [vmem:[#allocation120_spill] sm:$0xff]  ;;  %v10515_v13 = vpop.f32.mrf.mxu0  ;;  %v10520_v62 = vpop.f32.mrf.mxu1 }
 0x1d4   :  { %v10479_v49 = vmax.f32 %v14621_v38, %v4483_v11  ;;  %v14629_v11 = vld [vmem:[#allocation93_spill] sm:$0xff]  ;;  %v4498_v7 = vmax.f32 %v14642_v28, %v2109_v6  ;;  %v7775_v12 = vld [vmem:[%s13955_s1 + $0x300] sm:$0xff]  ;;  %v10598_v44 = vpop.permute.xlu1 %4776 }
 0x1d5   :  { %v10489_v29 = vmax.f32 %v14627_v30, %v4482_v25  ;;  %v14630_v9 = vmax.f32 %v14628_v47, %v14629_v11  ;;  %v14634_v25 = vld [vmem:[#allocation44_spill] sm:$0xff]  ;;  %v14638_v47 = vld [vmem:[#allocation94_spill] sm:$0xff]  ;;  %2465 = vmatmul.mubr.f32.gmra.mxu0 %v7775_v12  ;;  %2866 = vmatmul.mubr.f32.gmra.mxu1 %v7775_v12  ;;  %v10539_v28 = vpop.f32.mrf.mxu1  ;;  %14656 = vst [vmem:[#allocation98_spill] sm:$0xff] %v10598_v44 }
 0x1d6   :  { %14622 = vst [vmem:[#allocation71_spill] sm:$0xff] %v10479_v49  ;;  %v14636_v54 = vmax.f32 %v14634_v25, %v14635_v46  ;;  %v14644_v25 = vld [vmem:[#allocation46_spill] sm:$0xff]  ;;  %v14645_v46 = vld [vmem:[#allocation95_spill] sm:$0xff]  ;;  %v4944_v8 = vadd.f32 %v10598_v44, %v10457_v3 }
 0x1d7   :  { %v10494_v38 = vmax.f32 %v14630_v9, %v4484_v61  ;;  %v14637_v61 = vld [vmem:[#allocation45_spill] sm:$0xff]  ;;  %v4496_v9 = vmax.f32 %v14641_v60, %v1708_v27  ;;  %v14648_v27 = vld [vmem:[#allocation96_spill] sm:$0xff]  ;;  %v10537_v60 = vpop.f32.mrf.mxu0  ;;  %v7792_v3 = vld [vmem:[%s13955_s1 + $0x18] sm:$0xff] }
 0x1d8   :  { %v10506_v30 = vmax.f32 %v14636_v54, %v4495_v19  ;;  %v14639_v52 = vmax.f32 %v14637_v61, %v14638_v47  ;;  %v10522_v19 = vpop.permute.xlu0 %4786  ;;  %v14647_v61 = vld [vmem:[#allocation47_spill] sm:$0xff]  ;;  %v10625_v16 = vpop.permute.xlu1 %4771 }
 0x1d9   :  { %14631 = vst [vmem:[#allocation18_spill] sm:$0xff] %v10494_v38  ;;  %14643 = vst [vmem:[#allocation48_spill] sm:$0xff] %v10522_v19  ;;  %v14649_v47 = vmax.f32 %v14647_v61, %v14648_v27  ;;  %v6382_v27 = vld [vmem:[%s13957_s4 + $0x8] sm:$0x3]  ;;  %v4930_v35 = vadd.f32 %v10625_v16, %v10425_v22  ;;  %v7793_v22 = vld [vmem:[%s13955_s1 + $0x10] sm:$0xff] }
 0x1da   :  { %v10511_v11 = vmax.f32 %v14639_v52, %v4497_v41  ;;  %v14646_v41 = vmax.f32 %v14644_v25, %v14645_v46  ;;  %v7776_v52 = vld [vmem:[%s13955_s1 + $0x318] sm:$0xff]  ;;  %v10549_v25 = vpop.f32.mrf.mxu1  ;;  %v7778_v46 = vld [vmem:[%s13955_s1 + $0x328] sm:$0xff]  ;;  %6390 = vperm.xlu1 %7677, %v6382_v27   ;;  %14661 = vst [vmem:[#allocation99_spill] sm:$0xff] %v10625_v16 }
 0x1db   :  { %v10530_v6 = vmax.f32 %v14649_v47, %v4498_v7  ;;  %6732 = vmatprep.mubr.msk.f32.mxu0 %vm1141_vm0, %v7776_v52  ;;  %6788 = vmatprep.mubr.msk.f32.mxu1 %vm1141_vm0, %v7776_v52  ;;  %v7777_v7 = vld [vmem:[%s13955_s1 + $0x310] sm:$0xff]  ;;  %14651 = vst [vmem:[#allocation19_spill] sm:$0xff] %v10549_v25  ;;  %v7779_v52 = vld [vmem:[%s13955_s1 + $0x320] sm:$0xff] }
 0x1dc   :  { %14640 = vst [vmem:[#allocation72_spill] sm:$0xff] %v10511_v11  ;;  %v4692_v54 = vmax.f32 %v14646_v41, %v4496_v9  ;;  %v10544_v9 = vpop.f32.mrf.mxu0  ;;  %2471 = vmatmul.mubr.f32.gmra.mxu0 %v7777_v7  ;;  %2872 = vmatmul.mubr.f32.gmra.mxu1 %v7777_v7  ;;  %v10559_v61 = vpop.f32.mrf.mxu1  ;;  %v7808_v25 = vld [vmem:[%s13955_s1 + $0x80] sm:$0xff] }
 0x1dd   :  { %14650 = vst [vmem:[#allocation49_spill] sm:$0xff] %v10530_v6  ;;  %6733 = vmatprep.mubr.msk.f32.mxu0 %vm1141_vm0, %v7778_v46  ;;  %6789 = vmatprep.mubr.msk.f32.mxu1 %vm1141_vm0, %v7778_v46  ;;  %v7780_v46 = vld [vmem:[%s13955_s1 + $0x338] sm:$0xff]  ;;  %v10616_v36 = vpop.permute.xlu0 %4781  ;;  %v10654_v11 = vpop.permute.xlu1 %4761 }
 0x1de   :  { %v10542_v12 = vadd.f32 %v10522_v19, %v4692_v54  ;;  %v10557_v54 = vpop.f32.mrf.mxu0  ;;  %v10571_v7 = vpop.f32.mrf.mxu1  ;;  %14659 = vst [vmem:[#allocation22_spill] sm:$0xff] %v10616_v36  ;;  %14667 = vst [vmem:[#allocation101_spill] sm:$0xff] %v10654_v11  ;;  %v4958_v34 = vadd.f32 %v10616_v36, %v10489_v29 }
 0x1df   :  { %14652 = vst [vmem:[#allocation73_spill] sm:$0xff] %v10571_v7 }
 0x1e0   :  { %v14057_v41 = vmax.f32 %v10542_v12, 0.0  ;;  %v10566_v47 = vpop.f32.mrf.mxu0  ;;  %2477 = vmatmul.mubr.f32.gmra.mxu0 %v7779_v52  ;;  %2878 = vmatmul.mubr.f32.gmra.mxu1 %v7779_v52  ;;  %v10580_v27 = vpop.f32.mrf.mxu1  ;;  %v14676_v15 = vmax.f32 %v10542_v12, 0.0 }
 0x1e1   :  { %6734 = vmatprep.mubr.msk.f32.mxu0 %vm1141_vm0, %v7780_v46  ;;  %6790 = vmatprep.mubr.msk.f32.mxu1 %vm1141_vm0, %v7780_v46  ;;  %14653 = vst [vmem:[#allocation20_spill] sm:$0xff] %v10580_v27  ;;  %v10643_v58 = vpop.permute.xlu0 %4766  ;;  %v10685_v18 = vpop.permute.xlu1 %4751 }
 0x1e2   :  { %7241 = vmatprep.subr.mxu1 %v14057_v41  ;;  %v10578_v41 = vpop.f32.mrf.mxu0  ;;  %v10587_v52 = vpop.f32.mrf.mxu1  ;;  %14664 = vst [vmem:[#allocation77_spill] sm:$0xff] %v10643_v58  ;;  %14675 = vst [vmem:[#allocation27_spill] sm:$0xff] %v10685_v18 }
 0x1e3   :  { %14654 = vst [vmem:[#allocation74_spill] sm:$0xff] %v10587_v52 }
 0x1e4   :  { %v10582_v23 = vpop.f32.mrf.mxu0  ;;  %2483 = vmatmul.mubr.f32.gmra.mxu0 %v7781_v20  ;;  %2884 = vmatmul.mubr.f32.gmra.mxu1 %v7781_v20  ;;  %v10596_v5 = vpop.f32.mrf.mxu1  ;;  %v7783_v20 = vld [vmem:[%s13955_s1 + $0x340] sm:$0xff] }
 0x1e5   :  { %6735 = vmatprep.mubr.msk.f32.mxu0 %vm1141_vm0, %v7782_v31  ;;  %6791 = vmatprep.mubr.msk.f32.mxu1 %vm1141_vm0, %v7782_v31  ;;  %14655 = vst [vmem:[#allocation97_spill] sm:$0xff] %v10596_v5  ;;  %v7784_v31 = vld [vmem:[%s13955_s1 + $0x358] sm:$0xff]  ;;  %v10676_v33 = vpop.permute.xlu0 %4756  ;;  %v10726_v4 = vpop.permute.xlu1 %4741 }
 0x1e6   :  { %v10594_v46 = vpop.f32.mrf.mxu0  ;;  %v10605_v6 = vpop.f32.mrf.mxu1  ;;  %14672 = vst [vmem:[#allocation80_spill] sm:$0xff] %v10676_v33  ;;  %14685 = vst [vmem:[#allocation30_spill] sm:$0xff] %v10726_v4 }
 0x1e7   :  { %14657 = vst [vmem:[#allocation21_spill] sm:$0xff] %v10605_v6 }
 0x1e8   :  { %v10600_v38 = vpop.f32.mrf.mxu0  ;;  %2489 = vmatmul.mubr.f32.gmra.mxu0 %v7783_v20  ;;  %2890 = vmatmul.mubr.f32.gmra.mxu1 %v7783_v20  ;;  %v10614_v1 = vpop.f32.mrf.mxu1  ;;  %v7785_v20 = vld [vmem:[%s13955_s1 + $0x350] sm:$0xff] }
 0x1e9   :  { %6736 = vmatprep.mubr.msk.f32.mxu0 %vm1141_vm0, %v7784_v31  ;;  %6792 = vmatprep.mubr.msk.f32.mxu1 %vm1141_vm0, %v7784_v31  ;;  %14658 = vst [vmem:[#allocation75_spill] sm:$0xff] %v10614_v1  ;;  %v7786_v31 = vld [vmem:[%s13955_s1 + $0x368] sm:$0xff] }
 0x1ea   :  { %v10612_v32 = vpop.f32.mrf.mxu0  ;;  %v10623_v42 = vpop.f32.mrf.mxu1 }
 0x1eb   :  { %14660 = vst [vmem:[#allocation76_spill] sm:$0xff] %v10623_v42 }
 0x1ec   :  { %v10618_v45 = vpop.f32.mrf.mxu0  ;;  %2495 = vmatmul.mubr.f32.gmra.mxu0 %v7785_v20  ;;  %2896 = vmatmul.mubr.f32.gmra.mxu1 %v7785_v20  ;;  %v10634_v21 = vpop.f32.mrf.mxu1  ;;  %v7787_v20 = vld [vmem:[%s13955_s1 + $0x360] sm:$0xff] }
 0x1ed   :  { %6737 = vmatprep.mubr.msk.f32.mxu0 %vm1141_vm0, %v7786_v31  ;;  %6793 = vmatprep.mubr.msk.f32.mxu1 %vm1141_vm0, %v7786_v31  ;;  %14662 = vst [vmem:[#allocation100_spill] sm:$0xff] %v10634_v21  ;;  %v7788_v31 = vld [vmem:[%s13955_s1 + $0x378] sm:$0xff] }
 0x1ee   :  { %v10632_v48 = vpop.f32.mrf.mxu0  ;;  %v10641_v50 = vpop.f32.mrf.mxu1 }
 0x1ef   :  { %14663 = vst [vmem:[#allocation23_spill] sm:$0xff] %v10641_v50 }
 0x1f0   :  { %v10636_v17 = vpop.f32.mrf.mxu0  ;;  %2501 = vmatmul.mubr.f32.gmra.mxu0 %v7787_v20  ;;  %2902 = vmatmul.mubr.f32.gmra.mxu1 %v7787_v20  ;;  %v10652_v49 = vpop.f32.mrf.mxu1  ;;  %v7789_v20 = vld [vmem:[%s13955_s1 + $0x370] sm:$0xff] }
 0x1f1   :  { %6738 = vmatprep.mubr.msk.f32.mxu0 %vm1141_vm0, %v7788_v31  ;;  %6794 = vmatprep.mubr.msk.f32.mxu1 %vm1141_vm0, %v7788_v31  ;;  %14666 = vst [vmem:[#allocation78_spill] sm:$0xff] %v10652_v49  ;;  %v7790_v31 = vld [vmem:[%s13955_s1 + $0x8] sm:$0xff] }
 0x1f2   :  { %v10650_v14 = vpop.f32.mrf.mxu0  ;;  %v10661_v63 = vpop.f32.mrf.mxu1 }
 0x1f3   :  { %14665 = vst [vmem:[#allocation24_spill] sm:$0xff] %v10650_v14  ;;  %14669 = vst [vmem:[#allocation25_spill] sm:$0xff] %v10661_v63 }
 0x1f4   :  { %v10656_v51 = vpop.f32.mrf.mxu0  ;;  %2507 = vmatmul.mubr.f32.gmra.mxu0 %v7789_v20  ;;  %2908 = vmatmul.mubr.f32.gmra.mxu1 %v7789_v20  ;;  %v10672_v0 = vpop.f32.mrf.mxu1 }
 0x1f5   :  { %14668 = vst [vmem:[#allocation102_spill] sm:$0xff] %v10656_v51  ;;  %6795 = vmatprep.mubr.msk.f32.mxu0 %vm1141_vm0, %v7790_v31  ;;  %6851 = vmatprep.mubr.msk.f32.mxu1 %vm1141_vm0, %v7790_v31  ;;  %14671 = vst [vmem:[#allocation26_spill] sm:$0xff] %v10672_v0  ;;  %v5154_v31 = vmax.f32 %v4958_v34, 0.0  ;;  %v5140_v34 = vmax.f32 %v4944_v8, 0.0  ;;  %v6500_v8 = vld [vmem:[%s13954_s0 + $0x370] sm:$0xff] }
 0x1f6   :  { %v10670_v2 = vpop.f32.mrf.mxu0  ;;  %v10680_v29 = vpop.f32.mrf.mxu1 }
 0x1f7   :  { %14670 = vst [vmem:[#allocation79_spill] sm:$0xff] %v10670_v2  ;;  %14674 = vst [vmem:[#allocation104_spill] sm:$0xff] %v10680_v29 }
 0x1f8   :  { %v10678_v20 = vpop.f32.mrf.mxu0  ;;  %2979 = vmatmul.mubr.f32.vlgmr.msra.gmra.mxu0 %v7791_v55  ;;  %3380 = vmatmul.mubr.f32.vlgmr.msra.gmra.mxu1 %v7791_v55  ;;  %v10697_v37 = vpop.f32.mrf.mxu1  ;;  %v4916_v55 = vadd.f32 %v10643_v58, %v10393_v40  ;;  %v5126_v40 = vmax.f32 %v4930_v35, 0.0 }
 0x1f9   :  { %14673 = vst [vmem:[#allocation103_spill] sm:$0xff] %v10678_v20  ;;  %7242 = vmatpush3.msra.mxu1 %v14676_v15  ;;  %6796 = vmatprep.mubr.msk.f32.mxu0 %vm1141_vm0, %v7792_v3  ;;  %14678 = vst [vmem:[#allocation28_spill] sm:$0xff] %v10697_v37  ;;  %v14679_v15 = vld [vmem:[#allocation43_spill] sm:$0xff]  ;;  %v7830_v37 = vld [vmem:[%s13955_s1 + $0x108] sm:$0xff] }
 0x1fa   :  { %7243 = vmatprep.subr.mxu1 %v5154_v31  ;;  %v10695_v44 = vpop.f32.mrf.mxu0  ;;  %6852 = vmatprep.mubr.msk.f32.mxu1 %vm1141_vm0, %v7792_v3  ;;  %v10705_v36 = vpop.f32.mrf.mxu1  ;;  %v7794_v3 = vld [vmem:[%s13955_s1 + $0x28] sm:$0xff]  ;;  %v5112_v35 = vmax.f32 %v4916_v55, 0.0  ;;  %v4874_v55 = vadd.f32 %v10685_v18, %v10294_v56  ;;  %v7797_v18 = vld [vmem:[%s13955_s1 + $0x30] sm:$0xff]  ;;  %v510_v20 = vld [vmem:[%s13954_s0 + $0x178] sm:$0xff] }
 0x1fb   :  { %14677 = vst [vmem:[#allocation81_spill] sm:$0xff] %v10695_v44  ;;  %7244 = vmatpush3.msra.mxu1 %v5154_v31  ;;  %3717 = vmatpush1.msra.mxu0 %v14679_v15  ;;  %14681 = vst [vmem:[#allocation105_spill] sm:$0xff] %v10705_v36  ;;  %v10713_v31 = vpop.permute.xlu0 %4746  ;;  %v4902_v15 = vadd.f32 %v10654_v11, %v10361_v53  ;;  %v7795_v53 = vld [vmem:[%s13955_s1 + $0x20] sm:$0xff] }
 0x1fc   :  { %7245 = vmatprep.subr.mxu1 %v5140_v34  ;;  %v10703_v12 = vpop.f32.mrf.mxu0  ;;  %2985 = vmatmul.mubr.f32.gmra.mxu0 %v7793_v22  ;;  %14682 = vst [vmem:[#allocation106_spill] sm:$0xff] %v10713_v31  ;;  %v10723_v16 = vpop.f32.mrf.mxu1  ;;  %v4860_v56 = vadd.f32 %v10713_v31, %v10262_v39  ;;  %v5070_v11 = vmax.f32 %v4874_v55, 0.0 }
 0x1fd   :  { %14680 = vst [vmem:[#allocation82_spill] sm:$0xff] %v10703_v12  ;;  %3386 = vmatmul.mubr.f32.gmra.mxu1 %v7793_v22  ;;  %6797 = vmatprep.mubr.msk.f32.mxu0 %vm1141_vm0, %v7794_v3  ;;  %14684 = vst [vmem:[#allocation83_spill] sm:$0xff] %v10723_v16  ;;  %v4888_v22 = vadd.f32 %v10676_v33, %v10329_v24  ;;  %v10759_v33 = vpop.permute.xlu1 %4731 }
 0x1fe   :  { %7246 = vmatpush3.msra.mxu1 %v5140_v34  ;;  %v10721_v58 = vpop.f32.mrf.mxu0  ;;  %6853 = vmatprep.mubr.msk.f32.mxu1 %vm1141_vm0, %v7794_v3  ;;  %v10732_v12 = vpop.f32.mrf.mxu1  ;;  %v5098_v34 = vmax.f32 %v4902_v15, 0.0  ;;  %14693 = vst [vmem:[#allocation109_spill] sm:$0xff] %v10759_v33  ;;  %v5056_v31 = vmax.f32 %v4860_v56, 0.0  ;;  %v4818_v56 = vadd.f32 %v10759_v33, %v10166_v43  ;;  %v7801_v33 = vld [vmem:[%s13955_s1 + $0x50] sm:$0xff] }
 0x1ff   :  { %14683 = vst [vmem:[#allocation29_spill] sm:$0xff] %v10721_v58  ;;  %7247 = vmatprep.subr.mxu1 %v5126_v40  ;;  %3718 = vmatprep.subr.mxu0 %v6500_v8  ;;  %14687 = vst [vmem:[#allocation107_spill] sm:$0xff] %v10732_v12  ;;  %v7796_v8 = vld [vmem:[%s13955_s1 + $0x38] sm:$0xff]  ;;  %v5084_v15 = vmax.f32 %v4888_v22, 0.0  ;;  %v4846_v22 = vadd.f32 %v10726_v4, %v10230_v26 }
 0x200   :  { %7248 = vmatpush3.msra.mxu1 %v5126_v40  ;;  %v10730_v36 = vpop.f32.mrf.mxu0  ;;  %2991 = vmatmul.mubr.f32.gmra.mxu0 %v7795_v53  ;;  %v10741_v24 = vpop.f32.mrf.mxu1 }
 0x201   :  { %14686 = vst [vmem:[#allocation84_spill] sm:$0xff] %v10730_v36  ;;  %7249 = vmatprep.subr.mxu1 %v5112_v35  ;;  %3392 = vmatmul.mubr.f32.gmra.mxu1 %v7795_v53  ;;  %14689 = vst [vmem:[#allocation31_spill] sm:$0xff] %v10741_v24  ;;  %v10747_v40 = vpop.permute.xlu0 %4736  ;;  %v6528_v36 = vld [vmem:[%s13954_s0 + $0x278] sm:$0xff] }
 0x202   :  { %7250 = vmatpush3.msra.mxu1 %v5112_v35  ;;  %v10739_v3 = vpop.f32.mrf.mxu0  ;;  %6798 = vmatprep.mubr.msk.f32.mxu0 %vm1141_vm0, %v7796_v8  ;;  %14690 = vst [vmem:[#allocation85_spill] sm:$0xff] %v10747_v40  ;;  %v10754_v53 = vpop.f32.mrf.mxu1 }
 0x203   :  { %14688 = vst [vmem:[#allocation108_spill] sm:$0xff] %v10739_v3  ;;  %7251 = vmatprep.subr.mxu1 %v5098_v34  ;;  %6854 = vmatprep.mubr.msk.f32.mxu1 %vm1141_vm0, %v7796_v8  ;;  %14692 = vst [vmem:[#allocation86_spill] sm:$0xff] %v10754_v53  ;;  %v7798_v8 = vld [vmem:[%s13955_s1 + $0x48] sm:$0xff] }
 0x204   :  { %7252 = vmatpush3.msra.mxu1 %v5098_v34  ;;  %v10752_v35 = vpop.f32.mrf.mxu0  ;;  %2997 = vmatmul.mubr.f32.gmra.mxu0 %v7797_v18  ;;  %v10765_v34 = vpop.f32.mrf.mxu1 }
 0x205   :  { %14691 = vst [vmem:[#allocation32_spill] sm:$0xff] %v10752_v35  ;;  %7253 = vmatprep.subr.mxu1 %v5084_v15  ;;  %3398 = vmatmul.mubr.f32.gmra.mxu1 %v7797_v18  ;;  %14695 = vst [vmem:[#allocation34_spill] sm:$0xff] %v10765_v34  ;;  %v4832_v18 = vadd.f32 %v10747_v40, %v10198_v57  ;;  %v10781_v4 = vpop.permute.xlu0 %4726  ;;  %v5042_v34 = vmax.f32 %v4846_v22, 0.0  ;;  %v10793_v40 = vpop.permute.xlu1 %4721  ;;  %v6542_v35 = vld [vmem:[%s13954_s0 + $0x2f8] sm:$0xff] }
 0x206   :  { %7254 = vmatpush3.msra.mxu1 %v5084_v15  ;;  %v10763_v39 = vpop.f32.mrf.mxu0  ;;  %6799 = vmatprep.mubr.msk.f32.mxu0 %vm1141_vm0, %v7798_v8  ;;  %v10776_v55 = vpop.f32.mrf.mxu1  ;;  %v7799_v15 = vld [vmem:[%s13955_s1 + $0x40] sm:$0xff]  ;;  %14698 = vst [vmem:[#allocation88_spill] sm:$0xff] %v10781_v4  ;;  %14701 = vst [vmem:[#allocation36_spill] sm:$0xff] %v10793_v40  ;;  %v4804_v43 = vadd.f32 %v10781_v4, %v10134_v59 }
 0x207   :  { %14694 = vst [vmem:[#allocation110_spill] sm:$0xff] %v10763_v39  ;;  %7255 = vmatprep.subr.mxu1 %v5070_v11  ;;  %6855 = vmatprep.mubr.msk.f32.mxu1 %vm1141_vm0, %v7798_v8  ;;  %14697 = vst [vmem:[#allocation35_spill] sm:$0xff] %v10776_v55  ;;  %v7800_v8 = vld [vmem:[%s13955_s1 + $0x58] sm:$0xff]  ;;  %v5028_v22 = vmax.f32 %v4832_v18, 0.0  ;;  %v7845_v39 = vld [vmem:[%s13955_s1 + $0x170] sm:$0xff] }
 0x208   :  { %7256 = vmatpush3.msra.mxu1 %v5070_v11  ;;  %v10774_v26 = vpop.f32.mrf.mxu0  ;;  %3003 = vmatmul.mubr.f32.gmra.mxu0 %v7799_v15  ;;  %v10787_v11 = vpop.f32.mrf.mxu1  ;;  %v5000_v4 = vmax.f32 %v4804_v43, 0.0 }
 0x209   :  { %14696 = vst [vmem:[#allocation87_spill] sm:$0xff] %v10774_v26  ;;  %7257 = vmatprep.subr.mxu1 %v5056_v31  ;;  %3404 = vmatmul.mubr.f32.gmra.mxu1 %v7799_v15  ;;  %14700 = vst [vmem:[#allocation112_spill] sm:$0xff] %v10787_v11  ;;  %v5014_v11 = vmax.f32 %v4818_v56, 0.0  ;;  %v6555_v26 = vld [vmem:[%s13954_s0 + $0x370] sm:$0xff] }
 0x20a   :  { %7258 = vmatpush3.msra.mxu1 %v5056_v31  ;;  %v10785_v57 = vpop.f32.mrf.mxu0  ;;  %6800 = vmatprep.mubr.msk.f32.mxu0 %vm1141_vm0, %v7800_v8  ;;  %v10800_v15 = vpop.f32.mrf.mxu1 }
 0x20b   :  { %14699 = vst [vmem:[#allocation111_spill] sm:$0xff] %v10785_v57  ;;  %7259 = vmatprep.subr.mxu1 %v5042_v34  ;;  %6856 = vmatprep.mubr.msk.f32.mxu1 %vm1141_vm0, %v7800_v8  ;;  %14703 = vst [vmem:[#allocation37_spill] sm:$0xff] %v10800_v15  ;;  %v4790_v8 = vadd.f32 %v10793_v40, %v10102_v10  ;;  %v6556_v57 = vld [vmem:[%s13954_s0 + $0x378] sm:$0xff] }
 0x20c   :  { %7260 = vmatpush3.msra.mxu1 %v5042_v34  ;;  %v10798_v31 = vpop.f32.mrf.mxu0  ;;  %3009 = vmatmul.mubr.f32.gmra.mxu0 %v7801_v33  ;;  %v10809_v59 = vpop.f32.mrf.mxu1  ;;  %v7802_v34 = vld [vmem:[%s13955_s1 + $0x68] sm:$0xff] }
 0x20d   :  { %14702 = vst [vmem:[#allocation89_spill] sm:$0xff] %v10798_v31  ;;  %7261 = vmatprep.subr.mxu1 %v5028_v22  ;;  %3410 = vmatmul.mubr.f32.gmra.mxu1 %v7801_v33  ;;  %14705 = vst [vmem:[#allocation113_spill] sm:$0xff] %v10809_v59  ;;  %v10818_v33 = vadd.f32 %v10522_v19, %v10506_v30  ;;  %v4986_v30 = vmax.f32 %v4790_v8, 0.0  ;;  %v7804_v19 = vld [vmem:[%s13955_s1 + $0x78] sm:$0xff] }
 0x20e   :  { %7262 = vmatpush3.msra.mxu1 %v5028_v22  ;;  %v10807_v18 = vpop.f32.mrf.mxu0  ;;  %6801 = vmatprep.mubr.msk.f32.mxu0 %vm1141_vm0, %v7802_v34  ;;  %v10822_v56 = vpop.f32.mrf.mxu1  ;;  %v7803_v22 = vld [vmem:[%s13955_s1 + $0x60] sm:$0xff] }
 0x20f   :  { %14704 = vst [vmem:[#allocation90_spill] sm:$0xff] %v10807_v18  ;;  %7263 = vmatprep.subr.mxu1 %v5014_v11  ;;  %6857 = vmatprep.mubr.msk.f32.mxu1 %vm1141_vm0, %v7802_v34  ;;  %14706 = vst [vmem:[#allocation114_spill] sm:$0xff] %v10818_v33  ;;  %v6570_v18 = vld [vmem:[%s13954_s0 + $0x3f8] sm:$0xff] }
 0x210   :  { %7264 = vmatpush3.msra.mxu1 %v5014_v11  ;;  %v10820_v10 = vpop.f32.mrf.mxu0  ;;  %14707 = vst [vmem:[#allocation39_spill] sm:$0xff] %v10822_v56  ;;  %3015 = vmatmul.mubr.f32.gmra.mxu0 %v7803_v22  ;;  %v10833_v34 = vpop.f32.mrf.mxu1  ;;  %v7805_v56 = vld [vmem:[%s13955_s1 + $0x70] sm:$0xff] }
 0x211   :  { %7265 = vmatprep.subr.mxu1 %v5000_v4  ;;  %3416 = vmatmul.mubr.f32.gmra.mxu1 %v7803_v22  ;;  %14708 = vst [vmem:[#allocation33_spill] sm:$0xff] %v10833_v34 }
 0x212   :  { %7266 = vmatpush3.msra.mxu1 %v5000_v4  ;;  %v10831_v11 = vpop.f32.mrf.mxu0  ;;  %6802 = vmatprep.mubr.msk.f32.mxu0 %vm1141_vm0, %v7804_v19  ;;  %v14093_v4 = vmax.f32 %v10818_v33, 0.0  ;;  %v10847_v22 = vpop.f32.mrf.mxu1  ;;  %v7806_v33 = vld [vmem:[%s13955_s1 + $0x88] sm:$0xff] }
 0x213   :  { %7267 = vmatprep.subr.mxu1 %v4986_v30  ;;  %6858 = vmatprep.mubr.msk.f32.mxu1 %vm1141_vm0, %v7804_v19  ;;  %14709 = vst [vmem:[#allocation40_spill] sm:$0xff] %v10847_v22  ;;  %v7807_v19 = vld [vmem:[%s13954_s0 + $0x368] sm:$0xff] }
 0x214   :  { %7268 = vmatpush3.msra.mxu1 %v4986_v30  ;;  %v10845_v8 = vpop.f32.mrf.mxu0  ;;  %3021 = vmatmul.mubr.f32.gmra.mxu0 %v7805_v56  ;;  %v6486_v30 = vld [vmem:[%s13954_s0 + $0x2f0] sm:$0xff]  ;;  %v10863_v34 = vpop.f32.mrf.mxu1 }
 0x215   :  { %7272 = vmatprep.subr.mxu1 %v14093_v4  ;;  %3422 = vmatmul.mubr.f32.gmra.mxu1 %v7805_v56  ;;  %14710 = vst [vmem:[#allocation91_spill] sm:$0xff] %v10863_v34  ;;  %v7809_v4 = vld [vmem:[%s13955_s1 + $0x98] sm:$0xff]  ;;  %v7810_v56 = vld [vmem:[%s13954_s0 + $0x2e8] sm:$0xff] }
 0x216   :  { %v10861_v40 = vpop.f32.mrf.mxu0  ;;  %6803 = vmatprep.mubr.msk.f32.mxu0 %vm1141_vm0, %v7806_v33  ;;  %6859 = vmatprep.mubr.msk.f32.mxu1 %vm1141_vm0, %v7806_v33  ;;  %v10879_v22 = vpop.f32.mrf.mxu1  ;;  %v10887_v33 = vld [vmem:[%s13954_s0 + $0x270] sm:$0xff] }
 0x217   :  { %3719 = vmatpush1.msra.mxu0 %v7807_v19  ;;  %14711 = vst [vmem:[#allocation115_spill] sm:$0xff] %v10879_v22  ;;  %v7824_v19 = vld [vmem:[%s13955_s1 + $0xe8] sm:$0xff] }
 0x218   :  { %v10877_v43 = vpop.f32.mrf.mxu0  ;;  %3027 = vmatmul.mubr.f32.gmra.mxu0 %v7808_v25  ;;  %3720 = vmatprep.subr.mxu0 %v6486_v30  ;;  %v10899_v30 = vpop.f32.mrf.mxu1 }
 0x219   :  { %3428 = vmatmul.mubr.f32.gmra.mxu1 %v7808_v25  ;;  %6804 = vmatprep.mubr.msk.f32.mxu0 %vm1141_vm0, %v7809_v4  ;;  %14713 = vst [vmem:[#allocation41_spill] sm:$0xff] %v10899_v30  ;;  %v7812_v30 = vld [vmem:[%s13955_s1 + $0xa8] sm:$0xff] }
 0x21a   :  { %v10897_v34 = vpop.f32.mrf.mxu0  ;;  %6860 = vmatprep.mubr.msk.f32.mxu1 %vm1141_vm0, %v7809_v4  ;;  %3721 = vmatpush1.msra.mxu0 %v7810_v56  ;;  %v10912_v7 = vpop.f32.mrf.mxu1  ;;  %v7811_v4 = vld [vmem:[%s13955_s1 + $0x90] sm:$0xff]  ;;  %v7813_v25 = vld [vmem:[%s13954_s0 + $0x268] sm:$0xff] }
 0x21b   :  { %14712 = vst [vmem:[#allocation116_spill] sm:$0xff] %v10897_v34  ;;  %3722 = vmatprep.subr.mxu0 %v10887_v33  ;;  %14714 = vst [vmem:[#allocation92_spill] sm:$0xff] %v10912_v7  ;;  %v10920_v56 = vld [vmem:[%s13954_s0 + $0x1f0] sm:$0xff] }
 0x21c   :  { %v10910_v22 = vpop.f32.mrf.mxu0  ;;  %3033 = vmatmul.mubr.f32.gmra.mxu0 %v7811_v4  ;;  %v10932_v34 = vpop.f32.mrf.mxu1 }
 0x21d   :  { %3434 = vmatmul.mubr.f32.gmra.mxu1 %v7811_v4  ;;  %6805 = vmatprep.mubr.msk.f32.mxu0 %vm1141_vm0, %v7812_v30  ;;  %14716 = vst [vmem:[#allocation93_spill] sm:$0xff] %v10932_v34  ;;  %v7815_v34 = vld [vmem:[%s13955_s1 + $0xb8] sm:$0xff]  ;;  %v7816_v4 = vld [vmem:[%s13954_s0 + $0x1e8] sm:$0xff] }
 0x21e   :  { %v10930_v27 = vpop.f32.mrf.mxu0  ;;  %6861 = vmatprep.mubr.msk.f32.mxu1 %vm1141_vm0, %v7812_v30  ;;  %3723 = vmatpush1.msra.mxu0 %v7813_v25  ;;  %v10945_v52 = vpop.f32.mrf.mxu1  ;;  %v7814_v30 = vld [vmem:[%s13955_s1 + $0xa0] sm:$0xff]  ;;  %v10953_v25 = vld [vmem:[%s13954_s0 + $0x170] sm:$0xff] }
 0x21f   :  { %14715 = vst [vmem:[#allocation42_spill] sm:$0xff] %v10930_v27  ;;  %3724 = vmatprep.subr.mxu0 %v10920_v56  ;;  %14717 = vst [vmem:[#allocation117_spill] sm:$0xff] %v10945_v52 }
 0x220   :  { %v10943_v7 = vpop.f32.mrf.mxu0  ;;  %3039 = vmatmul.mubr.f32.gmra.mxu0 %v7814_v30  ;;  %v10965_v27 = vpop.f32.mrf.mxu1 }
 0x221   :  { %3440 = vmatmul.mubr.f32.gmra.mxu1 %v7814_v30  ;;  %6806 = vmatprep.mubr.msk.f32.mxu0 %vm1141_vm0, %v7815_v34  ;;  %14719 = vst [vmem:[#allocation44_spill] sm:$0xff] %v10965_v27  ;;  %v7818_v27 = vld [vmem:[%s13955_s1 + $0xc8] sm:$0xff] }
 0x222   :  { %v10963_v5 = vpop.f32.mrf.mxu0  ;;  %6862 = vmatprep.mubr.msk.f32.mxu1 %vm1141_vm0, %v7815_v34  ;;  %3725 = vmatpush1.msra.mxu0 %v7816_v4  ;;  %v10978_v6 = vpop.f32.mrf.mxu1  ;;  %v7817_v34 = vld [vmem:[%s13955_s1 + $0xb0] sm:$0xff]  ;;  %v7819_v30 = vld [vmem:[%s13954_s0 + $0x168] sm:$0xff] }
 0x223   :  { %14718 = vst [vmem:[#allocation118_spill] sm:$0xff] %v10963_v5  ;;  %3726 = vmatprep.subr.mxu0 %v10953_v25  ;;  %14720 = vst [vmem:[#allocation38_spill] sm:$0xff] %v10978_v6  ;;  %v10986_v4 = vld [vmem:[%s13954_s0 + $0xf0] sm:$0xff] }
 0x224   :  { %v10976_v52 = vpop.f32.mrf.mxu0  ;;  %3045 = vmatmul.mubr.f32.gmra.mxu0 %v7817_v34  ;;  %v10998_v5 = vpop.f32.mrf.mxu1 }
 0x225   :  { %3446 = vmatmul.mubr.f32.gmra.mxu1 %v7817_v34  ;;  %6807 = vmatprep.mubr.msk.f32.mxu0 %vm1141_vm0, %v7818_v27  ;;  %14722 = vst [vmem:[#allocation94_spill] sm:$0xff] %v10998_v5  ;;  %v7821_v5 = vld [vmem:[%s13955_s1 + $0xd8] sm:$0xff]  ;;  %v7822_v34 = vld [vmem:[%s13954_s0 + $0xe8] sm:$0xff] }
 0x226   :  { %v10996_v1 = vpop.f32.mrf.mxu0  ;;  %6863 = vmatprep.mubr.msk.f32.mxu1 %vm1141_vm0, %v7818_v27  ;;  %3727 = vmatpush1.msra.mxu0 %v7819_v30  ;;  %v11011_v42 = vpop.f32.mrf.mxu1  ;;  %v7820_v27 = vld [vmem:[%s13955_s1 + $0xc0] sm:$0xff]  ;;  %v11019_v30 = vld [vmem:[%s13954_s0 + $0x70] sm:$0xff] }
 0x227   :  { %14721 = vst [vmem:[#allocation45_spill] sm:$0xff] %v10996_v1  ;;  %3728 = vmatprep.subr.mxu0 %v10986_v4  ;;  %14723 = vst [vmem:[#allocation119_spill] sm:$0xff] %v11011_v42 }
 0x228   :  { %v11009_v6 = vpop.f32.mrf.mxu0  ;;  %3051 = vmatmul.mubr.f32.gmra.mxu0 %v7820_v27  ;;  %v11031_v1 = vpop.f32.mrf.mxu1 }
 0x229   :  { %3452 = vmatmul.mubr.f32.gmra.mxu1 %v7820_v27  ;;  %6808 = vmatprep.mubr.msk.f32.mxu0 %vm1141_vm0, %v7821_v5  ;;  %14725 = vst [vmem:[#allocation46_spill] sm:$0xff] %v11031_v1  ;;  %v6444_v27 = vld [vmem:[%s13954_s0 + $0x368] sm:$0xff] }
 0x22a   :  { %v11029_v21 = vpop.f32.mrf.mxu0  ;;  %6864 = vmatprep.mubr.msk.f32.mxu1 %vm1141_vm0, %v7821_v5  ;;  %3729 = vmatpush1.msra.mxu0 %v7822_v34  ;;  %v11044_v50 = vpop.f32.mrf.mxu1  ;;  %v7823_v5 = vld [vmem:[%s13955_s1 + $0xd0] sm:$0xff]  ;;  %v7825_v34 = vld [vmem:[%s13954_s0 + $0x68] sm:$0xff] }
 0x22b   :  { %14724 = vst [vmem:[#allocation120_spill] sm:$0xff] %v11029_v21  ;;  %3730 = vmatprep.subr.mxu0 %v11019_v30  ;;  %14727 = vst [vmem:[#allocation47_spill] sm:$0xff] %v11044_v50  ;;  %v7826_v50 = vld [vmem:[%s13954_s0 + $0x3e8] sm:$0xff]  ;;  %v496_v21 = vld [vmem:[%s13954_s0 + $0xf8] sm:$0xff] }
 0x22c   :  { %v11042_v42 = vpop.f32.mrf.mxu0  ;;  %3057 = vmatmul.mubr.f32.gmra.mxu0 %v7823_v5  ;;  %v11059_v49 = vpop.f32.mrf.mxu1 }
 0x22d   :  { %14726 = vst [vmem:[#allocation95_spill] sm:$0xff] %v11042_v42  ;;  %3458 = vmatmul.mubr.f32.gmra.mxu1 %v7823_v5  ;;  %6809 = vmatprep.mubr.msk.f32.mxu0 %vm1141_vm0, %v7824_v19  ;;  %14729 = vst [vmem:[#allocation43_spill] sm:$0xff] %v11059_v49  ;;  %v7828_v49 = vld [vmem:[%s13955_s1 + $0xf8] sm:$0xff] }
 0x22e   :  { %v11057_v1 = vpop.f32.mrf.mxu0  ;;  %6865 = vmatprep.mubr.msk.f32.mxu1 %vm1141_vm0, %v7824_v19  ;;  %3731 = vmatpush1.msra.mxu0 %v7825_v34  ;;  %v6457_v19 = vld [vmem:[%s13954_s0 + $0x3e0] sm:$0xff]  ;;  %v11077_v42 = vpop.f32.mrf.mxu1 }
 0x22f   :  { %14728 = vst [vmem:[#allocation96_spill] sm:$0xff] %v11057_v1  ;;  %3732 = vmatprep.subr.mxu0 %v7826_v50  ;;  %14731 = vst [vmem:[#allocation123_spill] sm:$0xff] %v11077_v42  ;;  %v7827_v34 = vld [vmem:[%s13955_s1 + $0xe0] sm:$0xff] }
 0x230   :  { %v11075_v63 = vpop.f32.mrf.mxu0  ;;  %3063 = vmatmul.mubr.f32.gmra.mxu0 %v7827_v34  ;;  %v11095_v1 = vpop.f32.mrf.mxu1 }
 0x231   :  { %14730 = vst [vmem:[#allocation122_spill] sm:$0xff] %v11075_v63  ;;  %3464 = vmatmul.mubr.f32.gmra.mxu1 %v7827_v34  ;;  %6810 = vmatprep.mubr.msk.f32.mxu0 %vm1141_vm0, %v7828_v49  ;;  %14733 = vst [vmem:[#allocation125_spill] sm:$0xff] %v11095_v1  ;;  %v6443_v34 = vld [vmem:[%s13954_s0 + $0x360] sm:$0xff] }
 0x232   :  { %v11093_v0 = vpop.f32.mrf.mxu0  ;;  %6866 = vmatprep.mubr.msk.f32.mxu1 %vm1141_vm0, %v7828_v49  ;;  %3733 = vmatpush1.msra.mxu0 %v6457_v19  ;;  %v11107_v29 = vpop.f32.mrf.mxu1  ;;  %v7829_v49 = vld [vmem:[%s13955_s1 + $0xf0] sm:$0xff]  ;;  %v6430_v19 = vld [vmem:[%s13954_s0 + $0x2e8] sm:$0xff] }
 0x233   :  { %14732 = vst [vmem:[#allocation124_spill] sm:$0xff] %v11093_v0  ;;  %3734 = vmatprep.subr.mxu0 %v6444_v27  ;;  %14735 = vst [vmem:[#allocation127_spill] sm:$0xff] %v11107_v29  ;;  %v7832_v27 = vld [vmem:[%s13955_s1 + $0x118] sm:$0xff] }
 0x234   :  { %v11105_v42 = vpop.f32.mrf.mxu0  ;;  %3069 = vmatmul.mubr.f32.gmra.mxu0 %v7829_v49  ;;  %v11125_v44 = vpop.f32.mrf.mxu1 }
 0x235   :  { %14734 = vst [vmem:[#allocation126_spill] sm:$0xff] %v11105_v42  ;;  %3470 = vmatmul.mubr.f32.gmra.mxu1 %v7829_v49  ;;  %6811 = vmatprep.mubr.msk.f32.mxu0 %vm1141_vm0, %v7830_v37  ;;  %14739 = vst [vmem:[#allocation129_spill] sm:$0xff] %v11125_v44  ;;  %v6429_v49 = vld [vmem:[%s13954_s0 + $0x2e0] sm:$0xff]  ;;  %v524_v42 = vld [vmem:[%s13954_s0 + $0x1f8] sm:$0xff] }
 0x236   :  { %v11123_v0 = vpop.f32.mrf.mxu0  ;;  %6867 = vmatprep.mubr.msk.f32.mxu1 %vm1141_vm0, %v7830_v37  ;;  %3735 = vmatpush1.msra.mxu0 %v6443_v34  ;;  %v11137_v50 = vpop.f32.mrf.mxu1  ;;  %v7831_v37 = vld [vmem:[%s13955_s1 + $0x100] sm:$0xff]  ;;  %v6416_v34 = vld [vmem:[%s13954_s0 + $0x268] sm:$0xff] }
 0x237   :  { %14738 = vst [vmem:[#allocation128_spill] sm:$0xff] %v11123_v0  ;;  %3736 = vmatprep.subr.mxu0 %v6430_v19  ;;  %14741 = vst [vmem:[#allocation131_spill] sm:$0xff] %v11137_v50  ;;  %v7834_v19 = vld [vmem:[%s13955_s1 + $0x128] sm:$0xff] }
 0x238   :  { %v11135_v29 = vpop.f32.mrf.mxu0  ;;  %3075 = vmatmul.mubr.f32.gmra.mxu0 %v7831_v37  ;;  %v11155_v16 = vpop.f32.mrf.mxu1 }
 0x239   :  { %14740 = vst [vmem:[#allocation130_spill] sm:$0xff] %v11135_v29  ;;  %3476 = vmatmul.mubr.f32.gmra.mxu1 %v7831_v37  ;;  %6812 = vmatprep.mubr.msk.f32.mxu0 %vm1141_vm0, %v7832_v27  ;;  %14743 = vst [vmem:[#allocation133_spill] sm:$0xff] %v11155_v16  ;;  %v6415_v37 = vld [vmem:[%s13954_s0 + $0x260] sm:$0xff] }
 0x23a   :  { %v11153_v44 = vpop.f32.mrf.mxu0  ;;  %6868 = vmatprep.mubr.msk.f32.mxu1 %vm1141_vm0, %v7832_v27  ;;  %3737 = vmatpush1.msra.mxu0 %v6429_v49  ;;  %v11167_v12 = vpop.f32.mrf.mxu1  ;;  %v7833_v27 = vld [vmem:[%s13955_s1 + $0x110] sm:$0xff]  ;;  %v75_v49 = vld [vmem:[%s13954_s0 + $0x1e8] sm:$0xff]  ;;  %v7847_v29 = vld [vmem:[%s13955_s1 + $0x180] sm:$0xff] }
 0x23b   :  { %14742 = vst [vmem:[#allocation132_spill] sm:$0xff] %v11153_v44  ;;  %3738 = vmatprep.subr.mxu0 %v6416_v34  ;;  %14745 = vst [vmem:[#allocation135_spill] sm:$0xff] %v11167_v12  ;;  %v7836_v34 = vld [vmem:[%s13955_s1 + $0x138] sm:$0xff]  ;;  %v6541_v44 = vld [vmem:[%s13954_s0 + $0x2f0] sm:$0xff] }
 0x23c   :  { %v11165_v50 = vpop.f32.mrf.mxu0  ;;  %3081 = vmatmul.mubr.f32.gmra.mxu0 %v7833_v27  ;;  %v11185_v24 = vpop.f32.mrf.mxu1 }
 0x23d   :  { %14744 = vst [vmem:[#allocation134_spill] sm:$0xff] %v11165_v50  ;;  %3482 = vmatmul.mubr.f32.gmra.mxu1 %v7833_v27  ;;  %6813 = vmatprep.mubr.msk.f32.mxu0 %vm1141_vm0, %v7834_v19  ;;  %14747 = vst [vmem:[#allocation137_spill] sm:$0xff] %v11185_v24  ;;  %v74_v27 = vld [vmem:[%s13954_s0 + $0x1e0] sm:$0xff] }
 0x23e   :  { %v11183_v16 = vpop.f32.mrf.mxu0  ;;  %6869 = vmatprep.mubr.msk.f32.mxu1 %vm1141_vm0, %v7834_v19  ;;  %3739 = vmatpush1.msra.mxu0 %v6415_v37  ;;  %v11197_v53 = vpop.f32.mrf.mxu1  ;;  %v7835_v19 = vld [vmem:[%s13955_s1 + $0x120] sm:$0xff]  ;;  %v61_v37 = vld [vmem:[%s13954_s0 + $0x168] sm:$0xff] }
 0x23f   :  { %14746 = vst [vmem:[#allocation136_spill] sm:$0xff] %v11183_v16  ;;  %3740 = vmatprep.subr.mxu0 %v75_v49  ;;  %14750 = vst [vmem:[#allocation139_spill] sm:$0xff] %v11197_v53  ;;  %v7838_v49 = vld [vmem:[%s13955_s1 + $0x148] sm:$0xff] }
 0x240   :  { %v11195_v12 = vpop.f32.mrf.mxu0  ;;  %3087 = vmatmul.mubr.f32.gmra.mxu0 %v7835_v19  ;;  %v11215_v50 = vpop.f32.mrf.mxu1 }
 0x241   :  { %14749 = vst [vmem:[#allocation138_spill] sm:$0xff] %v11195_v12  ;;  %3488 = vmatmul.mubr.f32.gmra.mxu1 %v7835_v19  ;;  %6814 = vmatprep.mubr.msk.f32.mxu0 %vm1141_vm0, %v7836_v34  ;;  %14752 = vst [vmem:[#allocation141_spill] sm:$0xff] %v11215_v50  ;;  %v60_v19 = vld [vmem:[%s13954_s0 + $0x160] sm:$0xff] }
 0x242   :  { %v11213_v24 = vpop.f32.mrf.mxu0  ;;  %6870 = vmatprep.mubr.msk.f32.mxu1 %vm1141_vm0, %v7836_v34  ;;  %3741 = vmatpush1.msra.mxu0 %v74_v27  ;;  %v11227_v55 = vpop.f32.mrf.mxu1  ;;  %v7837_v34 = vld [vmem:[%s13955_s1 + $0x130] sm:$0xff]  ;;  %v47_v27 = vld [vmem:[%s13954_s0 + $0xe8] sm:$0xff] }
 0x243   :  { %14751 = vst [vmem:[#allocation140_spill] sm:$0xff] %v11213_v24  ;;  %3742 = vmatprep.subr.mxu0 %v61_v37  ;;  %14755 = vst [vmem:[#allocation143_spill] sm:$0xff] %v11227_v55  ;;  %v7843_v24 = vld [vmem:[%s13955_s1 + $0x160] sm:$0xff] }
 0x244   :  { %v11225_v53 = vpop.f32.mrf.mxu0  ;;  %3093 = vmatmul.mubr.f32.gmra.mxu0 %v7837_v34  ;;  %v11245_v12 = vpop.f32.mrf.mxu1 }
 0x245   :  { %14754 = vst [vmem:[#allocation142_spill] sm:$0xff] %v11225_v53  ;;  %3494 = vmatmul.mubr.f32.gmra.mxu1 %v7837_v34  ;;  %6815 = vmatprep.mubr.msk.f32.mxu0 %vm1141_vm0, %v7838_v49  ;;  %14757 = vst [vmem:[#allocation145_spill] sm:$0xff] %v11245_v12  ;;  %v46_v34 = vld [vmem:[%s13954_s0 + $0xe0] sm:$0xff]  ;;  %v6569_v53 = vld [vmem:[%s13954_s0 + $0x3f0] sm:$0xff] }
 0x246   :  { %v11243_v50 = vpop.f32.mrf.mxu0  ;;  %6871 = vmatprep.mubr.msk.f32.mxu1 %vm1141_vm0, %v7838_v49  ;;  %3743 = vmatpush1.msra.mxu0 %v60_v19  ;;  %v11257_v15 = vpop.f32.mrf.mxu1  ;;  %v7839_v49 = vld [vmem:[%s13955_s1 + $0x140] sm:$0xff]  ;;  %v33_v19 = vld [vmem:[%s13954_s0 + $0x68] sm:$0xff] }
 0x247   :  { %14756 = vst [vmem:[#allocation144_spill] sm:$0xff] %v11243_v50  ;;  %3744 = vmatprep.subr.mxu0 %v47_v27  ;;  %v7840_v27 = vld [vmem:[%s13955_s1 + $0x158] sm:$0xff]  ;;  %v32_v12 = vld [vmem:[%s13954_s0 + $0x60] sm:$0xff]  ;;  %v7841_v50 = vld [vmem:[%s13955_s1 + $0x150] sm:$0xff] }
 0x248   :  { %v11255_v55 = vpop.f32.mrf.mxu0  ;;  %3099 = vmatmul.mubr.f32.gmra.mxu0 %v7839_v49  ;;  %v11271_v37 = vpop.f32.mrf.mxu1 }
 0x249   :  { %3500 = vmatmul.mubr.f32.gmra.mxu1 %v7839_v49  ;;  %6816 = vmatprep.mubr.msk.f32.mxu0 %vm1141_vm0, %v7840_v27 }
 0x24a   :  { %v11269_v1 = vpop.f32.mrf.mxu0  ;;  %6872 = vmatprep.mubr.msk.f32.mxu1 %vm1141_vm0, %v7840_v27  ;;  %3745 = vmatpush1.msra.mxu0 %v46_v34  ;;  %v11279_v49 = vpop.f32.mrf.mxu1  ;;  %v7842_v34 = vld [vmem:[%s13955_s1 + $0x168] sm:$0xff] }
 0x24b   :  { %3746 = vmatprep.subr.mxu0 %v33_v19 }
 0x24c   :  { %v11277_v59 = vpop.f32.mrf.mxu0  ;;  %3105 = vmatmul.mubr.f32.gmra.mxu0 %v7841_v50  ;;  %v11293_v27 = vpop.f32.mrf.mxu1 }
 0x24d   :  { %3506 = vmatmul.mubr.f32.gmra.mxu1 %v7841_v50  ;;  %6817 = vmatprep.mubr.msk.f32.mxu0 %vm1141_vm0, %v7842_v34 }
 0x24e   :  { %v11291_v19 = vpop.f32.mrf.mxu0  ;;  %6873 = vmatprep.mubr.msk.f32.mxu1 %vm1141_vm0, %v7842_v34  ;;  %3747 = vmatpush1.msra.mxu0 %v32_v12  ;;  %v11301_v50 = vpop.f32.mrf.mxu1  ;;  %v7844_v12 = vld [vmem:[%s13955_s1 + $0x178] sm:$0xff] }
 0x24f   :  { %3764 = vmatprep.subr.mxu0 %v6570_v18 }
 0x250   :  { %v11299_v31 = vpop.f32.mrf.mxu0  ;;  %3111 = vmatmul.mubr.f32.gmra.mxu0 %v7843_v24  ;;  %v11315_v34 = vpop.f32.mrf.mxu1 }
 0x251   :  { %3512 = vmatmul.mubr.f32.gmra.mxu1 %v7843_v24  ;;  %6818 = vmatprep.mubr.msk.f32.mxu0 %vm1141_vm0, %v7844_v12 }
 0x252   :  { %v11313_v18 = vpop.f32.mrf.mxu0  ;;  %6874 = vmatprep.mubr.msk.f32.mxu1 %vm1141_vm0, %v7844_v12  ;;  %3765 = vmatpush2.msra.mxu0 %v6569_v53  ;;  %v11323_v24 = vpop.f32.mrf.mxu1  ;;  %v7846_v53 = vld [vmem:[%s13955_s1 + $0x188] sm:$0xff] }
 0x253   :  { %3766 = vmatprep.subr.mxu0 %v6556_v57 }
 0x254   :  { %v11321_v16 = vpop.f32.mrf.mxu0  ;;  %3117 = vmatmul.mubr.f32.gmra.mxu0 %v7845_v39  ;;  %v11337_v12 = vpop.f32.mrf.mxu1 }
 0x255   :  { %3518 = vmatmul.mubr.f32.gmra.mxu1 %v7845_v39  ;;  %6819 = vmatprep.mubr.msk.f32.mxu0 %vm1141_vm0, %v7846_v53 }
 0x256   :  { %v11335_v57 = vpop.f32.mrf.mxu0  ;;  %6875 = vmatprep.mubr.msk.f32.mxu1 %vm1141_vm0, %v7846_v53  ;;  %3767 = vmatpush2.msra.mxu0 %v6555_v26  ;;  %v11345_v39 = vpop.f32.mrf.mxu1 }
 0x257   :  { %3768 = vmatprep.subr.mxu0 %v6542_v35  ;;  %v7848_v35 = vld [vmem:[%s13955_s1 + $0x198] sm:$0xff] }
 0x258   :  { %v11343_v3 = vpop.f32.mrf.mxu0  ;;  %3123 = vmatmul.mubr.f32.gmra.mxu0 %v7847_v29  ;;  %v11359_v53 = vpop.f32.mrf.mxu1 }
 0x259   :  { %3524 = vmatmul.mubr.f32.gmra.mxu1 %v7847_v29  ;;  %6820 = vmatprep.mubr.msk.f32.mxu0 %vm1141_vm0, %v7848_v35  ;;  %v7849_v29 = vld [vmem:[%s13955_s1 + $0x190] sm:$0xff] }
 0x25a   :  { %v11357_v26 = vpop.f32.mrf.mxu0  ;;  %6876 = vmatprep.mubr.msk.f32.mxu1 %vm1141_vm0, %v7848_v35  ;;  %3769 = vmatpush2.msra.mxu0 %v6541_v44  ;;  %v11364_v58 = vpop.f32.mrf.mxu1  ;;  %v7850_v35 = vld [vmem:[%s13955_s1 + $0x1a8] sm:$0xff] }
 0x25b   :  { %3770 = vmatprep.subr.mxu0 %v6528_v36 }
 0x25c   :  { %v11362_v0 = vpop.f32.mrf.mxu0  ;;  %3129 = vmatmul.mubr.f32.gmra.mxu0 %v7849_v29  ;;  %v11378_v44 = vpop.f32.mrf.mxu1 }
 0x25d   :  { %3530 = vmatmul.mubr.f32.gmra.mxu1 %v7849_v29  ;;  %6821 = vmatprep.mubr.msk.f32.mxu0 %vm1141_vm0, %v7850_v35  ;;  %v7851_v29 = vld [vmem:[%s13955_s1 + $0x1a0] sm:$0xff] }
 0x25e   :  { %v11376_v36 = vpop.f32.mrf.mxu0  ;;  %6877 = vmatprep.mubr.msk.f32.mxu1 %vm1141_vm0, %v7850_v35  ;;  %3771 = vmatpush2.msra.mxu0 %v10887_v33  ;;  %v11384_v63 = vpop.f32.mrf.mxu1  ;;  %v7852_v35 = vld [vmem:[%s13955_s1 + $0x1b8] sm:$0xff] }
 0x25f   :  { %3772 = vmatprep.subr.mxu0 %v524_v42 }
 0x260   :  { %v11382_v5 = vpop.f32.mrf.mxu0  ;;  %3135 = vmatmul.mubr.f32.gmra.mxu0 %v7851_v29  ;;  %v11398_v33 = vpop.f32.mrf.mxu1 }
 0x261   :  { %3536 = vmatmul.mubr.f32.gmra.mxu1 %v7851_v29  ;;  %6822 = vmatprep.mubr.msk.f32.mxu0 %vm1141_vm0, %v7852_v35  ;;  %14758 = vst [vmem:[#allocation146_spill] sm:$0xff] %v11398_v33  ;;  %v7853_v29 = vld [vmem:[%s13955_s1 + $0x1b0] sm:$0xff] }
 0x262   :  { %v11396_v42 = vpop.f32.mrf.mxu0  ;;  %6878 = vmatprep.mubr.msk.f32.mxu1 %vm1141_vm0, %v7852_v35  ;;  %3773 = vmatpush2.msra.mxu0 %v10920_v56  ;;  %v11404_v51 = vpop.f32.mrf.mxu1  ;;  %v7854_v35 = vld [vmem:[%s13955_s1 + $0x1c8] sm:$0xff] }
 0x263   :  { %3774 = vmatprep.subr.mxu0 %v510_v20  ;;  %14760 = vst [vmem:[#allocation148_spill] sm:$0xff] %v11404_v51 }
 0x264   :  { %v11402_v2 = vpop.f32.mrf.mxu0  ;;  %3141 = vmatmul.mubr.f32.gmra.mxu0 %v7853_v29  ;;  %v11418_v56 = vpop.f32.mrf.mxu1 }
 0x265   :  { %14759 = vst [vmem:[#allocation147_spill] sm:$0xff] %v11402_v2  ;;  %3542 = vmatmul.mubr.f32.gmra.mxu1 %v7853_v29  ;;  %6823 = vmatprep.mubr.msk.f32.mxu0 %vm1141_vm0, %v7854_v35  ;;  %14762 = vst [vmem:[#allocation150_spill] sm:$0xff] %v11418_v56  ;;  %v7855_v29 = vld [vmem:[%s13955_s1 + $0x1c0] sm:$0xff] }
 0x266   :  { %v11416_v20 = vpop.f32.mrf.mxu0  ;;  %6879 = vmatprep.mubr.msk.f32.mxu1 %vm1141_vm0, %v7854_v35  ;;  %3775 = vmatpush2.msra.mxu0 %v10953_v25  ;;  %v11424_v2 = vpop.f32.mrf.mxu1  ;;  %v7856_v35 = vld [vmem:[%s13955_s1 + $0x1d8] sm:$0xff] }
 0x267   :  { %14761 = vst [vmem:[#allocation149_spill] sm:$0xff] %v11416_v20  ;;  %3776 = vmatprep.subr.mxu0 %v496_v21  ;;  %14764 = vst [vmem:[#allocation152_spill] sm:$0xff] %v11424_v2  ;;  %v482_v20 = vld [vmem:[%s13954_s0 + $0x78] sm:$0xff] }
 0x268   :  { %v11422_v51 = vpop.f32.mrf.mxu0  ;;  %3147 = vmatmul.mubr.f32.gmra.mxu0 %v7855_v29  ;;  %v11438_v25 = vpop.f32.mrf.mxu1 }
 0x269   :  { %14763 = vst [vmem:[#allocation151_spill] sm:$0xff] %v11422_v51  ;;  %3548 = vmatmul.mubr.f32.gmra.mxu1 %v7855_v29  ;;  %6824 = vmatprep.mubr.msk.f32.mxu0 %vm1141_vm0, %v7856_v35  ;;  %14766 = vst [vmem:[#allocation154_spill] sm:$0xff] %v11438_v25  ;;  %v7857_v29 = vld [vmem:[%s13955_s1 + $0x1d0] sm:$0xff]  ;;  %v14787_v25 = vmax.f32 %v10515_v13, %v10820_v10  ;;  %v14792_v13 = vmax.f32 %v10537_v60, %v10831_v11  ;;  %v14799_v11 = vld [vmem:[#allocation19_spill] sm:$0xff] }
 0x26a   :  { %v11436_v21 = vpop.f32.mrf.mxu0  ;;  %6880 = vmatprep.mubr.msk.f32.mxu1 %vm1141_vm0, %v7856_v35  ;;  %3777 = vmatpush2.msra.mxu0 %v10986_v4  ;;  %v11444_v51 = vpop.f32.mrf.mxu1  ;;  %v14797_v60 = vmax.f32 %v10544_v9, %v10845_v8  ;;  %v14803_v9 = vmax.f32 %v10557_v54, %v10861_v40  ;;  %v14808_v54 = vmax.f32 %v10566_v47, %v10877_v43  ;;  %v14810_v40 = vld [vmem:[#allocation73_spill] sm:$0xff]  ;;  %v14814_v47 = vld [vmem:[#allocation116_spill] sm:$0xff] }
 0x26b   :  { %14765 = vst [vmem:[#allocation153_spill] sm:$0xff] %v11436_v21  ;;  %3778 = vmatprep.subr.mxu0 %v482_v20  ;;  %14768 = vst [vmem:[#allocation156_spill] sm:$0xff] %v11444_v51  ;;  %v7858_v21 = vld [vmem:[%s13955_s1 + $0x1e8] sm:$0xff]  ;;  %v14815_v43 = vmax.f32 %v10578_v41, %v14814_v47  ;;  %v14821_v41 = vmax.f32 %v10582_v23, %v10910_v22  ;;  %v14827_v23 = vld [vmem:[#allocation42_spill] sm:$0xff] }
 0x26c   :  { %v11442_v2 = vpop.f32.mrf.mxu0  ;;  %3153 = vmatmul.mubr.f32.gmra.mxu0 %v7857_v29  ;;  %v11455_v4 = vpop.f32.mrf.mxu1  ;;  %v14828_v22 = vmax.f32 %v10594_v46, %v14827_v23  ;;  %v7876_v47 = vld [vmem:[%s13955_s1 + $0x278] sm:$0xff]  ;;  %v14834_v46 = vmax.f32 %v10600_v38, %v10943_v7 }
 0x26d   :  { %14767 = vst [vmem:[#allocation155_spill] sm:$0xff] %v11442_v2  ;;  %3554 = vmatmul.mubr.f32.gmra.mxu1 %v7857_v29  ;;  %6825 = vmatprep.mubr.msk.f32.mxu0 %vm1141_vm0, %v7858_v21  ;;  %14770 = vst [vmem:[#allocation158_spill] sm:$0xff] %v11455_v4  ;;  %v7859_v29 = vld [vmem:[%s13955_s1 + $0x1e0] sm:$0xff]  ;;  %v14840_v38 = vld [vmem:[#allocation118_spill] sm:$0xff] }
 0x26e   :  { %v11453_v35 = vpop.f32.mrf.mxu0  ;;  %6881 = vmatprep.mubr.msk.f32.mxu1 %vm1141_vm0, %v7858_v21  ;;  %3779 = vmatpush2.msra.mxu0 %v11019_v30  ;;  %v11461_v51 = vpop.f32.mrf.mxu1  ;;  %v14841_v7 = vmax.f32 %v10612_v32, %v14840_v38  ;;  %v14847_v32 = vmax.f32 %v10618_v45, %v10976_v52  ;;  %v14853_v45 = vld [vmem:[#allocation45_spill] sm:$0xff] }
 0x26f   :  { %14769 = vst [vmem:[#allocation157_spill] sm:$0xff] %v11453_v35  ;;  %14772 = vst [vmem:[#allocation160_spill] sm:$0xff] %v11461_v51  ;;  %v7860_v35 = vld [vmem:[%s13955_s1 + $0x1f8] sm:$0xff]  ;;  %v14854_v52 = vmax.f32 %v10632_v48, %v14853_v45  ;;  %v14860_v48 = vmax.f32 %v10636_v17, %v11009_v6  ;;  %v14868_v17 = vld [vmem:[#allocation120_spill] sm:$0xff] }
 0x270   :  { %v11459_v20 = vpop.f32.mrf.mxu0  ;;  %3159 = vmatmul.mubr.f32.gmra.mxu0 %v7859_v29  ;;  %v11472_v21 = vpop.f32.mrf.mxu1 }
 0x271   :  { %14771 = vst [vmem:[#allocation159_spill] sm:$0xff] %v11459_v20  ;;  %3560 = vmatmul.mubr.f32.gmra.mxu1 %v7859_v29  ;;  %6826 = vmatprep.mubr.msk.f32.mxu0 %vm1141_vm0, %v7860_v35  ;;  %14774 = vst [vmem:[#allocation162_spill] sm:$0xff] %v11472_v21  ;;  %v7861_v29 = vld [vmem:[%s13955_s1 + $0x1f0] sm:$0xff]  ;;  %v7862_v20 = vld [vmem:[%s13955_s1 + $0x208] sm:$0xff] }
 0x272   :  { %v11470_v4 = vpop.f32.mrf.mxu0  ;;  %6882 = vmatprep.mubr.msk.f32.mxu1 %vm1141_vm0, %v7860_v35  ;;  %v11477_v51 = vpop.f32.mrf.mxu1 }
 0x273   :  { %14773 = vst [vmem:[#allocation161_spill] sm:$0xff] %v11470_v4  ;;  %14776 = vst [vmem:[#allocation164_spill] sm:$0xff] %v11477_v51 }
 0x274   :  { %v11475_v30 = vpop.f32.mrf.mxu0  ;;  %3165 = vmatmul.mubr.f32.gmra.mxu0 %v7861_v29  ;;  %v11488_v21 = vpop.f32.mrf.mxu1 }
 0x275   :  { %14775 = vst [vmem:[#allocation163_spill] sm:$0xff] %v11475_v30  ;;  %3566 = vmatmul.mubr.f32.gmra.mxu1 %v7861_v29  ;;  %6827 = vmatprep.mubr.msk.f32.mxu0 %vm1141_vm0, %v7862_v20  ;;  %14778 = vst [vmem:[#allocation166_spill] sm:$0xff] %v11488_v21  ;;  %v7863_v29 = vld [vmem:[%s13955_s1 + $0x200] sm:$0xff]  ;;  %v7864_v30 = vld [vmem:[%s13955_s1 + $0x218] sm:$0xff] }
 0x276   :  { %v11486_v4 = vpop.f32.mrf.mxu0  ;;  %6883 = vmatprep.mubr.msk.f32.mxu1 %vm1141_vm0, %v7862_v20  ;;  %v11493_v51 = vpop.f32.mrf.mxu1 }
 0x277   :  { %14777 = vst [vmem:[#allocation165_spill] sm:$0xff] %v11486_v4  ;;  %14780 = vst [vmem:[#allocation168_spill] sm:$0xff] %v11493_v51 }
 0x278   :  { %v11491_v35 = vpop.f32.mrf.mxu0  ;;  %3171 = vmatmul.mubr.f32.gmra.mxu0 %v7863_v29  ;;  %v11504_v21 = vpop.f32.mrf.mxu1 }
 0x279   :  { %14779 = vst [vmem:[#allocation167_spill] sm:$0xff] %v11491_v35  ;;  %3572 = vmatmul.mubr.f32.gmra.mxu1 %v7863_v29  ;;  %6828 = vmatprep.mubr.msk.f32.mxu0 %vm1141_vm0, %v7864_v30  ;;  %14782 = vst [vmem:[#allocation170_spill] sm:$0xff] %v11504_v21  ;;  %v7865_v29 = vld [vmem:[%s13955_s1 + $0x210] sm:$0xff]  ;;  %v7866_v35 = vld [vmem:[%s13955_s1 + $0x228] sm:$0xff] }
 0x27a   :  { %v11502_v4 = vpop.f32.mrf.mxu0  ;;  %6884 = vmatprep.mubr.msk.f32.mxu1 %vm1141_vm0, %v7864_v30  ;;  %v11509_v51 = vpop.f32.mrf.mxu1 }
 0x27b   :  { %14781 = vst [vmem:[#allocation169_spill] sm:$0xff] %v11502_v4  ;;  %14784 = vst [vmem:[#allocation172_spill] sm:$0xff] %v11509_v51 }
 0x27c   :  { %v11507_v20 = vpop.f32.mrf.mxu0  ;;  %3177 = vmatmul.mubr.f32.gmra.mxu0 %v7865_v29  ;;  %v11520_v21 = vpop.f32.mrf.mxu1 }
 0x27d   :  { %14783 = vst [vmem:[#allocation171_spill] sm:$0xff] %v11507_v20  ;;  %3578 = vmatmul.mubr.f32.gmra.mxu1 %v7865_v29  ;;  %6829 = vmatprep.mubr.msk.f32.mxu0 %vm1141_vm0, %v7866_v35  ;;  %14786 = vst [vmem:[#allocation174_spill] sm:$0xff] %v11520_v21  ;;  %v7867_v20 = vld [vmem:[%s13955_s1 + $0x220] sm:$0xff] }
 0x27e   :  { %v11518_v4 = vpop.f32.mrf.mxu0  ;;  %6885 = vmatprep.mubr.msk.f32.mxu1 %vm1141_vm0, %v7866_v35  ;;  %v2831_v51 = vpop.f32.mrf.mxu1 }
 0x27f   :  { %14785 = vst [vmem:[#allocation173_spill] sm:$0xff] %v11518_v4  ;;  %v4319_v2 = vmax.f32 %v11257_v15, %v2831_v51  ;;  %v7868_v4 = vld [vmem:[%s13955_s1 + $0x238] sm:$0xff] }
 0x280   :  { %v2430_v30 = vpop.f32.mrf.mxu0  ;;  %3183 = vmatmul.mubr.f32.gmra.mxu0 %v7867_v20  ;;  %v2833_v35 = vpop.f32.mrf.mxu1 }
 0x281   :  { %v4317_v29 = vmax.f32 %v11255_v55, %v2430_v30  ;;  %3584 = vmatmul.mubr.f32.gmra.mxu1 %v7867_v20  ;;  %6830 = vmatprep.mubr.msk.f32.mxu0 %vm1141_vm0, %v7868_v4  ;;  %v14789_v55 = vld [vmem:[#allocation39_spill] sm:$0xff]  ;;  %v4320_v20 = vmax.f32 %v11271_v37, %v2833_v35  ;;  %v7870_v35 = vld [vmem:[%s13955_s1 + $0x248] sm:$0xff] }
 0x282   :  { %v2432_v21 = vpop.f32.mrf.mxu0  ;;  %6886 = vmatprep.mubr.msk.f32.mxu1 %vm1141_vm0, %v7868_v4  ;;  %v14790_v30 = vmax.f32 %v10520_v62, %v14789_v55  ;;  %v2837_v33 = vpop.f32.mrf.mxu1  ;;  %v7869_v4 = vld [vmem:[%s13955_s1 + $0x230] sm:$0xff] }
 0x283   :  { %v11536_v56 = vmax.f32 %v14787_v25, %v4317_v29  ;;  %v4318_v15 = vmax.f32 %v11269_v1, %v2432_v21  ;;  %v14794_v62 = vld [vmem:[#allocation33_spill] sm:$0xff]  ;;  %v4333_v37 = vmax.f32 %v11279_v49, %v2837_v33 }
 0x284   :  { %v11541_v51 = vmax.f32 %v14790_v30, %v4319_v2  ;;  %v2436_v14 = vpop.f32.mrf.mxu0  ;;  %3189 = vmatmul.mubr.f32.gmra.mxu0 %v7869_v4  ;;  %v14795_v2 = vmax.f32 %v10539_v28, %v14794_v62  ;;  %v2839_v29 = vpop.f32.mrf.mxu1 }
 0x285   :  { %14788 = vst [vmem:[#allocation175_spill] sm:$0xff] %v11536_v56  ;;  %v11551_v10 = vmax.f32 %v14792_v13, %v4318_v15  ;;  %v4331_v1 = vmax.f32 %v11277_v59, %v2436_v14  ;;  %3590 = vmatmul.mubr.f32.gmra.mxu1 %v7869_v4  ;;  %6831 = vmatprep.mubr.msk.f32.mxu0 %vm1141_vm0, %v7870_v35  ;;  %v14800_v14 = vld [vmem:[#allocation40_spill] sm:$0xff]  ;;  %v14805_v4 = vld [vmem:[#allocation91_spill] sm:$0xff] }
 0x286   :  { %14791 = vst [vmem:[#allocation39_spill] sm:$0xff] %v11541_v51  ;;  %v11556_v25 = vmax.f32 %v14795_v2, %v4320_v20  ;;  %v2438_v21 = vpop.f32.mrf.mxu0  ;;  %6887 = vmatprep.mubr.msk.f32.mxu1 %vm1141_vm0, %v7870_v35  ;;  %v14801_v59 = vmax.f32 %v14799_v11, %v14800_v14  ;;  %v4334_v55 = vmax.f32 %v11293_v27, %v2839_v29  ;;  %v2843_v15 = vpop.f32.mrf.mxu1  ;;  %v7871_v20 = vld [vmem:[%s13955_s1 + $0x240] sm:$0xff]  ;;  %v7873_v14 = vld [vmem:[%s13955_s1 + $0x250] sm:$0xff] }
 0x287   :  { %14793 = vst [vmem:[#allocation176_spill] sm:$0xff] %v11551_v10  ;;  %v11568_v28 = vmax.f32 %v14797_v60, %v4331_v1  ;;  %v4332_v33 = vmax.f32 %v11291_v19, %v2438_v21  ;;  %v14806_v13 = vmax.f32 %v10559_v61, %v14805_v4  ;;  %v4347_v27 = vmax.f32 %v11301_v50, %v2843_v15  ;;  %v7874_v4 = vld [vmem:[%s13955_s1 + $0x268] sm:$0xff] }
 0x288   :  { %14796 = vst [vmem:[#allocation33_spill] sm:$0xff] %v11556_v25  ;;  %v11573_v49 = vmax.f32 %v14801_v59, %v4333_v37  ;;  %v2442_v30 = vpop.f32.mrf.mxu0  ;;  %3195 = vmatmul.mubr.f32.gmra.mxu0 %v7871_v20  ;;  %v2845_v1 = vpop.f32.mrf.mxu1  ;;  %v7872_v37 = vld [vmem:[%s13955_s1 + $0x258] sm:$0xff] }
 0x289   :  { %14798 = vst [vmem:[#allocation177_spill] sm:$0xff] %v11568_v28  ;;  %v11583_v8 = vmax.f32 %v14803_v9, %v4332_v33  ;;  %v11588_v62 = vmax.f32 %v14806_v13, %v4334_v55  ;;  %v4345_v19 = vmax.f32 %v11299_v31, %v2442_v30  ;;  %3596 = vmatmul.mubr.f32.gmra.mxu1 %v7871_v20  ;;  %v14811_v31 = vld [vmem:[#allocation115_spill] sm:$0xff]  ;;  %v14817_v33 = vld [vmem:[#allocation20_spill] sm:$0xff]  ;;  %v14818_v55 = vld [vmem:[#allocation41_spill] sm:$0xff] }
 0x28a   :  { %14802 = vst [vmem:[#allocation19_spill] sm:$0xff] %v11573_v49  ;;  %v2444_v2 = vpop.f32.mrf.mxu0  ;;  %6832 = vmatprep.mubr.msk.f32.mxu0 %vm1141_vm0, %v7872_v37  ;;  %6888 = vmatprep.mubr.msk.f32.mxu1 %vm1141_vm0, %v7872_v37  ;;  %v14812_v21 = vmax.f32 %v14810_v40, %v14811_v31  ;;  %v4348_v35 = vmax.f32 %v11315_v34, %v2845_v1  ;;  %v2849_v11 = vpop.f32.mrf.mxu1  ;;  %v7875_v40 = vld [vmem:[%s13955_s1 + $0x260] sm:$0xff]  ;;  %v7905_v49 = vld [vmem:[%s13955_s1 + $0x350] sm:$0xff] }
 0x28b   :  { %14804 = vst [vmem:[#allocation40_spill] sm:$0xff] %v11583_v8  ;;  %14807 = vst [vmem:[#allocation91_spill] sm:$0xff] %v11588_v62  ;;  %v11600_v61 = vmax.f32 %v14808_v54, %v4345_v19  ;;  %v4346_v29 = vmax.f32 %v11313_v18, %v2444_v2  ;;  %v14819_v30 = vmax.f32 %v14817_v33, %v14818_v55  ;;  %v14823_v19 = vld [vmem:[#allocation74_spill] sm:$0xff]  ;;  %v14836_v33 = vld [vmem:[#allocation21_spill] sm:$0xff] }
 0x28c   :  { %v11605_v50 = vmax.f32 %v14812_v21, %v4347_v27  ;;  %v2448_v60 = vpop.f32.mrf.mxu0  ;;  %3201 = vmatmul.mubr.f32.gmra.mxu0 %v7873_v14  ;;  %v4361_v34 = vmax.f32 %v11323_v24, %v2849_v11  ;;  %v2851_v9 = vpop.f32.mrf.mxu1  ;;  %v14830_v21 = vld [vmem:[#allocation97_spill] sm:$0xff]  ;;  %v7892_v62 = vld [vmem:[%s13955_s1 + $0x2f8] sm:$0xff] }
 0x28d   :  { %14809 = vst [vmem:[#allocation178_spill] sm:$0xff] %v11600_v61  ;;  %v11615_v59 = vmax.f32 %v14815_v43, %v4346_v29  ;;  %v11620_v15 = vmax.f32 %v14819_v30, %v4348_v35  ;;  %v4359_v18 = vmax.f32 %v11321_v16, %v2448_v60  ;;  %3602 = vmatmul.mubr.f32.gmra.mxu1 %v7873_v14  ;;  %v14824_v16 = vld [vmem:[#allocation92_spill] sm:$0xff]  ;;  %v14831_v29 = vld [vmem:[#allocation93_spill] sm:$0xff]  ;;  %v15068_v61 = vld [vmem:[#allocation106_spill] sm:$0xff] }
 0x28e   :  { %14813 = vst [vmem:[#allocation73_spill] sm:$0xff] %v11605_v50  ;;  %v2450_v20 = vpop.f32.mrf.mxu0  ;;  %6833 = vmatprep.mubr.msk.f32.mxu0 %vm1141_vm0, %v7874_v4  ;;  %6889 = vmatprep.mubr.msk.f32.mxu1 %vm1141_vm0, %v7874_v4  ;;  %v14825_v27 = vmax.f32 %v14823_v19, %v14824_v16  ;;  %v4362_v1 = vmax.f32 %v11337_v12, %v2851_v9  ;;  %v2855_v54 = vpop.f32.mrf.mxu1  ;;  %v7877_v9 = vld [vmem:[%s13955_s1 + $0x270] sm:$0xff]  ;;  %v14844_v19 = vld [vmem:[#allocation44_spill] sm:$0xff] }
 0x28f   :  { %14816 = vst [vmem:[#allocation115_spill] sm:$0xff] %v11615_v59  ;;  %14820 = vst [vmem:[#allocation116_spill] sm:$0xff] %v11620_v15  ;;  %v11632_v13 = vmax.f32 %v14821_v41, %v4359_v18  ;;  %v4360_v2 = vmax.f32 %v11335_v57, %v2450_v20  ;;  %v14832_v35 = vmax.f32 %v14830_v21, %v14831_v29  ;;  %v14843_v41 = vld [vmem:[#allocation75_spill] sm:$0xff]  ;;  %v7906_v50 = vld [vmem:[%s13955_s1 + $0x368] sm:$0xff] }
 0x290   :  { %v11637_v24 = vmax.f32 %v14825_v27, %v4361_v34  ;;  %v2454_v37 = vpop.f32.mrf.mxu0  ;;  %3207 = vmatmul.mubr.f32.gmra.mxu0 %v7875_v40  ;;  %v4375_v12 = vmax.f32 %v11345_v39, %v2855_v54  ;;  %v2857_v14 = vpop.f32.mrf.mxu1  ;;  %v14845_v16 = vmax.f32 %v14843_v41, %v14844_v19  ;;  %v7881_v19 = vld [vmem:[%s13955_s1 + $0x290] sm:$0xff]  ;;  %v15046_v59 = vld [vmem:[#allocation99_spill] sm:$0xff] }
 0x291   :  { %14822 = vst [vmem:[#allocation20_spill] sm:$0xff] %v11632_v13  ;;  %v11647_v31 = vmax.f32 %v14828_v22, %v4360_v2  ;;  %v11652_v60 = vmax.f32 %v14832_v35, %v4362_v1  ;;  %v4373_v57 = vmax.f32 %v11343_v3, %v2454_v37  ;;  %3608 = vmatmul.mubr.f32.gmra.mxu1 %v7875_v40  ;;  %v14837_v3 = vld [vmem:[#allocation117_spill] sm:$0xff]  ;;  %v7878_v37 = vld [vmem:[%s13955_s1 + $0x288] sm:$0xff] }
 0x292   :  { %14826 = vst [vmem:[#allocation41_spill] sm:$0xff] %v11637_v24  ;;  %v2456_v11 = vpop.f32.mrf.mxu0  ;;  %6834 = vmatprep.mubr.msk.f32.mxu0 %vm1141_vm0, %v7876_v47  ;;  %6890 = vmatprep.mubr.msk.f32.mxu1 %vm1141_vm0, %v7876_v47  ;;  %v14838_v55 = vmax.f32 %v14836_v33, %v14837_v3  ;;  %v4376_v18 = vmax.f32 %v11359_v53, %v2857_v14  ;;  %v2861_v20 = vpop.f32.mrf.mxu1  ;;  %v14849_v40 = vld [vmem:[#allocation76_spill] sm:$0xff]  ;;  %v14857_v14 = vld [vmem:[#allocation94_spill] sm:$0xff]  ;;  %v15067_v28 = vld [vmem:[#allocation9_spill] sm:$0xff] }
 0x293   :  { %14829 = vst [vmem:[#allocation74_spill] sm:$0xff] %v11647_v31  ;;  %14833 = vst [vmem:[#allocation92_spill] sm:$0xff] %v11652_v60  ;;  %v11664_v43 = vmax.f32 %v14834_v46, %v4373_v57  ;;  %v4374_v30 = vmax.f32 %v11357_v26, %v2456_v11  ;;  %v4389_v53 = vmax.f32 %v11364_v58, %v2861_v20  ;;  %v7879_v57 = vld [vmem:[%s13955_s1 + $0x280] sm:$0xff]  ;;  %v14856_v11 = vld [vmem:[#allocation100_spill] sm:$0xff] }
 0x294   :  { %v11669_v39 = vmax.f32 %v14838_v55, %v4375_v12  ;;  %v2460_v34 = vpop.f32.mrf.mxu0  ;;  %3213 = vmatmul.mubr.f32.gmra.mxu0 %v7877_v9  ;;  %v11684_v27 = vmax.f32 %v14845_v16, %v4376_v18  ;;  %v2863_v1 = vpop.f32.mrf.mxu1  ;;  %v14858_v47 = vmax.f32 %v14856_v11, %v14857_v14  ;;  %v7880_v55 = vld [vmem:[%s13955_s1 + $0x298] sm:$0xff]  ;;  %v14862_v18 = vld [vmem:[#allocation23_spill] sm:$0xff]  ;;  %v14867_v16 = vld [vmem:[#allocation24_spill] sm:$0xff]  ;;  %v4859_v13 = vadd.f32 %v15068_v61, %v15067_v28 }
 0x295   :  { %14835 = vst [vmem:[#allocation42_spill] sm:$0xff] %v11664_v43  ;;  %v11679_v4 = vmax.f32 %v14841_v7, %v4374_v30  ;;  %v4387_v26 = vmax.f32 %v11362_v0, %v2460_v34  ;;  %3614 = vmatmul.mubr.f32.gmra.mxu1 %v7877_v9  ;;  %6835 = vmatprep.mubr.msk.f32.mxu0 %vm1141_vm0, %v7878_v37  ;;  %v14850_v0 = vld [vmem:[#allocation38_spill] sm:$0xff]  ;;  %v14882_v11 = vld [vmem:[#allocation47_spill] sm:$0xff] }
 0x296   :  { %14839 = vst [vmem:[#allocation97_spill] sm:$0xff] %v11669_v39  ;;  %14846 = vst [vmem:[#allocation21_spill] sm:$0xff] %v11684_v27  ;;  %v2462_v2 = vpop.f32.mrf.mxu0  ;;  %6891 = vmatprep.mubr.msk.f32.mxu1 %vm1141_vm0, %v7878_v37  ;;  %v14851_v23 = vmax.f32 %v14849_v40, %v14850_v0  ;;  %v4390_v21 = vmax.f32 %v11378_v44, %v2863_v1  ;;  %v2867_v35 = vpop.f32.mrf.mxu1  ;;  %v14866_v9 = vld [vmem:[#allocation146_spill] sm:$0xff]  ;;  %v14869_v6 = vmax.f32 %v14867_v16, %v14868_v17  ;;  %v14876_v40 = vld [vmem:[#allocation148_spill] sm:$0xff] }
 0x297   :  { %14842 = vst [vmem:[#allocation93_spill] sm:$0xff] %v11679_v4  ;;  %v11696_v54 = vmax.f32 %v14847_v32, %v4387_v26  ;;  %v4388_v22 = vmax.f32 %v11376_v36, %v2462_v2  ;;  %v4403_v44 = vmax.f32 %v11384_v63, %v2867_v35  ;;  %v14872_v2 = vld [vmem:[#allocation46_spill] sm:$0xff]  ;;  %v14878_v35 = vld [vmem:[#allocation95_spill] sm:$0xff] }
 0x298   :  { %v11701_v58 = vmax.f32 %v14851_v23, %v4389_v53  ;;  %v2466_v29 = vpop.f32.mrf.mxu0  ;;  %3219 = vmatmul.mubr.f32.gmra.mxu0 %v7879_v57  ;;  %v11716_v46 = vmax.f32 %v14858_v47, %v4390_v21  ;;  %v2869_v3 = vpop.f32.mrf.mxu1  ;;  %v14871_v53 = vld [vmem:[#allocation78_spill] sm:$0xff]  ;;  %v7882_v21 = vld [vmem:[%s13955_s1 + $0x2a8] sm:$0xff]  ;;  %v14895_v16 = vld [vmem:[#allocation151_spill] sm:$0xff] }
 0x299   :  { %14848 = vst [vmem:[#allocation117_spill] sm:$0xff] %v11696_v54  ;;  %v11711_v12 = vmax.f32 %v14854_v52, %v4388_v22  ;;  %v4401_v36 = vmax.f32 %v11382_v5, %v2466_v29  ;;  %3620 = vmatmul.mubr.f32.gmra.mxu1 %v7879_v57  ;;  %6836 = vmatprep.mubr.msk.f32.mxu0 %vm1141_vm0, %v7880_v55  ;;  %v14863_v5 = vld [vmem:[#allocation119_spill] sm:$0xff]  ;;  %v14877_v29 = vld [vmem:[#allocation102_spill] sm:$0xff]  ;;  %v14881_v52 = vld [vmem:[#allocation25_spill] sm:$0xff] }
 0x29a   :  { %14852 = vst [vmem:[#allocation118_spill] sm:$0xff] %v11701_v58  ;;  %14859 = vst [vmem:[#allocation44_spill] sm:$0xff] %v11716_v46  ;;  %v2468_v33 = vpop.f32.mrf.mxu0  ;;  %6892 = vmatprep.mubr.msk.f32.mxu1 %vm1141_vm0, %v7880_v55  ;;  %v14864_v34 = vmax.f32 %v14862_v18, %v14863_v5  ;;  %v4404_v38 = vmax.f32 %v14866_v9, %v2869_v3  ;;  %v14873_v1 = vmax.f32 %v14871_v53, %v14872_v2  ;;  %v7883_v18 = vld [vmem:[%s13955_s1 + $0x2a0] sm:$0xff]  ;;  %v7894_v46 = vld [vmem:[%s13955_s1 + $0x308] sm:$0xff] }
 0x29b   :  { %14855 = vst [vmem:[#allocation75_spill] sm:$0xff] %v11711_v12  ;;  %v11728_v30 = vmax.f32 %v14860_v48, %v4401_v36  ;;  %v4402_v20 = vmax.f32 %v11396_v42, %v2468_v33  ;;  %v14875_v42 = vld [vmem:[#allocation147_spill] sm:$0xff]  ;;  %v14879_v57 = vmax.f32 %v14877_v29, %v14878_v35  ;;  %v14883_v14 = vmax.f32 %v14881_v52, %v14882_v11  ;;  %v14885_v36 = vld [vmem:[#allocation149_spill] sm:$0xff]  ;;  %v14886_v33 = vld [vmem:[#allocation150_spill] sm:$0xff] }
 0x29c   :  { %v11733_v63 = vmax.f32 %v14864_v34, %v4403_v44  ;;  %v2472_v7 = vpop.f32.mrf.mxu0  ;;  %v2873_v41 = vpop.f32.mrf.mxu1  ;;  %3225 = vmatmul.mubr.f32.gmra.mxu0 %v7881_v19  ;;  %v11748_v37 = vmax.f32 %v14873_v1, %v4404_v38  ;;  %v14887_v5 = vld [vmem:[#allocation79_spill] sm:$0xff]  ;;  %v14888_v34 = vld [vmem:[#allocation96_spill] sm:$0xff]  ;;  %v14891_v38 = vld [vmem:[#allocation26_spill] sm:$0xff] }
 0x29d   :  { %14861 = vst [vmem:[#allocation76_spill] sm:$0xff] %v11728_v30  ;;  %v11743_v26 = vmax.f32 %v14869_v6, %v4402_v20  ;;  %v4415_v32 = vmax.f32 %v14875_v42, %v2472_v7  ;;  %v4417_v0 = vmax.f32 %v14876_v40, %v2873_v41  ;;  %3626 = vmatmul.mubr.f32.gmra.mxu1 %v7881_v19  ;;  %v14892_v7 = vld [vmem:[#allocation43_spill] sm:$0xff]  ;;  %v14896_v6 = vld [vmem:[#allocation152_spill] sm:$0xff]  ;;  %v7884_v42 = vld [vmem:[%s13955_s1 + $0x2b8] sm:$0xff] }
 0x29e   :  { %14865 = vst [vmem:[#allocation38_spill] sm:$0xff] %v11733_v63  ;;  %14874 = vst [vmem:[#allocation100_spill] sm:$0xff] %v11748_v37  ;;  %v2474_v23 = vpop.f32.mrf.mxu0  ;;  %v2875_v22 = vpop.f32.mrf.mxu1  ;;  %6837 = vmatprep.mubr.msk.f32.mxu0 %vm1141_vm0, %v7882_v21  ;;  %6893 = vmatprep.mubr.msk.f32.mxu1 %vm1141_vm0, %v7882_v21  ;;  %v14889_v20 = vmax.f32 %v14887_v5, %v14888_v34  ;;  %v14893_v41 = vmax.f32 %v14891_v38, %v14892_v7  ;;  %v14898_v40 = vld [vmem:[#allocation122_spill] sm:$0xff]  ;;  %v14902_v21 = vld [vmem:[#allocation123_spill] sm:$0xff] }
 0x29f   :  { %14870 = vst [vmem:[#allocation45_spill] sm:$0xff] %v11743_v26  ;;  %v11760_v45 = vmax.f32 %v14879_v57, %v4415_v32  ;;  %v11765_v47 = vmax.f32 %v14883_v14, %v4417_v0  ;;  %v4416_v44 = vmax.f32 %v14885_v36, %v2474_v23  ;;  %v4418_v3 = vmax.f32 %v14886_v33, %v2875_v22  ;;  %v14897_v32 = vld [vmem:[#allocation103_spill] sm:$0xff]  ;;  %v14901_v22 = vld [vmem:[#allocation104_spill] sm:$0xff]  ;;  %v14905_v57 = vld [vmem:[#allocation153_spill] sm:$0xff] }
 0x2a0   :  { %v2478_v55 = vpop.f32.mrf.mxu0  ;;  %v2879_v48 = vpop.f32.mrf.mxu1  ;;  %3231 = vmatmul.mubr.f32.gmra.mxu0 %v7883_v18  ;;  %v14899_v0 = vmax.f32 %v14897_v32, %v14898_v40  ;;  %v14903_v29 = vmax.f32 %v14901_v22, %v14902_v21  ;;  %v14906_v11 = vld [vmem:[#allocation154_spill] sm:$0xff]  ;;  %v7885_v33 = vld [vmem:[%s13955_s1 + $0x2b0] sm:$0xff]  ;;  %v14911_v5 = vld [vmem:[#allocation28_spill] sm:$0xff] }
 0x2a1   :  { %14880 = vst [vmem:[#allocation94_spill] sm:$0xff] %v11760_v45  ;;  %14884 = vst [vmem:[#allocation23_spill] sm:$0xff] %v11765_v47  ;;  %v11775_v9 = vmax.f32 %v14889_v20, %v4416_v44  ;;  %v11780_v19 = vmax.f32 %v14893_v41, %v4418_v3  ;;  %v4429_v17 = vmax.f32 %v14895_v16, %v2478_v55  ;;  %3632 = vmatmul.mubr.f32.gmra.mxu1 %v7883_v18  ;;  %v14907_v3 = vld [vmem:[#allocation81_spill] sm:$0xff]  ;;  %v14908_v55 = vld [vmem:[#allocation124_spill] sm:$0xff] }
 0x2a2   :  { %v4431_v53 = vmax.f32 %v14896_v6, %v2879_v48  ;;  %v2480_v2 = vpop.f32.mrf.mxu0  ;;  %v2881_v1 = vpop.f32.mrf.mxu1  ;;  %6838 = vmatprep.mubr.msk.f32.mxu0 %vm1141_vm0, %v7884_v42  ;;  %6894 = vmatprep.mubr.msk.f32.mxu1 %vm1141_vm0, %v7884_v42  ;;  %v14909_v48 = vmax.f32 %v14907_v3, %v14908_v55  ;;  %v14912_v34 = vld [vmem:[#allocation125_spill] sm:$0xff]  ;;  %v14915_v7 = vld [vmem:[#allocation155_spill] sm:$0xff]  ;;  %v14916_v16 = vld [vmem:[#allocation156_spill] sm:$0xff] }
 0x2a3   :  { %14890 = vst [vmem:[#allocation119_spill] sm:$0xff] %v11775_v9  ;;  %14894 = vst [vmem:[#allocation146_spill] sm:$0xff] %v11780_v19  ;;  %v11792_v23 = vmax.f32 %v14899_v0, %v4429_v17  ;;  %v4430_v52 = vmax.f32 %v14905_v57, %v2480_v2  ;;  %v4432_v14 = vmax.f32 %v14906_v11, %v2881_v1  ;;  %v7886_v2 = vld [vmem:[%s13955_s1 + $0x2c8] sm:$0xff]  ;;  %v14917_v1 = vld [vmem:[#allocation82_spill] sm:$0xff] }
 0x2a4   :  { %v11797_v35 = vmax.f32 %v14903_v29, %v4431_v53  ;;  %v2484_v36 = vpop.f32.mrf.mxu0  ;;  %v2885_v44 = vpop.f32.mrf.mxu1  ;;  %3237 = vmatmul.mubr.f32.gmra.mxu0 %v7885_v33  ;;  %v14913_v20 = vmax.f32 %v14911_v5, %v14912_v34  ;;  %v14918_v42 = vld [vmem:[#allocation126_spill] sm:$0xff]  ;;  %v14921_v0 = vld [vmem:[#allocation105_spill] sm:$0xff]  ;;  %v14922_v22 = vld [vmem:[#allocation127_spill] sm:$0xff] }
 0x2a5   :  { %14900 = vst [vmem:[#allocation24_spill] sm:$0xff] %v11792_v23  ;;  %v11807_v18 = vmax.f32 %v14909_v48, %v4430_v52  ;;  %v4443_v41 = vmax.f32 %v14915_v7, %v2484_v36  ;;  %v4445_v17 = vmax.f32 %v14916_v16, %v2885_v44  ;;  %3638 = vmatmul.mubr.f32.gmra.mxu1 %v7885_v33  ;;  %v14925_v57 = vld [vmem:[#allocation157_spill] sm:$0xff]  ;;  %v14926_v11 = vld [vmem:[#allocation158_spill] sm:$0xff]  ;;  %v7887_v33 = vld [vmem:[%s13955_s1 + $0x2c0] sm:$0xff] }
 0x2a6   :  { %14904 = vst [vmem:[#allocation120_spill] sm:$0xff] %v11797_v35  ;;  %v11812_v38 = vmax.f32 %v14913_v20, %v4432_v14  ;;  %v2486_v6 = vpop.f32.mrf.mxu0  ;;  %v2887_v53 = vpop.f32.mrf.mxu1  ;;  %6839 = vmatprep.mubr.msk.f32.mxu0 %vm1141_vm0, %v7886_v2  ;;  %6895 = vmatprep.mubr.msk.f32.mxu1 %vm1141_vm0, %v7886_v2  ;;  %v14919_v32 = vmax.f32 %v14917_v1, %v14918_v42  ;;  %v14927_v3 = vld [vmem:[#allocation29_spill] sm:$0xff]  ;;  %v14928_v55 = vld [vmem:[#allocation128_spill] sm:$0xff]  ;;  %v14931_v34 = vld [vmem:[#allocation83_spill] sm:$0xff] }
 0x2a7   :  { %14910 = vst [vmem:[#allocation78_spill] sm:$0xff] %v11807_v18  ;;  %v14923_v21 = vmax.f32 %v14921_v0, %v14922_v22  ;;  %v4444_v52 = vmax.f32 %v14925_v57, %v2486_v6  ;;  %v4446_v14 = vmax.f32 %v14926_v11, %v2887_v53  ;;  %v14929_v48 = vmax.f32 %v14927_v3, %v14928_v55  ;;  %v14932_v20 = vld [vmem:[#allocation129_spill] sm:$0xff]  ;;  %v14935_v16 = vld [vmem:[#allocation159_spill] sm:$0xff]  ;;  %v14936_v6 = vld [vmem:[#allocation160_spill] sm:$0xff] }
 0x2a8   :  { %14914 = vst [vmem:[#allocation46_spill] sm:$0xff] %v11812_v38  ;;  %v11824_v40 = vmax.f32 %v14919_v32, %v4443_v41  ;;  %v2490_v36 = vpop.f32.mrf.mxu0  ;;  %v2891_v44 = vpop.f32.mrf.mxu1  ;;  %3243 = vmatmul.mubr.f32.gmra.mxu0 %v7887_v33  ;;  %v14933_v7 = vmax.f32 %v14931_v34, %v14932_v20  ;;  %v7888_v42 = vld [vmem:[%s13955_s1 + $0x2d8] sm:$0xff]  ;;  %v14937_v32 = vld [vmem:[#allocation84_spill] sm:$0xff]  ;;  %v14941_v57 = vld [vmem:[#allocation107_spill] sm:$0xff] }
 0x2a9   :  { %v11829_v29 = vmax.f32 %v14923_v21, %v4445_v17  ;;  %v11839_v5 = vmax.f32 %v14929_v48, %v4444_v52  ;;  %v4457_v17 = vmax.f32 %v14935_v16, %v2490_v36  ;;  %v4459_v53 = vmax.f32 %v14936_v6, %v2891_v44  ;;  %3644 = vmatmul.mubr.f32.gmra.mxu1 %v7887_v33  ;;  %v14938_v0 = vld [vmem:[#allocation130_spill] sm:$0xff]  ;;  %v14942_v52 = vld [vmem:[#allocation131_spill] sm:$0xff]  ;;  %v14945_v36 = vld [vmem:[#allocation161_spill] sm:$0xff] }
 0x2aa   :  { %14920 = vst [vmem:[#allocation147_spill] sm:$0xff] %v11824_v40  ;;  %v11844_v41 = vmax.f32 %v14933_v7, %v4446_v14  ;;  %v2492_v2 = vpop.f32.mrf.mxu0  ;;  %v2893_v1 = vpop.f32.mrf.mxu1  ;;  %6840 = vmatprep.mubr.msk.f32.mxu0 %vm1141_vm0, %v7888_v42  ;;  %6896 = vmatprep.mubr.msk.f32.mxu1 %vm1141_vm0, %v7888_v42  ;;  %v14939_v22 = vmax.f32 %v14937_v32, %v14938_v0  ;;  %v14946_v33 = vld [vmem:[#allocation162_spill] sm:$0xff]  ;;  %v7889_v34 = vld [vmem:[%s13955_s1 + $0x2d0] sm:$0xff]  ;;  %v14947_v20 = vld [vmem:[#allocation108_spill] sm:$0xff] }
 0x2ab   :  { %14924 = vst [vmem:[#allocation148_spill] sm:$0xff] %v11829_v29  ;;  %14930 = vst [vmem:[#allocation102_spill] sm:$0xff] %v11839_v5  ;;  %v14943_v11 = vmax.f32 %v14941_v57, %v14942_v52  ;;  %v4458_v44 = vmax.f32 %v14945_v36, %v2492_v2  ;;  %v4460_v3 = vmax.f32 %v14946_v33, %v2893_v1  ;;  %v14948_v7 = vld [vmem:[#allocation132_spill] sm:$0xff]  ;;  %v14951_v6 = vld [vmem:[#allocation31_spill] sm:$0xff] }
 0x2ac   :  { %14934 = vst [vmem:[#allocation95_spill] sm:$0xff] %v11844_v41  ;;  %v11856_v21 = vmax.f32 %v14939_v22, %v4457_v17  ;;  %v2496_v55 = vpop.f32.mrf.mxu0  ;;  %v2897_v48 = vpop.f32.mrf.mxu1  ;;  %3249 = vmatmul.mubr.f32.gmra.mxu0 %v7889_v34  ;;  %v14949_v16 = vmax.f32 %v14947_v20, %v14948_v7  ;;  %v14952_v42 = vld [vmem:[#allocation133_spill] sm:$0xff]  ;;  %v14955_v2 = vld [vmem:[#allocation163_spill] sm:$0xff]  ;;  %v14956_v1 = vld [vmem:[#allocation164_spill] sm:$0xff] }
 0x2ad   :  { %v11861_v14 = vmax.f32 %v14943_v11, %v4459_v53  ;;  %v14953_v53 = vmax.f32 %v14951_v6, %v14952_v42  ;;  %v4471_v0 = vmax.f32 %v14955_v2, %v2496_v55  ;;  %v4473_v22 = vmax.f32 %v14956_v1, %v2897_v48  ;;  %3650 = vmatmul.mubr.f32.gmra.mxu1 %v7889_v34  ;;  %v7890_v11 = vld [vmem:[%s13955_s1 + $0x2e8] sm:$0xff]  ;;  %v14961_v20 = vld [vmem:[#allocation86_spill] sm:$0xff]  ;;  %v14962_v55 = vld [vmem:[#allocation135_spill] sm:$0xff] }
 0x2ae   :  { %14940 = vst [vmem:[#allocation25_spill] sm:$0xff] %v11856_v21  ;;  %v11871_v17 = vmax.f32 %v14949_v16, %v4458_v44  ;;  %v2498_v57 = vpop.f32.mrf.mxu0  ;;  %v2899_v52 = vpop.f32.mrf.mxu1  ;;  %6841 = vmatprep.mubr.msk.f32.mxu0 %vm1141_vm0, %v7890_v11  ;;  %6897 = vmatprep.mubr.msk.f32.mxu1 %vm1141_vm0, %v7890_v11  ;;  %v14957_v36 = vld [vmem:[#allocation32_spill] sm:$0xff]  ;;  %v14958_v44 = vld [vmem:[#allocation134_spill] sm:$0xff]  ;;  %v14963_v7 = vmax.f32 %v14961_v20, %v14962_v55  ;;  %v14965_v34 = vld [vmem:[#allocation165_spill] sm:$0xff] }
 0x2af   :  { %14944 = vst [vmem:[#allocation47_spill] sm:$0xff] %v11861_v14  ;;  %v11876_v32 = vmax.f32 %v14953_v53, %v4460_v3  ;;  %v14959_v33 = vmax.f32 %v14957_v36, %v14958_v44  ;;  %v4472_v16 = vmax.f32 %v14965_v34, %v2498_v57  ;;  %v14966_v6 = vld [vmem:[#allocation166_spill] sm:$0xff]  ;;  %v7891_v1 = vld [vmem:[%s13955_s1 + $0x2e0] sm:$0xff]  ;;  %v14968_v36 = vld [vmem:[#allocation136_spill] sm:$0xff] }
 0x2b0   :  { %14950 = vst [vmem:[#allocation149_spill] sm:$0xff] %v11871_v17  ;;  %v11893_v48 = vmax.f32 %v14963_v7, %v4473_v22  ;;  %v4474_v42 = vmax.f32 %v14966_v6, %v2899_v52  ;;  %v2502_v53 = vpop.f32.mrf.mxu0  ;;  %v2903_v2 = vpop.f32.mrf.mxu1  ;;  %3255 = vmatmul.mubr.f32.gmra.mxu0 %v7891_v1  ;;  %v14967_v11 = vld [vmem:[#allocation110_spill] sm:$0xff]  ;;  %v14972_v20 = vld [vmem:[#allocation137_spill] sm:$0xff]  ;;  %v14975_v57 = vld [vmem:[#allocation167_spill] sm:$0xff] }
 0x2b1   :  { %14954 = vst [vmem:[#allocation150_spill] sm:$0xff] %v11876_v32  ;;  %v11888_v3 = vmax.f32 %v14959_v33, %v4471_v0  ;;  %v14969_v0 = vmax.f32 %v14967_v11, %v14968_v36  ;;  %v14971_v33 = vld [vmem:[#allocation34_spill] sm:$0xff]  ;;  %v4485_v7 = vmax.f32 %v14975_v57, %v2502_v53  ;;  %v14976_v52 = vld [vmem:[#allocation168_spill] sm:$0xff]  ;;  %3656 = vmatmul.mubr.f32.gmra.mxu1 %v7891_v1  ;;  %v14982_v53 = vld [vmem:[#allocation139_spill] sm:$0xff] }
 0x2b2   :  { %14964 = vst [vmem:[#allocation96_spill] sm:$0xff] %v11893_v48  ;;  %v14973_v22 = vmax.f32 %v14971_v33, %v14972_v20  ;;  %v4487_v34 = vmax.f32 %v14976_v52, %v2903_v2  ;;  %v2504_v6 = vpop.f32.mrf.mxu0  ;;  %v2905_v25 = vpop.f32.mrf.mxu1  ;;  %6842 = vmatprep.mubr.msk.f32.mxu0 %vm1141_vm0, %v7892_v62  ;;  %6898 = vmatprep.mubr.msk.f32.mxu1 %vm1141_vm0, %v7892_v62  ;;  %v14978_v11 = vld [vmem:[#allocation138_spill] sm:$0xff]  ;;  %v14985_v1 = vld [vmem:[#allocation169_spill] sm:$0xff]  ;;  %v14987_v60 = vld [vmem:[#allocation111_spill] sm:$0xff] }
 0x2b3   :  { %14960 = vst [vmem:[#allocation79_spill] sm:$0xff] %v11888_v3  ;;  %v11903_v44 = vmax.f32 %v14969_v0, %v4472_v16  ;;  %v14977_v16 = vld [vmem:[#allocation87_spill] sm:$0xff]  ;;  %v4486_v20 = vmax.f32 %v14985_v1, %v2504_v6  ;;  %v7893_v62 = vld [vmem:[%s13955_s1 + $0x2f0] sm:$0xff]  ;;  %v7902_v38 = vld [vmem:[%s13955_s1 + $0x348] sm:$0xff] }
 0x2b4   :  { %v11908_v55 = vmax.f32 %v14973_v22, %v4474_v42  ;;  %v14979_v36 = vmax.f32 %v14977_v16, %v14978_v11  ;;  %v14981_v0 = vld [vmem:[#allocation35_spill] sm:$0xff]  ;;  %v14986_v22 = vld [vmem:[#allocation170_spill] sm:$0xff]  ;;  %v2508_v52 = vpop.f32.mrf.mxu0  ;;  %v2909_v15 = vpop.f32.mrf.mxu1  ;;  %3261 = vmatmul.mubr.f32.gmra.mxu0 %v7893_v62  ;;  %v14988_v16 = vld [vmem:[#allocation140_spill] sm:$0xff] }
 0x2b5   :  { %14970 = vst [vmem:[#allocation26_spill] sm:$0xff] %v11903_v44  ;;  %v14983_v33 = vmax.f32 %v14981_v0, %v14982_v53  ;;  %v4488_v57 = vmax.f32 %v14986_v22, %v2905_v25  ;;  %v14992_v0 = vld [vmem:[#allocation141_spill] sm:$0xff]  ;;  %v14995_v6 = vld [vmem:[#allocation171_spill] sm:$0xff]  ;;  %v14996_v25 = vld [vmem:[#allocation172_spill] sm:$0xff]  ;;  %3662 = vmatmul.mubr.f32.gmra.mxu1 %v7893_v62  ;;  %6843 = vmatprep.mubr.msk.f32.mxu0 %vm1141_vm0, %v7894_v46 }
 0x2b6   :  { %14974 = vst [vmem:[#allocation43_spill] sm:$0xff] %v11908_v55  ;;  %v11920_v42 = vmax.f32 %v14979_v36, %v4485_v7  ;;  %v14989_v7 = vmax.f32 %v14987_v60, %v14988_v16  ;;  %v14991_v36 = vld [vmem:[#allocation112_spill] sm:$0xff]  ;;  %v4501_v1 = vmax.f32 %v14996_v25, %v2909_v15  ;;  %v2510_v22 = vpop.f32.mrf.mxu0  ;;  %v2911_v27 = vpop.f32.mrf.mxu1  ;;  %6899 = vmatprep.mubr.msk.f32.mxu1 %vm1141_vm0, %v7894_v46  ;;  %v14997_v60 = vld [vmem:[#allocation89_spill] sm:$0xff]  ;;  %v7895_v46 = vld [vmem:[%s13955_s1 + $0x300] sm:$0xff] }
 0x2b7   :  { %v11925_v2 = vmax.f32 %v14983_v33, %v4487_v34  ;;  %v14993_v34 = vmax.f32 %v14991_v36, %v14992_v0  ;;  %v4499_v33 = vmax.f32 %v14995_v6, %v2508_v52  ;;  %v15002_v52 = vld [vmem:[#allocation143_spill] sm:$0xff]  ;;  %v15005_v62 = vld [vmem:[#allocation173_spill] sm:$0xff]  ;;  %v7908_v58 = vld [vmem:[%s13955_s1 + $0x378] sm:$0xff] }
 0x2b8   :  { %14980 = vst [vmem:[#allocation151_spill] sm:$0xff] %v11920_v42  ;;  %v11935_v11 = vmax.f32 %v14989_v7, %v4486_v20  ;;  %v14998_v20 = vld [vmem:[#allocation142_spill] sm:$0xff]  ;;  %v15001_v7 = vld [vmem:[#allocation37_spill] sm:$0xff]  ;;  %v4500_v0 = vmax.f32 %v15005_v62, %v2510_v22  ;;  %v11961_v25 = vpop.f32.mrf.mxu0  ;;  %3267 = vmatmul.mubr.f32.gmra.mxu0 %v7895_v46  ;;  %v11966_v37 = vpop.f32.mrf.mxu1  ;;  %v7903_v55 = vld [vmem:[%s13955_s1 + $0x340] sm:$0xff] }
 0x2b9   :  { %14984 = vst [vmem:[#allocation152_spill] sm:$0xff] %v11925_v2  ;;  %v11940_v53 = vmax.f32 %v14993_v34, %v4488_v57  ;;  %v14999_v16 = vmax.f32 %v14997_v60, %v14998_v20  ;;  %v15003_v36 = vmax.f32 %v15001_v7, %v15002_v52  ;;  %v15006_v34 = vld [vmem:[#allocation174_spill] sm:$0xff]  ;;  %15007 = vst [vmem:[#allocation153_spill] sm:$0xff] %v11961_v25  ;;  %v15009_v60 = vld [vmem:[#allocation144_spill] sm:$0xff]  ;;  %3668 = vmatmul.mubr.f32.gmra.mxu1 %v7895_v46 }
 0x2ba   :  { %14990 = vst [vmem:[#allocation103_spill] sm:$0xff] %v11935_v11  ;;  %v4502_v6 = vmax.f32 %v15006_v34, %v2911_v27  ;;  %v15013_v7 = vld [vmem:[#allocation145_spill] sm:$0xff]  ;;  %v7896_v27 = vld [vmem:[%s13955_s1 + $0x318] sm:$0xff]  ;;  %v11984_v62 = vpop.f32.mrf.mxu1  ;;  %v7898_v46 = vld [vmem:[%s13955_s1 + $0x328] sm:$0xff] }
 0x2bb   :  { %14994 = vst [vmem:[#allocation122_spill] sm:$0xff] %v11940_v53  ;;  %v11952_v57 = vmax.f32 %v14999_v16, %v4499_v33  ;;  %v11957_v15 = vmax.f32 %v15003_v36, %v4501_v1  ;;  %v15008_v33 = vld [vmem:[#allocation90_spill] sm:$0xff]  ;;  %v15012_v1 = vld [vmem:[#allocation113_spill] sm:$0xff]  ;;  %6844 = vmatprep.mubr.msk.f32.mxu0 %vm1141_vm0, %v7896_v27  ;;  %v11982_v36 = vpop.f32.mrf.mxu0  ;;  %15016 = vst [vmem:[#allocation124_spill] sm:$0xff] %v11984_v62  ;;  %6900 = vmatprep.mubr.msk.f32.mxu1 %vm1141_vm0, %v7896_v27 }
 0x2bc   :  { %v15010_v20 = vmax.f32 %v15008_v33, %v15009_v60  ;;  %v15014_v52 = vmax.f32 %v15012_v1, %v15013_v7  ;;  %v7897_v34 = vld [vmem:[%s13955_s1 + $0x310] sm:$0xff]  ;;  %v7899_v1 = vld [vmem:[%s13955_s1 + $0x320] sm:$0xff]  ;;  %v7904_v53 = vld [vmem:[%s13955_s1 + $0x358] sm:$0xff] }
 0x2bd   :  { %15000 = vst [vmem:[#allocation104_spill] sm:$0xff] %v11952_v57  ;;  %15004 = vst [vmem:[#allocation123_spill] sm:$0xff] %v11957_v15  ;;  %3273 = vmatmul.mubr.f32.gmra.mxu0 %v7897_v34  ;;  %3674 = vmatmul.mubr.f32.gmra.mxu1 %v7897_v34  ;;  %v7901_v19 = vld [vmem:[%s13955_s1 + $0x330] sm:$0xff]  ;;  %v7907_v39 = vld [vmem:[%s13955_s1 + $0x360] sm:$0xff] }
 0x2be   :  { %v11971_v16 = vmax.f32 %v15010_v20, %v4500_v0  ;;  %v11976_v22 = vmax.f32 %v15014_v52, %v4502_v6  ;;  %v11987_v0 = vpop.f32.mrf.mxu0  ;;  %v11992_v6 = vpop.f32.mrf.mxu1  ;;  %6845 = vmatprep.mubr.msk.f32.mxu0 %vm1141_vm0, %v7898_v46  ;;  %6901 = vmatprep.mubr.msk.f32.mxu1 %vm1141_vm0, %v7898_v46  ;;  %v7900_v52 = vld [vmem:[%s13955_s1 + $0x338] sm:$0xff]  ;;  %v15052_v9 = vld [vmem:[#allocation77_spill] sm:$0xff]  ;;  %v15060_v44 = vld [vmem:[#allocation80_spill] sm:$0xff] }
 0x2bf   :  { %v6964_v14 = vld [vmem:[%s13958_s3 + $0x18] sm:$0x3]  ;;  %v15059_v17 = vld [vmem:[#allocation61_spill] sm:$0xff]  ;;  %v15083_v42 = vld [vmem:[#allocation4_spill] sm:$0xff] }
 0x2c0   :  { %15011 = vst [vmem:[#allocation154_spill] sm:$0xff] %v11971_v16  ;;  %15015 = vst [vmem:[#allocation81_spill] sm:$0xff] %v11976_v22  ;;  %v11998_v33 = vpop.f32.mrf.mxu0  ;;  %v12001_v60 = vpop.f32.mrf.mxu1  ;;  %v15042_v2 = vld [vmem:[#allocation98_spill] sm:$0xff]  ;;  %v4887_v11 = vadd.f32 %v15060_v44, %v15059_v17  ;;  %v15064_v17 = vld [vmem:[#allocation27_spill] sm:$0xff] }
 0x2c1   :  { %15017 = vst [vmem:[#allocation28_spill] sm:$0xff] %v12001_v60  ;;  %3279 = vmatmul.mubr.f32.gmra.mxu0 %v7899_v1  ;;  %3680 = vmatmul.mubr.f32.gmra.mxu1 %v7899_v1  ;;  %v15047_v4 = vld [vmem:[#allocation114_spill] sm:$0xff]  ;;  %v15076_v45 = vld [vmem:[#allocation85_spill] sm:$0xff]  ;;  %v15084_v57 = vld [vmem:[#allocation88_spill] sm:$0xff] }
 0x2c2   :  { %v12003_v20 = vpop.f32.mrf.mxu0  ;;  %v12008_v7 = vpop.f32.mrf.mxu1  ;;  %6846 = vmatprep.mubr.msk.f32.mxu0 %vm1141_vm0, %v7900_v52  ;;  %6902 = vmatprep.mubr.msk.f32.mxu1 %vm1141_vm0, %v7900_v52  ;;  %v15048_v12 = vmax.f32 %v15047_v4, 0.0  ;;  %v15072_v28 = vld [vmem:[#allocation30_spill] sm:$0xff]  ;;  %v15098_v25 = vld [vmem:[#allocation69_spill] sm:$0xff] }
 0x2c3   :  { %15018 = vst [vmem:[#allocation125_spill] sm:$0xff] %v12003_v20  ;;  %v15075_v30 = vld [vmem:[#allocation54_spill] sm:$0xff]  ;;  %v15106_v20 = vld [vmem:[#allocation12_spill] sm:$0xff] }
 0x2c4   :  { %v12014_v27 = vpop.f32.mrf.mxu0  ;;  %v12017_v34 = vpop.f32.mrf.mxu1  ;;  %v4831_v23 = vadd.f32 %v15076_v45, %v15075_v30  ;;  %v7920_v40 = vld [vmem:[%s13955_s1 + $0x58] sm:$0xff]  ;;  %v15080_v30 = vld [vmem:[#allocation109_spill] sm:$0xff]  ;;  %v4889_v60 = vadd.f32 %v15060_v44, %v15106_v20  ;;  %v15108_v20 = vld [vmem:[#allocation60_spill] sm:$0xff] }
 0x2c5   :  { %15019 = vst [vmem:[#allocation155_spill] sm:$0xff] %v12014_v27  ;;  %15020 = vst [vmem:[#allocation156_spill] sm:$0xff] %v12017_v34  ;;  %3285 = vmatmul.mubr.f32.gmra.mxu0 %v7901_v19  ;;  %3686 = vmatmul.mubr.f32.gmra.mxu1 %v7901_v19  ;;  %v15038_v34 = vld [vmem:[#allocation22_spill] sm:$0xff] }
 0x2c6   :  { %v12019_v46 = vpop.f32.mrf.mxu0  ;;  %v12024_v1 = vpop.f32.mrf.mxu1  ;;  %6847 = vmatprep.mubr.msk.f32.mxu0 %vm1141_vm0, %v7902_v38  ;;  %6903 = vmatprep.mubr.msk.f32.mxu1 %vm1141_vm0, %v7902_v38 }
 0x2c7   :  { %15021 = vst [vmem:[#allocation82_spill] sm:$0xff] %v12019_v46  ;;  %v15110_v46 = vld [vmem:[#allocation58_spill] sm:$0xff] }
 0x2c8   :  { %v12030_v41 = vpop.f32.mrf.mxu0  ;;  %v12033_v52 = vpop.f32.mrf.mxu1  ;;  %v4861_v27 = vadd.f32 %v15068_v61, %v15110_v46  ;;  %v15112_v46 = vld [vmem:[#allocation56_spill] sm:$0xff] }
 0x2c9   :  { %15022 = vst [vmem:[#allocation126_spill] sm:$0xff] %v12030_v41  ;;  %15023 = vst [vmem:[#allocation105_spill] sm:$0xff] %v12033_v52  ;;  %3291 = vmatmul.mubr.f32.gmra.mxu0 %v7903_v55  ;;  %3692 = vmatmul.mubr.f32.gmra.mxu1 %v7903_v55 }
 0x2ca   :  { %v12035_v32 = vpop.f32.mrf.mxu0  ;;  %v12040_v19 = vpop.f32.mrf.mxu1  ;;  %6848 = vmatprep.mubr.msk.f32.mxu0 %vm1141_vm0, %v7904_v53  ;;  %6904 = vmatprep.mubr.msk.f32.mxu1 %vm1141_vm0, %v7904_v53 }
 0x2cb   :  { %15024 = vst [vmem:[#allocation127_spill] sm:$0xff] %v12035_v32  ;;  %v15114_v32 = vld [vmem:[#allocation7_spill] sm:$0xff] }
 0x2cc   :  { %v12046_v22 = vpop.f32.mrf.mxu0  ;;  %v12049_v38 = vpop.f32.mrf.mxu1  ;;  %v4833_v41 = vadd.f32 %v15076_v45, %v15114_v32  ;;  %v15117_v32 = vld [vmem:[#allocation6_spill] sm:$0xff] }
 0x2cd   :  { %15025 = vst [vmem:[#allocation157_spill] sm:$0xff] %v12046_v22  ;;  %15026 = vst [vmem:[#allocation158_spill] sm:$0xff] %v12049_v38  ;;  %3297 = vmatmul.mubr.f32.gmra.mxu0 %v7905_v49  ;;  %3698 = vmatmul.mubr.f32.gmra.mxu1 %v7905_v49 }
 0x2ce   :  { %v12051_v51 = vpop.f32.mrf.mxu0  ;;  %v12056_v55 = vpop.f32.mrf.mxu1  ;;  %6849 = vmatprep.mubr.msk.f32.mxu0 %vm1141_vm0, %v7906_v50  ;;  %6905 = vmatprep.mubr.msk.f32.mxu1 %vm1141_vm0, %v7906_v50 }
 0x2cf   :  { %15027 = vst [vmem:[#allocation29_spill] sm:$0xff] %v12051_v51  ;;  %15028 = vst [vmem:[#allocation128_spill] sm:$0xff] %v12056_v55  ;;  %v15120_v51 = vld [vmem:[#allocation51_spill] sm:$0xff]  ;;  %v15193_v55 = vld [vmem:[#allocation177_spill] sm:$0xff] }
 0x2d0   :  { %v12062_v24 = vpop.f32.mrf.mxu0  ;;  %v12065_v53 = vpop.f32.mrf.mxu1  ;;  %v4805_v22 = vadd.f32 %v15084_v57, %v15120_v51  ;;  %v15123_v51 = vld [vmem:[#allocation3_spill] sm:$0xff] }
 0x2d1   :  { %15029 = vst [vmem:[#allocation83_spill] sm:$0xff] %v12062_v24  ;;  %15030 = vst [vmem:[#allocation129_spill] sm:$0xff] %v12065_v53  ;;  %3303 = vmatmul.mubr.f32.gmra.mxu0 %v7907_v39  ;;  %3704 = vmatmul.mubr.f32.gmra.mxu1 %v7907_v39  ;;  %v6963_v53 = vld [vmem:[%s13958_s3 + $0x10] sm:$0xff] }
 0x2d2   :  { %v12067_v38 = vpop.f32.mrf.mxu0  ;;  %v12072_v49 = vpop.f32.mrf.mxu1  ;;  %6850 = vmatprep.mubr.msk.f32.mxu0 %vm1141_vm0, %v7908_v58  ;;  %6906 = vmatprep.mubr.msk.f32.mxu1 %vm1141_vm0, %v7908_v58  ;;  %v7909_v39 = vld [vmem:[%s13955_s1 + $0x370] sm:$0xff]  ;;  %v7910_v58 = vld [vmem:[%s13955_s1 + $0x8] sm:$0xff] }
 0x2d3   :  { %15031 = vst [vmem:[#allocation159_spill] sm:$0xff] %v12067_v38  ;;  %15032 = vst [vmem:[#allocation160_spill] sm:$0xff] %v12072_v49  ;;  %v15126_v38 = vld [vmem:[#allocation49_spill] sm:$0xff] }
 0x2d4   :  { %v12078_v52 = vpop.f32.mrf.mxu0  ;;  %v12081_v50 = vpop.f32.mrf.mxu1 }
 0x2d5   :  { %15033 = vst [vmem:[#allocation84_spill] sm:$0xff] %v12078_v52  ;;  %15034 = vst [vmem:[#allocation130_spill] sm:$0xff] %v12081_v50  ;;  %3309 = vmatmul.mubr.f32.gmra.mxu0 %v7909_v39  ;;  %3710 = vmatmul.mubr.f32.gmra.mxu1 %v7909_v39  ;;  %v15037_v50 = vld [vmem:[#allocation70_spill] sm:$0xff]  ;;  %v15041_v39 = vld [vmem:[#allocation68_spill] sm:$0xff] }
 0x2d6   :  { %v12086_v63 = vpop.f32.mrf.mxu0  ;;  %v12091_v47 = vpop.f32.mrf.mxu1  ;;  %6907 = vmatprep.mubr.msk.f32.mxu0 %vm1141_vm0, %v7910_v58  ;;  %v4957_v35 = vadd.f32 %v15038_v34, %v15037_v50  ;;  %7269 = vmatprep.mubr.msk.f32.mxu1 %vm5186_vm1, %v6963_v53  ;;  %v4943_v15 = vadd.f32 %v15042_v2, %v15041_v39  ;;  %v5181_v58 = vld [vmem:[%s13958_s3] sm:$0xff]  ;;  %v7912_v39 = vld [vmem:[%s13955_s1 + $0x18] sm:$0xff] }
 0x2d7   :  { %15035 = vst [vmem:[#allocation107_spill] sm:$0xff] %v12086_v63  ;;  %15036 = vst [vmem:[#allocation131_spill] sm:$0xff] %v12091_v47  ;;  %v7911_v50 = vld [vmem:[%s13955_s1] sm:$0xff]  ;;  %v15132_v63 = vld [vmem:[#allocation17_spill] sm:$0xff] }
 0x2d8   :  { %v12099_v29 = vpop.f32.mrf.mxu0  ;;  %v12105_v48 = vpop.f32.mrf.mxu1  ;;  %v5153_v8 = vmax.f32 %v4957_v35, 0.0  ;;  %v5139_v35 = vmax.f32 %v4943_v15, 0.0  ;;  %v15055_v15 = vld [vmem:[#allocation63_spill] sm:$0xff]  ;;  %v7960_v47 = vld [vmem:[%s13955_s1 + $0x198] sm:$0xff] }
 0x2d9   :  { %15039 = vst [vmem:[#allocation161_spill] sm:$0xff] %v12099_v29  ;;  %15040 = vst [vmem:[#allocation162_spill] sm:$0xff] %v12105_v48  ;;  %3781 = vmatmul.mubr.f32.vlgmr.msra.gmra.mxu0 %v7911_v50  ;;  %7270 = vmatmul.mubr.msk.f32.vlgmr.msra.gmra.mxu1 %vm5186_vm1, %v6964_v14  ;;  %v15045_v48 = vld [vmem:[#allocation15_spill] sm:$0xff]  ;;  %v15051_v14 = vld [vmem:[#allocation14_spill] sm:$0xff] }
 0x2da   :  { %v12112_v10 = vpop.f32.mrf.mxu0  ;;  %v12117_v53 = vpop.f32.mrf.mxu1  ;;  %6908 = vmatprep.mubr.msk.f32.mxu0 %vm1141_vm0, %v7912_v39  ;;  %v4929_v31 = vadd.f32 %v15046_v59, %v15045_v48  ;;  %7273 = vmatpush3.msra.mxu1 %v15048_v12  ;;  %v4915_v18 = vadd.f32 %v15052_v9, %v15051_v14  ;;  %v7913_v48 = vld [vmem:[%s13955_s1 + $0x10] sm:$0xff] }
 0x2db   :  { %15043 = vst [vmem:[#allocation108_spill] sm:$0xff] %v12112_v10  ;;  %15044 = vst [vmem:[#allocation132_spill] sm:$0xff] %v12117_v53  ;;  %7300 = vmatprep.mubr.msk.f32.mxu1 %vm5186_vm1, %v5181_v58  ;;  %7274 = vmatprep.subr.mxu1 %v5153_v8  ;;  %v7914_v58 = vld [vmem:[%s13955_s1 + $0x28] sm:$0xff]  ;;  %v15056_v39 = vld [vmem:[#allocation101_spill] sm:$0xff] }
 0x2dc   :  { %v12128_v26 = vpop.f32.mrf.mxu0  ;;  %v12131_v50 = vpop.f32.mrf.mxu1  ;;  %7275 = vmatpush3.msra.mxu1 %v5153_v8  ;;  %v5125_v12 = vmax.f32 %v4929_v31, 0.0  ;;  %v4901_v8 = vadd.f32 %v15056_v39, %v15055_v15  ;;  %v7941_v29 = vld [vmem:[%s13955_s1 + $0xf0] sm:$0xff] }
 0x2dd   :  { %15049 = vst [vmem:[#allocation31_spill] sm:$0xff] %v12128_v26  ;;  %15050 = vst [vmem:[#allocation133_spill] sm:$0xff] %v12131_v50  ;;  %3787 = vmatmul.mubr.f32.gmra.mxu0 %v7913_v48  ;;  %7276 = vmatprep.subr.mxu1 %v5139_v35  ;;  %v5111_v48 = vmax.f32 %v4915_v18, 0.0  ;;  %v15063_v18 = vld [vmem:[#allocation59_spill] sm:$0xff]  ;;  %v15185_v10 = vld [vmem:[#allocation117_spill] sm:$0xff] }
 0x2de   :  { %v12135_v5 = vpop.f32.mrf.mxu0  ;;  %v12140_v4 = vpop.f32.mrf.mxu1  ;;  %6909 = vmatprep.mubr.msk.f32.mxu0 %vm1141_vm0, %v7914_v58  ;;  %7277 = vmatpush3.msra.mxu1 %v5139_v35  ;;  %v7915_v58 = vld [vmem:[%s13955_s1 + $0x20] sm:$0xff]  ;;  %v5097_v35 = vmax.f32 %v4901_v8, 0.0 }
 0x2df   :  { %15053 = vst [vmem:[#allocation163_spill] sm:$0xff] %v12135_v5  ;;  %15054 = vst [vmem:[#allocation164_spill] sm:$0xff] %v12140_v4  ;;  %7278 = vmatprep.subr.mxu1 %v5125_v12  ;;  %v15144_v5 = vld [vmem:[#allocation62_spill] sm:$0xff] }
 0x2e0   :  { %v12148_v14 = vpop.f32.mrf.mxu0  ;;  %v12150_v50 = vpop.f32.mrf.mxu1  ;;  %7279 = vmatpush3.msra.mxu1 %v5125_v12  ;;  %v4873_v12 = vadd.f32 %v15064_v17, %v15063_v18  ;;  %v4890_v26 = vadd.f32 %v15060_v44, %v15144_v5  ;;  %v15147_v5 = vld [vmem:[#allocation11_spill] sm:$0xff]  ;;  %v15183_v4 = vld [vmem:[#allocation94_spill] sm:$0xff] }
 0x2e1   :  { %15057 = vst [vmem:[#allocation32_spill] sm:$0xff] %v12148_v14  ;;  %15058 = vst [vmem:[#allocation134_spill] sm:$0xff] %v12150_v50  ;;  %3793 = vmatmul.mubr.f32.gmra.mxu0 %v7915_v58  ;;  %7280 = vmatprep.subr.mxu1 %v5111_v48  ;;  %v7916_v50 = vld [vmem:[%s13955_s1 + $0x38] sm:$0xff]  ;;  %v5083_v58 = vmax.f32 %v4887_v11, 0.0  ;;  %v15071_v11 = vld [vmem:[#allocation8_spill] sm:$0xff] }
 0x2e2   :  { %v12154_v31 = vpop.f32.mrf.mxu0  ;;  %v12159_v15 = vpop.f32.mrf.mxu1  ;;  %6910 = vmatprep.mubr.msk.f32.mxu0 %vm1141_vm0, %v7916_v50  ;;  %7281 = vmatpush3.msra.mxu1 %v5111_v48  ;;  %v7917_v50 = vld [vmem:[%s13955_s1 + $0x30] sm:$0xff]  ;;  %v5069_v48 = vmax.f32 %v4873_v12, 0.0 }
 0x2e3   :  { %15061 = vst [vmem:[#allocation86_spill] sm:$0xff] %v12154_v31  ;;  %15062 = vst [vmem:[#allocation135_spill] sm:$0xff] %v12159_v15  ;;  %7282 = vmatprep.subr.mxu1 %v5097_v35  ;;  %v15150_v31 = vld [vmem:[#allocation10_spill] sm:$0xff] }
 0x2e4   :  { %v12167_v16 = vpop.f32.mrf.mxu0  ;;  %v12169_v56 = vpop.f32.mrf.mxu1  ;;  %7283 = vmatpush3.msra.mxu1 %v5097_v35  ;;  %v4845_v35 = vadd.f32 %v15072_v28, %v15071_v11  ;;  %v4862_v14 = vadd.f32 %v15068_v61, %v15150_v31  ;;  %v15153_v31 = vld [vmem:[#allocation57_spill] sm:$0xff] }
 0x2e5   :  { %15065 = vst [vmem:[#allocation165_spill] sm:$0xff] %v12167_v16  ;;  %15066 = vst [vmem:[#allocation166_spill] sm:$0xff] %v12169_v56  ;;  %3799 = vmatmul.mubr.f32.gmra.mxu0 %v7917_v50  ;;  %7284 = vmatprep.subr.mxu1 %v5083_v58  ;;  %v7918_v56 = vld [vmem:[%s13955_s1 + $0x48] sm:$0xff]  ;;  %v5055_v50 = vmax.f32 %v4859_v13, 0.0 }
 0x2e6   :  { %v12173_v8 = vpop.f32.mrf.mxu0  ;;  %v12178_v18 = vpop.f32.mrf.mxu1  ;;  %6911 = vmatprep.mubr.msk.f32.mxu0 %vm1141_vm0, %v7918_v56  ;;  %7285 = vmatpush3.msra.mxu1 %v5083_v58  ;;  %v7919_v56 = vld [vmem:[%s13955_s1 + $0x40] sm:$0xff]  ;;  %v5041_v58 = vmax.f32 %v4845_v35, 0.0  ;;  %v15079_v13 = vld [vmem:[#allocation52_spill] sm:$0xff] }
 0x2e7   :  { %15069 = vst [vmem:[#allocation110_spill] sm:$0xff] %v12173_v8  ;;  %15070 = vst [vmem:[#allocation136_spill] sm:$0xff] %v12178_v18  ;;  %7286 = vmatprep.subr.mxu1 %v5069_v48  ;;  %v15156_v8 = vld [vmem:[#allocation55_spill] sm:$0xff] }
 0x2e8   :  { %v12186_v43 = vpop.f32.mrf.mxu0  ;;  %v12188_v54 = vpop.f32.mrf.mxu1  ;;  %7287 = vmatpush3.msra.mxu1 %v5069_v48  ;;  %v4817_v48 = vadd.f32 %v15080_v30, %v15079_v13  ;;  %v4834_v16 = vadd.f32 %v15076_v45, %v15156_v8  ;;  %v7948_v8 = vld [vmem:[%s13955_s1 + $0x138] sm:$0xff] }
 0x2e9   :  { %15073 = vst [vmem:[#allocation34_spill] sm:$0xff] %v12186_v43  ;;  %15074 = vst [vmem:[#allocation137_spill] sm:$0xff] %v12188_v54  ;;  %3805 = vmatmul.mubr.f32.gmra.mxu0 %v7919_v56  ;;  %7288 = vmatprep.subr.mxu1 %v5055_v50  ;;  %v5027_v56 = vmax.f32 %v4831_v23, 0.0  ;;  %v15087_v23 = vld [vmem:[#allocation121_spill] sm:$0xff]  ;;  %v15092_v54 = vld [vmem:[#allocation48_spill] sm:$0xff] }
 0x2ea   :  { %v12192_v12 = vpop.f32.mrf.mxu0  ;;  %v12197_v11 = vpop.f32.mrf.mxu1  ;;  %6912 = vmatprep.mubr.msk.f32.mxu0 %vm1141_vm0, %v7920_v40  ;;  %7289 = vmatpush3.msra.mxu1 %v5055_v50  ;;  %v7921_v40 = vld [vmem:[%s13955_s1 + $0x50] sm:$0xff]  ;;  %v5013_v50 = vmax.f32 %v4817_v48, 0.0  ;;  %v4974_v24 = vadd.f32 %v15092_v54, %v15126_v38  ;;  %v15129_v38 = vld [vmem:[#allocation18_spill] sm:$0xff] }
 0x2eb   :  { %15077 = vst [vmem:[#allocation167_spill] sm:$0xff] %v12192_v12  ;;  %15078 = vst [vmem:[#allocation168_spill] sm:$0xff] %v12197_v11  ;;  %7290 = vmatprep.subr.mxu1 %v5041_v58  ;;  %v4803_v11 = vadd.f32 %v15084_v57, %v15083_v42  ;;  %v15088_v42 = vld [vmem:[#allocation36_spill] sm:$0xff]  ;;  %v15166_v43 = vld [vmem:[#allocation5_spill] sm:$0xff] }
 0x2ec   :  { %v12205_v21 = vpop.f32.mrf.mxu0  ;;  %v12207_v3 = vpop.f32.mrf.mxu1  ;;  %7291 = vmatpush3.msra.mxu1 %v5041_v58  ;;  %v4789_v58 = vadd.f32 %v15088_v42, %v15087_v23  ;;  %v15091_v12 = vld [vmem:[#allocation72_spill] sm:$0xff] }
 0x2ed   :  { %15081 = vst [vmem:[#allocation87_spill] sm:$0xff] %v12205_v21  ;;  %15082 = vst [vmem:[#allocation138_spill] sm:$0xff] %v12207_v3  ;;  %3811 = vmatmul.mubr.f32.gmra.mxu0 %v7921_v40  ;;  %7292 = vmatprep.subr.mxu1 %v5027_v56  ;;  %v7922_v3 = vld [vmem:[%s13955_s1 + $0x68] sm:$0xff]  ;;  %v4999_v40 = vmax.f32 %v4803_v11, 0.0  ;;  %v7924_v11 = vld [vmem:[%s13955_s1 + $0x78] sm:$0xff] }
 0x2ee   :  { %v12211_v35 = vpop.f32.mrf.mxu0  ;;  %v12216_v13 = vpop.f32.mrf.mxu1  ;;  %6913 = vmatprep.mubr.msk.f32.mxu0 %vm1141_vm0, %v7922_v3  ;;  %7293 = vmatpush3.msra.mxu1 %v5027_v56  ;;  %v7923_v3 = vld [vmem:[%s13955_s1 + $0x60] sm:$0xff]  ;;  %v5182_v56 = vld [vmem:[%s13958_s3 + $0x8] sm:$0x3] }
 0x2ef   :  { %15085 = vst [vmem:[#allocation35_spill] sm:$0xff] %v12211_v35  ;;  %15086 = vst [vmem:[#allocation139_spill] sm:$0xff] %v12216_v13  ;;  %7294 = vmatprep.subr.mxu1 %v5013_v50  ;;  %v4973_v13 = vadd.f32 %v15092_v54, %v15091_v12  ;;  %v15095_v12 = vld [vmem:[#allocation71_spill] sm:$0xff] }
 0x2f0   :  { %v12224_v35 = vpop.f32.mrf.mxu0  ;;  %v12226_v21 = vpop.f32.mrf.mxu1  ;;  %7295 = vmatpush3.msra.mxu1 %v5013_v50  ;;  %v4959_v50 = vadd.f32 %v15038_v34, %v15095_v12  ;;  %v4945_v12 = vadd.f32 %v15042_v2, %v15098_v25 }
 0x2f1   :  { %15089 = vst [vmem:[#allocation169_spill] sm:$0xff] %v12224_v35  ;;  %15090 = vst [vmem:[#allocation170_spill] sm:$0xff] %v12226_v21  ;;  %3817 = vmatmul.mubr.f32.gmra.mxu0 %v7923_v3  ;;  %7296 = vmatprep.subr.mxu1 %v4999_v40  ;;  %v4985_v35 = vmax.f32 %v4789_v58, 0.0  ;;  %v6969_v58 = vld [vmem:[%s13958_s3 + $0x20] sm:$0xff] }
 0x2f2   :  { %v12230_v48 = vpop.f32.mrf.mxu0  ;;  %v12237_v23 = vpop.f32.mrf.mxu1  ;;  %6914 = vmatprep.mubr.msk.f32.mxu0 %vm1141_vm0, %v7924_v11  ;;  %7297 = vmatpush3.msra.mxu1 %v4999_v40  ;;  %v5169_v11 = vmax.f32 %v4973_v13, 0.0  ;;  %v15100_v21 = vld [vmem:[#allocation67_spill] sm:$0xff]  ;;  %v5141_v13 = vmax.f32 %v4945_v12, 0.0 }
 0x2f3   :  { %15093 = vst [vmem:[#allocation111_spill] sm:$0xff] %v12230_v48  ;;  %15094 = vst [vmem:[#allocation140_spill] sm:$0xff] %v12237_v23  ;;  %7298 = vmatprep.subr.mxu1 %v4985_v35  ;;  %v7925_v23 = vld [vmem:[%s13955_s1 + $0x70] sm:$0xff] }
 0x2f4   :  { %v12247_v3 = vpop.f32.mrf.mxu0  ;;  %v12254_v48 = vpop.f32.mrf.mxu1  ;;  %7299 = vmatpush3.msra.mxu1 %v4985_v35  ;;  %v5155_v35 = vmax.f32 %v4959_v50, 0.0 }
 0x2f5   :  { %15096 = vst [vmem:[#allocation112_spill] sm:$0xff] %v12247_v3  ;;  %15097 = vst [vmem:[#allocation141_spill] sm:$0xff] %v12254_v48  ;;  %3823 = vmatmul.mubr.f32.gmra.mxu0 %v7925_v23  ;;  %7303 = vmatprep.subr.mxu1 %v5169_v11  ;;  %v4931_v48 = vadd.f32 %v15046_v59, %v15100_v21  ;;  %v7926_v3 = vld [vmem:[%s13955_s1 + $0x88] sm:$0xff]  ;;  %v15102_v21 = vld [vmem:[#allocation65_spill] sm:$0xff] }
 0x2f6   :  { %v12260_v40 = vpop.f32.mrf.mxu0  ;;  %v12270_v25 = vpop.f32.mrf.mxu1  ;;  %7301 = vmatmul.mubr.msk.f32.vlgmr.msra.gmra.mxu1 %vm5186_vm1, %v5182_v56  ;;  %6915 = vmatprep.mubr.msk.f32.mxu0 %vm1141_vm0, %v7926_v3  ;;  %v7927_v3 = vld [vmem:[%s13955_s1 + $0x80] sm:$0xff] }
 0x2f7   :  { %15099 = vst [vmem:[#allocation171_spill] sm:$0xff] %v12260_v40  ;;  %7304 = vmatpush3.msra.mxu1 %v5169_v11  ;;  %v4917_v40 = vadd.f32 %v15052_v9, %v15102_v21  ;;  %7331 = vmatprep.mubr.msk.f32.mxu1 %vm5186_vm1, %v6969_v58  ;;  %v5127_v21 = vmax.f32 %v4931_v48, 0.0  ;;  %v7928_v58 = vld [vmem:[%s13955_s1 + $0x98] sm:$0xff] }
 0x2f8   :  { %v12277_v23 = vpop.f32.mrf.mxu0  ;;  %7305 = vmatprep.subr.mxu1 %v5155_v35  ;;  %v12285_v50 = vpop.f32.mrf.mxu1 }
 0x2f9   :  { %15101 = vst [vmem:[#allocation172_spill] sm:$0xff] %v12285_v50  ;;  %7306 = vmatpush3.msra.mxu1 %v5155_v35  ;;  %3829 = vmatmul.mubr.f32.gmra.mxu0 %v7927_v3  ;;  %v15104_v35 = vld [vmem:[#allocation13_spill] sm:$0xff] }
 0x2fa   :  { %v12292_v62 = vpop.f32.mrf.mxu0  ;;  %7307 = vmatprep.subr.mxu1 %v5141_v13  ;;  %v12299_v56 = vpop.f32.mrf.mxu1  ;;  %6916 = vmatprep.mubr.msk.f32.mxu0 %vm1141_vm0, %v7928_v58  ;;  %v4903_v11 = vadd.f32 %v15056_v39, %v15104_v35  ;;  %v7929_v35 = vld [vmem:[%s13955_s1 + $0x90] sm:$0xff] }
 0x2fb   :  { %15103 = vst [vmem:[#allocation89_spill] sm:$0xff] %v12292_v62  ;;  %7308 = vmatpush3.msra.mxu1 %v5141_v13  ;;  %v5113_v62 = vmax.f32 %v4917_v40, 0.0  ;;  %v7930_v40 = vld [vmem:[%s13955_s1 + $0xa8] sm:$0xff] }
 0x2fc   :  { %v12309_v3 = vpop.f32.mrf.mxu0  ;;  %7309 = vmatprep.subr.mxu1 %v5127_v21  ;;  %v12313_v48 = vpop.f32.mrf.mxu1  ;;  %v5099_v12 = vmax.f32 %v4903_v11, 0.0 }
 0x2fd   :  { %15105 = vst [vmem:[#allocation142_spill] sm:$0xff] %v12309_v3  ;;  %7310 = vmatpush3.msra.mxu1 %v5127_v21  ;;  %3835 = vmatmul.mubr.f32.gmra.mxu0 %v7929_v35  ;;  %v4875_v21 = vadd.f32 %v15064_v17, %v15108_v20  ;;  %v7931_v20 = vld [vmem:[%s13955_s1 + $0xa0] sm:$0xff] }
 0x2fe   :  { %v12317_v58 = vpop.f32.mrf.mxu0  ;;  %7311 = vmatprep.subr.mxu1 %v5113_v62  ;;  %v12324_v50 = vpop.f32.mrf.mxu1  ;;  %6917 = vmatprep.mubr.msk.f32.mxu0 %vm1141_vm0, %v7930_v40 }
 0x2ff   :  { %15107 = vst [vmem:[#allocation37_spill] sm:$0xff] %v12317_v58  ;;  %7312 = vmatpush3.msra.mxu1 %v5113_v62  ;;  %v5085_v58 = vmax.f32 %v4889_v60, 0.0  ;;  %v5071_v13 = vmax.f32 %v4875_v21, 0.0  ;;  %v7932_v60 = vld [vmem:[%s13955_s1 + $0xb8] sm:$0xff] }
 0x300   :  { %v12334_v35 = vpop.f32.mrf.mxu0  ;;  %7313 = vmatprep.subr.mxu1 %v5099_v12  ;;  %v12338_v11 = vpop.f32.mrf.mxu1 }
 0x301   :  { %15109 = vst [vmem:[#allocation143_spill] sm:$0xff] %v12334_v35  ;;  %7314 = vmatpush3.msra.mxu1 %v5099_v12  ;;  %3841 = vmatmul.mubr.f32.gmra.mxu0 %v7931_v20  ;;  %v4847_v12 = vadd.f32 %v15072_v28, %v15112_v46  ;;  %v7933_v46 = vld [vmem:[%s13955_s1 + $0xb0] sm:$0xff] }
 0x302   :  { %v12342_v40 = vpop.f32.mrf.mxu0  ;;  %7315 = vmatprep.subr.mxu1 %v5085_v58  ;;  %v12349_v3 = vpop.f32.mrf.mxu1  ;;  %6918 = vmatprep.mubr.msk.f32.mxu0 %vm1141_vm0, %v7932_v60 }
 0x303   :  { %15111 = vst [vmem:[#allocation173_spill] sm:$0xff] %v12342_v40  ;;  %7316 = vmatpush3.msra.mxu1 %v5085_v58  ;;  %v5057_v40 = vmax.f32 %v4861_v27, 0.0  ;;  %v5043_v62 = vmax.f32 %v4847_v12, 0.0  ;;  %v7934_v27 = vld [vmem:[%s13955_s1 + $0xc8] sm:$0xff] }
 0x304   :  { %v12359_v20 = vpop.f32.mrf.mxu0  ;;  %7317 = vmatprep.subr.mxu1 %v5071_v13  ;;  %v12363_v21 = vpop.f32.mrf.mxu1 }
 0x305   :  { %15113 = vst [vmem:[#allocation174_spill] sm:$0xff] %v12359_v20  ;;  %7318 = vmatpush3.msra.mxu1 %v5071_v13  ;;  %3847 = vmatmul.mubr.f32.gmra.mxu0 %v7933_v46  ;;  %v4819_v13 = vadd.f32 %v15080_v30, %v15117_v32  ;;  %v7935_v32 = vld [vmem:[%s13955_s1 + $0xc0] sm:$0xff] }
 0x306   :  { %v12367_v60 = vpop.f32.mrf.mxu0  ;;  %7319 = vmatprep.subr.mxu1 %v5057_v40  ;;  %v12374_v35 = vpop.f32.mrf.mxu1  ;;  %6919 = vmatprep.mubr.msk.f32.mxu0 %vm1141_vm0, %v7934_v27 }
 0x307   :  { %15115 = vst [vmem:[#allocation90_spill] sm:$0xff] %v12367_v60  ;;  %15116 = vst [vmem:[#allocation144_spill] sm:$0xff] %v12374_v35  ;;  %7320 = vmatpush3.msra.mxu1 %v5057_v40  ;;  %v5029_v60 = vmax.f32 %v4833_v41, 0.0  ;;  %v5015_v58 = vmax.f32 %v4819_v13, 0.0  ;;  %v7936_v41 = vld [vmem:[%s13955_s1 + $0xd8] sm:$0xff] }
 0x308   :  { %v12384_v46 = vpop.f32.mrf.mxu0  ;;  %7321 = vmatprep.subr.mxu1 %v5043_v62  ;;  %v12388_v12 = vpop.f32.mrf.mxu1 }
 0x309   :  { %15118 = vst [vmem:[#allocation113_spill] sm:$0xff] %v12384_v46  ;;  %15119 = vst [vmem:[#allocation145_spill] sm:$0xff] %v12388_v12  ;;  %7322 = vmatpush3.msra.mxu1 %v5043_v62  ;;  %3853 = vmatmul.mubr.f32.gmra.mxu0 %v7935_v32  ;;  %v4791_v62 = vadd.f32 %v15088_v42, %v15123_v51  ;;  %v7937_v51 = vld [vmem:[%s13955_s1 + $0xd0] sm:$0xff] }
 0x30a   :  { %v12392_v27 = vpop.f32.mrf.mxu0  ;;  %7323 = vmatprep.subr.mxu1 %v5029_v60  ;;  %v12399_v20 = vpop.f32.mrf.mxu1  ;;  %6920 = vmatprep.mubr.msk.f32.mxu0 %vm1141_vm0, %v7936_v41 }
 0x30b   :  { %15121 = vst [vmem:[#allocation70_spill] sm:$0xff] %v12392_v27  ;;  %15122 = vst [vmem:[#allocation68_spill] sm:$0xff] %v12399_v20  ;;  %7324 = vmatpush3.msra.mxu1 %v5029_v60  ;;  %v5001_v27 = vmax.f32 %v4805_v22, 0.0  ;;  %v4987_v40 = vmax.f32 %v4791_v62, 0.0  ;;  %v7938_v22 = vld [vmem:[%s13955_s1 + $0xe8] sm:$0xff] }
 0x30c   :  { %v12409_v32 = vpop.f32.mrf.mxu0  ;;  %7325 = vmatprep.subr.mxu1 %v5015_v58  ;;  %v12413_v13 = vpop.f32.mrf.mxu1  ;;  %v6970_v60 = vld [vmem:[%s13958_s3 + $0x28] sm:$0x3] }
 0x30d   :  { %15124 = vst [vmem:[#allocation15_spill] sm:$0xff] %v12409_v32  ;;  %15125 = vst [vmem:[#allocation114_spill] sm:$0xff] %v12413_v13  ;;  %7326 = vmatpush3.msra.mxu1 %v5015_v58  ;;  %3859 = vmatmul.mubr.f32.gmra.mxu0 %v7937_v51  ;;  %v4960_v58 = vadd.f32 %v15038_v34, %v15129_v38  ;;  %v4946_v38 = vadd.f32 %v15042_v2, %v15132_v63  ;;  %v6973_v32 = vld [vmem:[%s13958_s3 + $0x30] sm:$0xff]  ;;  %v15187_v20 = vld [vmem:[#allocation20_spill] sm:$0xff] }
 0x30e   :  { %v12417_v41 = vpop.f32.mrf.mxu0  ;;  %7327 = vmatprep.subr.mxu1 %v5001_v27  ;;  %v12424_v46 = vpop.f32.mrf.mxu1  ;;  %6921 = vmatprep.mubr.msk.f32.mxu0 %vm1141_vm0, %v7938_v22  ;;  %v5170_v22 = vmax.f32 %v4974_v24, 0.0  ;;  %v4835_v49 = vadd.f32 %v15076_v45, %v15187_v20  ;;  %v7962_v13 = vld [vmem:[%s13955_s1 + $0x1a8] sm:$0xff] }
 0x30f   :  { %15127 = vst [vmem:[#allocation14_spill] sm:$0xff] %v12417_v41  ;;  %15128 = vst [vmem:[#allocation63_spill] sm:$0xff] %v12424_v46  ;;  %7328 = vmatpush3.msra.mxu1 %v5001_v27  ;;  %v7939_v27 = vld [vmem:[%s13955_s1 + $0xe0] sm:$0xff]  ;;  %v5156_v63 = vmax.f32 %v4960_v58, 0.0  ;;  %v7940_v46 = vld [vmem:[%s13955_s1 + $0xf8] sm:$0xff]  ;;  %v5142_v62 = vmax.f32 %v4946_v38, 0.0 }
 0x310   :  { %v12434_v51 = vpop.f32.mrf.mxu0  ;;  %7329 = vmatprep.subr.mxu1 %v4987_v40  ;;  %v12441_v41 = vpop.f32.mrf.mxu1 }
 0x311   :  { %15130 = vst [vmem:[#allocation61_spill] sm:$0xff] %v12434_v51  ;;  %15131 = vst [vmem:[#allocation59_spill] sm:$0xff] %v12441_v41  ;;  %7330 = vmatpush3.msra.mxu1 %v4987_v40  ;;  %3865 = vmatmul.mubr.f32.gmra.mxu0 %v7939_v27  ;;  %v15135_v40 = vld [vmem:[#allocation16_spill] sm:$0xff] }
 0x312   :  { %v12445_v52 = vpop.f32.mrf.mxu0  ;;  %7334 = vmatprep.subr.mxu1 %v5170_v22  ;;  %v12455_v24 = vpop.f32.mrf.mxu1  ;;  %7332 = vmatmul.mubr.msk.f32.vlgmr.msra.gmra.mxu1 %vm5186_vm1, %v6970_v60  ;;  %v4932_v51 = vadd.f32 %v15046_v59, %v15135_v40  ;;  %v15138_v40 = vld [vmem:[#allocation66_spill] sm:$0xff] }
 0x313   :  { %15133 = vst [vmem:[#allocation9_spill] sm:$0xff] %v12445_v52  ;;  %15134 = vst [vmem:[#allocation8_spill] sm:$0xff] %v12455_v24  ;;  %7335 = vmatpush3.msra.mxu1 %v5170_v22  ;;  %6922 = vmatprep.mubr.msk.f32.mxu0 %vm1141_vm0, %v7940_v46  ;;  %v4918_v52 = vadd.f32 %v15052_v9, %v15138_v40  ;;  %v7942_v40 = vld [vmem:[%s13955_s1 + $0x108] sm:$0xff] }
 0x314   :  { %v12462_v27 = vpop.f32.mrf.mxu0  ;;  %7336 = vmatprep.subr.mxu1 %v5156_v63  ;;  %v12470_v58 = vpop.f32.mrf.mxu1  ;;  %7362 = vmatprep.mubr.msk.f32.mxu1 %vm5186_vm1, %v6973_v32  ;;  %v5128_v38 = vmax.f32 %v4932_v51, 0.0  ;;  %v15141_v32 = vld [vmem:[#allocation64_spill] sm:$0xff] }
 0x315   :  { %15136 = vst [vmem:[#allocation54_spill] sm:$0xff] %v12462_v27  ;;  %15137 = vst [vmem:[#allocation52_spill] sm:$0xff] %v12470_v58  ;;  %7337 = vmatpush3.msra.mxu1 %v5156_v63  ;;  %3871 = vmatmul.mubr.f32.gmra.mxu0 %v7941_v29  ;;  %v4904_v63 = vadd.f32 %v15056_v39, %v15141_v32  ;;  %v7943_v32 = vld [vmem:[%s13955_s1 + $0x100] sm:$0xff]  ;;  %v7958_v24 = vld [vmem:[%s13955_s1 + $0x188] sm:$0xff]  ;;  %v4863_v58 = vadd.f32 %v15068_v61, %v15185_v10 }
 0x316   :  { %v12475_v22 = vpop.f32.mrf.mxu0  ;;  %7338 = vmatprep.subr.mxu1 %v5142_v62  ;;  %v12482_v60 = vpop.f32.mrf.mxu1  ;;  %6923 = vmatprep.mubr.msk.f32.mxu0 %vm1141_vm0, %v7942_v40 }
 0x317   :  { %15139 = vst [vmem:[#allocation4_spill] sm:$0xff] %v12475_v22  ;;  %15140 = vst [vmem:[#allocation121_spill] sm:$0xff] %v12482_v60  ;;  %7339 = vmatpush3.msra.mxu1 %v5142_v62  ;;  %v5114_v22 = vmax.f32 %v4918_v52, 0.0  ;;  %v5100_v46 = vmax.f32 %v4904_v63, 0.0  ;;  %v7944_v52 = vld [vmem:[%s13955_s1 + $0x118] sm:$0xff] }
 0x318   :  { %v12492_v29 = vpop.f32.mrf.mxu0  ;;  %7340 = vmatprep.subr.mxu1 %v5128_v38  ;;  %v12496_v51 = vpop.f32.mrf.mxu1 }
 0x319   :  { %15142 = vst [vmem:[#allocation72_spill] sm:$0xff] %v12492_v29  ;;  %15143 = vst [vmem:[#allocation71_spill] sm:$0xff] %v12496_v51  ;;  %7341 = vmatpush3.msra.mxu1 %v5128_v38  ;;  %3877 = vmatmul.mubr.f32.gmra.mxu0 %v7943_v32  ;;  %v4876_v38 = vadd.f32 %v15064_v17, %v15147_v5  ;;  %v7945_v5 = vld [vmem:[%s13955_s1 + $0x110] sm:$0xff]  ;;  %v4891_v51 = vadd.f32 %v15060_v44, %v15183_v4 }
 0x31a   :  { %v12500_v40 = vpop.f32.mrf.mxu0  ;;  %7342 = vmatprep.subr.mxu1 %v5114_v22  ;;  %v12507_v27 = vpop.f32.mrf.mxu1  ;;  %6924 = vmatprep.mubr.msk.f32.mxu0 %vm1141_vm0, %v7944_v52 }
 0x31b   :  { %15145 = vst [vmem:[#allocation69_spill] sm:$0xff] %v12500_v40  ;;  %15146 = vst [vmem:[#allocation67_spill] sm:$0xff] %v12507_v27  ;;  %7343 = vmatpush3.msra.mxu1 %v5114_v22  ;;  %v5086_v40 = vmax.f32 %v4890_v26, 0.0  ;;  %v5072_v62 = vmax.f32 %v4876_v38, 0.0  ;;  %v7946_v26 = vld [vmem:[%s13955_s1 + $0x128] sm:$0xff]  ;;  %v5030_v22 = vmax.f32 %v4834_v16, 0.0 }
 0x31c   :  { %v12517_v32 = vpop.f32.mrf.mxu0  ;;  %7344 = vmatprep.subr.mxu1 %v5100_v46  ;;  %v12521_v63 = vpop.f32.mrf.mxu1 }
 0x31d   :  { %15148 = vst [vmem:[#allocation65_spill] sm:$0xff] %v12517_v32  ;;  %15149 = vst [vmem:[#allocation13_spill] sm:$0xff] %v12521_v63  ;;  %7345 = vmatpush3.msra.mxu1 %v5100_v46  ;;  %3883 = vmatmul.mubr.f32.gmra.mxu0 %v7945_v5  ;;  %v4848_v46 = vadd.f32 %v15072_v28, %v15153_v31  ;;  %v15181_v63 = vld [vmem:[#allocation147_spill] sm:$0xff] }
 0x31e   :  { %v12525_v52 = vpop.f32.mrf.mxu0  ;;  %7346 = vmatprep.subr.mxu1 %v5086_v40  ;;  %v12532_v29 = vpop.f32.mrf.mxu1  ;;  %6925 = vmatprep.mubr.msk.f32.mxu0 %vm1141_vm0, %v7946_v26  ;;  %v15176_v26 = vld [vmem:[#allocation104_spill] sm:$0xff] }
 0x31f   :  { %15151 = vst [vmem:[#allocation12_spill] sm:$0xff] %v12525_v52  ;;  %15152 = vst [vmem:[#allocation60_spill] sm:$0xff] %v12532_v29  ;;  %7347 = vmatpush3.msra.mxu1 %v5086_v40  ;;  %v5058_v52 = vmax.f32 %v4862_v14, 0.0  ;;  %v7947_v40 = vld [vmem:[%s13955_s1 + $0x120] sm:$0xff]  ;;  %v5044_v14 = vmax.f32 %v4848_v46, 0.0  ;;  %v4806_v29 = vadd.f32 %v15084_v57, %v15166_v43  ;;  %v7950_v43 = vld [vmem:[%s13955_s1 + $0x148] sm:$0xff] }
 0x320   :  { %v12542_v5 = vpop.f32.mrf.mxu0  ;;  %7348 = vmatprep.subr.mxu1 %v5072_v62  ;;  %v12546_v38 = vpop.f32.mrf.mxu1 }
 0x321   :  { %15154 = vst [vmem:[#allocation58_spill] sm:$0xff] %v12542_v5  ;;  %15155 = vst [vmem:[#allocation56_spill] sm:$0xff] %v12546_v38  ;;  %7349 = vmatpush3.msra.mxu1 %v5072_v62  ;;  %3889 = vmatmul.mubr.f32.gmra.mxu0 %v7947_v40  ;;  %v15161_v62 = vld [vmem:[#allocation53_spill] sm:$0xff] }
 0x322   :  { %v12552_v31 = vpop.f32.mrf.mxu0  ;;  %7350 = vmatprep.subr.mxu1 %v5058_v52  ;;  %v12559_v5 = vpop.f32.mrf.mxu1  ;;  %6926 = vmatprep.mubr.msk.f32.mxu0 %vm1141_vm0, %v7948_v8  ;;  %v4820_v27 = vadd.f32 %v15080_v30, %v15161_v62 }
 0x323   :  { %15158 = vst [vmem:[#allocation7_spill] sm:$0xff] %v12552_v31  ;;  %15160 = vst [vmem:[#allocation6_spill] sm:$0xff] %v12559_v5  ;;  %7351 = vmatpush3.msra.mxu1 %v5058_v52  ;;  %v7949_v52 = vld [vmem:[%s13955_s1 + $0x130] sm:$0xff] }
 0x324   :  { %v12569_v40 = vpop.f32.mrf.mxu0  ;;  %7352 = vmatprep.subr.mxu1 %v5044_v14  ;;  %v12573_v46 = vpop.f32.mrf.mxu1  ;;  %v5016_v16 = vmax.f32 %v4820_v27, 0.0 }
 0x325   :  { %15163 = vst [vmem:[#allocation51_spill] sm:$0xff] %v12569_v40  ;;  %15165 = vst [vmem:[#allocation3_spill] sm:$0xff] %v12573_v46  ;;  %7353 = vmatpush3.msra.mxu1 %v5044_v14  ;;  %3895 = vmatmul.mubr.f32.gmra.mxu0 %v7949_v52  ;;  %v15171_v14 = vld [vmem:[#allocation50_spill] sm:$0xff]  ;;  %v4975_v40 = vadd.f32 %v15092_v54, %v15176_v26  ;;  %v15178_v26 = vld [vmem:[#allocation151_spill] sm:$0xff] }
 0x326   :  { %v12579_v62 = vpop.f32.mrf.mxu0  ;;  %7354 = vmatprep.subr.mxu1 %v5030_v22  ;;  %v12586_v5 = vpop.f32.mrf.mxu1  ;;  %6927 = vmatprep.mubr.msk.f32.mxu0 %vm1141_vm0, %v7950_v43  ;;  %v4792_v18 = vadd.f32 %v15088_v42, %v15171_v14  ;;  %v15179_v43 = vld [vmem:[#allocation79_spill] sm:$0xff] }
 0x327   :  { %15168 = vst [vmem:[#allocation49_spill] sm:$0xff] %v12579_v62  ;;  %15170 = vst [vmem:[#allocation18_spill] sm:$0xff] %v12586_v5  ;;  %7355 = vmatpush3.msra.mxu1 %v5030_v22  ;;  %v5002_v62 = vmax.f32 %v4806_v29, 0.0  ;;  %v7951_v22 = vld [vmem:[%s13955_s1 + $0x140] sm:$0xff]  ;;  %v7952_v29 = vld [vmem:[%s13955_s1 + $0x158] sm:$0xff]  ;;  %v4947_v5 = vadd.f32 %v15042_v2, %v15179_v43 }
 0x328   :  { %v12596_v52 = vpop.f32.mrf.mxu0  ;;  %7356 = vmatprep.subr.mxu1 %v5016_v16  ;;  %v12600_v27 = vpop.f32.mrf.mxu1  ;;  %v4988_v38 = vmax.f32 %v4792_v18, 0.0  ;;  %v5171_v18 = vmax.f32 %v4975_v40, 0.0 }
 0x329   :  { %15173 = vst [vmem:[#allocation17_spill] sm:$0xff] %v12596_v52  ;;  %15175 = vst [vmem:[#allocation16_spill] sm:$0xff] %v12600_v27  ;;  %7357 = vmatpush3.msra.mxu1 %v5016_v16  ;;  %3901 = vmatmul.mubr.f32.gmra.mxu0 %v7951_v22  ;;  %v4961_v16 = vadd.f32 %v15038_v34, %v15178_v26  ;;  %v6974_v22 = vld [vmem:[%s13958_s3 + $0x38] sm:$0x3]  ;;  %v15180_v52 = vld [vmem:[#allocation25_spill] sm:$0xff]  ;;  %v5143_v15 = vmax.f32 %v4947_v5, 0.0 }
 0x32a   :  { %v12606_v14 = vpop.f32.mrf.mxu0  ;;  %7358 = vmatprep.subr.mxu1 %v5002_v62  ;;  %v12611_v8 = vpop.f32.mrf.mxu1  ;;  %6928 = vmatprep.mubr.msk.f32.mxu0 %vm1141_vm0, %v7952_v29  ;;  %v6977_v29 = vld [vmem:[%s13958_s3 + $0x40] sm:$0xff]  ;;  %v7956_v5 = vld [vmem:[%s13955_s1 + $0x178] sm:$0xff] }
 0x32b   :  { %7359 = vmatpush3.msra.mxu1 %v5002_v62  ;;  %v7953_v62 = vld [vmem:[%s13955_s1 + $0x150] sm:$0xff]  ;;  %v5157_v40 = vmax.f32 %v4961_v16, 0.0  ;;  %v7955_v16 = vld [vmem:[%s13955_s1 + $0x160] sm:$0xff] }
 0x32c   :  { %v12619_v32 = vpop.f32.mrf.mxu0  ;;  %7360 = vmatprep.subr.mxu1 %v4988_v38  ;;  %v12624_v27 = vpop.f32.mrf.mxu1 }
 0x32d   :  { %7361 = vmatpush3.msra.mxu1 %v4988_v38  ;;  %3907 = vmatmul.mubr.f32.gmra.mxu0 %v7953_v62  ;;  %v4933_v38 = vadd.f32 %v15046_v59, %v15180_v52  ;;  %v7954_v62 = vld [vmem:[%s13955_s1 + $0x168] sm:$0xff] }
 0x32e   :  { %v12628_v46 = vpop.f32.mrf.mxu0  ;;  %7365 = vmatprep.subr.mxu1 %v5171_v18  ;;  %v12636_v26 = vpop.f32.mrf.mxu1  ;;  %7363 = vmatmul.mubr.msk.f32.vlgmr.msra.gmra.mxu1 %vm5186_vm1, %v6974_v22  ;;  %v4919_v22 = vadd.f32 %v15052_v9, %v15181_v63  ;;  %v15182_v63 = vld [vmem:[#allocation24_spill] sm:$0xff] }
 0x32f   :  { %7366 = vmatpush3.msra.mxu1 %v5171_v18  ;;  %6929 = vmatprep.mubr.msk.f32.mxu0 %vm1141_vm0, %v7954_v62  ;;  %v5129_v62 = vmax.f32 %v4933_v38, 0.0 }
 0x330   :  { %v12641_v43 = vpop.f32.mrf.mxu0  ;;  %7367 = vmatprep.subr.mxu1 %v5157_v40  ;;  %v12647_v31 = vpop.f32.mrf.mxu1  ;;  %7393 = vmatprep.mubr.msk.f32.mxu1 %vm5186_vm1, %v6977_v29  ;;  %v4905_v29 = vadd.f32 %v15056_v39, %v15182_v63 }
 0x331   :  { %7368 = vmatpush3.msra.mxu1 %v5157_v40  ;;  %3913 = vmatmul.mubr.f32.gmra.mxu0 %v7955_v16  ;;  %v5115_v16 = vmax.f32 %v4919_v22, 0.0  ;;  %v15184_v22 = vld [vmem:[#allocation76_spill] sm:$0xff] }
 0x332   :  { %v12652_v52 = vpop.f32.mrf.mxu0  ;;  %7369 = vmatprep.subr.mxu1 %v5143_v15  ;;  %v12657_v18 = vpop.f32.mrf.mxu1  ;;  %6930 = vmatprep.mubr.msk.f32.mxu0 %vm1141_vm0, %v7956_v5  ;;  %v7957_v5 = vld [vmem:[%s13955_s1 + $0x170] sm:$0xff]  ;;  %v4877_v4 = vadd.f32 %v15064_v17, %v15184_v22 }
 0x333   :  { %7370 = vmatpush3.msra.mxu1 %v5143_v15  ;;  %v5101_v15 = vmax.f32 %v4905_v29, 0.0 }
 0x334   :  { %v12665_v40 = vpop.f32.mrf.mxu0  ;;  %7371 = vmatprep.subr.mxu1 %v5129_v62  ;;  %v12667_v60 = vpop.f32.mrf.mxu1 }
 0x335   :  { %7372 = vmatpush3.msra.mxu1 %v5129_v62  ;;  %3919 = vmatmul.mubr.f32.gmra.mxu0 %v7957_v5  ;;  %v5087_v5 = vmax.f32 %v4891_v51, 0.0  ;;  %v15186_v51 = vld [vmem:[#allocation42_spill] sm:$0xff] }
 0x336   :  { %v12671_v38 = vpop.f32.mrf.mxu0  ;;  %7373 = vmatprep.subr.mxu1 %v5115_v16  ;;  %v12676_v63 = vpop.f32.mrf.mxu1  ;;  %6931 = vmatprep.mubr.msk.f32.mxu0 %vm1141_vm0, %v7958_v24  ;;  %v7959_v24 = vld [vmem:[%s13955_s1 + $0x180] sm:$0xff]  ;;  %v4849_v10 = vadd.f32 %v15072_v28, %v15186_v51 }
 0x337   :  { %7374 = vmatpush3.msra.mxu1 %v5115_v16  ;;  %v5073_v16 = vmax.f32 %v4877_v4, 0.0 }
 0x338   :  { %v12684_v62 = vpop.f32.mrf.mxu0  ;;  %7375 = vmatprep.subr.mxu1 %v5101_v15  ;;  %v12686_v53 = vpop.f32.mrf.mxu1 }
 0x339   :  { %7376 = vmatpush3.msra.mxu1 %v5101_v15  ;;  %3925 = vmatmul.mubr.f32.gmra.mxu0 %v7959_v24  ;;  %v5059_v24 = vmax.f32 %v4863_v58, 0.0  ;;  %v15190_v58 = vld [vmem:[#allocation178_spill] sm:$0xff] }
 0x33a   :  { %v12690_v29 = vpop.f32.mrf.mxu0  ;;  %7377 = vmatprep.subr.mxu1 %v5087_v5  ;;  %v12695_v22 = vpop.f32.mrf.mxu1  ;;  %6932 = vmatprep.mubr.msk.f32.mxu0 %vm1141_vm0, %v7960_v47  ;;  %v7961_v47 = vld [vmem:[%s13955_s1 + $0x190] sm:$0xff]  ;;  %v4821_v20 = vadd.f32 %v15080_v30, %v15190_v58 }
 0x33b   :  { %7378 = vmatpush3.msra.mxu1 %v5087_v5  ;;  %v5045_v5 = vmax.f32 %v4849_v10, 0.0 }
 0x33c   :  { %v12703_v15 = vpop.f32.mrf.mxu0  ;;  %7379 = vmatprep.subr.mxu1 %v5073_v16  ;;  %v12705_v41 = vpop.f32.mrf.mxu1 }
 0x33d   :  { %7380 = vmatpush3.msra.mxu1 %v5073_v16  ;;  %3931 = vmatmul.mubr.f32.gmra.mxu0 %v7961_v47  ;;  %v5031_v47 = vmax.f32 %v4835_v49, 0.0  ;;  %v15196_v49 = vld [vmem:[#allocation175_spill] sm:$0xff] }
 0x33e   :  { %v12709_v4 = vpop.f32.mrf.mxu0  ;;  %7381 = vmatprep.subr.mxu1 %v5059_v24  ;;  %v12714_v51 = vpop.f32.mrf.mxu1  ;;  %6933 = vmatprep.mubr.msk.f32.mxu0 %vm1141_vm0, %v7962_v13  ;;  %v7963_v13 = vld [vmem:[%s13955_s1 + $0x1a0] sm:$0xff] }
 0x33f   :  { %15188 = vst [vmem:[#allocation66_spill] sm:$0xff] %v12709_v4  ;;  %15189 = vst [vmem:[#allocation64_spill] sm:$0xff] %v12714_v51  ;;  %7382 = vmatpush3.msra.mxu1 %v5059_v24  ;;  %v4807_v51 = vadd.f32 %v15084_v57, %v15193_v55  ;;  %v5017_v24 = vmax.f32 %v4821_v20, 0.0  ;;  %v4793_v55 = vadd.f32 %v15088_v42, %v15196_v49 }
 0x340   :  { %v12722_v16 = vpop.f32.mrf.mxu0  ;;  %7383 = vmatprep.subr.mxu1 %v5045_v5  ;;  %v12724_v35 = vpop.f32.mrf.mxu1 }
 0x341   :  { %15191 = vst [vmem:[#allocation62_spill] sm:$0xff] %v12722_v16  ;;  %15192 = vst [vmem:[#allocation11_spill] sm:$0xff] %v12724_v35  ;;  %7384 = vmatpush3.msra.mxu1 %v5045_v5  ;;  %3937 = vmatmul.mubr.f32.gmra.mxu0 %v7963_v13  ;;  %v7964_v35 = vld [vmem:[%s13955_s1 + $0x1b8] sm:$0xff]  ;;  %v5003_v13 = vmax.f32 %v4807_v51, 0.0  ;;  %v15202_v51 = vld [vmem:[#allocation103_spill] sm:$0xff] }
 0x342   :  { %v12728_v10 = vpop.f32.mrf.mxu0  ;;  %7385 = vmatprep.subr.mxu1 %v5031_v47  ;;  %v12733_v58 = vpop.f32.mrf.mxu1  ;;  %6934 = vmatprep.mubr.msk.f32.mxu0 %vm1141_vm0, %v7964_v35  ;;  %v15199_v16 = vld [vmem:[#allocation154_spill] sm:$0xff]  ;;  %v7965_v35 = vld [vmem:[%s13955_s1 + $0x1b0] sm:$0xff] }
 0x343   :  { %15194 = vst [vmem:[#allocation10_spill] sm:$0xff] %v12728_v10  ;;  %15195 = vst [vmem:[#allocation57_spill] sm:$0xff] %v12733_v58  ;;  %7386 = vmatpush3.msra.mxu1 %v5031_v47  ;;  %v4976_v58 = vadd.f32 %v15092_v54, %v15199_v16  ;;  %v4989_v47 = vmax.f32 %v4793_v55, 0.0  ;;  %v4962_v16 = vadd.f32 %v15038_v34, %v15202_v51 }
 0x344   :  { %v12741_v5 = vpop.f32.mrf.mxu0  ;;  %7387 = vmatprep.subr.mxu1 %v5017_v24  ;;  %v12743_v10 = vpop.f32.mrf.mxu1 }
 0x345   :  { %15197 = vst [vmem:[#allocation55_spill] sm:$0xff] %v12741_v5  ;;  %15198 = vst [vmem:[#allocation53_spill] sm:$0xff] %v12743_v10  ;;  %7388 = vmatpush3.msra.mxu1 %v5017_v24  ;;  %3943 = vmatmul.mubr.f32.gmra.mxu0 %v7965_v35  ;;  %v7966_v10 = vld [vmem:[%s13955_s1 + $0x1c8] sm:$0xff]  ;;  %v5172_v55 = vmax.f32 %v4976_v58, 0.0  ;;  %v5158_v58 = vmax.f32 %v4962_v16, 0.0  ;;  %v7969_v16 = vld [vmem:[%s13955_s1 + $0x1d0] sm:$0xff] }
 0x346   :  { %v12747_v20 = vpop.f32.mrf.mxu0  ;;  %7389 = vmatprep.subr.mxu1 %v5003_v13  ;;  %v12752_v49 = vpop.f32.mrf.mxu1  ;;  %6935 = vmatprep.mubr.msk.f32.mxu0 %vm1141_vm0, %v7966_v10  ;;  %v6978_v35 = vld [vmem:[%s13958_s3 + $0x48] sm:$0x3]  ;;  %v7967_v10 = vld [vmem:[%s13955_s1 + $0x1c0] sm:$0xff] }
 0x347   :  { %15200 = vst [vmem:[#allocation5_spill] sm:$0xff] %v12747_v20  ;;  %15201 = vst [vmem:[#allocation50_spill] sm:$0xff] %v12752_v49  ;;  %7390 = vmatpush3.msra.mxu1 %v5003_v13  ;;  %v15205_v49 = vld [vmem:[#allocation26_spill] sm:$0xff]  ;;  %v6981_v13 = vld [vmem:[%s13958_s3 + $0x50] sm:$0xff] }
 0x348   :  { %v12760_v24 = vpop.f32.mrf.mxu0  ;;  %7391 = vmatprep.subr.mxu1 %v4989_v47  ;;  %v12765_v20 = vpop.f32.mrf.mxu1  ;;  %v4948_v5 = vadd.f32 %v15042_v2, %v15205_v49 }
 0x349   :  { %15203 = vst [vmem:[#allocation104_spill] sm:$0xff] %v12760_v24  ;;  %15204 = vst [vmem:[#allocation151_spill] sm:$0xff] %v12765_v20  ;;  %7392 = vmatpush3.msra.mxu1 %v4989_v47  ;;  %3949 = vmatmul.mubr.f32.gmra.mxu0 %v7967_v10  ;;  %v15208_v20 = vld [vmem:[#allocation149_spill] sm:$0xff]  ;;  %v7968_v10 = vld [vmem:[%s13955_s1 + $0x1d8] sm:$0xff] }
 0x34a   :  { %v12769_v12 = vpop.f32.mrf.mxu0  ;;  %7396 = vmatprep.subr.mxu1 %v5172_v55  ;;  %v12777_v51 = vpop.f32.mrf.mxu1  ;;  %7394 = vmatmul.mubr.msk.f32.vlgmr.msra.gmra.mxu1 %vm5186_vm1, %v6978_v35  ;;  %v4934_v49 = vadd.f32 %v15046_v59, %v15208_v20  ;;  %v5144_v24 = vmax.f32 %v4948_v5, 0.0  ;;  %v7970_v5 = vld [vmem:[%s13955_s1 + $0x1e8] sm:$0xff] }
 0x34b   :  { %15206 = vst [vmem:[#allocation79_spill] sm:$0xff] %v12769_v12  ;;  %15207 = vst [vmem:[#allocation25_spill] sm:$0xff] %v12777_v51  ;;  %7397 = vmatpush3.msra.mxu1 %v5172_v55  ;;  %6936 = vmatprep.mubr.msk.f32.mxu0 %vm1141_vm0, %v7968_v10  ;;  %v15211_v51 = vld [vmem:[#allocation102_spill] sm:$0xff] }
 0x34c   :  { %v12782_v47 = vpop.f32.mrf.mxu0  ;;  %7398 = vmatprep.subr.mxu1 %v5158_v58  ;;  %v12788_v12 = vpop.f32.mrf.mxu1  ;;  %v4920_v35 = vadd.f32 %v15052_v9, %v15211_v51  ;;  %7424 = vmatprep.mubr.msk.f32.mxu1 %vm5186_vm1, %v6981_v13  ;;  %v5130_v10 = vmax.f32 %v4934_v49, 0.0  ;;  %v15214_v51 = vld [vmem:[#allocation78_spill] sm:$0xff] }
 0x34d   :  { %15209 = vst [vmem:[#allocation147_spill] sm:$0xff] %v12782_v47  ;;  %15210 = vst [vmem:[#allocation24_spill] sm:$0xff] %v12788_v12  ;;  %7399 = vmatpush3.msra.mxu1 %v5158_v58  ;;  %3955 = vmatmul.mubr.f32.gmra.mxu0 %v7969_v16  ;;  %v4906_v13 = vadd.f32 %v15056_v39, %v15214_v51  ;;  %v15217_v12 = vld [vmem:[#allocation119_spill] sm:$0xff] }
 0x34e   :  { %v12793_v20 = vpop.f32.mrf.mxu0  ;;  %7400 = vmatprep.subr.mxu1 %v5144_v24  ;;  %v12798_v55 = vpop.f32.mrf.mxu1  ;;  %6937 = vmatprep.mubr.msk.f32.mxu0 %vm1141_vm0, %v7970_v5  ;;  %v5116_v16 = vmax.f32 %v4920_v35, 0.0  ;;  %v7971_v5 = vld [vmem:[%s13955_s1 + $0x1e0] sm:$0xff]  ;;  %v15220_v35 = vld [vmem:[#allocation45_spill] sm:$0xff] }
 0x34f   :  { %15212 = vst [vmem:[#allocation94_spill] sm:$0xff] %v12793_v20  ;;  %15213 = vst [vmem:[#allocation76_spill] sm:$0xff] %v12798_v55  ;;  %7401 = vmatpush3.msra.mxu1 %v5144_v24  ;;  %v4892_v55 = vadd.f32 %v15060_v44, %v15217_v12  ;;  %v5102_v24 = vmax.f32 %v4906_v13, 0.0  ;;  %v4878_v12 = vadd.f32 %v15064_v17, %v15220_v35  ;;  %v7979_v47 = vld [vmem:[%s13955_s1 + $0x220] sm:$0xff] }
 0x350   :  { %v12806_v58 = vpop.f32.mrf.mxu0  ;;  %7402 = vmatprep.subr.mxu1 %v5130_v10  ;;  %v12808_v20 = vpop.f32.mrf.mxu1 }
 0x351   :  { %15215 = vst [vmem:[#allocation117_spill] sm:$0xff] %v12806_v58  ;;  %15216 = vst [vmem:[#allocation42_spill] sm:$0xff] %v12808_v20  ;;  %7403 = vmatpush3.msra.mxu1 %v5130_v10  ;;  %3961 = vmatmul.mubr.f32.gmra.mxu0 %v7971_v5  ;;  %v7972_v20 = vld [vmem:[%s13955_s1 + $0x1f8] sm:$0xff]  ;;  %v5088_v5 = vmax.f32 %v4892_v55, 0.0  ;;  %v15223_v58 = vld [vmem:[#allocation75_spill] sm:$0xff] }
 0x352   :  { %v12812_v49 = vpop.f32.mrf.mxu0  ;;  %7404 = vmatprep.subr.mxu1 %v5116_v16  ;;  %v12817_v51 = vpop.f32.mrf.mxu1  ;;  %6938 = vmatprep.mubr.msk.f32.mxu0 %vm1141_vm0, %v7972_v20  ;;  %v7973_v20 = vld [vmem:[%s13955_s1 + $0x1f0] sm:$0xff] }
 0x353   :  { %15218 = vst [vmem:[#allocation20_spill] sm:$0xff] %v12812_v49  ;;  %15219 = vst [vmem:[#allocation178_spill] sm:$0xff] %v12817_v51  ;;  %7405 = vmatpush3.msra.mxu1 %v5116_v16  ;;  %v4864_v51 = vadd.f32 %v15068_v61, %v15223_v58  ;;  %v5074_v16 = vmax.f32 %v4878_v12, 0.0  ;;  %v15226_v55 = vld [vmem:[#allocation93_spill] sm:$0xff] }
 0x354   :  { %v12825_v10 = vpop.f32.mrf.mxu0  ;;  %7406 = vmatprep.subr.mxu1 %v5102_v24  ;;  %v12827_v49 = vpop.f32.mrf.mxu1  ;;  %v4850_v58 = vadd.f32 %v15072_v28, %v15226_v55 }
 0x355   :  { %15221 = vst [vmem:[#allocation177_spill] sm:$0xff] %v12825_v10  ;;  %15222 = vst [vmem:[#allocation175_spill] sm:$0xff] %v12827_v49  ;;  %7407 = vmatpush3.msra.mxu1 %v5102_v24  ;;  %3967 = vmatmul.mubr.f32.gmra.mxu0 %v7973_v20  ;;  %v7974_v49 = vld [vmem:[%s13955_s1 + $0x208] sm:$0xff]  ;;  %v5060_v20 = vmax.f32 %v4864_v51, 0.0  ;;  %v15229_v10 = vld [vmem:[#allocation74_spill] sm:$0xff] }
 0x356   :  { %v12831_v13 = vpop.f32.mrf.mxu0  ;;  %7408 = vmatprep.subr.mxu1 %v5088_v5  ;;  %v12836_v35 = vpop.f32.mrf.mxu1  ;;  %6939 = vmatprep.mubr.msk.f32.mxu0 %vm1141_vm0, %v7974_v49  ;;  %v7975_v49 = vld [vmem:[%s13955_s1 + $0x200] sm:$0xff] }
 0x357   :  { %15224 = vst [vmem:[#allocation154_spill] sm:$0xff] %v12831_v13  ;;  %15225 = vst [vmem:[#allocation103_spill] sm:$0xff] %v12836_v35  ;;  %7409 = vmatpush3.msra.mxu1 %v5088_v5  ;;  %v4836_v35 = vadd.f32 %v15076_v45, %v15229_v10  ;;  %v5046_v5 = vmax.f32 %v4850_v58, 0.0  ;;  %v15232_v51 = vld [vmem:[#allocation115_spill] sm:$0xff] }
 0x358   :  { %v12844_v24 = vpop.f32.mrf.mxu0  ;;  %7410 = vmatprep.subr.mxu1 %v5074_v16  ;;  %v12846_v13 = vpop.f32.mrf.mxu1  ;;  %v4822_v10 = vadd.f32 %v15080_v30, %v15232_v51  ;;  %v15246_v30 = vld [vmem:[#allocation96_spill] sm:$0xff] }
 0x359   :  { %15227 = vst [vmem:[#allocation26_spill] sm:$0xff] %v12844_v24  ;;  %15228 = vst [vmem:[#allocation149_spill] sm:$0xff] %v12846_v13  ;;  %7411 = vmatpush3.msra.mxu1 %v5074_v16  ;;  %3973 = vmatmul.mubr.f32.gmra.mxu0 %v7975_v49  ;;  %v7976_v13 = vld [vmem:[%s13955_s1 + $0x218] sm:$0xff]  ;;  %v5032_v49 = vmax.f32 %v4836_v35, 0.0  ;;  %v15235_v24 = vld [vmem:[#allocation40_spill] sm:$0xff] }
 0x35a   :  { %v12850_v12 = vpop.f32.mrf.mxu0  ;;  %7412 = vmatprep.subr.mxu1 %v5060_v20  ;;  %v12855_v55 = vpop.f32.mrf.mxu1  ;;  %6940 = vmatprep.mubr.msk.f32.mxu0 %vm1141_vm0, %v7976_v13  ;;  %v7977_v13 = vld [vmem:[%s13955_s1 + $0x210] sm:$0xff]  ;;  %v15238_v35 = vld [vmem:[#allocation176_spill] sm:$0xff] }
 0x35b   :  { %15230 = vst [vmem:[#allocation102_spill] sm:$0xff] %v12850_v12  ;;  %15231 = vst [vmem:[#allocation78_spill] sm:$0xff] %v12855_v55  ;;  %7413 = vmatpush3.msra.mxu1 %v5060_v20  ;;  %v4808_v55 = vadd.f32 %v15084_v57, %v15235_v24  ;;  %v5018_v20 = vmax.f32 %v4822_v10, 0.0  ;;  %v4794_v24 = vadd.f32 %v15088_v42, %v15238_v35 }
 0x35c   :  { %v12863_v16 = vpop.f32.mrf.mxu0  ;;  %7414 = vmatprep.subr.mxu1 %v5046_v5  ;;  %v12865_v12 = vpop.f32.mrf.mxu1 }
 0x35d   :  { %15233 = vst [vmem:[#allocation119_spill] sm:$0xff] %v12863_v16  ;;  %15234 = vst [vmem:[#allocation45_spill] sm:$0xff] %v12865_v12  ;;  %7415 = vmatpush3.msra.mxu1 %v5046_v5  ;;  %3979 = vmatmul.mubr.f32.gmra.mxu0 %v7977_v13  ;;  %v7978_v12 = vld [vmem:[%s13955_s1 + $0x228] sm:$0xff]  ;;  %v5004_v13 = vmax.f32 %v4808_v55, 0.0  ;;  %v15241_v16 = vld [vmem:[#allocation123_spill] sm:$0xff]  ;;  %v4990_v35 = vmax.f32 %v4794_v24, 0.0 }
 0x35e   :  { %v12869_v58 = vpop.f32.mrf.mxu0  ;;  %7416 = vmatprep.subr.mxu1 %v5032_v49  ;;  %v12874_v51 = vpop.f32.mrf.mxu1  ;;  %6941 = vmatprep.mubr.msk.f32.mxu0 %vm1141_vm0, %v7978_v12  ;;  %v15242_v55 = vld [vmem:[#allocation152_spill] sm:$0xff] }
 0x35f   :  { %15236 = vst [vmem:[#allocation75_spill] sm:$0xff] %v12869_v58  ;;  %15237 = vst [vmem:[#allocation93_spill] sm:$0xff] %v12874_v51  ;;  %7417 = vmatpush3.msra.mxu1 %v5032_v49  ;;  %v4977_v51 = vadd.f32 %v15092_v54, %v15241_v16  ;;  %v4963_v16 = vadd.f32 %v15038_v34, %v15242_v55  ;;  %v4949_v55 = vadd.f32 %v15042_v2, %v15246_v30  ;;  %v15250_v30 = vld [vmem:[#allocation112_spill] sm:$0xff] }
 0x360   :  { %v12882_v5 = vpop.f32.mrf.mxu0  ;;  %7418 = vmatprep.subr.mxu1 %v5018_v20  ;;  %v12884_v58 = vpop.f32.mrf.mxu1 }
 0x361   :  { %15239 = vst [vmem:[#allocation74_spill] sm:$0xff] %v12882_v5  ;;  %15240 = vst [vmem:[#allocation115_spill] sm:$0xff] %v12884_v58  ;;  %7419 = vmatpush3.msra.mxu1 %v5018_v20  ;;  %3985 = vmatmul.mubr.f32.gmra.mxu0 %v7979_v47  ;;  %v7980_v58 = vld [vmem:[%s13955_s1 + $0x238] sm:$0xff]  ;;  %v5173_v57 = vmax.f32 %v4977_v51, 0.0  ;;  %v15251_v51 = vmax.f32 %v11982_v36, %v15250_v30  ;;  %v15259_v30 = vld [vmem:[#allocation148_spill] sm:$0xff] }
 0x362   :  { %v3232_v10 = vpop.f32.mrf.mxu0  ;;  %7420 = vmatprep.subr.mxu1 %v5004_v13  ;;  %v3633_v49 = vpop.f32.mrf.mxu1  ;;  %6942 = vmatprep.mubr.msk.f32.mxu0 %vm1141_vm0, %v7980_v58  ;;  %v6982_v47 = vld [vmem:[%s13958_s3 + $0x58] sm:$0x3] }
 0x363   :  { %v4321_v12 = vmax.f32 %v12606_v14, %v3232_v10  ;;  %v4323_v20 = vmax.f32 %v12611_v8, %v3633_v49  ;;  %7421 = vmatpush3.msra.mxu1 %v5004_v13  ;;  %v15243_v14 = vld [vmem:[#allocation153_spill] sm:$0xff]  ;;  %v15244_v10 = vld [vmem:[#allocation111_spill] sm:$0xff]  ;;  %v15247_v8 = vld [vmem:[#allocation140_spill] sm:$0xff] }
 0x364   :  { %v3234_v5 = vpop.f32.mrf.mxu0  ;;  %v15245_v24 = vmax.f32 %v15243_v14, %v15244_v10  ;;  %7422 = vmatprep.subr.mxu1 %v4990_v35  ;;  %v3635_v58 = vpop.f32.mrf.mxu1  ;;  %v15248_v13 = vmax.f32 %v11966_v37, %v15247_v8  ;;  %v15253_v10 = vld [vmem:[#allocation124_spill] sm:$0xff] }
 0x365   :  { %v4322_v42 = vmax.f32 %v12619_v32, %v3234_v5  ;;  %v4324_v34 = vmax.f32 %v12624_v27, %v3635_v58  ;;  %7423 = vmatpush3.msra.mxu1 %v4990_v35  ;;  %v6985_v32 = vld [vmem:[%s13958_s3 + $0x60] sm:$0xff]  ;;  %v5159_v35 = vmax.f32 %v4963_v16, 0.0 }
 0x366   :  { %v12905_v54 = vmax.f32 %v15245_v24, %v4321_v12  ;;  %v12913_v49 = vmax.f32 %v15248_v13, %v4323_v20  ;;  %v3238_v4 = vpop.f32.mrf.mxu0  ;;  %v7981_v12 = vld [vmem:[%s13955_s1 + $0x230] sm:$0xff]  ;;  %7427 = vmatprep.subr.mxu1 %v5173_v57  ;;  %v3639_v27 = vpop.f32.mrf.mxu1  ;;  %7425 = vmatmul.mubr.msk.f32.vlgmr.msra.gmra.mxu1 %vm5186_vm1, %v6982_v47  ;;  %v15252_v20 = vld [vmem:[#allocation47_spill] sm:$0xff] }
 0x367   :  { %3991 = vmatmul.mubr.f32.gmra.mxu0 %v7981_v12  ;;  %v12925_v5 = vmax.f32 %v15251_v51, %v4322_v42  ;;  %v4335_v37 = vmax.f32 %v12628_v46, %v3238_v4  ;;  %v4935_v14 = vadd.f32 %v15046_v59, %v15252_v20  ;;  %v15254_v24 = vld [vmem:[#allocation141_spill] sm:$0xff]  ;;  %v4337_v13 = vmax.f32 %v12636_v26, %v3639_v27  ;;  %v7982_v42 = vld [vmem:[%s13955_s1 + $0x248] sm:$0xff]  ;;  %v15257_v46 = vld [vmem:[#allocation171_spill] sm:$0xff] }
 0x368   :  { %15249 = vst [vmem:[#allocation40_spill] sm:$0xff] %v12913_v49  ;;  %v15255_v58 = vmax.f32 %v15253_v10, %v15254_v24  ;;  %7428 = vmatpush3.msra.mxu1 %v5173_v57  ;;  %v3240_v36 = vpop.f32.mrf.mxu0  ;;  %6943 = vmatprep.mubr.msk.f32.mxu0 %vm1141_vm0, %v7982_v42  ;;  %v15258_v4 = vmax.f32 %v11987_v0, %v15257_v46  ;;  %v5145_v12 = vmax.f32 %v4949_v55, 0.0  ;;  %v15264_v10 = vld [vmem:[#allocation156_spill] sm:$0xff]  ;;  %v15270_v42 = vld [vmem:[#allocation89_spill] sm:$0xff] }
 0x369   :  { %7429 = vmatprep.subr.mxu1 %v5159_v35  ;;  %v4336_v47 = vmax.f32 %v12641_v43, %v3240_v36  ;;  %v4921_v57 = vadd.f32 %v15052_v9, %v15259_v30  ;;  %7455 = vmatprep.mubr.msk.f32.mxu1 %vm5186_vm1, %v6985_v32  ;;  %v15260_v26 = vmax.f32 %v11992_v6, %v12270_v25  ;;  %v7983_v43 = vld [vmem:[%s13955_s1 + $0x240] sm:$0xff]  ;;  %v5131_v25 = vmax.f32 %v4935_v14, 0.0  ;;  %v15269_v36 = vld [vmem:[#allocation125_spill] sm:$0xff] }
 0x36a   :  { %v12934_v8 = vmax.f32 %v15255_v58, %v4324_v34  ;;  %v12944_v16 = vmax.f32 %v15258_v4, %v4335_v37  ;;  %v3641_v34 = vpop.f32.mrf.mxu1  ;;  %7430 = vmatpush3.msra.mxu1 %v5159_v35  ;;  %v3244_v0 = vpop.f32.mrf.mxu0  ;;  %v15262_v55 = vmax.f32 %v11998_v33, %v12277_v23  ;;  %v15263_v35 = vld [vmem:[#allocation120_spill] sm:$0xff]  ;;  %v4156_v24 = vmax.f32 %v15264_v10, %v12313_v48  ;;  %v15272_v48 = vld [vmem:[#allocation23_spill] sm:$0xff] }
 0x36b   :  { %v12953_v51 = vmax.f32 %v15260_v26, %v4337_v13  ;;  %v4338_v27 = vmax.f32 %v12647_v31, %v3641_v34  ;;  %3997 = vmatmul.mubr.f32.gmra.mxu0 %v7983_v43  ;;  %7431 = vmatprep.subr.mxu1 %v5145_v12  ;;  %v4349_v32 = vmax.f32 %v12652_v52, %v3244_v0  ;;  %v7984_v31 = vld [vmem:[%s13955_s1 + $0x258] sm:$0xff]  ;;  %v15265_v33 = vld [vmem:[#allocation28_spill] sm:$0xff]  ;;  %v5117_v30 = vmax.f32 %v4921_v57, 0.0  ;;  %v7985_v43 = vld [vmem:[%s13955_s1 + $0x250] sm:$0xff] }
 0x36c   :  { %15256 = vst [vmem:[#allocation176_spill] sm:$0xff] %v12934_v8  ;;  %v12962_v37 = vmax.f32 %v15262_v55, %v4336_v47  ;;  %v3645_v6 = vpop.f32.mrf.mxu1  ;;  %6944 = vmatprep.mubr.msk.f32.mxu0 %vm1141_vm0, %v7984_v31  ;;  %v4907_v20 = vadd.f32 %v15056_v39, %v15263_v35  ;;  %v15266_v23 = vld [vmem:[#allocation172_spill] sm:$0xff]  ;;  %7432 = vmatpush3.msra.mxu1 %v5145_v12  ;;  %v3246_v14 = vpop.f32.mrf.mxu0  ;;  %v15276_v55 = vld [vmem:[#allocation142_spill] sm:$0xff]  ;;  %v15279_v35 = vld [vmem:[#allocation105_spill] sm:$0xff] }
 0x36d   :  { %15261 = vst [vmem:[#allocation123_spill] sm:$0xff] %v12953_v51  ;;  %v15267_v58 = vmax.f32 %v15265_v33, %v15266_v23  ;;  %v4351_v52 = vmax.f32 %v12657_v18, %v3645_v6  ;;  %v15271_v46 = vmax.f32 %v15269_v36, %v15270_v42  ;;  %7433 = vmatprep.subr.mxu1 %v5131_v25  ;;  %v15360_v8 = vld [vmem:[#allocation151_spill] sm:$0xff] }
 0x36e   :  { %v4350_v47 = vmax.f32 %v12665_v40, %v3246_v14  ;;  %v3647_v34 = vpop.f32.mrf.mxu1  ;;  %v4893_v26 = vadd.f32 %v15060_v44, %v15272_v48  ;;  %7434 = vmatpush3.msra.mxu1 %v5131_v25  ;;  %v3250_v12 = vpop.f32.mrf.mxu0  ;;  %v15275_v40 = vld [vmem:[#allocation155_spill] sm:$0xff]  ;;  %v15278_v25 = vld [vmem:[#allocation38_spill] sm:$0xff]  ;;  %v4170_v10 = vmax.f32 %v15279_v35, %v12338_v11  ;;  %v15285_v11 = vmax.f32 %v12024_v1, %v12324_v50 }
 0x36f   :  { %v12976_v13 = vmax.f32 %v15267_v58, %v4338_v27  ;;  %v12982_v4 = vmax.f32 %v15271_v46, %v4349_v32  ;;  %v15273_v27 = vmax.f32 %v12008_v7, %v12299_v56  ;;  %v4352_v18 = vmax.f32 %v12667_v60, %v3647_v34  ;;  %4003 = vmatmul.mubr.f32.gmra.mxu0 %v7985_v43  ;;  %v7986_v60 = vld [vmem:[%s13955_s1 + $0x268] sm:$0xff]  ;;  %v15281_v58 = vld [vmem:[#allocation82_spill] sm:$0xff]  ;;  %v7987_v48 = vld [vmem:[%s13955_s1 + $0x260] sm:$0xff] }
 0x370   :  { %v15277_v57 = vmax.f32 %v15275_v40, %v15276_v55  ;;  %7435 = vmatprep.subr.mxu1 %v5117_v30  ;;  %v4363_v6 = vmax.f32 %v12671_v38, %v3250_v12  ;;  %v3651_v7 = vpop.f32.mrf.mxu1  ;;  %v5103_v56 = vmax.f32 %v4907_v20, 0.0  ;;  %6945 = vmatprep.mubr.msk.f32.mxu0 %vm1141_vm0, %v7986_v60  ;;  %v4879_v31 = vadd.f32 %v15064_v17, %v15278_v25  ;;  %v3252_v38 = vpop.f32.mrf.mxu0  ;;  %v15282_v20 = vld [vmem:[#allocation37_spill] sm:$0xff]  ;;  %v15291_v55 = vld [vmem:[#allocation158_spill] sm:$0xff] }
 0x371   :  { %15268 = vst [vmem:[#allocation152_spill] sm:$0xff] %v12976_v13  ;;  %v12990_v0 = vmax.f32 %v15273_v27, %v4351_v52  ;;  %v13010_v33 = vmax.f32 %v4156_v24, %v4352_v18  ;;  %v4365_v23 = vmax.f32 %v12676_v63, %v3651_v7  ;;  %7436 = vmatpush3.msra.mxu1 %v5117_v30  ;;  %v5089_v46 = vmax.f32 %v4893_v26, 0.0  ;;  %v15288_v27 = vld [vmem:[#allocation143_spill] sm:$0xff]  ;;  %v15290_v43 = vld [vmem:[#allocation97_spill] sm:$0xff] }
 0x372   :  { %v12999_v32 = vmax.f32 %v15277_v57, %v4350_v47  ;;  %v15283_v52 = vmax.f32 %v15281_v58, %v15282_v20  ;;  %7437 = vmatprep.subr.mxu1 %v5103_v56  ;;  %v4364_v36 = vmax.f32 %v12684_v62, %v3252_v38  ;;  %v3653_v42 = vpop.f32.mrf.mxu1  ;;  %v15284_v47 = vld [vmem:[#allocation118_spill] sm:$0xff]  ;;  %v3256_v30 = vpop.f32.mrf.mxu0  ;;  %v5075_v50 = vmax.f32 %v4879_v31, 0.0  ;;  %v15294_v60 = vld [vmem:[#allocation173_spill] sm:$0xff] }
 0x373   :  { %15274 = vst [vmem:[#allocation153_spill] sm:$0xff] %v12990_v0  ;;  %15280 = vst [vmem:[#allocation111_spill] sm:$0xff] %v13010_v33  ;;  %v4865_v34 = vadd.f32 %v15068_v61, %v15284_v47  ;;  %v13024_v24 = vmax.f32 %v15285_v11, %v4365_v23  ;;  %v4366_v63 = vmax.f32 %v12686_v53, %v3653_v42  ;;  %7438 = vmatpush3.msra.mxu1 %v5103_v56  ;;  %v15287_v62 = vld [vmem:[#allocation126_spill] sm:$0xff]  ;;  %v15293_v56 = vld [vmem:[#allocation127_spill] sm:$0xff] }
 0x374   :  { %v13016_v14 = vmax.f32 %v15283_v52, %v4363_v6  ;;  %4009 = vmatmul.mubr.f32.gmra.mxu0 %v7987_v48  ;;  %v15289_v26 = vmax.f32 %v15287_v62, %v15288_v27  ;;  %7439 = vmatprep.subr.mxu1 %v5089_v46  ;;  %v4377_v12 = vmax.f32 %v12690_v29, %v3256_v30  ;;  %v3657_v1 = vpop.f32.mrf.mxu1  ;;  %v7988_v53 = vld [vmem:[%s13955_s1 + $0x278] sm:$0xff]  ;;  %v3258_v29 = vpop.f32.mrf.mxu0  ;;  %v15296_v58 = vld [vmem:[#allocation41_spill] sm:$0xff] }
 0x375   :  { %15286 = vst [vmem:[#allocation96_spill] sm:$0xff] %v13024_v24  ;;  %6946 = vmatprep.mubr.msk.f32.mxu0 %vm1141_vm0, %v7988_v53  ;;  %v4851_v40 = vadd.f32 %v15072_v28, %v15290_v43  ;;  %v4184_v57 = vmax.f32 %v15291_v55, %v12363_v21  ;;  %v13044_v6 = vmax.f32 %v4170_v10, %v4366_v63  ;;  %v5061_v38 = vmax.f32 %v4865_v34, 0.0  ;;  %v15300_v42 = vld [vmem:[#allocation174_spill] sm:$0xff]  ;;  %v15303_v63 = vld [vmem:[#allocation73_spill] sm:$0xff] }
 0x376   :  { %v13033_v18 = vmax.f32 %v15289_v26, %v4364_v36  ;;  %v4379_v7 = vmax.f32 %v12695_v22, %v3657_v1  ;;  %7440 = vmatpush3.msra.mxu1 %v5089_v46  ;;  %v15295_v25 = vmax.f32 %v15293_v56, %v15294_v60  ;;  %v4378_v35 = vmax.f32 %v12703_v15, %v3258_v29  ;;  %v3659_v23 = vpop.f32.mrf.mxu1  ;;  %v3262_v52 = vpop.f32.mrf.mxu0  ;;  %v7989_v36 = vld [vmem:[%s13955_s1 + $0x270] sm:$0xff]  ;;  %v15302_v34 = vld [vmem:[#allocation66_spill] sm:$0xff]  ;;  %v15308_v1 = vld [vmem:[#allocation64_spill] sm:$0xff] }
 0x377   :  { %15292 = vst [vmem:[#allocation140_spill] sm:$0xff] %v13044_v6  ;;  %7441 = vmatprep.subr.mxu1 %v5075_v50  ;;  %v4837_v20 = vadd.f32 %v15076_v45, %v15296_v58  ;;  %v15297_v21 = vmax.f32 %v12040_v19, %v12349_v3  ;;  %v4380_v22 = vmax.f32 %v12705_v41, %v3659_v23  ;;  %v15299_v15 = vld [vmem:[#allocation157_spill] sm:$0xff]  ;;  %v5047_v3 = vmax.f32 %v4851_v40, 0.0  ;;  %v7990_v41 = vld [vmem:[%s13955_s1 + $0x288] sm:$0xff]  ;;  %v15310_v40 = vld [vmem:[#allocation90_spill] sm:$0xff] }
 0x378   :  { %v13050_v31 = vmax.f32 %v15295_v25, %v4377_v12  ;;  %7442 = vmatpush3.msra.mxu1 %v5075_v50  ;;  %4015 = vmatmul.mubr.f32.gmra.mxu0 %v7989_v36  ;;  %v15301_v46 = vmax.f32 %v15299_v15, %v15300_v42  ;;  %v4391_v11 = vmax.f32 %v15302_v34, %v3262_v52  ;;  %v3663_v19 = vpop.f32.mrf.mxu1  ;;  %v15304_v30 = vld [vmem:[#allocation109_spill] sm:$0xff]  ;;  %v3264_v53 = vpop.f32.mrf.mxu0  ;;  %v15312_v29 = vld [vmem:[#allocation62_spill] sm:$0xff]  ;;  %v15314_v23 = vld [vmem:[#allocation88_spill] sm:$0xff] }
 0x379   :  { %v13058_v10 = vmax.f32 %v15297_v21, %v4379_v7  ;;  %7443 = vmatprep.subr.mxu1 %v5061_v38  ;;  %6947 = vmatprep.mubr.msk.f32.mxu0 %vm1141_vm0, %v7990_v41  ;;  %v4823_v48 = vadd.f32 %v15304_v30, %v15303_v63  ;;  %v15305_v62 = vld [vmem:[#allocation145_spill] sm:$0xff]  ;;  %v13078_v12 = vmax.f32 %v4184_v57, %v4380_v22  ;;  %v5033_v25 = vmax.f32 %v4837_v20, 0.0  ;;  %v15315_v21 = vld [vmem:[#allocation128_spill] sm:$0xff]  ;;  %v7991_v42 = vld [vmem:[%s13955_s1 + $0x280] sm:$0xff] }
 0x37a   :  { %v13067_v47 = vmax.f32 %v15301_v46, %v4378_v35  ;;  %v15306_v27 = vld [vmem:[#allocation129_spill] sm:$0xff]  ;;  %v4393_v50 = vmax.f32 %v15308_v1, %v3663_v19  ;;  %7444 = vmatpush3.msra.mxu1 %v5061_v38  ;;  %v4392_v56 = vmax.f32 %v15312_v29, %v3264_v53  ;;  %v3665_v60 = vpop.f32.mrf.mxu1  ;;  %v15313_v35 = vld [vmem:[#allocation19_spill] sm:$0xff]  ;;  %v15316_v57 = vld [vmem:[#allocation144_spill] sm:$0xff]  ;;  %v3268_v15 = vpop.f32.mrf.mxu0 }
 0x37b   :  { %15298 = vst [vmem:[#allocation112_spill] sm:$0xff] %v13058_v10  ;;  %v4198_v26 = vmax.f32 %v15306_v27, %v15305_v62  ;;  %15307 = vst [vmem:[#allocation47_spill] sm:$0xff] %v13078_v12  ;;  %v15309_v43 = vld [vmem:[#allocation29_spill] sm:$0xff]  ;;  %7445 = vmatprep.subr.mxu1 %v5047_v3  ;;  %v4809_v58 = vadd.f32 %v15314_v23, %v15313_v35  ;;  %v15317_v22 = vmax.f32 %v15315_v21, %v15316_v57  ;;  %v15319_v38 = vld [vmem:[#allocation11_spill] sm:$0xff] }
 0x37c   :  { %v15311_v55 = vmax.f32 %v15309_v43, %v15310_v40  ;;  %v4394_v36 = vmax.f32 %v15319_v38, %v3665_v60  ;;  %7446 = vmatpush3.msra.mxu1 %v5047_v3  ;;  %4021 = vmatmul.mubr.f32.gmra.mxu0 %v7991_v42  ;;  %v15320_v46 = vld [vmem:[#allocation83_spill] sm:$0xff]  ;;  %v15321_v34 = vld [vmem:[#allocation113_spill] sm:$0xff]  ;;  %v15323_v19 = vld [vmem:[#allocation10_spill] sm:$0xff]  ;;  %v3669_v63 = vpop.f32.mrf.mxu1  ;;  %v5019_v62 = vmax.f32 %v4823_v48, 0.0  ;;  %v3270_v60 = vpop.f32.mrf.mxu0 }
 0x37d   :  { %v13092_v52 = vmax.f32 %v15317_v22, %v4393_v50  ;;  %v15322_v20 = vmax.f32 %v15320_v46, %v15321_v34  ;;  %7447 = vmatprep.subr.mxu1 %v5033_v25  ;;  %v4405_v41 = vmax.f32 %v15323_v19, %v3268_v15  ;;  %v7992_v3 = vld [vmem:[%s13955_s1 + $0x298] sm:$0xff]  ;;  %v15324_v27 = vld [vmem:[#allocation39_spill] sm:$0xff]  ;;  %v15325_v1 = vld [vmem:[#allocation36_spill] sm:$0xff]  ;;  %v5005_v42 = vmax.f32 %v4809_v58, 0.0 }
 0x37e   :  { %v13084_v7 = vmax.f32 %v15311_v55, %v4391_v11  ;;  %6948 = vmatprep.mubr.msk.f32.mxu0 %vm1141_vm0, %v7992_v3  ;;  %v4795_v50 = vadd.f32 %v15325_v1, %v15324_v27  ;;  %v15326_v53 = vld [vmem:[#allocation114_spill] sm:$0xff]  ;;  %v13112_v55 = vmax.f32 %v4198_v26, %v4394_v36  ;;  %v15329_v29 = vld [vmem:[#allocation57_spill] sm:$0xff]  ;;  %7448 = vmatpush3.msra.mxu1 %v5033_v25  ;;  %v15330_v35 = vld [vmem:[#allocation159_spill] sm:$0xff]  ;;  %v3671_v15 = vpop.f32.mrf.mxu1  ;;  %v3274_v27 = vpop.f32.mrf.mxu0 }
 0x37f   :  { %15318 = vst [vmem:[#allocation124_spill] sm:$0xff] %v13092_v52  ;;  %v13101_v11 = vmax.f32 %v15322_v20, %v4392_v56  ;;  %v15327_v43 = vld [vmem:[#allocation130_spill] sm:$0xff]  ;;  %v4407_v56 = vmax.f32 %v15329_v29, %v3669_v63  ;;  %7449 = vmatprep.subr.mxu1 %v5019_v62  ;;  %v15333_v22 = vld [vmem:[#allocation55_spill] sm:$0xff]  ;;  %v15334_v46 = vld [vmem:[#allocation81_spill] sm:$0xff] }
 0x380   :  { %v4212_v40 = vmax.f32 %v15327_v43, %v15326_v53  ;;  %15328 = vst [vmem:[#allocation141_spill] sm:$0xff] %v13112_v55  ;;  %v15331_v48 = vld [vmem:[#allocation70_spill] sm:$0xff]  ;;  %v4406_v38 = vmax.f32 %v15333_v22, %v3270_v60  ;;  %v15335_v34 = vld [vmem:[#allocation48_spill] sm:$0xff]  ;;  %v15340_v25 = vld [vmem:[#allocation53_spill] sm:$0xff]  ;;  %7450 = vmatpush3.msra.mxu1 %v5019_v62 }
 0x381   :  { %v15332_v21 = vmax.f32 %v15330_v35, %v15331_v48  ;;  %v4978_v20 = vadd.f32 %v15335_v34, %v15334_v46  ;;  %v15336_v19 = vld [vmem:[#allocation160_spill] sm:$0xff]  ;;  %v4408_v63 = vmax.f32 %v15340_v25, %v3671_v15  ;;  %v15342_v43 = vld [vmem:[#allocation15_spill] sm:$0xff]  ;;  %7451 = vmatprep.subr.mxu1 %v5005_v42  ;;  %v15344_v60 = vld [vmem:[#allocation5_spill] sm:$0xff]  ;;  %v3675_v48 = vpop.f32.mrf.mxu1 }
 0x382   :  { %v15337_v26 = vld [vmem:[#allocation68_spill] sm:$0xff]  ;;  %v4419_v35 = vmax.f32 %v15344_v60, %v3274_v27  ;;  %v15346_v22 = vld [vmem:[#allocation22_spill] sm:$0xff]  ;;  %v15347_v46 = vld [vmem:[#allocation59_spill] sm:$0xff]  ;;  %7452 = vmatpush3.msra.mxu1 %v5005_v42  ;;  %v3276_v27 = vpop.f32.mrf.mxu0 }
 0x383   :  { %v13118_v57 = vmax.f32 %v15332_v21, %v4405_v41  ;;  %v15338_v36 = vmax.f32 %v15336_v19, %v15337_v26  ;;  %v7993_v41 = vld [vmem:[%s13955_s1 + $0x290] sm:$0xff]  ;;  %v15341_v53 = vld [vmem:[#allocation84_spill] sm:$0xff]  ;;  %v15345_v21 = vld [vmem:[#allocation122_spill] sm:$0xff] }
 0x384   :  { %4027 = vmatmul.mubr.f32.gmra.mxu0 %v7993_v41  ;;  %v15343_v58 = vmax.f32 %v15341_v53, %v15342_v43  ;;  %v7994_v62 = vld [vmem:[%s13955_s1 + $0x2a8] sm:$0xff]  ;;  %v4964_v15 = vadd.f32 %v15346_v22, %v15345_v21  ;;  %v15348_v19 = vld [vmem:[#allocation162_spill] sm:$0xff]  ;;  %v15351_v41 = vld [vmem:[#allocation107_spill] sm:$0xff]  ;;  %v3677_v21 = vpop.f32.mrf.mxu1  ;;  %v3280_v49 = vpop.f32.mrf.mxu0 }
 0x385   :  { %v13126_v3 = vmax.f32 %v15338_v36, %v4407_v56  ;;  %v4991_v56 = vmax.f32 %v4795_v50, 0.0  ;;  %6949 = vmatprep.mubr.msk.f32.mxu0 %vm1141_vm0, %v7994_v62  ;;  %v4226_v26 = vmax.f32 %v15348_v19, %v15347_v46  ;;  %v13146_v36 = vmax.f32 %v4212_v40, %v4408_v63  ;;  %v6986_v50 = vld [vmem:[%s13958_s3 + $0x68] sm:$0x3]  ;;  %v15352_v53 = vld [vmem:[#allocation14_spill] sm:$0xff]  ;;  %v15355_v40 = vld [vmem:[#allocation43_spill] sm:$0xff] }
 0x386   :  { %v13135_v29 = vmax.f32 %v15343_v58, %v4406_v38  ;;  %v15350_v38 = vld [vmem:[#allocation50_spill] sm:$0xff]  ;;  %v15353_v43 = vmax.f32 %v15351_v41, %v15352_v53  ;;  %v15354_v60 = vld [vmem:[#allocation104_spill] sm:$0xff]  ;;  %v5174_v46 = vmax.f32 %v4978_v20, 0.0  ;;  %v4950_v63 = vadd.f32 %v15042_v2, %v15355_v40  ;;  %v15357_v42 = vld [vmem:[#allocation63_spill] sm:$0xff] }
 0x387   :  { %15339 = vst [vmem:[#allocation171_spill] sm:$0xff] %v13126_v3  ;;  %15349 = vst [vmem:[#allocation148_spill] sm:$0xff] %v13146_v36  ;;  %v4421_v25 = vmax.f32 %v15350_v38, %v3675_v48  ;;  %7453 = vmatprep.subr.mxu1 %v4991_v56  ;;  %v4420_v62 = vmax.f32 %v15354_v60, %v3276_v27  ;;  %v15356_v48 = vld [vmem:[#allocation131_spill] sm:$0xff]  ;;  %v4422_v13 = vmax.f32 %v15360_v8, %v3677_v21  ;;  %v6989_v20 = vld [vmem:[%s13958_s3 + $0x70] sm:$0xff]  ;;  %v3681_v8 = vpop.f32.mrf.mxu1 }
 0x388   :  { %v13155_v58 = vmax.f32 %v15353_v43, %v4419_v35  ;;  %v15358_v19 = vmax.f32 %v15356_v48, %v15357_v42  ;;  %7454 = vmatpush3.msra.mxu1 %v4991_v56  ;;  %v7995_v35 = vld [vmem:[%s13955_s1 + $0x2a0] sm:$0xff]  ;;  %v15361_v27 = vld [vmem:[#allocation161_spill] sm:$0xff]  ;;  %v5160_v56 = vmax.f32 %v4964_v15, 0.0  ;;  %v15365_v21 = vld [vmem:[#allocation150_spill] sm:$0xff] }
 0x389   :  { %4033 = vmatmul.mubr.f32.gmra.mxu0 %v7995_v35  ;;  %v15362_v41 = vld [vmem:[#allocation61_spill] sm:$0xff]  ;;  %7458 = vmatprep.subr.mxu1 %v5174_v46  ;;  %v4936_v40 = vadd.f32 %v15046_v59, %v15365_v21  ;;  %v15366_v48 = vld [vmem:[#allocation52_spill] sm:$0xff]  ;;  %v13183_v35 = vmax.f32 %v4226_v26, %v4422_v13  ;;  %v3683_v13 = vpop.f32.mrf.mxu1  ;;  %v5146_v26 = vmax.f32 %v4950_v63, 0.0  ;;  %v15374_v21 = vld [vmem:[#allocation95_spill] sm:$0xff] }
 0x38a   :  { %v13163_v38 = vmax.f32 %v15358_v19, %v4421_v25  ;;  %v15363_v53 = vmax.f32 %v15361_v27, %v15362_v41  ;;  %v15364_v25 = vld [vmem:[#allocation79_spill] sm:$0xff]  ;;  %7456 = vmatmul.mubr.msk.f32.vlgmr.msra.gmra.mxu1 %vm5186_vm1, %v6986_v50  ;;  %v15367_v42 = vld [vmem:[#allocation133_spill] sm:$0xff]  ;;  %v15370_v50 = vld [vmem:[#allocation108_spill] sm:$0xff] }
 0x38b   :  { %v4433_v60 = vmax.f32 %v15364_v25, %v3280_v49  ;;  %v4240_v19 = vmax.f32 %v15367_v42, %v15366_v48  ;;  %15368 = vst [vmem:[#allocation156_spill] sm:$0xff] %v13183_v35  ;;  %v15369_v33 = vld [vmem:[#allocation25_spill] sm:$0xff]  ;;  %7459 = vmatpush3.msra.mxu1 %v5174_v46  ;;  %v7996_v49 = vld [vmem:[%s13955_s1 + $0x2b8] sm:$0xff]  ;;  %7486 = vmatprep.mubr.msk.f32.mxu1 %vm5186_vm1, %v6989_v20  ;;  %v15375_v46 = vld [vmem:[#allocation132_spill] sm:$0xff] }
 0x38c   :  { %15359 = vst [vmem:[#allocation120_spill] sm:$0xff] %v13163_v38  ;;  %v13175_v43 = vmax.f32 %v15363_v53, %v4420_v62  ;;  %v4435_v51 = vmax.f32 %v15369_v33, %v3681_v8  ;;  %v3282_v62 = vpop.f32.mrf.mxu0  ;;  %6950 = vmatprep.mubr.msk.f32.mxu0 %vm1141_vm0, %v7996_v49  ;;  %v15371_v15 = vld [vmem:[#allocation9_spill] sm:$0xff]  ;;  %7460 = vmatprep.subr.mxu1 %v5160_v56  ;;  %v15373_v53 = vld [vmem:[#allocation147_spill] sm:$0xff]  ;;  %v15376_v8 = vld [vmem:[#allocation8_spill] sm:$0xff] }
 0x38d   :  { %v15372_v27 = vmax.f32 %v15370_v50, %v15371_v15  ;;  %v4434_v25 = vmax.f32 %v15373_v53, %v3282_v62  ;;  %v4922_v33 = vadd.f32 %v15052_v9, %v15374_v21  ;;  %v15377_v48 = vmax.f32 %v15375_v46, %v15376_v8  ;;  %v15379_v49 = vld [vmem:[#allocation24_spill] sm:$0xff]  ;;  %7461 = vmatpush3.msra.mxu1 %v5160_v56  ;;  %v7997_v62 = vld [vmem:[%s13955_s1 + $0x2b0] sm:$0xff]  ;;  %v15380_v63 = vld [vmem:[#allocation31_spill] sm:$0xff]  ;;  %v3687_v21 = vpop.f32.mrf.mxu1 }
 0x38e   :  { %v4436_v6 = vmax.f32 %v15379_v49, %v3683_v13  ;;  %4039 = vmatmul.mubr.f32.gmra.mxu0 %v7997_v62  ;;  %v15381_v50 = vld [vmem:[#allocation54_spill] sm:$0xff]  ;;  %7462 = vmatprep.subr.mxu1 %v5146_v26  ;;  %v7998_v56 = vld [vmem:[%s13955_s1 + $0x2c8] sm:$0xff]  ;;  %v15385_v8 = vld [vmem:[#allocation71_spill] sm:$0xff] }
 0x38f   :  { %v13193_v41 = vmax.f32 %v15372_v27, %v4433_v60  ;;  %v13202_v42 = vmax.f32 %v15377_v48, %v4435_v51  ;;  %v3286_v60 = vpop.f32.mrf.mxu0  ;;  %v15382_v15 = vmax.f32 %v15380_v63, %v15381_v50  ;;  %v15383_v20 = vld [vmem:[#allocation94_spill] sm:$0xff]  ;;  %v5132_v51 = vmax.f32 %v4936_v40, 0.0  ;;  %6951 = vmatprep.mubr.msk.f32.mxu0 %vm1141_vm0, %v7998_v56  ;;  %7463 = vmatpush3.msra.mxu1 %v5146_v26  ;;  %v15389_v50 = vld [vmem:[#allocation163_spill] sm:$0xff]  ;;  %v15390_v40 = vld [vmem:[#allocation4_spill] sm:$0xff]  ;;  %v3689_v12 = vpop.f32.mrf.mxu1 }
 0x390   :  { %v4447_v53 = vmax.f32 %v15383_v20, %v3286_v60  ;;  %v15384_v13 = vld [vmem:[#allocation46_spill] sm:$0xff]  ;;  %v13222_v62 = vmax.f32 %v4240_v19, %v4436_v6  ;;  %v15392_v0 = vld [vmem:[#allocation117_spill] sm:$0xff]  ;;  %v5118_v24 = vmax.f32 %v4922_v33, 0.0 }
 0x391   :  { %15378 = vst [vmem:[#allocation28_spill] sm:$0xff] %v13202_v42  ;;  %v13211_v27 = vmax.f32 %v15382_v15, %v4434_v25  ;;  %v4908_v46 = vadd.f32 %v15056_v39, %v15384_v13  ;;  %v15386_v48 = vld [vmem:[#allocation134_spill] sm:$0xff]  ;;  %v15388_v25 = vld [vmem:[#allocation76_spill] sm:$0xff]  ;;  %v3288_v60 = vpop.f32.mrf.mxu0  ;;  %v15391_v15 = vmax.f32 %v15389_v50, %v15390_v40  ;;  %7464 = vmatprep.subr.mxu1 %v5132_v51  ;;  %v15395_v6 = vld [vmem:[#allocation121_spill] sm:$0xff] }
 0x392   :  { %v4254_v49 = vmax.f32 %v15386_v48, %v15385_v8  ;;  %15387 = vst [vmem:[#allocation172_spill] sm:$0xff] %v13222_v62  ;;  %v4449_v63 = vmax.f32 %v15388_v25, %v3687_v21  ;;  %v4448_v56 = vmax.f32 %v15392_v0, %v3288_v60  ;;  %v15393_v13 = vld [vmem:[#allocation146_spill] sm:$0xff]  ;;  %v15394_v8 = vld [vmem:[#allocation164_spill] sm:$0xff]  ;;  %7465 = vmatpush3.msra.mxu1 %v5132_v51  ;;  %v15410_v10 = vld [vmem:[#allocation177_spill] sm:$0xff] }
 0x393   :  { %v13228_v20 = vmax.f32 %v15391_v15, %v4447_v53  ;;  %v4894_v55 = vadd.f32 %v15060_v44, %v15393_v13  ;;  %v15396_v19 = vmax.f32 %v15394_v8, %v15395_v6  ;;  %v15397_v26 = vld [vmem:[#allocation42_spill] sm:$0xff]  ;;  %v3292_v25 = vpop.f32.mrf.mxu0  ;;  %v7999_v53 = vld [vmem:[%s13955_s1 + $0x2c0] sm:$0xff]  ;;  %v15398_v0 = vld [vmem:[#allocation32_spill] sm:$0xff]  ;;  %7466 = vmatprep.subr.mxu1 %v5118_v24  ;;  %v3693_v13 = vpop.f32.mrf.mxu1 }
 0x394   :  { %v4450_v21 = vmax.f32 %v15397_v26, %v3689_v12  ;;  %4045 = vmatmul.mubr.f32.gmra.mxu0 %v7999_v53  ;;  %v15399_v60 = vld [vmem:[#allocation72_spill] sm:$0xff]  ;;  %v8000_v12 = vld [vmem:[%s13955_s1 + $0x2d8] sm:$0xff]  ;;  %v15403_v6 = vld [vmem:[#allocation13_spill] sm:$0xff]  ;;  %7467 = vmatpush3.msra.mxu1 %v5118_v24 }
 0x395   :  { %v13236_v48 = vmax.f32 %v15396_v19, %v4449_v63  ;;  %v15400_v33 = vmax.f32 %v15398_v0, %v15399_v60  ;;  %v15401_v40 = vld [vmem:[#allocation20_spill] sm:$0xff]  ;;  %v5104_v63 = vmax.f32 %v4908_v46, 0.0  ;;  %6952 = vmatprep.mubr.msk.f32.mxu0 %vm1141_vm0, %v8000_v12  ;;  %v15404_v19 = vld [vmem:[#allocation166_spill] sm:$0xff]  ;;  %v15408_v46 = vld [vmem:[#allocation69_spill] sm:$0xff]  ;;  %v3695_v36 = vpop.f32.mrf.mxu1  ;;  %v5090_v52 = vmax.f32 %v4894_v55, 0.0 }
 0x396   :  { %v4461_v15 = vmax.f32 %v15401_v40, %v3292_v25  ;;  %v15402_v51 = vld [vmem:[#allocation100_spill] sm:$0xff]  ;;  %v4268_v26 = vmax.f32 %v15404_v19, %v15403_v6  ;;  %v13256_v53 = vmax.f32 %v4254_v49, %v4450_v21  ;;  %v3294_v25 = vpop.f32.mrf.mxu0  ;;  %v15407_v60 = vld [vmem:[#allocation86_spill] sm:$0xff]  ;;  %v15412_v6 = vld [vmem:[#allocation135_spill] sm:$0xff] }
 0x397   :  { %v13245_v50 = vmax.f32 %v15400_v33, %v4448_v56  ;;  %v4880_v8 = vadd.f32 %v15064_v17, %v15402_v51  ;;  %v15406_v56 = vld [vmem:[#allocation178_spill] sm:$0xff]  ;;  %v15409_v33 = vmax.f32 %v15407_v60, %v15408_v46  ;;  %7468 = vmatprep.subr.mxu1 %v5104_v63  ;;  %v4462_v12 = vmax.f32 %v15410_v10, %v3294_v25  ;;  %v15411_v51 = vld [vmem:[#allocation44_spill] sm:$0xff]  ;;  %v15413_v49 = vld [vmem:[#allocation67_spill] sm:$0xff] }
 0x398   :  { %15405 = vst [vmem:[#allocation125_spill] sm:$0xff] %v13256_v53  ;;  %v4463_v0 = vmax.f32 %v15406_v56, %v3693_v13  ;;  %v4866_v35 = vadd.f32 %v15068_v61, %v15411_v51  ;;  %v15414_v21 = vmax.f32 %v15412_v6, %v15413_v49  ;;  %v15415_v24 = vld [vmem:[#allocation175_spill] sm:$0xff]  ;;  %7469 = vmatpush3.msra.mxu1 %v5104_v63  ;;  %v3298_v56 = vpop.f32.mrf.mxu0  ;;  %v15416_v10 = vld [vmem:[#allocation165_spill] sm:$0xff]  ;;  %v15419_v46 = vld [vmem:[#allocation154_spill] sm:$0xff]  ;;  %v3699_v51 = vpop.f32.mrf.mxu1 }
 0x399   :  { %v13262_v40 = vmax.f32 %v15409_v33, %v4461_v15  ;;  %v4464_v13 = vmax.f32 %v15415_v24, %v3695_v36  ;;  %v8001_v15 = vld [vmem:[%s13955_s1 + $0x2d0] sm:$0xff]  ;;  %7470 = vmatprep.subr.mxu1 %v5090_v52  ;;  %v4475_v33 = vmax.f32 %v15419_v46, %v3298_v56  ;;  %v8002_v36 = vld [vmem:[%s13955_s1 + $0x2e8] sm:$0xff] }
 0x39a   :  { %v13270_v19 = vmax.f32 %v15414_v21, %v4463_v0  ;;  %4051 = vmatmul.mubr.f32.gmra.mxu0 %v8001_v15  ;;  %v15417_v25 = vld [vmem:[#allocation65_spill] sm:$0xff]  ;;  %v5076_v0 = vmax.f32 %v4880_v8, 0.0  ;;  %v15422_v21 = vld [vmem:[#allocation103_spill] sm:$0xff]  ;;  %7471 = vmatpush3.msra.mxu1 %v5090_v52  ;;  %v15423_v15 = vld [vmem:[#allocation110_spill] sm:$0xff]  ;;  %v3701_v46 = vpop.f32.mrf.mxu1  ;;  %v5062_v3 = vmax.f32 %v4866_v35, 0.0 }
 0x39b   :  { %v15418_v55 = vmax.f32 %v15416_v10, %v15417_v25  ;;  %6953 = vmatprep.mubr.msk.f32.mxu0 %vm1141_vm0, %v8002_v36  ;;  %v15420_v63 = vld [vmem:[#allocation21_spill] sm:$0xff]  ;;  %v13288_v49 = vmax.f32 %v4268_v26, %v4464_v13  ;;  %v4477_v24 = vmax.f32 %v15422_v21, %v3699_v51  ;;  %v15424_v10 = vld [vmem:[#allocation12_spill] sm:$0xff]  ;;  %v15426_v8 = vld [vmem:[#allocation26_spill] sm:$0xff] }
 0x39c   :  { %v4852_v6 = vadd.f32 %v15072_v28, %v15420_v63  ;;  %v15425_v56 = vmax.f32 %v15423_v15, %v15424_v10  ;;  %7472 = vmatprep.subr.mxu1 %v5076_v0  ;;  %v15427_v36 = vld [vmem:[#allocation92_spill] sm:$0xff]  ;;  %v15431_v52 = vld [vmem:[#allocation149_spill] sm:$0xff]  ;;  %v15433_v15 = vld [vmem:[#allocation58_spill] sm:$0xff] }
 0x39d   :  { %v13279_v60 = vmax.f32 %v15418_v55, %v4462_v12  ;;  %15421 = vst [vmem:[#allocation89_spill] sm:$0xff] %v13288_v49  ;;  %v3300_v12 = vpop.f32.mrf.mxu0  ;;  %v4838_v62 = vadd.f32 %v15076_v45, %v15427_v36  ;;  %v15428_v63 = vld [vmem:[#allocation136_spill] sm:$0xff]  ;;  %v4478_v51 = vmax.f32 %v15431_v52, %v3701_v46  ;;  %7473 = vmatpush3.msra.mxu1 %v5076_v0 }
 0x39e   :  { %v13294_v25 = vmax.f32 %v15425_v56, %v4475_v33  ;;  %v4476_v55 = vmax.f32 %v15426_v8, %v3300_v12  ;;  %v15429_v26 = vld [vmem:[#allocation60_spill] sm:$0xff]  ;;  %v8003_v33 = vld [vmem:[%s13955_s1 + $0x2e0] sm:$0xff]  ;;  %v15432_v12 = vld [vmem:[#allocation34_spill] sm:$0xff]  ;;  %7474 = vmatprep.subr.mxu1 %v5062_v3  ;;  %v5048_v36 = vmax.f32 %v4852_v6, 0.0 }
 0x39f   :  { %v15430_v13 = vmax.f32 %v15428_v63, %v15429_v26  ;;  %v3304_v21 = vpop.f32.mrf.mxu0  ;;  %4057 = vmatmul.mubr.f32.gmra.mxu0 %v8003_v33  ;;  %v15434_v35 = vmax.f32 %v15432_v12, %v15433_v15  ;;  %v15435_v56 = vld [vmem:[#allocation102_spill] sm:$0xff]  ;;  %v15436_v0 = vld [vmem:[#allocation116_spill] sm:$0xff]  ;;  %v15437_v63 = vld [vmem:[#allocation137_spill] sm:$0xff]  ;;  %7475 = vmatpush3.msra.mxu1 %v5062_v3  ;;  %v5034_v6 = vmax.f32 %v4838_v62, 0.0 }
 0x3a0   :  { %v4489_v8 = vmax.f32 %v15435_v56, %v3304_v21  ;;  %v4824_v46 = vadd.f32 %v15304_v30, %v15436_v0  ;;  %v15438_v26 = vld [vmem:[#allocation56_spill] sm:$0xff]  ;;  %7476 = vmatprep.subr.mxu1 %v5048_v36  ;;  %v15440_v33 = vld [vmem:[#allocation119_spill] sm:$0xff]  ;;  %v8005_v56 = vld [vmem:[%s13955_s1 + $0x2f0] sm:$0xff] }
 0x3a1   :  { %v13302_v38 = vmax.f32 %v15430_v13, %v4477_v24  ;;  %v13311_v10 = vmax.f32 %v15434_v35, %v4476_v55  ;;  %v8004_v24 = vld [vmem:[%s13955_s1 + $0x2f8] sm:$0xff]  ;;  %v15439_v13 = vmax.f32 %v15437_v63, %v15438_v26  ;;  %v3306_v55 = vpop.f32.mrf.mxu0  ;;  %v15441_v12 = vld [vmem:[#allocation91_spill] sm:$0xff]  ;;  %7477 = vmatpush3.msra.mxu1 %v5048_v36  ;;  %v8006_v62 = vld [vmem:[%s13955_s1 + $0x308] sm:$0xff] }
 0x3a2   :  { %6954 = vmatprep.mubr.msk.f32.mxu0 %vm1141_vm0, %v8004_v24  ;;  %v4490_v21 = vmax.f32 %v15440_v33, %v3306_v55  ;;  %v4810_v15 = vadd.f32 %v15314_v23, %v15441_v12  ;;  %v15442_v24 = vld [vmem:[#allocation167_spill] sm:$0xff]  ;;  %7478 = vmatprep.subr.mxu1 %v5034_v6  ;;  %v15446_v36 = vld [vmem:[#allocation33_spill] sm:$0xff] }
 0x3a3   :  { %v13323_v52 = vmax.f32 %v15439_v13, %v4478_v51  ;;  %v3310_v35 = vpop.f32.mrf.mxu0  ;;  %4063 = vmatmul.mubr.f32.gmra.mxu0 %v8005_v56  ;;  %v15443_v0 = vld [vmem:[#allocation7_spill] sm:$0xff]  ;;  %v5020_v13 = vmax.f32 %v4824_v46, 0.0  ;;  %v4796_v55 = vadd.f32 %v15325_v1, %v15446_v36  ;;  %7479 = vmatpush3.msra.mxu1 %v5034_v6  ;;  %v15453_v46 = vld [vmem:[#allocation74_spill] sm:$0xff]  ;;  %v15455_v36 = vld [vmem:[#allocation17_spill] sm:$0xff] }
 0x3a4   :  { %v15444_v51 = vmax.f32 %v15442_v24, %v15443_v0  ;;  %v15445_v3 = vld [vmem:[#allocation75_spill] sm:$0xff]  ;;  %6955 = vmatprep.mubr.msk.f32.mxu0 %vm1141_vm0, %v8006_v62  ;;  %v15451_v0 = vld [vmem:[#allocation49_spill] sm:$0xff]  ;;  %v5006_v42 = vmax.f32 %v4810_v15, 0.0 }
 0x3a5   :  { %v4503_v26 = vmax.f32 %v15445_v3, %v3310_v35  ;;  %v3312_v33 = vpop.f32.mrf.mxu0  ;;  %v15447_v12 = vld [vmem:[#allocation87_spill] sm:$0xff]  ;;  %7480 = vmatprep.subr.mxu1 %v5020_v13  ;;  %v15454_v62 = vld [vmem:[#allocation169_spill] sm:$0xff] }
 0x3a6   :  { %v4685_v63 = vmax.f32 %v15444_v51, %v4489_v8  ;;  %v15448_v56 = vld [vmem:[#allocation51_spill] sm:$0xff]  ;;  %v4504_v3 = vmax.f32 %v15453_v46, %v3312_v33  ;;  %7481 = vmatpush3.msra.mxu1 %v5020_v13 }
 0x3a7   :  { %v15449_v53 = vmax.f32 %v15447_v12, %v15448_v56  ;;  %v15450_v8 = vld [vmem:[#allocation35_spill] sm:$0xff]  ;;  %v13348_v49 = vpop.f32.mrf.mxu0  ;;  %v15456_v12 = vmax.f32 %v15454_v62, %v15455_v36  ;;  %7482 = vmatprep.subr.mxu1 %v5006_v42 }
 0x3a8   :  { %v15452_v51 = vmax.f32 %v15450_v8, %v15451_v0  ;;  %v8007_v6 = vld [vmem:[%s13955_s1 + $0x300] sm:$0xff]  ;;  %v4965_v13 = vadd.f32 %v15346_v22, %v4685_v63  ;;  %7483 = vmatpush3.msra.mxu1 %v5006_v42  ;;  %v8009_v63 = vld [vmem:[%s13955_s1 + $0x310] sm:$0xff]  ;;  %v4951_v42 = vadd.f32 %v15042_v2, %v13294_v25  ;;  %v4952_v25 = vadd.f32 %v15042_v2, %v13311_v10 }
 0x3a9   :  { %v4686_v24 = vmax.f32 %v15449_v53, %v4490_v21  ;;  %4069 = vmatmul.mubr.f32.gmra.mxu0 %v8007_v6  ;;  %v4700_v53 = vmax.f32 %v15456_v12, %v4504_v3  ;;  %v4992_v21 = vmax.f32 %v4796_v55, 0.0  ;;  %v13362_v33 = vpop.f32.mrf.mxu0  ;;  %v6990_v55 = vld [vmem:[%s13958_s3 + $0x78] sm:$0x3]  ;;  %v4937_v6 = vadd.f32 %v15046_v59, %v13262_v40  ;;  %v8011_v12 = vld [vmem:[%s13955_s1 + $0x320] sm:$0xff] }
 0x3aa   :  { %v4699_v35 = vmax.f32 %v15452_v51, %v4503_v26  ;;  %v8008_v26 = vld [vmem:[%s13955_s1 + $0x318] sm:$0xff]  ;;  %v5161_v46 = vmax.f32 %v4965_v13, 0.0  ;;  %v4923_v40 = vadd.f32 %v15052_v9, %v13228_v20 }
 0x3ab   :  { %6956 = vmatprep.mubr.msk.f32.mxu0 %vm1141_vm0, %v8008_v26  ;;  %7484 = vmatprep.subr.mxu1 %v4992_v21  ;;  %v4980_v8 = vadd.f32 %v15335_v34, %v4700_v53  ;;  %v4966_v0 = vadd.f32 %v15346_v22, %v4686_v24  ;;  %v13369_v51 = vpop.f32.mrf.mxu0  ;;  %v5147_v53 = vmax.f32 %v4951_v42, 0.0  ;;  %v5133_v26 = vmax.f32 %v4937_v6, 0.0  ;;  %v8012_v13 = vld [vmem:[%s13955_s1 + $0x338] sm:$0xff]  ;;  %v13413_v42 = vpop.f32.mrf.mxu1 }
 0x3ac   :  { %v4979_v15 = vadd.f32 %v15335_v34, %v4699_v35  ;;  %7485 = vmatpush3.msra.mxu1 %v4992_v21  ;;  %v8010_v35 = vld [vmem:[%s13955_s1 + $0x328] sm:$0xff]  ;;  %v4938_v21 = vadd.f32 %v15046_v59, %v13279_v60  ;;  %v4909_v60 = vadd.f32 %v15056_v39, %v13193_v41  ;;  %v4881_v6 = vadd.f32 %v15064_v17, %v13118_v57 }
 0x3ad   :  { %4075 = vmatmul.mubr.f32.gmra.mxu0 %v8009_v63  ;;  %v5176_v24 = vmax.f32 %v4980_v8, 0.0  ;;  %v13380_v3 = vpop.f32.mrf.mxu0  ;;  %7487 = vmatmul.mubr.msk.f32.vlgmr.msra.gmra.mxu1 %vm5186_vm1, %v6990_v55  ;;  %v5162_v62 = vmax.f32 %v4966_v0, 0.0  ;;  %v8013_v55 = vld [vmem:[%s13955_s1 + $0x330] sm:$0xff]  ;;  %v5119_v0 = vmax.f32 %v4923_v40, 0.0  ;;  %v4910_v63 = vadd.f32 %v15056_v39, %v13211_v27 }
 0x3ae   :  { %v5175_v56 = vmax.f32 %v4979_v15, 0.0  ;;  %6957 = vmatprep.mubr.msk.f32.mxu0 %vm1141_vm0, %v8010_v35  ;;  %v5148_v15 = vmax.f32 %v4952_v25, 0.0  ;;  %v5134_v8 = vmax.f32 %v4938_v21, 0.0  ;;  %v5105_v35 = vmax.f32 %v4909_v60, 0.0 }
 0x3af   :  { %7520 = vmatprep.subr.mxu1 %v5176_v24  ;;  %v13387_v36 = vpop.f32.mrf.mxu0  ;;  %v4896_v25 = vadd.f32 %v15060_v44, %v13175_v43  ;;  %v4882_v57 = vadd.f32 %v15064_v17, %v13135_v29  ;;  %v4867_v43 = vadd.f32 %v15068_v61, %v13084_v7  ;;  %v5077_v40 = vmax.f32 %v4881_v6, 0.0 }
 0x3b0   :  { %7489 = vmatprep.subr.mxu0 %v5175_v56  ;;  %7521 = vmatpush3.msra.mxu1 %v5176_v24  ;;  %v8014_v24 = vld [vmem:[%s13955_s1 + $0x348] sm:$0xff]  ;;  %v4853_v29 = vadd.f32 %v15072_v28, %v13050_v31  ;;  %v4868_v60 = vadd.f32 %v15068_v61, %v13101_v11  ;;  %v4839_v11 = vadd.f32 %v15076_v45, %v13016_v14 }
 0x3b1   :  { %7490 = vmatpush3.msra.mxu0 %v5175_v56  ;;  %7522 = vmatprep.subr.mxu1 %v5162_v62  ;;  %v13396_v10 = vpop.f32.mrf.mxu0  ;;  %v4924_v56 = vadd.f32 %v15052_v9, %v13245_v50  ;;  %v4895_v50 = vadd.f32 %v15060_v44, %v13155_v58  ;;  %v5106_v58 = vmax.f32 %v4910_v63, 0.0  ;;  %v4854_v63 = vadd.f32 %v15072_v28, %v13067_v47 }
 0x3b2   :  { %7491 = vmatprep.subr.mxu0 %v5161_v46  ;;  %4081 = vmatmul.mubr.f32.gmra.mxu0 %v8011_v12  ;;  %v8015_v12 = vld [vmem:[%s13955_s1 + $0x340] sm:$0xff]  ;;  %v4840_v14 = vadd.f32 %v15076_v45, %v13033_v18 }
 0x3b3   :  { %7492 = vmatpush3.msra.mxu0 %v5161_v46  ;;  %7523 = vmatpush3.msra.mxu1 %v5162_v62  ;;  %v13406_v20 = vpop.f32.mrf.mxu0  ;;  %v5120_v46 = vmax.f32 %v4924_v56, 0.0  ;;  %v13429_v62 = vpop.f32.mrf.mxu1  ;;  %v5078_v56 = vmax.f32 %v4882_v57, 0.0 }
 0x3b4   :  { %7493 = vmatprep.subr.mxu0 %v5147_v53  ;;  %6958 = vmatprep.mubr.msk.f32.mxu0 %vm1141_vm0, %v8012_v13  ;;  %v8016_v13 = vld [vmem:[%s13955_s1 + $0x358] sm:$0xff] }
 0x3b5   :  { %7494 = vmatpush3.msra.mxu0 %v5147_v53  ;;  %7524 = vmatprep.subr.mxu1 %v5148_v15  ;;  %v13415_v41 = vpop.f32.mrf.mxu0  ;;  %v5091_v53 = vmax.f32 %v4895_v50, 0.0  ;;  %v3711_v7 = vpop.f32.mrf.mxu1  ;;  %v5049_v50 = vmax.f32 %v4853_v29, 0.0  ;;  %v4811_v29 = vadd.f32 %v15314_v23, %v12944_v16  ;;  %v8020_v16 = vld [vmem:[%s13955_s1 + $0x378] sm:$0xff] }
 0x3b6   :  { %7495 = vmatprep.subr.mxu0 %v5133_v26  ;;  %4087 = vmatmul.mubr.f32.gmra.mxu0 %v8013_v55  ;;  %v8017_v55 = vld [vmem:[%s13955_s1 + $0x350] sm:$0xff] }
 0x3b7   :  { %7525 = vmatpush3.msra.mxu1 %v5148_v15  ;;  %7496 = vmatpush3.msra.mxu0 %v5133_v26  ;;  %v13423_v27 = vpop.f32.mrf.mxu0  ;;  %v5092_v26 = vmax.f32 %v4896_v25, 0.0  ;;  %v3713_v6 = vpop.f32.mrf.mxu1  ;;  %v8018_v25 = vld [vmem:[%s13955_s1 + $0x368] sm:$0xff] }
 0x3b8   :  { %7526 = vmatprep.subr.mxu1 %v5134_v8  ;;  %7497 = vmatprep.subr.mxu0 %v5119_v0 }
 0x3b9   :  { %7527 = vmatpush3.msra.mxu1 %v5134_v8  ;;  %7498 = vmatpush3.msra.mxu0 %v5119_v0  ;;  %v13434_v21 = vpop.f32.mrf.mxu0  ;;  %v5063_v0 = vmax.f32 %v4867_v43, 0.0  ;;  %v8019_v43 = vld [vmem:[%s13955_s1 + $0x360] sm:$0xff] }
 0x3ba   :  { %6959 = vmatprep.mubr.msk.f32.mxu0 %vm1141_vm0, %v8014_v24  ;;  %7499 = vmatprep.subr.mxu0 %v5105_v35 }
 0x3bb   :  { %7528 = vmatprep.subr.mxu1 %v5120_v46  ;;  %4093 = vmatmul.mubr.f32.gmra.mxu0 %v8015_v12  ;;  %v13440_v15 = vpop.f32.mrf.mxu0  ;;  %v5050_v12 = vmax.f32 %v4854_v63, 0.0 }
 0x3bc   :  { %7529 = vmatpush3.msra.mxu1 %v5120_v46  ;;  %7500 = vmatpush3.msra.mxu0 %v5105_v35  ;;  %v5064_v35 = vmax.f32 %v4868_v60, 0.0  ;;  %v15457_v46 = vld [vmem:[#allocation93_spill] sm:$0xff]  ;;  %v15461_v60 = vld [vmem:[#allocation18_spill] sm:$0xff] }
 0x3bd   :  { %7530 = vmatprep.subr.mxu1 %v5106_v58  ;;  %7501 = vmatprep.subr.mxu0 %v5091_v53  ;;  %v13450_v8 = vpop.f32.mrf.mxu0  ;;  %v4505_v24 = vmax.f32 %v15457_v46, %v3711_v7  ;;  %v15464_v46 = vld [vmem:[#allocation168_spill] sm:$0xff] }
 0x3be   :  { %7531 = vmatpush3.msra.mxu1 %v5106_v58  ;;  %7502 = vmatpush3.msra.mxu0 %v5091_v53  ;;  %v4825_v58 = vadd.f32 %v15304_v30, %v12982_v4  ;;  %v15458_v53 = vld [vmem:[#allocation78_spill] sm:$0xff]  ;;  %v4826_v4 = vadd.f32 %v15304_v30, %v12999_v32  ;;  %v4812_v32 = vadd.f32 %v15314_v23, %v12962_v37 }
 0x3bf   :  { %6960 = vmatprep.mubr.msk.f32.mxu0 %vm1141_vm0, %v8016_v13  ;;  %7503 = vmatprep.subr.mxu0 %v5077_v40  ;;  %v13457_v31 = vpop.f32.mrf.mxu0  ;;  %v4491_v57 = vmax.f32 %v15458_v53, %v13413_v42  ;;  %v15459_v13 = vld [vmem:[#allocation115_spill] sm:$0xff] }
 0x3c0   :  { %7532 = vmatprep.subr.mxu1 %v5092_v26  ;;  %4099 = vmatmul.mubr.f32.gmra.mxu0 %v8017_v55  ;;  %v4506_v18 = vmax.f32 %v15459_v13, %v3713_v6  ;;  %v15460_v42 = vld [vmem:[#allocation139_spill] sm:$0xff]  ;;  %v5021_v55 = vmax.f32 %v4825_v58, 0.0  ;;  %v5022_v37 = vmax.f32 %v4826_v4, 0.0 }
 0x3c1   :  { %7533 = vmatpush3.msra.mxu1 %v5092_v26  ;;  %7504 = vmatpush3.msra.mxu0 %v5077_v40  ;;  %v13466_v47 = vpop.f32.mrf.mxu0  ;;  %v5035_v40 = vmax.f32 %v4839_v11, 0.0  ;;  %v15462_v7 = vmax.f32 %v15460_v42, %v15461_v60  ;;  %v15463_v11 = vld [vmem:[#allocation45_spill] sm:$0xff]  ;;  %v6993_v4 = vld [vmem:[%s13958_s3 + $0x80] sm:$0xff]  ;;  %v15471_v42 = vld [vmem:[#allocation138_spill] sm:$0xff] }
 0x3c2   :  { %7534 = vmatprep.subr.mxu1 %v5078_v56  ;;  %7505 = vmatprep.subr.mxu0 %v5063_v0  ;;  %v15472_v60 = vld [vmem:[#allocation3_spill] sm:$0xff] }
 0x3c3   :  { %7535 = vmatpush3.msra.mxu1 %v5078_v56  ;;  %7506 = vmatpush3.msra.mxu0 %v5063_v0  ;;  %v13477_v26 = vpop.f32.mrf.mxu0  ;;  %v4701_v56 = vmax.f32 %v15462_v7, %v4505_v24  ;;  %v5036_v0 = vmax.f32 %v4840_v14, 0.0  ;;  %v15465_v24 = vld [vmem:[#allocation6_spill] sm:$0xff]  ;;  %v15468_v14 = vld [vmem:[#allocation16_spill] sm:$0xff]  ;;  %v15473_v7 = vmax.f32 %v15471_v42, %v15472_v60 }
 0x3c4   :  { %6961 = vmatprep.mubr.msk.f32.mxu0 %vm1141_vm0, %v8018_v25  ;;  %7507 = vmatprep.subr.mxu0 %v5049_v50  ;;  %v15466_v6 = vmax.f32 %v15464_v46, %v15465_v24  ;;  %v6998_v24 = vld [vmem:[%s13958_s3 + $0x98] sm:$0x3] }
 0x3c5   :  { %7536 = vmatprep.subr.mxu1 %v5064_v35  ;;  %4105 = vmatmul.mubr.f32.gmra.mxu0 %v8019_v43  ;;  %v13487_v63 = vpop.f32.mrf.mxu0  ;;  %v8021_v43 = vld [vmem:[%s13955_s1 + $0x370] sm:$0xff]  ;;  %v4981_v13 = vadd.f32 %v15335_v34, %v4701_v56 }
 0x3c6   :  { %7537 = vmatpush3.msra.mxu1 %v5064_v35  ;;  %7508 = vmatpush3.msra.mxu0 %v5049_v50  ;;  %v4492_v50 = vmax.f32 %v15463_v11, %v13429_v62  ;;  %v4797_v35 = vadd.f32 %v15325_v1, %v12905_v54  ;;  %v4687_v25 = vmax.f32 %v15466_v6, %v4491_v57  ;;  %v15467_v62 = vld [vmem:[#allocation170_spill] sm:$0xff]  ;;  %v5007_v54 = vmax.f32 %v4811_v29, 0.0 }
 0x3c7   :  { %7538 = vmatprep.subr.mxu1 %v5050_v12  ;;  %7509 = vmatprep.subr.mxu0 %v5035_v40  ;;  %v13502_v58 = vpop.f32.mrf.mxu0  ;;  %v5008_v57 = vmax.f32 %v4812_v32, 0.0 }
 0x3c8   :  { %7539 = vmatpush3.msra.mxu1 %v5050_v12  ;;  %7510 = vmatpush3.msra.mxu0 %v5035_v40  ;;  %v15469_v12 = vmax.f32 %v15467_v62, %v15468_v14  ;;  %v4798_v40 = vadd.f32 %v15325_v1, %v12925_v5  ;;  %v4688_v11 = vmax.f32 %v15473_v7, %v4492_v50  ;;  %v4993_v29 = vmax.f32 %v4797_v35, 0.0  ;;  %v6994_v5 = vld [vmem:[%s13958_s3 + $0x88] sm:$0x3] }
 0x3c9   :  { %6962 = vmatprep.mubr.msk.f32.mxu0 %vm1141_vm0, %v8020_v16  ;;  %7511 = vmatprep.subr.mxu0 %v5021_v55  ;;  %v5177_v50 = vmax.f32 %v4981_v13, 0.0  ;;  %v6997_v16 = vld [vmem:[%s13958_s3 + $0x90] sm:$0xff]  ;;  %v4953_v35 = vadd.f32 %v15042_v2, %v13302_v38  ;;  %v4954_v14 = vadd.f32 %v15042_v2, %v13323_v52 }
 0x3ca   :  { %7540 = vmatprep.subr.mxu1 %v5036_v0  ;;  %v4702_v53 = vmax.f32 %v15469_v12, %v4506_v18  ;;  %4111 = vmatmul.mubr.f32.gmra.mxu0 %v8021_v43  ;;  %v13516_v18 = vpop.f32.mrf.mxu0  ;;  %v4994_v56 = vmax.f32 %v4798_v40, 0.0  ;;  %v4968_v6 = vadd.f32 %v15346_v22, %v4688_v11  ;;  %v15482_v11 = vld [vmem:[#allocation120_spill] sm:$0xff] }
 0x3cb   :  { %7541 = vmatpush3.msra.mxu1 %v5036_v0  ;;  %7512 = vmatpush3.msra.mxu0 %v5021_v55  ;;  %15470 = vst [vmem:[#allocation23_spill] sm:$0xff] %v13516_v18  ;;  %v4967_v55 = vadd.f32 %v15346_v22, %v4687_v25  ;;  %v5149_v12 = vmax.f32 %v4953_v35, 0.0  ;;  %v5150_v42 = vmax.f32 %v4954_v14, 0.0  ;;  %v15488_v14 = vld [vmem:[#allocation124_spill] sm:$0xff] }
 0x3cc   :  { %7542 = vmatprep.subr.mxu1 %v5022_v37  ;;  %7513 = vmatprep.subr.mxu0 %v5007_v54  ;;  %v13525_v0 = vpop.f32.mrf.mxu0  ;;  %v4982_v32 = vadd.f32 %v15335_v34, %v4702_v53  ;;  %v4925_v53 = vadd.f32 %v15052_v9, %v13236_v48  ;;  %v15481_v48 = vld [vmem:[#allocation125_spill] sm:$0xff] }
 0x3cd   :  { %7543 = vmatpush3.msra.mxu1 %v5022_v37  ;;  %7514 = vmatpush3.msra.mxu0 %v5007_v54  ;;  %15474 = vst [vmem:[#allocation155_spill] sm:$0xff] %v13525_v0  ;;  %v5163_v25 = vmax.f32 %v4967_v55, 0.0  ;;  %v4939_v37 = vadd.f32 %v15046_v59, %v13270_v19  ;;  %v5164_v19 = vmax.f32 %v4968_v6, 0.0  ;;  %v15478_v54 = vld [vmem:[#allocation89_spill] sm:$0xff]  ;;  %v4926_v60 = vadd.f32 %v15052_v9, %v15481_v48 }
 0x3ce   :  { %7544 = vmatprep.subr.mxu1 %v5008_v57  ;;  %7515 = vmatprep.subr.mxu0 %v4993_v29  ;;  %v13534_v46 = vpop.f32.mrf.mxu0  ;;  %v5178_v38 = vmax.f32 %v4982_v32, 0.0  ;;  %v4940_v40 = vadd.f32 %v15046_v59, %v15478_v54  ;;  %v5121_v7 = vmax.f32 %v4925_v53, 0.0  ;;  %v15490_v54 = vld [vmem:[#allocation148_spill] sm:$0xff] }
 0x3cf   :  { %7517 = vmatprep.mubr.msk.f32.mxu0 %vm5186_vm1, %v6993_v4  ;;  %7516 = vmatpush3.msra.mxu0 %v4993_v29  ;;  %15475 = vst [vmem:[#allocation142_spill] sm:$0xff] %v13534_v46  ;;  %v15479_v4 = vld [vmem:[#allocation28_spill] sm:$0xff]  ;;  %v4897_v29 = vadd.f32 %v15060_v44, %v15482_v11  ;;  %v5122_v6 = vmax.f32 %v4926_v60, 0.0  ;;  %v15493_v60 = vld [vmem:[#allocation141_spill] sm:$0xff] }
 0x3d0   :  { %7545 = vmatpush3.msra.mxu1 %v5008_v57  ;;  %7518 = vmatmul.mubr.msk.f32.vlgmr.msra.gmra.mxu0 %vm5186_vm1, %v6994_v5  ;;  %v13543_v62 = vpop.f32.mrf.mxu0  ;;  %v5135_v57 = vmax.f32 %v4939_v37, 0.0  ;;  %v4911_v52 = vadd.f32 %v15056_v39, %v15479_v4  ;;  %v5136_v55 = vmax.f32 %v4940_v40, 0.0  ;;  %v4884_v40 = vadd.f32 %v15064_v17, %v15490_v54  ;;  %v15491_v4 = vld [vmem:[#allocation112_spill] sm:$0xff] }
 0x3d1   :  { %7546 = vmatprep.subr.mxu1 %v4994_v56  ;;  %7551 = vmatprep.subr.mxu0 %v5177_v50  ;;  %15476 = vst [vmem:[#allocation38_spill] sm:$0xff] %v13543_v62 }
 0x3d2   :  { %7547 = vmatpush3.msra.mxu1 %v4994_v56  ;;  %7548 = vmatprep.mubr.msk.f32.mxu1 %vm5186_vm1, %v6997_v16  ;;  %v13551_v43 = vpop.f32.mrf.mxu0  ;;  %v15484_v56 = vld [vmem:[#allocation172_spill] sm:$0xff]  ;;  %v15485_v16 = vld [vmem:[#allocation171_spill] sm:$0xff] }
 0x3d3   :  { %7552 = vmatpush3.msra.mxu0 %v5177_v50  ;;  %7549 = vmatmul.mubr.msk.f32.vlgmr.msra.gmra.mxu1 %vm5186_vm1, %v6998_v24  ;;  %15477 = vst [vmem:[#allocation105_spill] sm:$0xff] %v13551_v43  ;;  %v4912_v32 = vadd.f32 %v15056_v39, %v15484_v56  ;;  %v5107_v50 = vmax.f32 %v4911_v52, 0.0  ;;  %v4883_v35 = vadd.f32 %v15064_v17, %v15485_v16 }
 0x3d4   :  { %7553 = vmatprep.subr.mxu0 %v5163_v25  ;;  %7582 = vmatprep.subr.mxu1 %v5178_v38  ;;  %v13557_v13 = vpop.f32.mrf.mxu0  ;;  %v4855_v52 = vadd.f32 %v15072_v28, %v15491_v4 }
 0x3d5   :  { %7554 = vmatpush3.msra.mxu0 %v5163_v25  ;;  %7583 = vmatpush3.msra.mxu1 %v5178_v38  ;;  %15480 = vst [vmem:[#allocation82_spill] sm:$0xff] %v13557_v13  ;;  %v15487_v25 = vld [vmem:[#allocation156_spill] sm:$0xff]  ;;  %v5093_v38 = vmax.f32 %v4897_v29, 0.0 }
 0x3d6   :  { %7555 = vmatprep.subr.mxu0 %v5149_v12  ;;  %7584 = vmatprep.subr.mxu1 %v5164_v19  ;;  %v13563_v5 = vpop.f32.mrf.mxu0  ;;  %v4898_v37 = vadd.f32 %v15060_v44, %v15487_v25  ;;  %v15494_v29 = vld [vmem:[#allocation96_spill] sm:$0xff] }
 0x3d7   :  { %7556 = vmatpush3.msra.mxu0 %v5149_v12  ;;  %7585 = vmatpush3.msra.mxu1 %v5164_v19  ;;  %15483 = vst [vmem:[#allocation37_spill] sm:$0xff] %v13563_v5  ;;  %v4869_v12 = vadd.f32 %v15068_v61, %v15488_v14  ;;  %v5108_v19 = vmax.f32 %v4912_v32, 0.0  ;;  %v5080_v32 = vmax.f32 %v4884_v40, 0.0  ;;  %v15498_v14 = vld [vmem:[#allocation140_spill] sm:$0xff]  ;;  %v15499_v40 = vld [vmem:[#allocation123_spill] sm:$0xff] }
 0x3d8   :  { %7557 = vmatprep.subr.mxu0 %v5135_v57  ;;  %7586 = vmatprep.subr.mxu1 %v5150_v42  ;;  %v13569_v24 = vpop.f32.mrf.mxu0  ;;  %v5094_v48 = vmax.f32 %v4898_v37, 0.0 }
 0x3d9   :  { %7558 = vmatpush3.msra.mxu0 %v5135_v57  ;;  %7587 = vmatpush3.msra.mxu1 %v5150_v42  ;;  %15486 = vst [vmem:[#allocation118_spill] sm:$0xff] %v13569_v24  ;;  %v5079_v57 = vmax.f32 %v4883_v35, 0.0  ;;  %v5065_v11 = vmax.f32 %v4869_v12, 0.0  ;;  %v5051_v35 = vmax.f32 %v4855_v52, 0.0  ;;  %v4842_v12 = vadd.f32 %v15076_v45, %v15498_v14 }
 0x3da   :  { %7559 = vmatprep.subr.mxu0 %v5121_v7  ;;  %7588 = vmatprep.subr.mxu1 %v5136_v55  ;;  %v13575_v53 = vpop.f32.mrf.mxu0 }
 0x3db   :  { %7560 = vmatpush3.msra.mxu0 %v5121_v7  ;;  %7589 = vmatpush3.msra.mxu1 %v5136_v55  ;;  %15489 = vst [vmem:[#allocation126_spill] sm:$0xff] %v13575_v53  ;;  %v4870_v7 = vadd.f32 %v15068_v61, %v15493_v60  ;;  %v4841_v55 = vadd.f32 %v15076_v45, %v15494_v29  ;;  %v15501_v29 = vld [vmem:[#allocation40_spill] sm:$0xff] }
 0x3dc   :  { %7561 = vmatprep.subr.mxu0 %v5107_v50  ;;  %7590 = vmatprep.subr.mxu1 %v5122_v6  ;;  %v13581_v42 = vpop.f32.mrf.mxu0 }
 0x3dd   :  { %7562 = vmatpush3.msra.mxu0 %v5107_v50  ;;  %7591 = vmatpush3.msra.mxu1 %v5122_v6  ;;  %15492 = vst [vmem:[#allocation143_spill] sm:$0xff] %v13581_v42  ;;  %v15496_v50 = vld [vmem:[#allocation47_spill] sm:$0xff]  ;;  %v15497_v6 = vld [vmem:[#allocation153_spill] sm:$0xff]  ;;  %v5037_v54 = vmax.f32 %v4841_v55, 0.0  ;;  %v4799_v55 = vadd.f32 %v15325_v1, %v15501_v29 }
 0x3de   :  { %7563 = vmatprep.subr.mxu0 %v5093_v38  ;;  %7592 = vmatprep.subr.mxu1 %v5108_v19  ;;  %v13587_v56 = vpop.f32.mrf.mxu0  ;;  %v4856_v16 = vadd.f32 %v15072_v28, %v15496_v50  ;;  %v4827_v25 = vadd.f32 %v15304_v30, %v15497_v6  ;;  %v5038_v50 = vmax.f32 %v4842_v12, 0.0  ;;  %v15502_v6 = vld [vmem:[#allocation152_spill] sm:$0xff] }
 0x3df   :  { %7564 = vmatpush3.msra.mxu0 %v5093_v38  ;;  %7593 = vmatpush3.msra.mxu1 %v5108_v19  ;;  %15495 = vst [vmem:[#allocation97_spill] sm:$0xff] %v13587_v56  ;;  %v5066_v38 = vmax.f32 %v4870_v7, 0.0 }
 0x3e0   :  { %7565 = vmatprep.subr.mxu0 %v5079_v57  ;;  %7594 = vmatprep.subr.mxu1 %v5094_v48  ;;  %v13593_v37 = vpop.f32.mrf.mxu0  ;;  %v5052_v52 = vmax.f32 %v4856_v16, 0.0  ;;  %v4814_v16 = vadd.f32 %v15314_v23, %v15502_v6  ;;  %v7005_v6 = vld [vmem:[%s13958_s3 + $0xb0] sm:$0xff] }
 0x3e1   :  { %7566 = vmatpush3.msra.mxu0 %v5079_v57  ;;  %7595 = vmatpush3.msra.mxu1 %v5094_v48  ;;  %v4813_v57 = vadd.f32 %v15314_v23, %v15499_v40  ;;  %v15500_v48 = vld [vmem:[#allocation111_spill] sm:$0xff]  ;;  %v15503_v40 = vld [vmem:[#allocation176_spill] sm:$0xff] }
 0x3e2   :  { %7567 = vmatprep.subr.mxu0 %v5065_v11  ;;  %7596 = vmatprep.subr.mxu1 %v5080_v32  ;;  %v13601_v4 = vpop.f32.mrf.mxu0  ;;  %v4828_v60 = vadd.f32 %v15304_v30, %v15500_v48  ;;  %v4800_v48 = vadd.f32 %v15325_v1, %v15503_v40 }
 0x3e3   :  { %7568 = vmatpush3.msra.mxu0 %v5065_v11  ;;  %7597 = vmatpush3.msra.mxu1 %v5080_v32  ;;  %v5023_v11 = vmax.f32 %v4827_v25, 0.0  ;;  %v5009_v14 = vmax.f32 %v4813_v57, 0.0  ;;  %v7001_v57 = vld [vmem:[%s13958_s3 + $0xa0] sm:$0xff] }
 0x3e4   :  { %7569 = vmatprep.subr.mxu0 %v5051_v35  ;;  %7598 = vmatprep.subr.mxu1 %v5066_v38  ;;  %v13609_v32 = vpop.f32.mrf.mxu0  ;;  %v5024_v25 = vmax.f32 %v4828_v60, 0.0 }
 0x3e5   :  { %7570 = vmatpush3.msra.mxu0 %v5051_v35  ;;  %7599 = vmatpush3.msra.mxu1 %v5066_v38 }
 0x3e6   :  { %7571 = vmatprep.subr.mxu0 %v5037_v54  ;;  %7600 = vmatprep.subr.mxu1 %v5052_v52  ;;  %v13615_v38 = vpop.f32.mrf.mxu0 }
 0x3e7   :  { %7572 = vmatpush3.msra.mxu0 %v5037_v54  ;;  %7601 = vmatpush3.msra.mxu1 %v5052_v52  ;;  %v4995_v54 = vmax.f32 %v4799_v55, 0.0  ;;  %v5010_v52 = vmax.f32 %v4814_v16, 0.0  ;;  %v4996_v55 = vmax.f32 %v4800_v48, 0.0  ;;  %v7006_v16 = vld [vmem:[%s13958_s3 + $0xb8] sm:$0x3] }
 0x3e8   :  { %7573 = vmatprep.subr.mxu0 %v5023_v11  ;;  %7602 = vmatprep.subr.mxu1 %v5038_v50  ;;  %v13621_v29 = vpop.f32.mrf.mxu0 }
 0x3e9   :  { %7574 = vmatpush3.msra.mxu0 %v5023_v11  ;;  %7603 = vmatpush3.msra.mxu1 %v5038_v50  ;;  %v7002_v11 = vld [vmem:[%s13958_s3 + $0xa8] sm:$0x3] }
 0x3ea   :  { %7575 = vmatprep.subr.mxu0 %v5009_v14  ;;  %7604 = vmatprep.subr.mxu1 %v5024_v25  ;;  %v13631_v50 = vpop.f32.mrf.mxu0 }
 0x3eb   :  { %7576 = vmatpush3.msra.mxu0 %v5009_v14  ;;  %7605 = vmatpush3.msra.mxu1 %v5024_v25 }
 0x3ec   :  { %7577 = vmatprep.subr.mxu0 %v4995_v54  ;;  %7606 = vmatprep.subr.mxu1 %v5010_v52  ;;  %v13640_v14 = vpop.f32.mrf.mxu0 }
 0x3ed   :  { %7578 = vmatpush3.msra.mxu0 %v4995_v54  ;;  %7579 = vmatprep.mubr.msk.f32.mxu0 %vm5186_vm1, %v7001_v57 }
 0x3ee   :  { %7607 = vmatpush3.msra.mxu1 %v5010_v52  ;;  %7580 = vmatmul.mubr.msk.f32.vlgmr.msra.gmra.mxu0 %vm5186_vm1, %v7002_v11  ;;  %v13646_v40 = vpop.f32.mrf.mxu0 }
 0x3ef   :  { %7608 = vmatprep.subr.mxu1 %v4996_v55  ;;  %7610 = vmatprep.mubr.msk.f32.mxu1 %vm5186_vm1, %v7005_v6  ;;  %v7009_v6 = vld [vmem:[%s13958_s3 + $0xc0] sm:$0xff] }
 0x3f0   :  { %7609 = vmatpush3.msra.mxu1 %v4996_v55  ;;  %v13651_v54 = vpop.f32.mrf.mxu0  ;;  %7641 = vmatprep.mubr.msk.f32.mxu0 %vm5186_vm1, %v7009_v6 }
 0x3f1   :  { %7611 = vmatmul.mubr.msk.f32.vlgmr.msra.gmra.mxu1 %vm5186_vm1, %v7006_v16  ;;  %v7013_v16 = vld [vmem:[%s13958_s3 + $0xd0] sm:$0xff] }
 0x3f2   :  { %v13655_v57 = vpop.f32.mrf.mxu0  ;;  %7672 = vmatprep.mubr.msk.f32.mxu1 %vm5186_vm1, %v7013_v16 }
 0x3f4   :  { %v13659_v55 = vpop.f32.mrf.mxu0 }
 0x3f6   :  { %v13663_v25 = vpop.f32.mrf.mxu0 }
 0x3f8   :  { %v13667_v48 = vpop.f32.mrf.mxu0 }
 0x3fa   :  { %v13671_v60 = vpop.f32.mrf.mxu0 }
 0x3fc   :  { %v13675_v12 = vpop.f32.mrf.mxu0 }
 0x3fe   :  { %v13679_v35 = vpop.f32.mrf.mxu0 }
 0x400   :  { %v13683_v7 = vpop.f32.mrf.mxu0 }
 0x402   :  { %v13687_v19 = vpop.f32.mrf.mxu0 }
 0x403   :  { %15504 = vst [vmem:[#allocation158_spill] sm:$0xff] %v13687_v19 }
 0x404   :  { %v13691_v1 = vpop.f32.mrf.mxu0 }
 0x405   :  { %15505 = vst [vmem:[#allocation127_spill] sm:$0xff] %v13691_v1 }
 0x406   :  { %v13695_v23 = vpop.f32.mrf.mxu0 }
 0x407   :  { %15506 = vst [vmem:[#allocation173_spill] sm:$0xff] %v13695_v23 }
 0x408   :  { %v13699_v30 = vpop.f32.mrf.mxu0 }
 0x409   :  { %15507 = vst [vmem:[#allocation41_spill] sm:$0xff] %v13699_v30 }
 0x40a   :  { %v13703_v45 = vpop.f32.mrf.mxu0 }
 0x40b   :  { %15508 = vst [vmem:[#allocation157_spill] sm:$0xff] %v13703_v45 }
 0x40c   :  { %v13707_v28 = vpop.f32.mrf.mxu0 }
 0x40d   :  { %15509 = vst [vmem:[#allocation174_spill] sm:$0xff] %v13707_v28 }
 0x40e   :  { %v13711_v61 = vpop.f32.mrf.mxu0 }
 0x40f   :  { %15510 = vst [vmem:[#allocation66_spill] sm:$0xff] %v13711_v61 }
 0x410   :  { %v13715_v17 = vpop.f32.mrf.mxu0 }
 0x411   :  { %15511 = vst [vmem:[#allocation73_spill] sm:$0xff] %v13715_v17 }
 0x412   :  { %v13719_v44 = vpop.f32.mrf.mxu0 }
 0x413   :  { %15512 = vst [vmem:[#allocation145_spill] sm:$0xff] %v13719_v44 }
 0x414   :  { %v13723_v39 = vpop.f32.mrf.mxu0 }
 0x415   :  { %15513 = vst [vmem:[#allocation129_spill] sm:$0xff] %v13723_v39 }
 0x416   :  { %v13727_v9 = vpop.f32.mrf.mxu0 }
 0x417   :  { %15514 = vst [vmem:[#allocation64_spill] sm:$0xff] %v13727_v9 }
 0x418   :  { %v3950_v59 = vpop.f32.mrf.mxu0 }
 0x41a   :  { %v3952_v2 = vpop.f32.mrf.mxu0 }
 0x41c   :  { %v3956_v22 = vpop.f32.mrf.mxu0 }
 0x41e   :  { %v3958_v34 = vpop.f32.mrf.mxu0 }
 0x420   :  { %v3962_v52 = vpop.f32.mrf.mxu0 }
 0x422   :  { %v3964_v17 = vpop.f32.mrf.mxu0 }
 0x424   :  { %v3968_v24 = vpop.f32.mrf.mxu0 }
 0x426   :  { %v3970_v61 = vpop.f32.mrf.mxu0 }
 0x428   :  { %v3974_v5 = vpop.f32.mrf.mxu0 }
 0x42a   :  { %v3976_v11 = vpop.f32.mrf.mxu0 }
 0x42c   :  { %v3980_v44 = vpop.f32.mrf.mxu0 }
 0x42e   :  { %v3982_v53 = vpop.f32.mrf.mxu0 }
 0x430   :  { %v3986_v39 = vpop.f32.mrf.mxu0 }
 0x432   :  { %v3988_v9 = vpop.f32.mrf.mxu0 }
 0x434   :  { %v3992_v56 = vpop.f32.mrf.mxu0 }
 0x436   :  { %v13739_v42 = vpop.f32.mrf.mxu0 }
 0x438   :  { %v13741_v28 = vpop.f32.mrf.mxu0 }
 0x43a   :  { %v13743_v13 = vpop.f32.mrf.mxu0 }
 0x43b   :  { %15515 = vst [vmem:[#allocation29_spill] sm:$0xff] %v13743_v13 }
 0x43c   :  { %v13745_v45 = vpop.f32.mrf.mxu0 }
 0x43d   :  { %15516 = vst [vmem:[#allocation90_spill] sm:$0xff] %v13745_v45 }
 0x43e   :  { %v13747_v43 = vpop.f32.mrf.mxu0 }
 0x43f   :  { %15517 = vst [vmem:[#allocation62_spill] sm:$0xff] %v13747_v43 }
 0x440   :  { %v13749_v30 = vpop.f32.mrf.mxu0 }
 0x441   :  { %15518 = vst [vmem:[#allocation19_spill] sm:$0xff] %v13749_v30  ;;  %v15526_v30 = vmax.f32 %v13348_v49, %v13593_v37 }
 0x442   :  { %v13751_v6 = vpop.f32.mrf.mxu0 }
 0x443   :  { %15519 = vst [vmem:[#allocation128_spill] sm:$0xff] %v13751_v6 }
 0x444   :  { %v13753_v62 = vpop.f32.mrf.mxu0 }
 0x445   :  { %15520 = vst [vmem:[#allocation144_spill] sm:$0xff] %v13753_v62 }
 0x446   :  { %v13755_v23 = vpop.f32.mrf.mxu0 }
 0x447   :  { %15521 = vst [vmem:[#allocation11_spill] sm:$0xff] %v13755_v23  ;;  %v15527_v23 = vmax.f32 %v13362_v33, %v13601_v4 }
 0x448   :  { %v13757_v16 = vpop.f32.mrf.mxu0 }
 0x449   :  { %15522 = vst [vmem:[#allocation83_spill] sm:$0xff] %v13757_v16 }
 0x44a   :  { %v13759_v46 = vpop.f32.mrf.mxu0 }
 0x44b   :  { %15523 = vst [vmem:[#allocation113_spill] sm:$0xff] %v13759_v46 }
 0x44c   :  { %v13761_v1 = vpop.f32.mrf.mxu0 }
 0x44d   :  { %15524 = vst [vmem:[#allocation10_spill] sm:$0xff] %v13761_v1 }
 0x44e   :  { %v13763_v0 = vpop.f32.mrf.mxu0 }
 0x44f   :  { %15525 = vst [vmem:[#allocation39_spill] sm:$0xff] %v13763_v0  ;;  %v15528_v0 = vmax.f32 %v13369_v51, %v13609_v32 }
 0x450   :  { %v4034_v19 = vpop.f32.mrf.mxu0 }
 0x451   :  { %v4325_v45 = vmax.f32 %v3950_v59, %v4034_v19 }
 0x452   :  { %v4036_v18 = vpop.f32.mrf.mxu0 }
 0x453   :  { %v13768_v43 = vmax.f32 %v15526_v30, %v4325_v45  ;;  %v4326_v6 = vmax.f32 %v3952_v2, %v4036_v18  ;;  %v15529_v45 = vmax.f32 %v13380_v3, %v13615_v38  ;;  %v15531_v3 = vmax.f32 %v13406_v20, %v13640_v14 }
 0x454   :  { %v4040_v62 = vpop.f32.mrf.mxu0  ;;  %v15534_v20 = vmax.f32 %v13434_v21, %v13655_v57  ;;  %v15537_v21 = vmax.f32 %v13457_v31, %v13667_v48  ;;  %v15540_v31 = vmax.f32 %v13487_v63, %v13679_v35  ;;  %v15547_v35 = vld [vmem:[#allocation155_spill] sm:$0xff] }
 0x455   :  { %v13773_v16 = vmax.f32 %v15527_v23, %v4326_v6  ;;  %v4339_v46 = vmax.f32 %v3956_v22, %v4040_v62  ;;  %v4158_v23 = vmax.f32 %v13396_v10, %v13631_v50  ;;  %v15530_v22 = vmax.f32 %v13387_v36, %v13621_v29 }
 0x456   :  { %v4042_v13 = vpop.f32.mrf.mxu0  ;;  %v15532_v10 = vmax.f32 %v13415_v41, %v13646_v40  ;;  %v15535_v41 = vmax.f32 %v13440_v15, %v13659_v55  ;;  %v15538_v15 = vmax.f32 %v13466_v47, %v13671_v60 }
 0x457   :  { %v13778_v1 = vmax.f32 %v15528_v0, %v4339_v46  ;;  %v4340_v59 = vmax.f32 %v3958_v34, %v4042_v13 }
 0x458   :  { %v4046_v19 = vpop.f32.mrf.mxu0 }
 0x459   :  { %v13783_v30 = vmax.f32 %v15529_v45, %v4340_v59  ;;  %v4353_v2 = vmax.f32 %v3962_v52, %v4046_v19 }
 0x45a   :  { %v4048_v49 = vpop.f32.mrf.mxu0 }
 0x45b   :  { %v13790_v33 = vmax.f32 %v15530_v22, %v4353_v2  ;;  %v4354_v51 = vmax.f32 %v3964_v17, %v4048_v49  ;;  %v15533_v17 = vmax.f32 %v13423_v27, %v13651_v54  ;;  %v15536_v27 = vmax.f32 %v13450_v8, %v13663_v25  ;;  %v15542_v2 = vld [vmem:[#allocation29_spill] sm:$0xff] }
 0x45c   :  { %v4052_v18 = vpop.f32.mrf.mxu0  ;;  %v15539_v8 = vmax.f32 %v13477_v26, %v13675_v12  ;;  %v15543_v26 = vld [vmem:[#allocation23_spill] sm:$0xff]  ;;  %v15544_v12 = vld [vmem:[#allocation158_spill] sm:$0xff] }
 0x45d   :  { %v13792_v0 = vmax.f32 %v4158_v23, %v4354_v51  ;;  %v4367_v34 = vmax.f32 %v3968_v24, %v4052_v18  ;;  %v15545_v23 = vmax.f32 %v15543_v26, %v15544_v12  ;;  %v15546_v51 = vld [vmem:[#allocation90_spill] sm:$0xff]  ;;  %v15570_v26 = vld [vmem:[#allocation83_spill] sm:$0xff] }
 0x45e   :  { %v4054_v46 = vpop.f32.mrf.mxu0 }
 0x45f   :  { %v13797_v62 = vmax.f32 %v15531_v3, %v4367_v34  ;;  %v4368_v13 = vmax.f32 %v3970_v61, %v4054_v46  ;;  %v15548_v34 = vld [vmem:[#allocation127_spill] sm:$0xff]  ;;  %v15550_v3 = vld [vmem:[#allocation62_spill] sm:$0xff] }
 0x460   :  { %v4058_v37 = vpop.f32.mrf.mxu0  ;;  %v15549_v46 = vmax.f32 %v15547_v35, %v15548_v34  ;;  %v15573_v35 = vld [vmem:[#allocation73_spill] sm:$0xff] }
 0x461   :  { %v13802_v4 = vmax.f32 %v15532_v10, %v4368_v13  ;;  %v4381_v36 = vmax.f32 %v3974_v5, %v4058_v37  ;;  %v15551_v37 = vld [vmem:[#allocation142_spill] sm:$0xff] }
 0x462   :  { %v4060_v32 = vpop.f32.mrf.mxu0 }
 0x463   :  { %v13807_v38 = vmax.f32 %v15533_v17, %v4381_v36  ;;  %v4382_v24 = vmax.f32 %v3976_v11, %v4060_v32  ;;  %v15554_v32 = vld [vmem:[#allocation19_spill] sm:$0xff] }
 0x464   :  { %v4064_v29 = vpop.f32.mrf.mxu0 }
 0x465   :  { %v13812_v50 = vmax.f32 %v15534_v20, %v4382_v24  ;;  %v4395_v61 = vmax.f32 %v3980_v44, %v4064_v29  ;;  %v15555_v29 = vld [vmem:[#allocation38_spill] sm:$0xff]  ;;  %v15556_v20 = vld [vmem:[#allocation41_spill] sm:$0xff] }
 0x466   :  { %v4066_v14 = vpop.f32.mrf.mxu0 }
 0x467   :  { %v13817_v40 = vmax.f32 %v15535_v41, %v4395_v61  ;;  %v4396_v5 = vmax.f32 %v3982_v53, %v4066_v14  ;;  %v15557_v61 = vmax.f32 %v15555_v29, %v15556_v20  ;;  %v15558_v41 = vld [vmem:[#allocation128_spill] sm:$0xff] }
 0x469   :  { %v4070_v52 = vpop.f32.mrf.mxu0  ;;  %v13822_v54 = vmax.f32 %v15536_v27, %v4396_v5  ;;  %v15560_v27 = vld [vmem:[#allocation157_spill] sm:$0xff] }
 0x46a   :  { %v4409_v11 = vmax.f32 %v3986_v39, %v4070_v52  ;;  %v15559_v52 = vld [vmem:[#allocation105_spill] sm:$0xff] }
 0x46b   :  { %v4072_v6 = vpop.f32.mrf.mxu0 }
 0x46c   :  { %v13827_v57 = vmax.f32 %v15537_v21, %v4409_v11  ;;  %v4410_v44 = vmax.f32 %v3988_v9, %v4072_v6  ;;  %v15561_v11 = vmax.f32 %v15559_v52, %v15560_v27  ;;  %v15584_v52 = vld [vmem:[#allocation64_spill] sm:$0xff] }
 0x46d   :  { %v4076_v59 = vpop.f32.mrf.mxu0 }
 0x46e   :  { %v13832_v55 = vmax.f32 %v15538_v15, %v4410_v44  ;;  %v4423_v53 = vmax.f32 %v3992_v56, %v4076_v59  ;;  %v15541_v56 = vmax.f32 %v13502_v58, %v13683_v7  ;;  %v15552_v58 = vld [vmem:[#allocation173_spill] sm:$0xff]  ;;  %v15562_v44 = vld [vmem:[#allocation144_spill] sm:$0xff] }
 0x46f   :  { %v4078_v19 = vpop.f32.mrf.mxu0  ;;  %v15553_v7 = vmax.f32 %v15551_v37, %v15552_v58  ;;  %v15576_v58 = vld [vmem:[#allocation126_spill] sm:$0xff] }
 0x470   :  { %v13837_v25 = vmax.f32 %v15539_v8, %v4423_v53  ;;  %v4424_v39 = vmax.f32 %v13739_v42, %v4078_v19  ;;  %v15563_v53 = vld [vmem:[#allocation82_spill] sm:$0xff] }
 0x471   :  { %v15564_v19 = vld [vmem:[#allocation174_spill] sm:$0xff] }
 0x472   :  { %v4082_v45 = vpop.f32.mrf.mxu0  ;;  %v13843_v9 = vmax.f32 %v15540_v31, %v4424_v39  ;;  %v15565_v8 = vmax.f32 %v15563_v53, %v15564_v19 }
 0x473   :  { %v4437_v48 = vmax.f32 %v13741_v28, %v4082_v45  ;;  %v15566_v45 = vld [vmem:[#allocation11_spill] sm:$0xff] }
 0x474   :  { %v4084_v47 = vpop.f32.mrf.mxu0 }
 0x475   :  { %v4633_v60 = vmax.f32 %v15541_v56, %v4437_v48  ;;  %v4438_v49 = vmax.f32 %v15542_v2, %v4084_v47  ;;  %v15567_v48 = vld [vmem:[#allocation37_spill] sm:$0xff]  ;;  %v15568_v47 = vld [vmem:[#allocation66_spill] sm:$0xff] }
 0x476   :  { %v4088_v42 = vpop.f32.mrf.mxu0  ;;  %v15569_v56 = vmax.f32 %v15567_v48, %v15568_v47 }
 0x477   :  { %v13853_v22 = vmax.f32 %v15545_v23, %v4438_v49  ;;  %v4451_v18 = vmax.f32 %v15546_v51, %v4088_v42  ;;  %v15571_v42 = vld [vmem:[#allocation113_spill] sm:$0xff] }
 0x478   :  { %v4090_v63 = vpop.f32.mrf.mxu0 }
 0x479   :  { %v4647_v28 = vmax.f32 %v15549_v46, %v4451_v18  ;;  %v4452_v13 = vmax.f32 %v15550_v3, %v4090_v63  ;;  %v15572_v63 = vld [vmem:[#allocation118_spill] sm:$0xff] }
 0x47a   :  { %v15574_v34 = vmax.f32 %v15572_v63, %v15573_v35  ;;  %v15575_v3 = vld [vmem:[#allocation10_spill] sm:$0xff]  ;;  %v15591_v35 = vld [vmem:[#allocation101_spill] sm:$0xff] }
 0x47b   :  { %v4648_v10 = vmax.f32 %v15553_v7, %v4452_v13  ;;  %v4094_v36 = vpop.f32.mrf.mxu0  ;;  %v15577_v7 = vld [vmem:[#allocation145_spill] sm:$0xff] }
 0x47c   :  { %v4465_v17 = vmax.f32 %v15554_v32, %v4094_v36  ;;  %v15578_v36 = vmax.f32 %v15576_v58, %v15577_v7 }
 0x47d   :  { %v4096_v24 = vpop.f32.mrf.mxu0 }
 0x47e   :  { %v4661_v14 = vmax.f32 %v15557_v61, %v4465_v17  ;;  %v4466_v5 = vmax.f32 %v15558_v41, %v4096_v24  ;;  %v15579_v17 = vld [vmem:[#allocation143_spill] sm:$0xff]  ;;  %v15580_v24 = vld [vmem:[#allocation129_spill] sm:$0xff] }
 0x47f   :  { %v15581_v29 = vmax.f32 %v15579_v17, %v15580_v24  ;;  %v15582_v61 = vld [vmem:[#allocation39_spill] sm:$0xff] }
 0x480   :  { %v4662_v6 = vmax.f32 %v15561_v11, %v4466_v5  ;;  %v4100_v21 = vpop.f32.mrf.mxu0  ;;  %v15583_v5 = vld [vmem:[#allocation97_spill] sm:$0xff] }
 0x481   :  { %v4479_v59 = vmax.f32 %v15562_v44, %v4100_v21  ;;  %v15585_v27 = vmax.f32 %v15583_v5, %v15584_v52  ;;  %v15586_v21 = vld [vmem:[#allocation48_spill] sm:$0xff] }
 0x482   :  { %v4102_v15 = vpop.f32.mrf.mxu0 }
 0x483   :  { %v4675_v39 = vmax.f32 %v15565_v8, %v4479_v59  ;;  %v4480_v31 = vmax.f32 %v15566_v45, %v4102_v15  ;;  %v15587_v59 = vld [vmem:[#allocation22_spill] sm:$0xff] }
 0x484   :  { %v15588_v8 = vld [vmem:[#allocation98_spill] sm:$0xff] }
 0x485   :  { %v4676_v2 = vmax.f32 %v15569_v56, %v4480_v31  ;;  %v4106_v49 = vpop.f32.mrf.mxu0  ;;  %v4955_v45 = vadd.f32 %v15588_v8, %v4675_v39  ;;  %v15589_v56 = vld [vmem:[#allocation99_spill] sm:$0xff] }
 0x486   :  { %v4493_v12 = vmax.f32 %v15570_v26, %v4106_v49  ;;  %v4941_v49 = vadd.f32 %v15589_v56, %v4661_v14 }
 0x487   :  { %v4108_v23 = vpop.f32.mrf.mxu0  ;;  %v4956_v26 = vadd.f32 %v15588_v8, %v4676_v2 }
 0x488   :  { %v4494_v51 = vmax.f32 %v15571_v42, %v4108_v23  ;;  %v4689_v46 = vmax.f32 %v15574_v34, %v4493_v12  ;;  %v5151_v12 = vmax.f32 %v4955_v45, 0.0  ;;  %v15590_v42 = vld [vmem:[#allocation77_spill] sm:$0xff]  ;;  %v5137_v39 = vmax.f32 %v4941_v49, 0.0 }
 0x489   :  { %v5152_v63 = vmax.f32 %v4956_v26, 0.0  ;;  %v4913_v34 = vadd.f32 %v15591_v35, %v4633_v60  ;;  %v4928_v14 = vadd.f32 %v15590_v42, %v4648_v10  ;;  %v15593_v10 = vld [vmem:[#allocation27_spill] sm:$0xff] }
 0x48a   :  { %v4112_v18 = vpop.f32.mrf.mxu0  ;;  %v4690_v32 = vmax.f32 %v15578_v36, %v4494_v51  ;;  %v4969_v15 = vadd.f32 %v15587_v59, %v4689_v46  ;;  %v4927_v51 = vadd.f32 %v15590_v42, %v4647_v28  ;;  %v15592_v28 = vld [vmem:[#allocation80_spill] sm:$0xff] }
 0x48b   :  { %v4507_v13 = vmax.f32 %v15575_v3, %v4112_v18  ;;  %v4942_v18 = vadd.f32 %v15589_v56, %v4662_v6  ;;  %v4899_v3 = vadd.f32 %v15592_v28, %v13837_v25  ;;  %v4914_v6 = vadd.f32 %v15591_v35, %v13853_v22  ;;  %v15594_v22 = vld [vmem:[#allocation106_spill] sm:$0xff] }
 0x48c   :  { %v4114_v37 = vpop.f32.mrf.mxu0  ;;  %v4970_v31 = vadd.f32 %v15587_v59, %v4690_v32  ;;  %v5165_v48 = vmax.f32 %v4969_v15, 0.0  ;;  %v5123_v2 = vmax.f32 %v4927_v51, 0.0  ;;  %v5124_v60 = vmax.f32 %v4928_v14, 0.0 }
 0x48d   :  { %v4703_v20 = vmax.f32 %v15581_v29, %v4507_v13  ;;  %v4508_v41 = vmax.f32 %v15582_v61, %v4114_v37  ;;  %v5138_v46 = vmax.f32 %v4942_v18, 0.0  ;;  %v5109_v13 = vmax.f32 %v4913_v34, 0.0 }
 0x48e   :  { %v5166_v23 = vmax.f32 %v4970_v31, 0.0  ;;  %v4885_v37 = vadd.f32 %v15593_v10, %v13827_v57  ;;  %v4900_v58 = vadd.f32 %v15592_v28, %v13843_v9  ;;  %v5095_v25 = vmax.f32 %v4899_v3, 0.0  ;;  %v15595_v9 = vld [vmem:[#allocation30_spill] sm:$0xff]  ;;  %v7271_v31 = vpop.f32.mrf.mxu1 }
 0x48f   :  { %v4704_v11 = vmax.f32 %v15585_v27, %v4508_v41  ;;  %v4983_v44 = vadd.f32 %v15586_v21, %v4703_v20  ;;  %v5110_v7 = vmax.f32 %v4914_v6, 0.0  ;;  %v4871_v36 = vadd.f32 %v15594_v22, %v13817_v40 }
 0x490   :  { %v4886_v32 = vadd.f32 %v15593_v10, %v13832_v55  ;;  %v5081_v57 = vmax.f32 %v4885_v37, 0.0  ;;  %v5096_v17 = vmax.f32 %v4900_v58, 0.0  ;;  %v4857_v24 = vadd.f32 %v15595_v9, %v13807_v38  ;;  %v15596_v55 = vld [vmem:[#allocation85_spill] sm:$0xff]  ;;  %v7519_v58 = vpop.f32.mrf.mxu0 }
 0x491   :  { %v5179_v53 = vmax.f32 %v4983_v44, 0.0  ;;  %v4984_v19 = vadd.f32 %v15586_v21, %v4704_v11  ;;  %v4872_v29 = vadd.f32 %v15594_v22, %v13822_v54  ;;  %v5067_v40 = vmax.f32 %v4871_v36, 0.0  ;;  %v15597_v54 = vld [vmem:[#allocation109_spill] sm:$0xff] }
 0x492   :  { %v5082_v20 = vmax.f32 %v4886_v32, 0.0  ;;  %v4843_v61 = vadd.f32 %v15596_v55, %v13797_v62  ;;  %v4858_v41 = vadd.f32 %v15595_v9, %v13812_v50  ;;  %v5053_v38 = vmax.f32 %v4857_v24, 0.0  ;;  %v15598_v50 = vld [vmem:[#allocation88_spill] sm:$0xff]  ;;  %v5940_v32 = vpop.f32.mrf.mxu0 }
 0x493   :  { %7613 = vmatprep.subr.mxu0 %v5179_v53  ;;  %v5180_v47 = vmax.f32 %v4984_v19, 0.0  ;;  %v5068_v5 = vmax.f32 %v4872_v29, 0.0  ;;  %v4829_v52 = vadd.f32 %v15597_v54, %v13790_v33  ;;  %v4844_v27 = vadd.f32 %v15596_v55, %v13802_v4  ;;  %v15599_v4 = vld [vmem:[#allocation36_spill] sm:$0xff] }
 0x494   :  { %7614 = vmatpush3.msra.mxu0 %v5179_v53  ;;  %v5039_v62 = vmax.f32 %v4843_v61, 0.0  ;;  %v5054_v11 = vmax.f32 %v4858_v41, 0.0  ;;  %v4815_v21 = vadd.f32 %v15598_v50, %v13778_v1  ;;  %v4830_v44 = vadd.f32 %v15597_v54, %v13792_v0 }
 0x495   :  { %7615 = vmatprep.subr.mxu0 %v5165_v48  ;;  %7644 = vmatprep.subr.mxu1 %v5180_v47  ;;  %v5025_v33 = vmax.f32 %v4829_v52, 0.0  ;;  %v5040_v59 = vmax.f32 %v4844_v27, 0.0  ;;  %v4801_v15 = vadd.f32 %v15599_v4, %v13768_v43  ;;  %v4816_v53 = vadd.f32 %v15598_v50, %v13783_v30  ;;  %v7010_v43 = vld [vmem:[%s13958_s3 + $0xc8] sm:$0x3] }
 0x496   :  { %7616 = vmatpush3.msra.mxu0 %v5165_v48  ;;  %7645 = vmatpush3.msra.mxu1 %v5180_v47  ;;  %v5011_v1 = vmax.f32 %v4815_v21, 0.0  ;;  %v5026_v19 = vmax.f32 %v4830_v44, 0.0  ;;  %v4802_v0 = vadd.f32 %v15599_v4, %v13773_v16  ;;  %v7014_v16 = vld [vmem:[%s13958_s3 + $0xd8] sm:$0x3]  ;;  %v5259_v48 = vpop.f32.mrf.mxu1 }
 0x497   :  { %7617 = vmatprep.subr.mxu0 %v5151_v12  ;;  %7646 = vmatprep.subr.mxu1 %v5166_v23  ;;  %v4997_v8 = vmax.f32 %v4801_v15, 0.0  ;;  %v5012_v45 = vmax.f32 %v4816_v53, 0.0 }
 0x498   :  { %7618 = vmatpush3.msra.mxu0 %v5151_v12  ;;  %7647 = vmatpush3.msra.mxu1 %v5166_v23  ;;  %v4998_v30 = vmax.f32 %v4802_v0, 0.0  ;;  %v7302_v47 = vpop.f32.mrf.mxu1 }
 0x499   :  { %7619 = vmatprep.subr.mxu0 %v5137_v39  ;;  %7648 = vmatprep.subr.mxu1 %v5152_v63  ;;  %v5346_v18 = vadd.f32 %v7302_v47, %v7271_v31 }
 0x49a   :  { %7620 = vmatpush3.msra.mxu0 %v5137_v39  ;;  %7649 = vmatpush3.msra.mxu1 %v5152_v63  ;;  %v5340_v56 = vpop.f32.mrf.mxu1 }
 0x49b   :  { %7621 = vmatprep.subr.mxu0 %v5123_v2  ;;  %7650 = vmatprep.subr.mxu1 %v5138_v46  ;;  %v5341_v39 = vadd.f32 %v5340_v56, %v5259_v48 }
 0x49c   :  { %7622 = vmatpush3.msra.mxu0 %v5123_v2  ;;  %7651 = vmatpush3.msra.mxu1 %v5138_v46  ;;  %v7333_v49 = vpop.f32.mrf.mxu1 }
 0x49d   :  { %7623 = vmatprep.subr.mxu0 %v5109_v13  ;;  %7652 = vmatprep.subr.mxu1 %v5124_v60  ;;  %v5434_v35 = vadd.f32 %v7333_v49, %v5346_v18 }
 0x49e   :  { %7624 = vmatpush3.msra.mxu0 %v5109_v13  ;;  %7653 = vmatpush3.msra.mxu1 %v5124_v60  ;;  %v5424_v26 = vpop.f32.mrf.mxu1 }
 0x49f   :  { %7625 = vmatprep.subr.mxu0 %v5095_v25  ;;  %7654 = vmatprep.subr.mxu1 %v5110_v7  ;;  %v5433_v34 = vadd.f32 %v5424_v26, %v5341_v39 }
 0x4a0   :  { %7626 = vmatpush3.msra.mxu0 %v5095_v25  ;;  %7655 = vmatpush3.msra.mxu1 %v5110_v7  ;;  %v7364_v12 = vpop.f32.mrf.mxu1 }
 0x4a1   :  { %7627 = vmatprep.subr.mxu0 %v5081_v57  ;;  %7656 = vmatprep.subr.mxu1 %v5096_v17  ;;  %v5520_v2 = vadd.f32 %v7364_v12, %v5434_v35 }
 0x4a2   :  { %7628 = vmatpush3.msra.mxu0 %v5081_v57  ;;  %7657 = vmatpush3.msra.mxu1 %v5096_v17  ;;  %v5510_v23 = vpop.f32.mrf.mxu1 }
 0x4a3   :  { %7629 = vmatprep.subr.mxu0 %v5067_v40  ;;  %7658 = vmatprep.subr.mxu1 %v5082_v20  ;;  %v5519_v46 = vadd.f32 %v5510_v23, %v5433_v34 }
 0x4a4   :  { %7630 = vmatpush3.msra.mxu0 %v5067_v40  ;;  %7659 = vmatpush3.msra.mxu1 %v5082_v20  ;;  %v7395_v42 = vpop.f32.mrf.mxu1 }
 0x4a5   :  { %7631 = vmatprep.subr.mxu0 %v5053_v38  ;;  %7660 = vmatprep.subr.mxu1 %v5068_v5  ;;  %v5606_v3 = vadd.f32 %v7395_v42, %v5520_v2 }
 0x4a6   :  { %7632 = vmatpush3.msra.mxu0 %v5053_v38  ;;  %7661 = vmatpush3.msra.mxu1 %v5068_v5  ;;  %v5596_v51 = vpop.f32.mrf.mxu1 }
 0x4a7   :  { %7633 = vmatprep.subr.mxu0 %v5039_v62  ;;  %7662 = vmatprep.subr.mxu1 %v5054_v11  ;;  %v5605_v6 = vadd.f32 %v5596_v51, %v5519_v46 }
 0x4a8   :  { %7634 = vmatpush3.msra.mxu0 %v5039_v62  ;;  %7663 = vmatpush3.msra.mxu1 %v5054_v11  ;;  %v7426_v63 = vpop.f32.mrf.mxu1 }
 0x4a9   :  { %7635 = vmatprep.subr.mxu0 %v5025_v33  ;;  %7664 = vmatprep.subr.mxu1 %v5040_v59  ;;  %v5692_v60 = vadd.f32 %v7426_v63, %v5606_v3 }
 0x4aa   :  { %7636 = vmatpush3.msra.mxu0 %v5025_v33  ;;  %7665 = vmatpush3.msra.mxu1 %v5040_v59  ;;  %v5682_v14 = vpop.f32.mrf.mxu1  ;;  %v6391_v59 = vpop.permute.xlu1 %6390 }
 0x4ab   :  { %7637 = vmatprep.subr.mxu0 %v5011_v1  ;;  %7666 = vmatprep.subr.mxu1 %v5026_v19  ;;  %v5691_v37 = vadd.f32 %v5682_v14, %v5605_v6 }
 0x4ac   :  { %7638 = vmatpush3.msra.mxu0 %v5011_v1  ;;  %7667 = vmatpush3.msra.mxu1 %v5026_v19  ;;  %v7457_v28 = vpop.f32.mrf.mxu1  ;;  %v6386_v1 = vpop.permute.xlu0 %6385 }
 0x4ad   :  { %7639 = vmatprep.subr.mxu0 %v4997_v8  ;;  %7668 = vmatprep.subr.mxu1 %v5012_v45  ;;  %v5778_v25 = vadd.f32 %v7457_v28, %v5692_v60 }
 0x4ae   :  { %7640 = vmatpush3.msra.mxu0 %v4997_v8  ;;  %7669 = vmatpush3.msra.mxu1 %v5012_v45  ;;  %v5768_v13 = vpop.f32.mrf.mxu1  ;;  %v7581_v24 = vpop.f32.mrf.mxu0 }
 0x4af   :  { %7642 = vmatmul.mubr.msk.f32.vlgmr.msra.gmra.mxu0 %vm5186_vm1, %v7010_v43  ;;  %7670 = vmatprep.subr.mxu1 %v4998_v30  ;;  %v5777_v22 = vadd.f32 %v5768_v13, %v5691_v37 }
 0x4b0   :  { %7671 = vmatpush3.msra.mxu1 %v4998_v30  ;;  %v7488_v10 = vpop.f32.mrf.mxu1  ;;  %v6112_v55 = vpop.f32.mrf.mxu0 }
 0x4b1   :  { %7673 = vmatmul.mubr.msk.f32.vlgmr.msra.gmra.mxu1 %vm5186_vm1, %v7014_v16  ;;  %v5864_v36 = vadd.f32 %v7488_v10, %v5778_v25 }
 0x4b2   :  { %v5854_v7 = vpop.f32.mrf.mxu1 }
 0x4b3   :  { %v5863_v17 = vadd.f32 %v5854_v7, %v5777_v22  ;;  %v5950_v9 = vadd.f32 %v7519_v58, %v5864_v36 }
 0x4b4   :  { %v7550_v57 = vpop.f32.mrf.mxu1 }
 0x4b5   :  { %v5949_v29 = vadd.f32 %v5940_v32, %v5863_v17  ;;  %v6036_v20 = vadd.f32 %v7550_v57, %v5950_v9 }
 0x4b6   :  { %v6026_v40 = vpop.f32.mrf.mxu1 }
 0x4b7   :  { %v6035_v41 = vadd.f32 %v6026_v40, %v5949_v29  ;;  %v6122_v38 = vadd.f32 %v7581_v24, %v6036_v20 }
 0x4b8   :  { %v7612_v61 = vpop.f32.mrf.mxu1 }
 0x4b9   :  { %v6121_v5 = vadd.f32 %v6112_v55, %v6035_v41  ;;  %v6208_v52 = vadd.f32 %v7612_v61, %v6122_v38 }
 0x4ba   :  { %v6198_v54 = vpop.f32.mrf.mxu1 }
 0x4bb   :  { %v6207_v62 = vadd.f32 %v6198_v54, %v6121_v5 }
 0x56f   :  { %v7643_v27 = vpop.f32.mrf.mxu0 }
 0x570   :  { %v6294_v11 = vadd.f32 %v7643_v27, %v6208_v52 }
 0x571   :  { %v6284_v50 = vpop.f32.mrf.mxu0  ;;  %v7674_v21 = vpop.f32.mrf.mxu1 }
 0x572   :  { %v6293_v44 = vadd.f32 %v6284_v50, %v6207_v62  ;;  %v6380_v33 = vadd.f32 %v7674_v21, %v6294_v11 }
 0x573   :  { %v6370_v4 = vpop.f32.mrf.mxu1 }
 0x574   :  { %v6394_v15 = vadd.f32 %v6391_v59, %v6380_v33  ;;  %v6379_v53 = vadd.f32 %v6370_v4, %v6293_v44 }
 0x576   :  { %v6396_v19 = vmax.f32 %v6394_v15, 0.0  ;;  %v6393_v0 = vadd.f32 %v6386_v1, %v6379_v53 }
 0x578   :  { %6398 = vst [vmem:[%s13959_s5 + $0x8] sm:$0x3] %v6396_v19  ;;  %v6395_v8 = vmax.f32 %v6393_v0, 0.0 }
 0x57a   :  { %6397 = vst [vmem:[%s13959_s5] sm:$0xff] %v6395_v8 }

</bundles_post_ra>
